<compile_context>
chip_gen: v7x
topology: tpu7x:2x2x1
jax: 0.10.0
libtpu: 0.0.40
codegen_flags: <defaults>
</compile_context>

<pallas_src>
import jax
import jax.numpy as jnp
import numpy as np
from jax import lax
from jax.experimental import pallas as pl
from jax.experimental.pallas import tpu as pltpu


# ------------------------------ fused kernel ------------------------------- #

def _inception_aux_kernel(x_ref, w0_ref, s0_ref, c0_ref, w1_ref, s1_ref,
                          c1_ref, wf_ref, bf_ref, o_ref):
    # x_ref : (1, H, W, Cin) f32   (one sample per grid step)
    # w0_ref: (Cin, 128) bf16      s0/c0: (1, 128) f32   (folded BN)
    # w1_ref: (25, 128, 768) bf16  s1/c1: (1, 768) f32   (folded BN)
    # wf_ref: (768, NCpad) bf16    bf_ref: (1, NCpad) f32
    # o_ref : (1, 1, NCpad) f32
    kh, st = 5, 3
    _, H, W, _ = x_ref.shape
    n_oh = (H - kh) // st + 1
    n_ow = (W - kh) // st + 1
    npix = n_oh * n_ow

    x = x_ref[0].astype(jnp.float32)                       # (H, W, Cin)

    # Pooling matrix P[ow, w] = 1 iff st*ow <= w < st*ow + kh (built in-regs).
    o_idx = lax.broadcasted_iota(jnp.int32, (n_ow, W), 0)
    w_idx = lax.broadcasted_iota(jnp.int32, (n_ow, W), 1)
    pmat = ((w_idx >= st * o_idx) &
            (w_idx < st * o_idx + kh)).astype(jnp.float32)  # (n_ow, W)

    # avg_pool2d(k=5, s=3): H via unrolled row adds, W via one MXU matmul.
    prows = []
    for oh in range(n_oh):
        hsum = x[st * oh]
        for dh in range(1, kh):
            hsum = hsum + x[st * oh + dh]                   # (W, Cin)
        prows.append(jnp.dot(pmat, hsum, preferred_element_type=jnp.float32))
    pooled = jnp.concatenate(prows, axis=0) * jnp.float32(1.0 / (kh * kh))
    # pooled: (25, Cin), rows in (oh, ow) order -> matches HWIO flattening.

    # conv0 (1x1) + folded BN + ReLU -> (25, 128)
    y0 = jnp.dot(pooled.astype(jnp.bfloat16), w0_ref[...],
                 preferred_element_type=jnp.float32)
    y0 = jnp.maximum(y0 * s0_ref[...] + c0_ref[...], 0.0)
    y0 = y0.astype(jnp.bfloat16)

    # conv1 (5x5 VALID on the 5x5 map) + folded BN + ReLU -> (1, 768)
    acc = jnp.dot(y0[0:1, :], w1_ref[0], preferred_element_type=jnp.float32)
    for p in range(1, npix):
        acc = acc + jnp.dot(y0[p:p + 1, :], w1_ref[p],
                            preferred_element_type=jnp.float32)
    y1 = jnp.maximum(acc * s1_ref[...] + c1_ref[...], 0.0)

    # fc (bias only, lane-padded output -> unmasked lane-dense store)
    out = jnp.dot(y1.astype(jnp.bfloat16), wf_ref[...],
                  preferred_element_type=jnp.float32) + bf_ref[...]
    o_ref[0] = out.astype(o_ref.dtype)


# ------------------------------ wrapper ------------------------------------ #

def inception_aux_forward(params, x_nchw):
    n, cin, h, w = x_nchw.shape
    oh = (h - 5) // 3 + 1
    ow = (w - 5) // 3 + 1
    # The module's flatten -> Linear(768, nc) requires a 5x5 pooled map
    # (i.e. 17x17 spatial input, the real InceptionV3 aux size).
    assert (oh, ow) == (5, 5), f"InceptionAux needs 17x17 spatial input, got {h}x{w}"

    num_classes = params["wf"].shape[1]
    nc_pad = ((num_classes + 127) // 128) * 128

    # One-time layout / dtype prep (weights -> bf16, fc lane-padded to 128).
    # TODO(synk): fold the NCHW->NHWC transpose into the kernel's input DMA.
    x = jnp.transpose(x_nchw, (0, 2, 3, 1)).astype(jnp.float32)      # NHWC
    w0 = params["w0"].astype(jnp.bfloat16)                           # (Cin,128)
    w1 = params["w1"].reshape(25, 128, 768).astype(jnp.bfloat16)
    wf = jnp.zeros((768, nc_pad), jnp.bfloat16).at[:, :num_classes].set(
        params["wf"].astype(jnp.bfloat16))
    bf = jnp.zeros((1, nc_pad), jnp.float32).at[:, :num_classes].set(
        params["bf"])
    s0 = params["s0"].reshape(1, 128)
    c0 = params["c0"].reshape(1, 128)
    s1 = params["s1"].reshape(1, 768)
    c1 = params["c1"].reshape(1, 768)

    const2 = lambda i: (0, 0)       # resident blocks: never re-fetched
    out = pl.pallas_call(
        _inception_aux_kernel,
        out_shape=jax.ShapeDtypeStruct((n, 1, nc_pad), jnp.float32),
        grid=(n,),
        in_specs=[
            pl.BlockSpec((1, h, w, cin), lambda i: (i, 0, 0, 0)),
            pl.BlockSpec((cin, 128), const2),
            pl.BlockSpec((1, 128), const2),
            pl.BlockSpec((1, 128), const2),
            pl.BlockSpec((25, 128, 768), lambda i: (0, 0, 0)),
            pl.BlockSpec((1, 768), const2),
            pl.BlockSpec((1, 768), const2),
            pl.BlockSpec((768, nc_pad), const2),
            pl.BlockSpec((1, nc_pad), const2),
        ],
        out_specs=pl.BlockSpec((1, 1, nc_pad), lambda i: (i, 0, 0)),
        compiler_params=pltpu.CompilerParams(
            dimension_semantics=("parallel",),
            vmem_limit_bytes=32 * 1024 * 1024),
    )(x, w0, s0, c0, w1, s1, c1, wf, bf)
    return out[:, 0, :num_classes]


# ------------------------------ parameters --------------------------------- #

def init_params(key, in_channels, num_classes):
    ks = jax.random.split(key, 12)
    eps = 1e-3
    p = {}
    # conv0: 1x1, in_channels -> 128, bias=False (stored as (Cin, 128))
    p["w0"] = 0.1 * jax.random.normal(ks[0], (in_channels, 128), jnp.float32)
    g0 = 1.0 + 0.1 * jax.random.normal(ks[1], (128,), jnp.float32)
    b0 = 0.1 * jax.random.normal(ks[2], (128,), jnp.float32)
    m0 = 0.1 * jax.random.normal(ks[3], (128,), jnp.float32)
    v0 = 1.0 + 0.1 * jnp.abs(jax.random.normal(ks[4], (128,), jnp.float32))
    p["s0"] = g0 / jnp.sqrt(v0 + eps)
    p["c0"] = b0 - m0 * p["s0"]
    # conv1: 5x5, 128 -> 768, bias=False ("stddev=0.01"); HWIO layout
    w1_hwio = 0.01 * jax.random.normal(ks[5], (5, 5, 128, 768), jnp.float32)
    p["w1_hwio"] = w1_hwio
    p["w1"] = w1_hwio.reshape(5 * 5 * 128, 768)
    g1 = 1.0 + 0.1 * jax.random.normal(ks[6], (768,), jnp.float32)
    b1 = 0.1 * jax.random.normal(ks[7], (768,), jnp.float32)
    m1 = 0.1 * jax.random.normal(ks[8], (768,), jnp.float32)
    v1 = 1.0 + 0.1 * jnp.abs(jax.random.normal(ks[9], (768,), jnp.float32))
    p["s1"] = g1 / jnp.sqrt(v1 + eps)
    p["c1"] = b1 - m1 * p["s1"]
    # fc: 768 -> num_classes, with bias ("stddev=0.001")
    p["wf"] = 0.001 * jax.random.normal(ks[10], (768, num_classes), jnp.float32)
    p["bf"] = 0.001 * jax.random.normal(ks[11], (num_classes,), jnp.float32)
    return p


# ------------------------- plain-JAX f32 reference ------------------------- #

def reference_forward(params, x_nchw):
    x = jnp.transpose(x_nchw, (0, 2, 3, 1)).astype(jnp.float32)
    pooled = lax.reduce_window(x, 0.0, lax.add,
                               (1, 5, 5, 1), (1, 3, 3, 1), "VALID") / 25.0
    w0 = params["w0"].reshape(1, 1, -1, 128)
    dn0 = lax.conv_dimension_numbers(pooled.shape, w0.shape,
                                     ("NHWC", "HWIO", "NHWC"))
    y0 = lax.conv_general_dilated(pooled, w0, (1, 1), "VALID",
                                  dimension_numbers=dn0)
    y0 = jnp.maximum(y0 * params["s0"] + params["c0"], 0.0)
    dn1 = lax.conv_dimension_numbers(y0.shape, params["w1_hwio"].shape,
                                     ("NHWC", "HWIO", "NHWC"))
    y1 = lax.conv_general_dilated(y0, params["w1_hwio"], (1, 1), "VALID",
                                  dimension_numbers=dn1)
    y1 = jnp.maximum(y1 * params["s1"] + params["c1"], 0.0)
    y1 = y1.reshape(y1.shape[0], -1)
    return y1 @ params["wf"] + params["bf"]


if __name__ == "__main__":
    key = jax.random.PRNGKey(0)
    kx, kp = jax.random.split(key)

    in_channels, num_classes = 4, 10
    # Spatial 17x17 so avg_pool -> 5x5 and conv1(5x5 valid) -> 1x1, matching
    # the module's flatten -> Linear(768, num_classes) (16x16 would not run
    # through the original PyTorch module either).
    x = jax.random.normal(kx, (2, in_channels, 17, 17), jnp.float32)
    params = init_params(kp, in_channels, num_classes)

    fwd = jax.jit(inception_aux_forward)
    out = fwd(params, x)
    jax.block_until_ready(out)

    ref = reference_forward(params, x)
    # Kernel uses bf16 weights/activations on the MXU (f32 accumulation);
    # reference is pure f32 module semantics -> loose-ish tolerance.
    np.testing.assert_allclose(np.asarray(out), np.asarray(ref),
                               rtol=2e-2, atol=5e-4)
    print("KERNEL_OK")
</pallas_src>

<mosaic_0001>
module attributes {stable_mosaic.version = 11 : i64} {
  func.func @_inception_aux_kernel(%arg0: i32, %arg1: memref<1x17x17x4xf32, #tpu.memory_space<vmem>>, %arg2: memref<4x128xbf16, #tpu.memory_space<vmem>>, %arg3: memref<1x128xf32, #tpu.memory_space<vmem>>, %arg4: memref<1x128xf32, #tpu.memory_space<vmem>>, %arg5: memref<25x128x768xbf16, #tpu.memory_space<vmem>>, %arg6: memref<1x768xf32, #tpu.memory_space<vmem>>, %arg7: memref<1x768xf32, #tpu.memory_space<vmem>>, %arg8: memref<768x128xbf16, #tpu.memory_space<vmem>>, %arg9: memref<1x128xf32, #tpu.memory_space<vmem>>, %arg10: memref<1x1x128xf32, #tpu.memory_space<vmem>>) attributes {dimension_semantics = [#tpu.dimension_semantics<parallel>], iteration_bounds = array<i64: 2>, scalar_prefetch = 0 : i64, scratch_operands = 0 : i64, tpu.core_type = #tpu.core_type<tc>, window_params = [{transform_indices = @transform_0, window_bounds = array<i64: 1, 17, 17, 4>}, {pipeline_mode = #tpu.pipeline_mode<synchronous>, transform_indices = @transform_1, window_bounds = array<i64: 4, 128>}, {pipeline_mode = #tpu.pipeline_mode<synchronous>, transform_indices = @transform_2, window_bounds = array<i64: 1, 128>}, {pipeline_mode = #tpu.pipeline_mode<synchronous>, transform_indices = @transform_3, window_bounds = array<i64: 1, 128>}, {pipeline_mode = #tpu.pipeline_mode<synchronous>, transform_indices = @transform_4, window_bounds = array<i64: 25, 128, 768>}, {pipeline_mode = #tpu.pipeline_mode<synchronous>, transform_indices = @transform_5, window_bounds = array<i64: 1, 768>}, {pipeline_mode = #tpu.pipeline_mode<synchronous>, transform_indices = @transform_6, window_bounds = array<i64: 1, 768>}, {pipeline_mode = #tpu.pipeline_mode<synchronous>, transform_indices = @transform_7, window_bounds = array<i64: 768, 128>}, {pipeline_mode = #tpu.pipeline_mode<synchronous>, transform_indices = @transform_8, window_bounds = array<i64: 1, 128>}, {transform_indices = @transform_9, window_bounds = array<i64: 1, 1, 128>}]} {
    %c0 = arith.constant 0 : index
    %c0_0 = arith.constant 0 : index
    %c0_1 = arith.constant 0 : index
    %c0_2 = arith.constant 0 : index
    %0 = vector.load %arg1[%c0, %c0_0, %c0_1, %c0_2] : memref<1x17x17x4xf32, #tpu.memory_space<vmem>>, vector<1x17x17x4xf32>
    %1 = vector.shape_cast %0 : vector<1x17x17x4xf32> to vector<17x17x4xf32>
    %2 = tpu.iota {dimensions = array<i32: 0>} : vector<5x17xi32>
    %3 = tpu.iota {dimensions = array<i32: 1>} : vector<5x17xi32>
    %c3_i32 = arith.constant 3 : i32
    %4 = vector.broadcast %c3_i32 : i32 to vector<5x17xi32>
    %5 = arith.muli %4, %2 : vector<5x17xi32>
    %6 = arith.cmpi sge, %3, %5 : vector<5x17xi32>
    %c3_i32_3 = arith.constant 3 : i32
    %7 = vector.broadcast %c3_i32_3 : i32 to vector<5x17xi32>
    %8 = arith.muli %7, %2 : vector<5x17xi32>
    %c5_i32 = arith.constant 5 : i32
    %9 = vector.broadcast %c5_i32 : i32 to vector<5x17xi32>
    %10 = arith.addi %8, %9 : vector<5x17xi32>
    %11 = arith.cmpi slt, %3, %10 : vector<5x17xi32>
    %12 = arith.andi %6, %11 : vector<5x17xi1>
    %13 = arith.extui %12 : vector<5x17xi1> to vector<5x17xi32>
    %14 = arith.sitofp %13 : vector<5x17xi32> to vector<5x17xf32>
    %15 = vector.extract_strided_slice %1 {offsets = [0, 0, 0], sizes = [1, 17, 4], strides = [1, 1, 1]} : vector<17x17x4xf32> to vector<1x17x4xf32>
    %16 = vector.shape_cast %15 : vector<1x17x4xf32> to vector<17x4xf32>
    %17 = vector.extract_strided_slice %1 {offsets = [1, 0, 0], sizes = [1, 17, 4], strides = [1, 1, 1]} : vector<17x17x4xf32> to vector<1x17x4xf32>
    %18 = vector.shape_cast %17 : vector<1x17x4xf32> to vector<17x4xf32>
    %19 = arith.addf %16, %18 : vector<17x4xf32>
    %20 = vector.extract_strided_slice %1 {offsets = [2, 0, 0], sizes = [1, 17, 4], strides = [1, 1, 1]} : vector<17x17x4xf32> to vector<1x17x4xf32>
    %21 = vector.shape_cast %20 : vector<1x17x4xf32> to vector<17x4xf32>
    %22 = arith.addf %19, %21 : vector<17x4xf32>
    %23 = vector.extract_strided_slice %1 {offsets = [3, 0, 0], sizes = [1, 17, 4], strides = [1, 1, 1]} : vector<17x17x4xf32> to vector<1x17x4xf32>
    %24 = vector.shape_cast %23 : vector<1x17x4xf32> to vector<17x4xf32>
    %25 = arith.addf %22, %24 : vector<17x4xf32>
    %26 = vector.extract_strided_slice %1 {offsets = [4, 0, 0], sizes = [1, 17, 4], strides = [1, 1, 1]} : vector<17x17x4xf32> to vector<1x17x4xf32>
    %27 = vector.shape_cast %26 : vector<1x17x4xf32> to vector<17x4xf32>
    %28 = arith.addf %25, %27 : vector<17x4xf32>
    %cst = arith.constant dense<0.000000e+00> : vector<5x4xf32>
    %29 = tpu.matmul %14, %28, %cst {dimension_numbers = #tpu.dot_dimension_numbers<[1], [0], [0], [1], [0, 0, 1, 1], [], []>} : vector<5x17xf32>, vector<17x4xf32>, vector<5x4xf32> -> vector<5x4xf32>
    %30 = vector.extract_strided_slice %1 {offsets = [3, 0, 0], sizes = [1, 17, 4], strides = [1, 1, 1]} : vector<17x17x4xf32> to vector<1x17x4xf32>
    %31 = vector.shape_cast %30 : vector<1x17x4xf32> to vector<17x4xf32>
    %32 = vector.extract_strided_slice %1 {offsets = [4, 0, 0], sizes = [1, 17, 4], strides = [1, 1, 1]} : vector<17x17x4xf32> to vector<1x17x4xf32>
    %33 = vector.shape_cast %32 : vector<1x17x4xf32> to vector<17x4xf32>
    %34 = arith.addf %31, %33 : vector<17x4xf32>
    %35 = vector.extract_strided_slice %1 {offsets = [5, 0, 0], sizes = [1, 17, 4], strides = [1, 1, 1]} : vector<17x17x4xf32> to vector<1x17x4xf32>
    %36 = vector.shape_cast %35 : vector<1x17x4xf32> to vector<17x4xf32>
    %37 = arith.addf %34, %36 : vector<17x4xf32>
    %38 = vector.extract_strided_slice %1 {offsets = [6, 0, 0], sizes = [1, 17, 4], strides = [1, 1, 1]} : vector<17x17x4xf32> to vector<1x17x4xf32>
    %39 = vector.shape_cast %38 : vector<1x17x4xf32> to vector<17x4xf32>
    %40 = arith.addf %37, %39 : vector<17x4xf32>
    %41 = vector.extract_strided_slice %1 {offsets = [7, 0, 0], sizes = [1, 17, 4], strides = [1, 1, 1]} : vector<17x17x4xf32> to vector<1x17x4xf32>
    %42 = vector.shape_cast %41 : vector<1x17x4xf32> to vector<17x4xf32>
    %43 = arith.addf %40, %42 : vector<17x4xf32>
    %cst_4 = arith.constant dense<0.000000e+00> : vector<5x4xf32>
    %44 = tpu.matmul %14, %43, %cst_4 {dimension_numbers = #tpu.dot_dimension_numbers<[1], [0], [0], [1], [0, 0, 1, 1], [], []>} : vector<5x17xf32>, vector<17x4xf32>, vector<5x4xf32> -> vector<5x4xf32>
    %45 = vector.extract_strided_slice %1 {offsets = [6, 0, 0], sizes = [1, 17, 4], strides = [1, 1, 1]} : vector<17x17x4xf32> to vector<1x17x4xf32>
    %46 = vector.shape_cast %45 : vector<1x17x4xf32> to vector<17x4xf32>
    %47 = vector.extract_strided_slice %1 {offsets = [7, 0, 0], sizes = [1, 17, 4], strides = [1, 1, 1]} : vector<17x17x4xf32> to vector<1x17x4xf32>
    %48 = vector.shape_cast %47 : vector<1x17x4xf32> to vector<17x4xf32>
    %49 = arith.addf %46, %48 : vector<17x4xf32>
    %50 = vector.extract_strided_slice %1 {offsets = [8, 0, 0], sizes = [1, 17, 4], strides = [1, 1, 1]} : vector<17x17x4xf32> to vector<1x17x4xf32>
    %51 = vector.shape_cast %50 : vector<1x17x4xf32> to vector<17x4xf32>
    %52 = arith.addf %49, %51 : vector<17x4xf32>
    %53 = vector.extract_strided_slice %1 {offsets = [9, 0, 0], sizes = [1, 17, 4], strides = [1, 1, 1]} : vector<17x17x4xf32> to vector<1x17x4xf32>
    %54 = vector.shape_cast %53 : vector<1x17x4xf32> to vector<17x4xf32>
    %55 = arith.addf %52, %54 : vector<17x4xf32>
    %56 = vector.extract_strided_slice %1 {offsets = [10, 0, 0], sizes = [1, 17, 4], strides = [1, 1, 1]} : vector<17x17x4xf32> to vector<1x17x4xf32>
    %57 = vector.shape_cast %56 : vector<1x17x4xf32> to vector<17x4xf32>
    %58 = arith.addf %55, %57 : vector<17x4xf32>
    %cst_5 = arith.constant dense<0.000000e+00> : vector<5x4xf32>
    %59 = tpu.matmul %14, %58, %cst_5 {dimension_numbers = #tpu.dot_dimension_numbers<[1], [0], [0], [1], [0, 0, 1, 1], [], []>} : vector<5x17xf32>, vector<17x4xf32>, vector<5x4xf32> -> vector<5x4xf32>
    %60 = vector.extract_strided_slice %1 {offsets = [9, 0, 0], sizes = [1, 17, 4], strides = [1, 1, 1]} : vector<17x17x4xf32> to vector<1x17x4xf32>
    %61 = vector.shape_cast %60 : vector<1x17x4xf32> to vector<17x4xf32>
    %62 = vector.extract_strided_slice %1 {offsets = [10, 0, 0], sizes = [1, 17, 4], strides = [1, 1, 1]} : vector<17x17x4xf32> to vector<1x17x4xf32>
    %63 = vector.shape_cast %62 : vector<1x17x4xf32> to vector<17x4xf32>
    %64 = arith.addf %61, %63 : vector<17x4xf32>
    %65 = vector.extract_strided_slice %1 {offsets = [11, 0, 0], sizes = [1, 17, 4], strides = [1, 1, 1]} : vector<17x17x4xf32> to vector<1x17x4xf32>
    %66 = vector.shape_cast %65 : vector<1x17x4xf32> to vector<17x4xf32>
    %67 = arith.addf %64, %66 : vector<17x4xf32>
    %68 = vector.extract_strided_slice %1 {offsets = [12, 0, 0], sizes = [1, 17, 4], strides = [1, 1, 1]} : vector<17x17x4xf32> to vector<1x17x4xf32>
    %69 = vector.shape_cast %68 : vector<1x17x4xf32> to vector<17x4xf32>
    %70 = arith.addf %67, %69 : vector<17x4xf32>
    %71 = vector.extract_strided_slice %1 {offsets = [13, 0, 0], sizes = [1, 17, 4], strides = [1, 1, 1]} : vector<17x17x4xf32> to vector<1x17x4xf32>
    %72 = vector.shape_cast %71 : vector<1x17x4xf32> to vector<17x4xf32>
    %73 = arith.addf %70, %72 : vector<17x4xf32>
    %cst_6 = arith.constant dense<0.000000e+00> : vector<5x4xf32>
    %74 = tpu.matmul %14, %73, %cst_6 {dimension_numbers = #tpu.dot_dimension_numbers<[1], [0], [0], [1], [0, 0, 1, 1], [], []>} : vector<5x17xf32>, vector<17x4xf32>, vector<5x4xf32> -> vector<5x4xf32>
    %75 = vector.extract_strided_slice %1 {offsets = [12, 0, 0], sizes = [1, 17, 4], strides = [1, 1, 1]} : vector<17x17x4xf32> to vector<1x17x4xf32>
    %76 = vector.shape_cast %75 : vector<1x17x4xf32> to vector<17x4xf32>
    %77 = vector.extract_strided_slice %1 {offsets = [13, 0, 0], sizes = [1, 17, 4], strides = [1, 1, 1]} : vector<17x17x4xf32> to vector<1x17x4xf32>
    %78 = vector.shape_cast %77 : vector<1x17x4xf32> to vector<17x4xf32>
    %79 = arith.addf %76, %78 : vector<17x4xf32>
    %80 = vector.extract_strided_slice %1 {offsets = [14, 0, 0], sizes = [1, 17, 4], strides = [1, 1, 1]} : vector<17x17x4xf32> to vector<1x17x4xf32>
    %81 = vector.shape_cast %80 : vector<1x17x4xf32> to vector<17x4xf32>
    %82 = arith.addf %79, %81 : vector<17x4xf32>
    %83 = vector.extract_strided_slice %1 {offsets = [15, 0, 0], sizes = [1, 17, 4], strides = [1, 1, 1]} : vector<17x17x4xf32> to vector<1x17x4xf32>
    %84 = vector.shape_cast %83 : vector<1x17x4xf32> to vector<17x4xf32>
    %85 = arith.addf %82, %84 : vector<17x4xf32>
    %86 = vector.extract_strided_slice %1 {offsets = [16, 0, 0], sizes = [1, 17, 4], strides = [1, 1, 1]} : vector<17x17x4xf32> to vector<1x17x4xf32>
    %87 = vector.shape_cast %86 : vector<1x17x4xf32> to vector<17x4xf32>
    %88 = arith.addf %85, %87 : vector<17x4xf32>
    %cst_7 = arith.constant dense<0.000000e+00> : vector<5x4xf32>
    %89 = tpu.matmul %14, %88, %cst_7 {dimension_numbers = #tpu.dot_dimension_numbers<[1], [0], [0], [1], [0, 0, 1, 1], [], []>} : vector<5x17xf32>, vector<17x4xf32>, vector<5x4xf32> -> vector<5x4xf32>
    %90 = tpu.concatenate %29, %44, %59, %74, %89 in 0 : vector<5x4xf32>, vector<5x4xf32>, vector<5x4xf32>, vector<5x4xf32>, vector<5x4xf32> -> vector<25x4xf32>
    %cst_8 = arith.constant 4.000000e-02 : f32
    %91 = vector.broadcast %cst_8 : f32 to vector<25x4xf32>
    %92 = arith.mulf %90, %91 : vector<25x4xf32>
    %93 = arith.truncf %92 : vector<25x4xf32> to vector<25x4xbf16>
    %c0_9 = arith.constant 0 : index
    %c0_10 = arith.constant 0 : index
    %94 = vector.load %arg2[%c0_9, %c0_10] : memref<4x128xbf16, #tpu.memory_space<vmem>>, vector<4x128xbf16>
    %cst_11 = arith.constant dense<0.000000e+00> : vector<25x128xf32>
    %95 = tpu.matmul %93, %94, %cst_11 {dimension_numbers = #tpu.dot_dimension_numbers<[1], [0], [0], [1], [0, 0, 1, 1], [], []>} : vector<25x4xbf16>, vector<4x128xbf16>, vector<25x128xf32> -> vector<25x128xf32>
    %c0_12 = arith.constant 0 : index
    %c0_13 = arith.constant 0 : index
    %96 = vector.load %arg3[%c0_12, %c0_13] : memref<1x128xf32, #tpu.memory_space<vmem>>, vector<1x128xf32>
    %97 = vector.broadcast %96 : vector<1x128xf32> to vector<25x128xf32>
    %98 = arith.mulf %95, %97 : vector<25x128xf32>
    %c0_14 = arith.constant 0 : index
    %c0_15 = arith.constant 0 : index
    %99 = vector.load %arg4[%c0_14, %c0_15] : memref<1x128xf32, #tpu.memory_space<vmem>>, vector<1x128xf32>
    %100 = vector.broadcast %99 : vector<1x128xf32> to vector<25x128xf32>
    %101 = arith.addf %98, %100 : vector<25x128xf32>
    %cst_16 = arith.constant 0.000000e+00 : f32
    %102 = vector.broadcast %cst_16 : f32 to vector<25x128xf32>
    %103 = arith.maximumf %101, %102 : vector<25x128xf32>
    %104 = arith.truncf %103 : vector<25x128xf32> to vector<25x128xbf16>
    %105 = vector.extract_strided_slice %104 {offsets = [0, 0], sizes = [1, 128], strides = [1, 1]} : vector<25x128xbf16> to vector<1x128xbf16>
    %c0_17 = arith.constant 0 : index
    %c0_18 = arith.constant 0 : index
    %c0_19 = arith.constant 0 : index
    %106 = vector.load %arg5[%c0_17, %c0_18, %c0_19] : memref<25x128x768xbf16, #tpu.memory_space<vmem>>, vector<1x128x768xbf16>
    %107 = vector.shape_cast %106 : vector<1x128x768xbf16> to vector<128x768xbf16>
    %cst_20 = arith.constant dense<0.000000e+00> : vector<1x768xf32>
    %108 = tpu.matmul %105, %107, %cst_20 {dimension_numbers = #tpu.dot_dimension_numbers<[1], [0], [0], [1], [0, 0, 1, 1], [], []>} : vector<1x128xbf16>, vector<128x768xbf16>, vector<1x768xf32> -> vector<1x768xf32>
    %109 = vector.extract_strided_slice %104 {offsets = [1, 0], sizes = [1, 128], strides = [1, 1]} : vector<25x128xbf16> to vector<1x128xbf16>
    %c1 = arith.constant 1 : index
    %c0_21 = arith.constant 0 : index
    %c0_22 = arith.constant 0 : index
    %110 = vector.load %arg5[%c1, %c0_21, %c0_22] : memref<25x128x768xbf16, #tpu.memory_space<vmem>>, vector<1x128x768xbf16>
    %111 = vector.shape_cast %110 : vector<1x128x768xbf16> to vector<128x768xbf16>
    %cst_23 = arith.constant dense<0.000000e+00> : vector<1x768xf32>
    %112 = tpu.matmul %109, %111, %cst_23 {dimension_numbers = #tpu.dot_dimension_numbers<[1], [0], [0], [1], [0, 0, 1, 1], [], []>} : vector<1x128xbf16>, vector<128x768xbf16>, vector<1x768xf32> -> vector<1x768xf32>
    %113 = arith.addf %108, %112 : vector<1x768xf32>
    %114 = vector.extract_strided_slice %104 {offsets = [2, 0], sizes = [1, 128], strides = [1, 1]} : vector<25x128xbf16> to vector<1x128xbf16>
    %c2 = arith.constant 2 : index
    %c0_24 = arith.constant 0 : index
    %c0_25 = arith.constant 0 : index
    %115 = vector.load %arg5[%c2, %c0_24, %c0_25] : memref<25x128x768xbf16, #tpu.memory_space<vmem>>, vector<1x128x768xbf16>
    %116 = vector.shape_cast %115 : vector<1x128x768xbf16> to vector<128x768xbf16>
    %cst_26 = arith.constant dense<0.000000e+00> : vector<1x768xf32>
    %117 = tpu.matmul %114, %116, %cst_26 {dimension_numbers = #tpu.dot_dimension_numbers<[1], [0], [0], [1], [0, 0, 1, 1], [], []>} : vector<1x128xbf16>, vector<128x768xbf16>, vector<1x768xf32> -> vector<1x768xf32>
    %118 = arith.addf %113, %117 : vector<1x768xf32>
    %119 = vector.extract_strided_slice %104 {offsets = [3, 0], sizes = [1, 128], strides = [1, 1]} : vector<25x128xbf16> to vector<1x128xbf16>
    %c3 = arith.constant 3 : index
    %c0_27 = arith.constant 0 : index
    %c0_28 = arith.constant 0 : index
    %120 = vector.load %arg5[%c3, %c0_27, %c0_28] : memref<25x128x768xbf16, #tpu.memory_space<vmem>>, vector<1x128x768xbf16>
    %121 = vector.shape_cast %120 : vector<1x128x768xbf16> to vector<128x768xbf16>
    %cst_29 = arith.constant dense<0.000000e+00> : vector<1x768xf32>
    %122 = tpu.matmul %119, %121, %cst_29 {dimension_numbers = #tpu.dot_dimension_numbers<[1], [0], [0], [1], [0, 0, 1, 1], [], []>} : vector<1x128xbf16>, vector<128x768xbf16>, vector<1x768xf32> -> vector<1x768xf32>
    %123 = arith.addf %118, %122 : vector<1x768xf32>
    %124 = vector.extract_strided_slice %104 {offsets = [4, 0], sizes = [1, 128], strides = [1, 1]} : vector<25x128xbf16> to vector<1x128xbf16>
    %c4 = arith.constant 4 : index
    %c0_30 = arith.constant 0 : index
    %c0_31 = arith.constant 0 : index
    %125 = vector.load %arg5[%c4, %c0_30, %c0_31] : memref<25x128x768xbf16, #tpu.memory_space<vmem>>, vector<1x128x768xbf16>
    %126 = vector.shape_cast %125 : vector<1x128x768xbf16> to vector<128x768xbf16>
    %cst_32 = arith.constant dense<0.000000e+00> : vector<1x768xf32>
    %127 = tpu.matmul %124, %126, %cst_32 {dimension_numbers = #tpu.dot_dimension_numbers<[1], [0], [0], [1], [0, 0, 1, 1], [], []>} : vector<1x128xbf16>, vector<128x768xbf16>, vector<1x768xf32> -> vector<1x768xf32>
    %128 = arith.addf %123, %127 : vector<1x768xf32>
    %129 = vector.extract_strided_slice %104 {offsets = [5, 0], sizes = [1, 128], strides = [1, 1]} : vector<25x128xbf16> to vector<1x128xbf16>
    %c5 = arith.constant 5 : index
    %c0_33 = arith.constant 0 : index
    %c0_34 = arith.constant 0 : index
    %130 = vector.load %arg5[%c5, %c0_33, %c0_34] : memref<25x128x768xbf16, #tpu.memory_space<vmem>>, vector<1x128x768xbf16>
    %131 = vector.shape_cast %130 : vector<1x128x768xbf16> to vector<128x768xbf16>
    %cst_35 = arith.constant dense<0.000000e+00> : vector<1x768xf32>
    %132 = tpu.matmul %129, %131, %cst_35 {dimension_numbers = #tpu.dot_dimension_numbers<[1], [0], [0], [1], [0, 0, 1, 1], [], []>} : vector<1x128xbf16>, vector<128x768xbf16>, vector<1x768xf32> -> vector<1x768xf32>
    %133 = arith.addf %128, %132 : vector<1x768xf32>
    %134 = vector.extract_strided_slice %104 {offsets = [6, 0], sizes = [1, 128], strides = [1, 1]} : vector<25x128xbf16> to vector<1x128xbf16>
    %c6 = arith.constant 6 : index
    %c0_36 = arith.constant 0 : index
    %c0_37 = arith.constant 0 : index
    %135 = vector.load %arg5[%c6, %c0_36, %c0_37] : memref<25x128x768xbf16, #tpu.memory_space<vmem>>, vector<1x128x768xbf16>
    %136 = vector.shape_cast %135 : vector<1x128x768xbf16> to vector<128x768xbf16>
    %cst_38 = arith.constant dense<0.000000e+00> : vector<1x768xf32>
    %137 = tpu.matmul %134, %136, %cst_38 {dimension_numbers = #tpu.dot_dimension_numbers<[1], [0], [0], [1], [0, 0, 1, 1], [], []>} : vector<1x128xbf16>, vector<128x768xbf16>, vector<1x768xf32> -> vector<1x768xf32>
    %138 = arith.addf %133, %137 : vector<1x768xf32>
    %139 = vector.extract_strided_slice %104 {offsets = [7, 0], sizes = [1, 128], strides = [1, 1]} : vector<25x128xbf16> to vector<1x128xbf16>
    %c7 = arith.constant 7 : index
    %c0_39 = arith.constant 0 : index
    %c0_40 = arith.constant 0 : index
    %140 = vector.load %arg5[%c7, %c0_39, %c0_40] : memref<25x128x768xbf16, #tpu.memory_space<vmem>>, vector<1x128x768xbf16>
    %141 = vector.shape_cast %140 : vector<1x128x768xbf16> to vector<128x768xbf16>
    %cst_41 = arith.constant dense<0.000000e+00> : vector<1x768xf32>
    %142 = tpu.matmul %139, %141, %cst_41 {dimension_numbers = #tpu.dot_dimension_numbers<[1], [0], [0], [1], [0, 0, 1, 1], [], []>} : vector<1x128xbf16>, vector<128x768xbf16>, vector<1x768xf32> -> vector<1x768xf32>
    %143 = arith.addf %138, %142 : vector<1x768xf32>
    %144 = vector.extract_strided_slice %104 {offsets = [8, 0], sizes = [1, 128], strides = [1, 1]} : vector<25x128xbf16> to vector<1x128xbf16>
    %c8 = arith.constant 8 : index
    %c0_42 = arith.constant 0 : index
    %c0_43 = arith.constant 0 : index
    %145 = vector.load %arg5[%c8, %c0_42, %c0_43] : memref<25x128x768xbf16, #tpu.memory_space<vmem>>, vector<1x128x768xbf16>
    %146 = vector.shape_cast %145 : vector<1x128x768xbf16> to vector<128x768xbf16>
    %cst_44 = arith.constant dense<0.000000e+00> : vector<1x768xf32>
    %147 = tpu.matmul %144, %146, %cst_44 {dimension_numbers = #tpu.dot_dimension_numbers<[1], [0], [0], [1], [0, 0, 1, 1], [], []>} : vector<1x128xbf16>, vector<128x768xbf16>, vector<1x768xf32> -> vector<1x768xf32>
    %148 = arith.addf %143, %147 : vector<1x768xf32>
    %149 = vector.extract_strided_slice %104 {offsets = [9, 0], sizes = [1, 128], strides = [1, 1]} : vector<25x128xbf16> to vector<1x128xbf16>
    %c9 = arith.constant 9 : index
    %c0_45 = arith.constant 0 : index
    %c0_46 = arith.constant 0 : index
    %150 = vector.load %arg5[%c9, %c0_45, %c0_46] : memref<25x128x768xbf16, #tpu.memory_space<vmem>>, vector<1x128x768xbf16>
    %151 = vector.shape_cast %150 : vector<1x128x768xbf16> to vector<128x768xbf16>
    %cst_47 = arith.constant dense<0.000000e+00> : vector<1x768xf32>
    %152 = tpu.matmul %149, %151, %cst_47 {dimension_numbers = #tpu.dot_dimension_numbers<[1], [0], [0], [1], [0, 0, 1, 1], [], []>} : vector<1x128xbf16>, vector<128x768xbf16>, vector<1x768xf32> -> vector<1x768xf32>
    %153 = arith.addf %148, %152 : vector<1x768xf32>
    %154 = vector.extract_strided_slice %104 {offsets = [10, 0], sizes = [1, 128], strides = [1, 1]} : vector<25x128xbf16> to vector<1x128xbf16>
    %c10 = arith.constant 10 : index
    %c0_48 = arith.constant 0 : index
    %c0_49 = arith.constant 0 : index
    %155 = vector.load %arg5[%c10, %c0_48, %c0_49] : memref<25x128x768xbf16, #tpu.memory_space<vmem>>, vector<1x128x768xbf16>
    %156 = vector.shape_cast %155 : vector<1x128x768xbf16> to vector<128x768xbf16>
    %cst_50 = arith.constant dense<0.000000e+00> : vector<1x768xf32>
    %157 = tpu.matmul %154, %156, %cst_50 {dimension_numbers = #tpu.dot_dimension_numbers<[1], [0], [0], [1], [0, 0, 1, 1], [], []>} : vector<1x128xbf16>, vector<128x768xbf16>, vector<1x768xf32> -> vector<1x768xf32>
    %158 = arith.addf %153, %157 : vector<1x768xf32>
    %159 = vector.extract_strided_slice %104 {offsets = [11, 0], sizes = [1, 128], strides = [1, 1]} : vector<25x128xbf16> to vector<1x128xbf16>
    %c11 = arith.constant 11 : index
    %c0_51 = arith.constant 0 : index
    %c0_52 = arith.constant 0 : index
    %160 = vector.load %arg5[%c11, %c0_51, %c0_52] : memref<25x128x768xbf16, #tpu.memory_space<vmem>>, vector<1x128x768xbf16>
    %161 = vector.shape_cast %160 : vector<1x128x768xbf16> to vector<128x768xbf16>
    %cst_53 = arith.constant dense<0.000000e+00> : vector<1x768xf32>
    %162 = tpu.matmul %159, %161, %cst_53 {dimension_numbers = #tpu.dot_dimension_numbers<[1], [0], [0], [1], [0, 0, 1, 1], [], []>} : vector<1x128xbf16>, vector<128x768xbf16>, vector<1x768xf32> -> vector<1x768xf32>
    %163 = arith.addf %158, %162 : vector<1x768xf32>
    %164 = vector.extract_strided_slice %104 {offsets = [12, 0], sizes = [1, 128], strides = [1, 1]} : vector<25x128xbf16> to vector<1x128xbf16>
    %c12 = arith.constant 12 : index
    %c0_54 = arith.constant 0 : index
    %c0_55 = arith.constant 0 : index
    %165 = vector.load %arg5[%c12, %c0_54, %c0_55] : memref<25x128x768xbf16, #tpu.memory_space<vmem>>, vector<1x128x768xbf16>
    %166 = vector.shape_cast %165 : vector<1x128x768xbf16> to vector<128x768xbf16>
    %cst_56 = arith.constant dense<0.000000e+00> : vector<1x768xf32>
    %167 = tpu.matmul %164, %166, %cst_56 {dimension_numbers = #tpu.dot_dimension_numbers<[1], [0], [0], [1], [0, 0, 1, 1], [], []>} : vector<1x128xbf16>, vector<128x768xbf16>, vector<1x768xf32> -> vector<1x768xf32>
    %168 = arith.addf %163, %167 : vector<1x768xf32>
    %169 = vector.extract_strided_slice %104 {offsets = [13, 0], sizes = [1, 128], strides = [1, 1]} : vector<25x128xbf16> to vector<1x128xbf16>
    %c13 = arith.constant 13 : index
    %c0_57 = arith.constant 0 : index
    %c0_58 = arith.constant 0 : index
    %170 = vector.load %arg5[%c13, %c0_57, %c0_58] : memref<25x128x768xbf16, #tpu.memory_space<vmem>>, vector<1x128x768xbf16>
    %171 = vector.shape_cast %170 : vector<1x128x768xbf16> to vector<128x768xbf16>
    %cst_59 = arith.constant dense<0.000000e+00> : vector<1x768xf32>
    %172 = tpu.matmul %169, %171, %cst_59 {dimension_numbers = #tpu.dot_dimension_numbers<[1], [0], [0], [1], [0, 0, 1, 1], [], []>} : vector<1x128xbf16>, vector<128x768xbf16>, vector<1x768xf32> -> vector<1x768xf32>
    %173 = arith.addf %168, %172 : vector<1x768xf32>
    %174 = vector.extract_strided_slice %104 {offsets = [14, 0], sizes = [1, 128], strides = [1, 1]} : vector<25x128xbf16> to vector<1x128xbf16>
    %c14 = arith.constant 14 : index
    %c0_60 = arith.constant 0 : index
    %c0_61 = arith.constant 0 : index
    %175 = vector.load %arg5[%c14, %c0_60, %c0_61] : memref<25x128x768xbf16, #tpu.memory_space<vmem>>, vector<1x128x768xbf16>
    %176 = vector.shape_cast %175 : vector<1x128x768xbf16> to vector<128x768xbf16>
    %cst_62 = arith.constant dense<0.000000e+00> : vector<1x768xf32>
    %177 = tpu.matmul %174, %176, %cst_62 {dimension_numbers = #tpu.dot_dimension_numbers<[1], [0], [0], [1], [0, 0, 1, 1], [], []>} : vector<1x128xbf16>, vector<128x768xbf16>, vector<1x768xf32> -> vector<1x768xf32>
    %178 = arith.addf %173, %177 : vector<1x768xf32>
    %179 = vector.extract_strided_slice %104 {offsets = [15, 0], sizes = [1, 128], strides = [1, 1]} : vector<25x128xbf16> to vector<1x128xbf16>
    %c15 = arith.constant 15 : index
    %c0_63 = arith.constant 0 : index
    %c0_64 = arith.constant 0 : index
    %180 = vector.load %arg5[%c15, %c0_63, %c0_64] : memref<25x128x768xbf16, #tpu.memory_space<vmem>>, vector<1x128x768xbf16>
    %181 = vector.shape_cast %180 : vector<1x128x768xbf16> to vector<128x768xbf16>
    %cst_65 = arith.constant dense<0.000000e+00> : vector<1x768xf32>
    %182 = tpu.matmul %179, %181, %cst_65 {dimension_numbers = #tpu.dot_dimension_numbers<[1], [0], [0], [1], [0, 0, 1, 1], [], []>} : vector<1x128xbf16>, vector<128x768xbf16>, vector<1x768xf32> -> vector<1x768xf32>
    %183 = arith.addf %178, %182 : vector<1x768xf32>
    %184 = vector.extract_strided_slice %104 {offsets = [16, 0], sizes = [1, 128], strides = [1, 1]} : vector<25x128xbf16> to vector<1x128xbf16>
    %c16 = arith.constant 16 : index
    %c0_66 = arith.constant 0 : index
    %c0_67 = arith.constant 0 : index
    %185 = vector.load %arg5[%c16, %c0_66, %c0_67] : memref<25x128x768xbf16, #tpu.memory_space<vmem>>, vector<1x128x768xbf16>
    %186 = vector.shape_cast %185 : vector<1x128x768xbf16> to vector<128x768xbf16>
    %cst_68 = arith.constant dense<0.000000e+00> : vector<1x768xf32>
    %187 = tpu.matmul %184, %186, %cst_68 {dimension_numbers = #tpu.dot_dimension_numbers<[1], [0], [0], [1], [0, 0, 1, 1], [], []>} : vector<1x128xbf16>, vector<128x768xbf16>, vector<1x768xf32> -> vector<1x768xf32>
    %188 = arith.addf %183, %187 : vector<1x768xf32>
    %189 = vector.extract_strided_slice %104 {offsets = [17, 0], sizes = [1, 128], strides = [1, 1]} : vector<25x128xbf16> to vector<1x128xbf16>
    %c17 = arith.constant 17 : index
    %c0_69 = arith.constant 0 : index
    %c0_70 = arith.constant 0 : index
    %190 = vector.load %arg5[%c17, %c0_69, %c0_70] : memref<25x128x768xbf16, #tpu.memory_space<vmem>>, vector<1x128x768xbf16>
    %191 = vector.shape_cast %190 : vector<1x128x768xbf16> to vector<128x768xbf16>
    %cst_71 = arith.constant dense<0.000000e+00> : vector<1x768xf32>
    %192 = tpu.matmul %189, %191, %cst_71 {dimension_numbers = #tpu.dot_dimension_numbers<[1], [0], [0], [1], [0, 0, 1, 1], [], []>} : vector<1x128xbf16>, vector<128x768xbf16>, vector<1x768xf32> -> vector<1x768xf32>
    %193 = arith.addf %188, %192 : vector<1x768xf32>
    %194 = vector.extract_strided_slice %104 {offsets = [18, 0], sizes = [1, 128], strides = [1, 1]} : vector<25x128xbf16> to vector<1x128xbf16>
    %c18 = arith.constant 18 : index
    %c0_72 = arith.constant 0 : index
    %c0_73 = arith.constant 0 : index
    %195 = vector.load %arg5[%c18, %c0_72, %c0_73] : memref<25x128x768xbf16, #tpu.memory_space<vmem>>, vector<1x128x768xbf16>
    %196 = vector.shape_cast %195 : vector<1x128x768xbf16> to vector<128x768xbf16>
    %cst_74 = arith.constant dense<0.000000e+00> : vector<1x768xf32>
    %197 = tpu.matmul %194, %196, %cst_74 {dimension_numbers = #tpu.dot_dimension_numbers<[1], [0], [0], [1], [0, 0, 1, 1], [], []>} : vector<1x128xbf16>, vector<128x768xbf16>, vector<1x768xf32> -> vector<1x768xf32>
    %198 = arith.addf %193, %197 : vector<1x768xf32>
    %199 = vector.extract_strided_slice %104 {offsets = [19, 0], sizes = [1, 128], strides = [1, 1]} : vector<25x128xbf16> to vector<1x128xbf16>
    %c19 = arith.constant 19 : index
    %c0_75 = arith.constant 0 : index
    %c0_76 = arith.constant 0 : index
    %200 = vector.load %arg5[%c19, %c0_75, %c0_76] : memref<25x128x768xbf16, #tpu.memory_space<vmem>>, vector<1x128x768xbf16>
    %201 = vector.shape_cast %200 : vector<1x128x768xbf16> to vector<128x768xbf16>
    %cst_77 = arith.constant dense<0.000000e+00> : vector<1x768xf32>
    %202 = tpu.matmul %199, %201, %cst_77 {dimension_numbers = #tpu.dot_dimension_numbers<[1], [0], [0], [1], [0, 0, 1, 1], [], []>} : vector<1x128xbf16>, vector<128x768xbf16>, vector<1x768xf32> -> vector<1x768xf32>
    %203 = arith.addf %198, %202 : vector<1x768xf32>
    %204 = vector.extract_strided_slice %104 {offsets = [20, 0], sizes = [1, 128], strides = [1, 1]} : vector<25x128xbf16> to vector<1x128xbf16>
    %c20 = arith.constant 20 : index
    %c0_78 = arith.constant 0 : index
    %c0_79 = arith.constant 0 : index
    %205 = vector.load %arg5[%c20, %c0_78, %c0_79] : memref<25x128x768xbf16, #tpu.memory_space<vmem>>, vector<1x128x768xbf16>
    %206 = vector.shape_cast %205 : vector<1x128x768xbf16> to vector<128x768xbf16>
    %cst_80 = arith.constant dense<0.000000e+00> : vector<1x768xf32>
    %207 = tpu.matmul %204, %206, %cst_80 {dimension_numbers = #tpu.dot_dimension_numbers<[1], [0], [0], [1], [0, 0, 1, 1], [], []>} : vector<1x128xbf16>, vector<128x768xbf16>, vector<1x768xf32> -> vector<1x768xf32>
    %208 = arith.addf %203, %207 : vector<1x768xf32>
    %209 = vector.extract_strided_slice %104 {offsets = [21, 0], sizes = [1, 128], strides = [1, 1]} : vector<25x128xbf16> to vector<1x128xbf16>
    %c21 = arith.constant 21 : index
    %c0_81 = arith.constant 0 : index
    %c0_82 = arith.constant 0 : index
    %210 = vector.load %arg5[%c21, %c0_81, %c0_82] : memref<25x128x768xbf16, #tpu.memory_space<vmem>>, vector<1x128x768xbf16>
    %211 = vector.shape_cast %210 : vector<1x128x768xbf16> to vector<128x768xbf16>
    %cst_83 = arith.constant dense<0.000000e+00> : vector<1x768xf32>
    %212 = tpu.matmul %209, %211, %cst_83 {dimension_numbers = #tpu.dot_dimension_numbers<[1], [0], [0], [1], [0, 0, 1, 1], [], []>} : vector<1x128xbf16>, vector<128x768xbf16>, vector<1x768xf32> -> vector<1x768xf32>
    %213 = arith.addf %208, %212 : vector<1x768xf32>
    %214 = vector.extract_strided_slice %104 {offsets = [22, 0], sizes = [1, 128], strides = [1, 1]} : vector<25x128xbf16> to vector<1x128xbf16>
    %c22 = arith.constant 22 : index
    %c0_84 = arith.constant 0 : index
    %c0_85 = arith.constant 0 : index
    %215 = vector.load %arg5[%c22, %c0_84, %c0_85] : memref<25x128x768xbf16, #tpu.memory_space<vmem>>, vector<1x128x768xbf16>
    %216 = vector.shape_cast %215 : vector<1x128x768xbf16> to vector<128x768xbf16>
    %cst_86 = arith.constant dense<0.000000e+00> : vector<1x768xf32>
    %217 = tpu.matmul %214, %216, %cst_86 {dimension_numbers = #tpu.dot_dimension_numbers<[1], [0], [0], [1], [0, 0, 1, 1], [], []>} : vector<1x128xbf16>, vector<128x768xbf16>, vector<1x768xf32> -> vector<1x768xf32>
    %218 = arith.addf %213, %217 : vector<1x768xf32>
    %219 = vector.extract_strided_slice %104 {offsets = [23, 0], sizes = [1, 128], strides = [1, 1]} : vector<25x128xbf16> to vector<1x128xbf16>
    %c23 = arith.constant 23 : index
    %c0_87 = arith.constant 0 : index
    %c0_88 = arith.constant 0 : index
    %220 = vector.load %arg5[%c23, %c0_87, %c0_88] : memref<25x128x768xbf16, #tpu.memory_space<vmem>>, vector<1x128x768xbf16>
    %221 = vector.shape_cast %220 : vector<1x128x768xbf16> to vector<128x768xbf16>
    %cst_89 = arith.constant dense<0.000000e+00> : vector<1x768xf32>
    %222 = tpu.matmul %219, %221, %cst_89 {dimension_numbers = #tpu.dot_dimension_numbers<[1], [0], [0], [1], [0, 0, 1, 1], [], []>} : vector<1x128xbf16>, vector<128x768xbf16>, vector<1x768xf32> -> vector<1x768xf32>
    %223 = arith.addf %218, %222 : vector<1x768xf32>
    %224 = vector.extract_strided_slice %104 {offsets = [24, 0], sizes = [1, 128], strides = [1, 1]} : vector<25x128xbf16> to vector<1x128xbf16>
    %c24 = arith.constant 24 : index
    %c0_90 = arith.constant 0 : index
    %c0_91 = arith.constant 0 : index
    %225 = vector.load %arg5[%c24, %c0_90, %c0_91] : memref<25x128x768xbf16, #tpu.memory_space<vmem>>, vector<1x128x768xbf16>
    %226 = vector.shape_cast %225 : vector<1x128x768xbf16> to vector<128x768xbf16>
    %cst_92 = arith.constant dense<0.000000e+00> : vector<1x768xf32>
    %227 = tpu.matmul %224, %226, %cst_92 {dimension_numbers = #tpu.dot_dimension_numbers<[1], [0], [0], [1], [0, 0, 1, 1], [], []>} : vector<1x128xbf16>, vector<128x768xbf16>, vector<1x768xf32> -> vector<1x768xf32>
    %228 = arith.addf %223, %227 : vector<1x768xf32>
    %c0_93 = arith.constant 0 : index
    %c0_94 = arith.constant 0 : index
    %229 = vector.load %arg6[%c0_93, %c0_94] : memref<1x768xf32, #tpu.memory_space<vmem>>, vector<1x768xf32>
    %230 = arith.mulf %228, %229 : vector<1x768xf32>
    %c0_95 = arith.constant 0 : index
    %c0_96 = arith.constant 0 : index
    %231 = vector.load %arg7[%c0_95, %c0_96] : memref<1x768xf32, #tpu.memory_space<vmem>>, vector<1x768xf32>
    %232 = arith.addf %230, %231 : vector<1x768xf32>
    %cst_97 = arith.constant 0.000000e+00 : f32
    %233 = vector.broadcast %cst_97 : f32 to vector<1x768xf32>
    %234 = arith.maximumf %232, %233 : vector<1x768xf32>
    %235 = arith.truncf %234 : vector<1x768xf32> to vector<1x768xbf16>
    %c0_98 = arith.constant 0 : index
    %c0_99 = arith.constant 0 : index
    %236 = vector.load %arg8[%c0_98, %c0_99] : memref<768x128xbf16, #tpu.memory_space<vmem>>, vector<768x128xbf16>
    %cst_100 = arith.constant dense<0.000000e+00> : vector<1x128xf32>
    %237 = tpu.matmul %235, %236, %cst_100 {dimension_numbers = #tpu.dot_dimension_numbers<[1], [0], [0], [1], [0, 0, 1, 1], [], []>} : vector<1x768xbf16>, vector<768x128xbf16>, vector<1x128xf32> -> vector<1x128xf32>
    %c0_101 = arith.constant 0 : index
    %c0_102 = arith.constant 0 : index
    %238 = vector.load %arg9[%c0_101, %c0_102] : memref<1x128xf32, #tpu.memory_space<vmem>>, vector<1x128xf32>
    %239 = arith.addf %237, %238 : vector<1x128xf32>
    %c0_103 = arith.constant 0 : index
    %c0_104 = arith.constant 0 : index
    %c0_105 = arith.constant 0 : index
    %240 = vector.load %arg10[%c0_103, %c0_104, %c0_105] : memref<1x1x128xf32, #tpu.memory_space<vmem>>, vector<1x1x128xf32>
    %241 = vector.shape_cast %240 : vector<1x1x128xf32> to vector<1x128xf32>
    %242 = vector.shape_cast %239 : vector<1x128xf32> to vector<1x1x128xf32>
    tpu.vector_store %arg10[%c0_103, %c0_104, %c0_105], %242 {strides = array<i32>} : memref<1x1x128xf32, #tpu.memory_space<vmem>>, vector<1x1x128xf32>,
    return
  }
  func.func @transform_0(%arg0: i32) -> (i32, i32, i32, i32) {
    %c0_i32 = arith.constant 0 : i32
    %c0_i32_0 = arith.constant 0 : i32
    %c0_i32_1 = arith.constant 0 : i32
    %c0_i32_2 = arith.constant 0 : i32
    return %arg0, %c0_i32, %c0_i32_0, %c0_i32_1 : i32, i32, i32, i32
  }
  func.func @transform_1(%arg0: i32) -> (i32, i32) {
    %c0_i32 = arith.constant 0 : i32
    %c0_i32_0 = arith.constant 0 : i32
    %c0_i32_1 = arith.constant 0 : i32
    return %c0_i32, %c0_i32_0 : i32, i32
  }
  func.func @transform_2(%arg0: i32) -> (i32, i32) {
    %c0_i32 = arith.constant 0 : i32
    %c0_i32_0 = arith.constant 0 : i32
    %c0_i32_1 = arith.constant 0 : i32
    return %c0_i32, %c0_i32_0 : i32, i32
  }
  func.func @transform_3(%arg0: i32) -> (i32, i32) {
    %c0_i32 = arith.constant 0 : i32
    %c0_i32_0 = arith.constant 0 : i32
    %c0_i32_1 = arith.constant 0 : i32
    return %c0_i32, %c0_i32_0 : i32, i32
  }
  func.func @transform_4(%arg0: i32) -> (i32, i32, i32) {
    %c0_i32 = arith.constant 0 : i32
    %c0_i32_0 = arith.constant 0 : i32
    %c0_i32_1 = arith.constant 0 : i32
    %c0_i32_2 = arith.constant 0 : i32
    return %c0_i32, %c0_i32_0, %c0_i32_1 : i32, i32, i32
  }
  func.func @transform_5(%arg0: i32) -> (i32, i32) {
    %c0_i32 = arith.constant 0 : i32
    %c0_i32_0 = arith.constant 0 : i32
    %c0_i32_1 = arith.constant 0 : i32
    return %c0_i32, %c0_i32_0 : i32, i32
  }
  func.func @transform_6(%arg0: i32) -> (i32, i32) {
    %c0_i32 = arith.constant 0 : i32
    %c0_i32_0 = arith.constant 0 : i32
    %c0_i32_1 = arith.constant 0 : i32
    return %c0_i32, %c0_i32_0 : i32, i32
  }
  func.func @transform_7(%arg0: i32) -> (i32, i32) {
    %c0_i32 = arith.constant 0 : i32
    %c0_i32_0 = arith.constant 0 : i32
    %c0_i32_1 = arith.constant 0 : i32
    return %c0_i32, %c0_i32_0 : i32, i32
  }
  func.func @transform_8(%arg0: i32) -> (i32, i32) {
    %c0_i32 = arith.constant 0 : i32
    %c0_i32_0 = arith.constant 0 : i32
    %c0_i32_1 = arith.constant 0 : i32
    return %c0_i32, %c0_i32_0 : i32, i32
  }
  func.func @transform_9(%arg0: i32) -> (i32, i32, i32) {
    %c0_i32 = arith.constant 0 : i32
    %c0_i32_0 = arith.constant 0 : i32
    %c0_i32_1 = arith.constant 0 : i32
    return %arg0, %c0_i32, %c0_i32_0 : i32, i32, i32
  }
}

</mosaic_0001>

<bundles_post_ra>
// kernel: inception_aux_forward.1
= control target key start
LH: loop header
LB: loop body
LE: loop exit
PB: predicated region body
PF: predicated region fallthrough
CT: control target
= control target key end

     0   :  { %14 = vsyncpa [#allocation3], 0  ;;  %s21185_s0 = inlined_call_operand.vmem [shape: f32[2,17,17,4], index: 0, kind: input, shape index: {}]   ;;  %s21186_s1 = inlined_call_operand.vmem [shape: bf16[4,128], index: 1, kind: input, shape index: {}]   ;;  %s21187_s2 = inlined_call_operand.vmem [shape: f32[1,128], index: 2, kind: input, shape index: {}]   ;;  %s21188_s3 = inlined_call_operand.vmem [shape: f32[1,128], index: 3, kind: input, shape index: {}]   ;;  %s21189_s4 = inlined_call_operand.vmem [shape: bf16[25,128,768], index: 4, kind: input, shape index: {}]   ;;  %s21190_s5 = inlined_call_operand.vmem [shape: f32[1,768], index: 5, kind: input, shape index: {}]   ;;  %s21191_s6 = inlined_call_operand.vmem [shape: f32[1,768], index: 6, kind: input, shape index: {}]   ;;  %s21192_s7 = inlined_call_operand.vmem [shape: bf16[768,128], index: 7, kind: input, shape index: {}]   ;;  %s21193_s8 = inlined_call_operand.vmem [shape: f32[1,128], index: 8, kind: input, shape index: {}]   ;;  %s21194_s9 = inlined_call_operand.hbm [shape: f32[2,1,128], index: 9, kind: output, shape index: {}]  }
   0x1   :  { %16 = vsyncpa [#allocation3 + $0x1], 0  ;;  %s16962_s30 = smov 0   ;;  %s16964_s10 = smov 0  }
   0x2   :  { %s16966_s11 = smov 0   ;;  %s16968_s12 = smov 0  }
   0x3 LB: > { %s16983_s13 = sadd.s32 4294967295, %s16905_s12   ;;  %s12088_s14 = sadd.s32 4294967294, %s16905_s12   ;;  %s16905_s12 = sphi %s16968_s12, %s21202_s12   ;;  %s16901_s11 = sphi %s16966_s11, %s21201_s11   ;;  %s16897_s10 = sphi %s16964_s10, %s21200_s10   ;;  %s16893_s30 = sphi %s16962_s30, %s21199_s30  }
   0x4   : > { %s16987_s15 = sadd.s32 1, %s16905_s12   ;;  %s223_s16 = sadd.s32 1, %s16901_s11 }
   0x5   : > { %s220_s17 = ssub.s32 %s16905_s12, %s16987_s15  ;;  %p233_p0 = scmp.ne.s32.totalorder %s16901_s11, %s16897_s10 }
   0x6   : > { %p221_p1 = scmp.eq.s32.totalorder %s220_s17, 0  ;;  %p234_p2 = scmp.eq.s32.totalorder %s16983_s13, 1 }
   0x7   : > { %p239_p3 = scmp.ne.s32.totalorder %s16897_s10, %s16893_s30  ;;  %p240_p4 = scmp.eq.s32.totalorder %s12088_s14, 1 }
   0x8   : > { %s16998_s18 = scalar_select %p221_p1, %s16901_s11, %s223_s16  }
   0x9   : > { %p17000_p5 = por %p234_p2, %p233_p0  ;;  %p17004_p6 = por %p240_p4, %p239_p3 }
   0xa   : > { %p12091_p7 = scmp.ge.s32.totalorder %s16905_s12, 1  ;;  %p290_p8 = scmp.lt.s32.totalorder %s16905_s12, 3 }
   0xc   : > { %p291_p9 = pnand %p12091_p7, %p290_p8 }
   0xd   : > { %p325_p10 = scmp.lt.s32.totalorder (!%p291_p9), %s16983_s13, 1  ;;  %v16907_v0 = vmov (!%p291_p9), 0.0|0.0   ;;  %v382_v1 = vlaneseq (!%p291_p9)  ;;  %vm16908_vm0 = vmmov (!%p291_p9), 0   ;;  %v16909_v2 = vmov (!%p291_p9), 0.0   ;;  %s323_s26 = sand.u32 (!%p291_p9), 1, %s16897_s10  }
   0xe   : > { %294 = sbr.rel (%p291_p9) target bundleno = 2205 (0x89d), region = 56  ;;  %14651 = vmatprep.subr.bf16.mxu0 (!%p291_p9), %v16907_v0  ;;  %14654 = vmatprep.subr.bf16.mxu1 (!%p291_p9), %v16907_v0  ;;  %vm409_vm1 = vcmask (!%p291_p9), 1040384   ;;  %vm405_vm3 = vcmask (!%p291_p9), 138240   ;;  %vm837_vm6 = vcmask (!%p291_p9), 1041408   ;;  %vm835_vm7 = vcmask (!%p291_p9), 1044480   ;;  %s14508_s27 = sshll.u32 (!%p291_p9), %s16983_s13, 4 }
   0xf   : > { %14606 = vmatprep.mubr.msk.f32.mxu0 (!%p291_p9), %vm16908_vm0, %v16909_v2  ;;  %14615 = vmatprep.mubr.msk.f32.mxu1 (!%p291_p9), %vm16908_vm0, %v16909_v2  ;;  %v17018_v3 = vshrl.u32 (!%p291_p9), %v382_v1, 7  ;;  %v385_v16 = vand.u32 (!%p291_p9), 127, %v382_v1  ;;  %vm839_vm8 = vcmask (!%p291_p9), 1046528   ;;  %vm841_vm9 = vcmask (!%p291_p9), 1043456   ;;  %s324_s28 = scalar_lea.vmem (!%p291_p9), [#allocation2], %s323_s26  ;;  %s21143_s17 = scalar_lea.hbm (!%p291_p9), %s21194_s9, %s14508_s27 }
  0x10   : > { %vm850_vm10 = vcmask (!%p291_p9), 31744   ;;  %s12033_s29 = sshll.u32 (!%p291_p9), %s324_s28, 4  ;;  %s21145_s29 = int_to_ptr.vmem [resolvable:$true] %s12033_s29 }
  0x11   : > { %v386_v4 = vmul.u32 (!%p291_p9), 3, %v17018_v3 }
  0x13   : > { %v388_v22 = vadd.s32 (!%p291_p9), 5, %v386_v4  ;;  %vm17046_vm2 = vcmp.ge.s32.totalorder (!%p291_p9), %v385_v16, %v386_v4 }
  0x15   : > { %s326_s21 = scalar_select %p325_p10, %s16983_s13, 1  ;;  %vm389_vm4 = vcmp.lt.s32.totalorder %v385_v16, %v388_v22 }
  0x16   : > { %vm390_vm5 = vmand %vm17046_vm2, %vm389_vm4  ;;  %s16911_s13 = smov [#allocation2]  }
  0x17   : > { %s14951_s22 = smul.u32 408, %s326_s21  ;;  %s12021_s21 = scalar_lea.sflag [#allocation3], %s323_s26 }
  0x18   : > { %s16847_s23 = sshll.u32 %s16911_s13, 4  ;;  %s16848_s23 = int_to_ptr.vmem [resolvable:$false] %s16847_s23 }
  0x19   : > { %s17023_s25 = scalar_lea.vmem %s21185_s0, %s14951_s22  ;;  %s16843_s22 = scalar_lea.vmem %s21145_s29, 16 }
  0x1a   : > { %v331_v5 = vld [vmem:[%s17023_s25] sm:$0xff]  ;;  %v332_v6 = vld [vmem:[%s17023_s25 + $0x8] sm:$0xff]  ;;  %v334_v7 = vld [vmem:[%s17023_s25 + $0x18] sm:$0xff]  ;;  %p16844_p11 = scmp.ne.s32.totalorder %s21145_s29, %s16843_s22  ;;  %s16849_s24 = scalar_lea.vmem %s16848_s23, 32 }
  0x1b   : > { %v335_v8 = vld [vmem:[%s17023_s25 + $0x20] sm:$0xff]  ;;  %v337_v9 = vld [vmem:[%s17023_s25 + $0x30] sm:$0xff]  ;;  %v338_v10 = vld [vmem:[%s17023_s25 + $0x38] sm:$0xff]  ;;  %v393_v11 = vadd.f32 %v334_v7, %v331_v5  ;;  %v17066_v7 = vsel %vm390_vm5, 1.0, %v16909_v2  ;;  %p16850_p0 = scmp.lt.s32.totalorder %s21145_s29, %s16848_s23  ;;  %p16851_p1 = scmp.lt.s32.totalorder %s16849_s24, %s16843_s22 }
  0x1c   : > { %v340_v12 = vld [vmem:[%s17023_s25 + $0x48] sm:$0xff]  ;;  %v341_v13 = vld [vmem:[%s17023_s25 + $0x50] sm:$0xff]  ;;  %v343_v14 = vld [vmem:[%s17023_s25 + $0x60] sm:$0xff]  ;;  %v394_v15 = vadd.f32 %v335_v8, %v332_v6  ;;  %p16845_p12 = pnand %p16844_p11, %p17000_p5 }
  0x1d   : > { %v344_v17 = vld [vmem:[%s17023_s25 + $0x68] sm:$0xff]  ;;  %v396_v18 = vadd.f32 %v393_v11, %v337_v9  ;;  %v483_v19 = vadd.f32 %v343_v14, %v340_v12  ;;  %v346_v20 = vld [vmem:[%s17023_s25 + $0x78] sm:$0xff]  ;;  %v347_v21 = vld [vmem:[%s17023_s25 + $0x80] sm:$0xff]  ;;  %p16852_p2 = por %p16851_p1, %p16850_p0 }
  0x1e   : > { %v397_v23 = vadd.f32 %v394_v15, %v338_v10  ;;  %v484_v24 = vadd.f32 %v344_v17, %v341_v13  ;;  %v349_v25 = vld [vmem:[%s17023_s25 + $0x90] sm:$0xff]  ;;  %v350_v26 = vld [vmem:[%s17023_s25 + $0x98] sm:$0xff]  ;;  %v352_v27 = vld [vmem:[%s17023_s25 + $0xa8] sm:$0xff]  ;;  %p16846_p13 = pneg %p16845_p12 }
  0x1f   : > { %v399_v28 = vadd.f32 %v396_v18, %v340_v12  ;;  %v353_v29 = vld [vmem:[%s17023_s25 + $0xb0] sm:$0xff]  ;;  %v355_v30 = vld [vmem:[%s17023_s25 + $0xc0] sm:$0xff]  ;;  %v356_v31 = vld [vmem:[%s17023_s25 + $0xc8] sm:$0xff]  ;;  %v486_v32 = vadd.f32 %v483_v19, %v346_v20  ;;  %v568_v33 = vadd.f32 %v352_v27, %v349_v25 }
  0x20   : > { %v400_v34 = vadd.f32 %v397_v23, %v341_v13  ;;  %v358_v35 = vld [vmem:[%s17023_s25 + $0xd8] sm:$0xff]  ;;  %v487_v36 = vadd.f32 %v484_v24, %v347_v21  ;;  %v569_v37 = vadd.f32 %v353_v29, %v350_v26  ;;  %v333_v38 = vld [vmem:[%s17023_s25 + $0x10] sm:$0x1]  ;;  %v336_v43 = vld [vmem:[%s17023_s25 + $0x28] sm:$0x1]  ;;  %p16853_p3 = pnand %p16852_p2, %p16846_p13 }
  0x21   : > { %v402_v40 = vadd.f32 %v399_v28, %v343_v14  ;;  %v489_v41 = vadd.f32 %v486_v32, %v349_v25  ;;  %v571_v42 = vadd.f32 %v568_v33, %v355_v30  ;;  %v339_v44 = vld [vmem:[%s17023_s25 + $0x40] sm:$0x1]  ;;  %v342_v45 = vld [vmem:[%s17023_s25 + $0x58] sm:$0x1]  ;;  %v345_v50 = vld [vmem:[%s17023_s25 + $0x70] sm:$0x1]  ;;  %v395_v51 = vadd.f32 %v336_v43, %v333_v38 }
  0x22   : > { %v403_v46 = vadd.f32 %v400_v34, %v344_v17  ;;  %v359_v47 = vld [vmem:[%s17023_s25 + $0xe0] sm:$0xff]  ;;  %v490_v48 = vadd.f32 %v487_v36, %v350_v26  ;;  %v572_v49 = vadd.f32 %v569_v37, %v356_v31  ;;  %v348_v52 = vld [vmem:[%s17023_s25 + $0x88] sm:$0x1]  ;;  %v485_v55 = vadd.f32 %v345_v50, %v342_v45  ;;  %v354_v57 = vld [vmem:[%s17023_s25 + $0xb8] sm:$0x1] }
  0x23   : > { %v492_v53 = vadd.f32 %v489_v41, %v352_v27  ;;  %v574_v54 = vadd.f32 %v571_v42, %v358_v35  ;;  %v351_v56 = vld [vmem:[%s17023_s25 + $0xa0] sm:$0x1]  ;;  %v357_v58 = vld [vmem:[%s17023_s25 + $0xd0] sm:$0x1]  ;;  %v398_v62 = vadd.f32 %v395_v51, %v339_v44  ;;  %v360_v63 = vld [vmem:[%s17023_s25 + $0xe8] sm:$0x1] }
  0x24   : > { %v14652_v59 = vpack.c.bf16 %v403_v46, %v402_v40  ;;  %v493_v60 = vadd.f32 %v490_v48, %v353_v29  ;;  %v575_v61 = vadd.f32 %v572_v49, %v359_v47  ;;  %v361_v1 = vld [vmem:[%s17023_s25 + $0xf0] sm:$0xff]  ;;  %v362_v4 = vld [vmem:[%s17023_s25 + $0xf8] sm:$0xff]  ;;  %v488_v5 = vadd.f32 %v485_v55, %v348_v52  ;;  %v364_v9 = vld [vmem:[%s17023_s25 + $0x108] sm:$0xff] }
  0x25   : > { %v570_v6 = vadd.f32 %v354_v57, %v351_v56  ;;  %v577_v8 = vadd.f32 %v574_v54, %v361_v1  ;;  %v365_v10 = vld [vmem:[%s17023_s25 + $0x110] sm:$0xff]  ;;  %v367_v11 = vld [vmem:[%s17023_s25 + $0x120] sm:$0xff]  ;;  %v401_v13 = vadd.f32 %v398_v62, %v342_v45  ;;  %v653_v15 = vadd.f32 %v361_v1, %v358_v35  ;;  %v368_v16 = vld [vmem:[%s17023_s25 + $0x128] sm:$0xff] }
  0x26   : > { %14653 = vmatpush3.bf16.msra.mxu0 %v14652_v59  ;;  %v14655_v12 = vpack.c.bf16 %v493_v60, %v492_v53  ;;  %v578_v14 = vadd.f32 %v575_v61, %v362_v4  ;;  %v370_v17 = vld [vmem:[%s17023_s25 + $0x138] sm:$0xff]  ;;  %v371_v18 = vld [vmem:[%s17023_s25 + $0x140] sm:$0xff]  ;;  %v491_v19 = vadd.f32 %v488_v5, %v351_v56  ;;  %v654_v21 = vadd.f32 %v362_v4, %v359_v47  ;;  %v369_v25 = vld [vmem:[%s17023_s25 + $0x130] sm:$0x1] }
  0x27   : > { %14604 = vmatprep.subr.mxu0 %v16909_v2  ;;  %v573_v20 = vadd.f32 %v570_v6, %v357_v58  ;;  %v738_v22 = vadd.f32 %v370_v17, %v367_v11  ;;  %v363_v23 = vld [vmem:[%s17023_s25 + $0x100] sm:$0x1]  ;;  %v366_v24 = vld [vmem:[%s17023_s25 + $0x118] sm:$0x1]  ;;  %v404_v26 = vadd.f32 %v401_v13, %v345_v50  ;;  %v656_v28 = vadd.f32 %v653_v15, %v364_v9  ;;  %v372_v30 = vld [vmem:[%s17023_s25 + $0x148] sm:$0x1] }
  0x28   : > { %14656 = vmatpush3.bf16.msra.mxu1 %v14655_v12  ;;  %v14658_v27 = vpack.c.bf16 %v578_v14, %v577_v8  ;;  %v739_v29 = vadd.f32 %v371_v18, %v368_v16  ;;  %v373_v31 = vld [vmem:[%s17023_s25 + $0x150] sm:$0xff]  ;;  %v374_v32 = vld [vmem:[%s17023_s25 + $0x158] sm:$0xff]  ;;  %v494_v33 = vadd.f32 %v491_v19, %v354_v57  ;;  %v657_v35 = vadd.f32 %v654_v21, %v365_v10  ;;  %v376_v37 = vld [vmem:[%s17023_s25 + $0x168] sm:$0xff] }
  0x29   : > { %14613 = vmatprep.subr.mxu1 %v16909_v2  ;;  %v576_v34 = vadd.f32 %v573_v20, %v360_v63  ;;  %v655_v36 = vadd.f32 %v363_v23, %v360_v63  ;;  %v377_v38 = vld [vmem:[%s17023_s25 + $0x170] sm:$0xff]  ;;  %v659_v39 = vadd.f32 %v656_v28, %v367_v11  ;;  %v740_v40 = vadd.f32 %v372_v30, %v369_v25  ;;  %v379_v41 = vld [vmem:[%s17023_s25 + $0x180] sm:$0xff]  ;;  %v380_v42 = vld [vmem:[%s17023_s25 + $0x188] sm:$0xff] }
  0x2a   : > { %14605 = vmatpush3.msk.msra.mxu0 %vm409_vm1, %v404_v26  ;;  %v741_v43 = vadd.f32 %v738_v22, %v373_v31  ;;  %v742_v44 = vadd.f32 %v739_v29, %v374_v32  ;;  %v375_v45 = vld [vmem:[%s17023_s25 + $0x160] sm:$0x1]  ;;  %v660_v46 = vadd.f32 %v657_v35, %v368_v16  ;;  %v378_v49 = vld [vmem:[%s17023_s25 + $0x178] sm:$0x1]  ;;  %v381_v58 = vld [vmem:[%s17023_s25 + $0x190] sm:$0x1] }
  0x2b   : > { %14607 = vmatmul.mubr.msk.f32.vlgmr.msra.gmra.mrb[0].mxu0 %vm405_vm3, %v17066_v7  ;;  %14657 = vmatprep.subr.bf16.mxu0 %v16907_v0  ;;  %v579_v47 = vadd.f32 %v576_v34, %v363_v23  ;;  %v658_v48 = vadd.f32 %v655_v36, %v366_v24  ;;  %v662_v50 = vadd.f32 %v659_v39, %v370_v17  ;;  %v14997_v4 = vld [vmem:[%s21189_s4 + $0x184] ss:$24 sps:$4 sm:$0xff]   ;;  %v15000_v5 = vld [vmem:[%s21189_s4 + $0x794] ss:$24 sps:$4 sm:$0xff]   ;;  %v15007_v9 = vld [vmem:[%s21189_s4 + $0x1e0] ss:$24 sps:$4 sm:$0xff]  }
  0x2c   : > { %14614 = vmatpush3.msk.msra.mxu1 %vm409_vm1, %v494_v33  ;;  %14659 = vmatpush3.bf16.msra.mxu0 %v14658_v27  ;;  %v744_v51 = vadd.f32 %v741_v43, %v376_v37  ;;  %v745_v52 = vadd.f32 %v742_v44, %v377_v38  ;;  %v663_v53 = vadd.f32 %v660_v46, %v371_v18  ;;  %v15003_v6 = vld [vmem:[%s21189_s4 + $0x1b4] ss:$24 sps:$4 sm:$0xff]   ;;  %v15009_v8 = vld [vmem:[%s21189_s4 + $0x1e4] ss:$24 sps:$4 sm:$0xff]   ;;  %v15013_v11 = vld [vmem:[%s21189_s4 + $0x210] ss:$24 sps:$4 sm:$0xff]  }
  0x2d   : > { %14616 = vmatmul.mubr.msk.f32.vlgmr.msra.gmra.mrb[0].mxu1 %vm405_vm3, %v17066_v7  ;;  %14660 = vmatprep.subr.bf16.mxu1 %v16907_v0  ;;  %v661_v54 = vadd.f32 %v658_v48, %v369_v25  ;;  %v743_v55 = vadd.f32 %v740_v40, %v375_v45  ;;  %v15015_v10 = vld [vmem:[%s21189_s4 + $0x214] ss:$24 sps:$4 sm:$0xff]   ;;  %v15021_v12 = vld [vmem:[%s21189_s4 + $0x244] ss:$24 sps:$4 sm:$0xff]   ;;  %v15019_v13 = vld [vmem:[%s21189_s4 + $0x240] ss:$24 sps:$4 sm:$0xff]  }
  0x2e   : > { %14622 = vmatprep.subr.mxu0 %v16909_v2  ;;  %14624 = vmatprep.mubr.msk.f32.mxu0 %vm16908_vm0, %v16909_v2  ;;  %v747_v56 = vadd.f32 %v744_v51, %v379_v41  ;;  %v748_v57 = vadd.f32 %v745_v52, %v380_v42  ;;  %v14661_v59 = vpack.c.bf16 %v663_v53, %v662_v50  ;;  %v14998_v35 = vld [vmem:[%s21189_s4 + $0x790] ss:$24 sps:$4 sm:$0xff]   ;;  %v15006_v38 = vld [vmem:[%s21189_s4 + $0x7c4] ss:$24 sps:$4 sm:$0xff]   ;;  %v15004_v40 = vld [vmem:[%s21189_s4 + $0x7c0] ss:$24 sps:$4 sm:$0xff]  }
  0x2f   : > { %14633 = vmatprep.mubr.msk.f32.mxu1 %vm16908_vm0, %v16909_v2  ;;  %v746_v60 = vadd.f32 %v743_v55, %v378_v49  ;;  %v664_v62 = vadd.f32 %v661_v54, %v372_v30  ;;  %v15012_v41 = vld [vmem:[%s21189_s4 + $0x7f4] ss:$24 sps:$4 sm:$0xff]   ;;  %v15010_v42 = vld [vmem:[%s21189_s4 + $0x7f0] ss:$24 sps:$4 sm:$0xff]   ;;  %v15018_v43 = vld [vmem:[%s21189_s4 + $0x824] ss:$24 sps:$4 sm:$0xff]  }
  0x30   : > { %14623 = vmatpush3.msk.msra.mxu0 %vm409_vm1, %v579_v47  ;;  %v14664_v61 = vpack.c.bf16 %v748_v57, %v747_v56  ;;  %14662 = vmatpush3.bf16.msra.mxu1 %v14661_v59  ;;  %v15016_v44 = vld [vmem:[%s21189_s4 + $0x820] ss:$24 sps:$4 sm:$0xff]   ;;  %v15024_v45 = vld [vmem:[%s21189_s4 + $0x854] ss:$24 sps:$4 sm:$0xff]   ;;  %v15022_v46 = vld [vmem:[%s21189_s4 + $0x850] ss:$24 sps:$4 sm:$0xff]  }
  0x31   : > { %14625 = vmatmul.mubr.msk.f32.vlgmr.msra.gmra.mrb[2].mxu0 %vm405_vm3, %v17066_v7  ;;  %14631 = vmatprep.subr.mxu1 %v16909_v2  ;;  %v749_v63 = vadd.f32 %v746_v60, %v381_v58  ;;  %v15027_v47 = vld [vmem:[%s21189_s4 + $0x274] ss:$24 sps:$4 sm:$0xff]   ;;  %v15025_v48 = vld [vmem:[%s21189_s4 + $0x270] ss:$24 sps:$4 sm:$0xff]   ;;  %v15030_v49 = vld [vmem:[%s21189_s4 + $0x884] ss:$24 sps:$4 sm:$0xff]  }
  0x32   : > { %14663 = vmatprep.subr.bf16.mxu0 %v16907_v0  ;;  %14642 = vmatprep.mubr.msk.f32.mxu0 %vm16908_vm0, %v16909_v2  ;;  %v849_v0 = vld [vmem:[%s21186_s1] sm:$0x3]  ;;  %v15033_v51 = vld [vmem:[%s21189_s4 + $0x2a4] ss:$24 sps:$4 sm:$0xff]   ;;  %v15036_v53 = vld [vmem:[%s21189_s4 + $0x8b4] ss:$24 sps:$4 sm:$0xff]  }
  0x33   : > { %14665 = vmatpush3.bf16.msra.mxu0 %v14664_v61  ;;  %v858_v1 = vsel %vm837_vm6, %v849_v0, 0  ;;  %v15028_v50 = vld [vmem:[%s21189_s4 + $0x880] ss:$24 sps:$4 sm:$0xff]   ;;  %v15034_v54 = vld [vmem:[%s21189_s4 + $0x8b0] ss:$24 sps:$4 sm:$0xff]   ;;  %v16910_v59 = vmov 0  }
  0x34   : > { %14640 = vmatprep.subr.mxu0 %v16909_v2  ;;  %14632 = vmatpush3.msk.msra.mxu1 %vm409_vm1, %v664_v62  ;;  %v14995_v2 = vld [vmem:[%s21189_s4 + $0x180] ss:$24 sps:$4 sm:$0xff]   ;;  %v15037_v55 = vld [vmem:[%s21189_s4 + $0x2d0] ss:$24 sps:$4 sm:$0xff]   ;;  %v15039_v56 = vld [vmem:[%s21189_s4 + $0x2d4] ss:$24 sps:$4 sm:$0xff]  }
  0x35   : > { %14634 = vmatmul.mubr.msk.f32.vlgmr.msra.gmra.mrb[2].mxu1 %vm405_vm3, %v17066_v7  ;;  %14950 = vmatprep.subr.msk.bf16.mxu1 %vm837_vm6, %v849_v0  ;;  %v15031_v52 = vld [vmem:[%s21189_s4 + $0x2a0] ss:$24 sps:$4 sm:$0xff]   ;;  %v15042_v58 = vld [vmem:[%s21189_s4 + $0x8e4] ss:$24 sps:$4 sm:$0xff]  }
  0x36   : > { %14646 = vmatpush3.bf16.msra.mxu1 %v858_v1  ;;  %v15040_v57 = vld [vmem:[%s21189_s4 + $0x8e0] ss:$24 sps:$4 sm:$0xff]   ;;  %v15045_v60 = vld [vmem:[%s21189_s4 + $0x18c] ss:$24 sps:$4 sm:$0xff]  }
  0x37   : > { %14641 = vmatpush3.msk.msra.mxu0 %vm409_vm1, %v749_v63  ;;  %3398 = vmatprep.subr.bf16.mxu1 %v15000_v5  ;;  %v15048_v61 = vld [vmem:[%s21189_s4 + $0x904] ss:$24 sps:$4 sm:$0xff]   ;;  %v12106_v62 = vld [vmem:[%s21187_s2] ss:$0 sm:$0xff] }
  0x38   : > { %14643 = vmatmul.mubr.msk.f32.vlgmr.msra.gmra.mrb[4].mxu0 %vm405_vm3, %v17066_v7  ;;  %1278 = vmatprep.subr.bf16.mxu0 %v14997_v4  ;;  %v15001_v7 = vld [vmem:[%s21189_s4 + $0x1b0] ss:$24 sps:$4 sm:$0xff]   ;;  %v12107_v63 = vld [vmem:[%s21188_s3] ss:$0 sm:$0xff] }
  0x39   : > { %1279 = vmatpush1.bf16.msra.mxu0 %v14995_v2  ;;  %1310 = vmatprep.mubr.bf16.mxu0 %v16910_v59 }
  0x3a   : > { %1280 = vmatprep.subr.bf16.mxu0 %v15003_v6 }
  0x3d   : > { %1281 = vmatpush1.bf16.msra.mxu0 %v15001_v7 }
  0x3e   : > { %1282 = vmatprep.subr.bf16.mxu0 %v15009_v8 }
  0x41   : > { %1283 = vmatpush1.bf16.msra.mxu0 %v15007_v9 }
  0x42   : > { %1284 = vmatprep.subr.bf16.mxu0 %v15015_v10 }
  0x45   : > { %1285 = vmatpush1.bf16.msra.mxu0 %v15013_v11 }
  0x46   : > { %1286 = vmatprep.subr.bf16.mxu0 %v15021_v12 }
  0x49   : > { %1287 = vmatpush1.bf16.msra.mxu0 %v15019_v13 }
  0x4a   : > { %1288 = vmatprep.subr.bf16.mxu0 %v15027_v47  ;;  %v15087_v47 = vld [vmem:[%s21189_s4 + $0x2dc] ss:$24 sps:$4 sm:$0xff]  }
  0x4d   : > { %1289 = vmatpush1.bf16.msra.mxu0 %v15025_v48  ;;  %v15085_v48 = vld [vmem:[%s21189_s4 + $0x2d8] ss:$24 sps:$4 sm:$0xff]  }
  0x4e   : > { %1290 = vmatprep.subr.bf16.mxu0 %v15033_v51  ;;  %v15093_v51 = vld [vmem:[%s21189_s4 + $0x194] ss:$24 sps:$4 sm:$0xff]  }
  0x51   : > { %1291 = vmatpush1.bf16.msra.mxu0 %v15031_v52  ;;  %v15091_v52 = vld [vmem:[%s21189_s4 + $0x190] ss:$24 sps:$4 sm:$0xff]  }
  0x52   : > { %1292 = vmatprep.subr.bf16.mxu0 %v15039_v56  ;;  %v15097_v56 = vld [vmem:[%s21189_s4 + $0x1c0] ss:$24 sps:$4 sm:$0xff]  }
  0x55   : > { %1293 = vmatpush1.bf16.msra.mxu0 %v15037_v55  ;;  %v15099_v55 = vld [vmem:[%s21189_s4 + $0x1c4] ss:$24 sps:$4 sm:$0xff]  }
  0x56   : > { %1319 = vmatprep.subr.bf16.mxu0 %v15045_v60  ;;  %v15105_v60 = vld [vmem:[%s21189_s4 + $0x1f4] ss:$24 sps:$4 sm:$0xff]  }
  0xfe   : > { %v479_v14 = vpop.f32.mrb[0].mxu0 }
  0xff   : > { %v14608_v15 = vpop.f32.mrb[1].mxu0 }
 0x100   : > { %v564_v16 = vpop.f32.mrb[0].mxu1 }
 0x101   : > { %v824_v17 = vrot.slane %v564_v16, 3  ;;  %v14617_v18 = vpop.f32.mrb[1].mxu1 }
 0x103   : > { %v836_v19 = vsel %vm835_vm7, %v479_v14, %v824_v17 }
 0x104   : > { %v649_v20 = vpop.f32.mrb[2].mxu0  ;;  %v843_v27 = vmul.f32 0.04, %v836_v19  ;;  %v15043_v19 = vld [vmem:[%s21189_s4 + $0x188] ss:$24 sps:$4 sm:$0xff]  }
 0x105   : > { %v827_v21 = vrot.slane %v649_v20, 6  ;;  %v14626_v22 = vpop.f32.mrb[3].mxu0 }
 0x106   : > { %v15046_v22 = vld [vmem:[%s21189_s4 + $0x900] ss:$24 sps:$4 sm:$0xff]  }
 0x107   : > { %v838_v23 = vsel %vm837_vm6, %v824_v17, %v827_v21  ;;  %v15051_v21 = vld [vmem:[%s21189_s4 + $0x1bc] ss:$24 sps:$4 sm:$0xff]  }
 0x108   : > { %v734_v24 = vpop.f32.mrb[2].mxu1 }
 0x109   : > { %v830_v25 = vrot.slane %v734_v24, 1  ;;  %v14635_v26 = vpop.f32.mrb[3].mxu1  ;;  %v15054_v24 = vld [vmem:[%s21189_s4 + $0x934] ss:$24 sps:$4 sm:$0xff]  }
 0x10a   : > { %v15057_v26 = vld [vmem:[%s21189_s4 + $0x1ec] ss:$24 sps:$4 sm:$0xff]  }
 0x10b   : > { %v819_v28 = vpop.f32.mrb[4].mxu0  ;;  %v840_v29 = vsel %vm839_vm8, %v838_v23, %v830_v25 }
 0x10c   : > { %v833_v30 = vrot.slane %v819_v28, 4  ;;  %v14644_v31 = vpop.f32.mrb[5].mxu0  ;;  %v844_v32 = vmul.f32 0.04, %v840_v29  ;;  %v15055_v28 = vld [vmem:[%s21189_s4 + $0x1e8] ss:$24 sps:$4 sm:$0xff]  }
 0x10d   : > { %v15060_v29 = vld [vmem:[%s21189_s4 + $0x964] ss:$24 sps:$4 sm:$0xff]  }
 0x10e   : > { %v842_v33 = vsel %vm841_vm9, %v830_v25, %v833_v30  ;;  %v846_v34 = vmul.f32 0.04, %v833_v30  ;;  %v847_v36 = vpack.c.bf16 %v844_v32, %v843_v27  ;;  %v15049_v25 = vld [vmem:[%s21189_s4 + $0x1b8] ss:$24 sps:$4 sm:$0xff]   ;;  %v15063_v31 = vld [vmem:[%s21189_s4 + $0x21c] ss:$24 sps:$4 sm:$0xff]  }
 0x10f   : > { %v845_v37 = vmul.f32 0.04, %v842_v33  ;;  %v15052_v27 = vld [vmem:[%s21189_s4 + $0x930] ss:$24 sps:$4 sm:$0xff]   ;;  %v15058_v30 = vld [vmem:[%s21189_s4 + $0x960] ss:$24 sps:$4 sm:$0xff]  }
 0x110   : > { %14647 = vmatprep.mubr.msk.bf16.mxu1 %vm850_vm10, %v847_v36  ;;  %v15061_v32 = vld [vmem:[%s21189_s4 + $0x218] ss:$24 sps:$4 sm:$0xff]   ;;  %v15066_v33 = vld [vmem:[%s21189_s4 + $0x994] ss:$24 sps:$4 sm:$0xff]   ;;  %v15067_v36 = vld [vmem:[%s21189_s4 + $0x248] ss:$24 sps:$4 sm:$0xff]  }
 0x111   : > { %v848_v39 = vpack.c.bf16 %v846_v34, %v845_v37  ;;  %v15064_v34 = vld [vmem:[%s21189_s4 + $0x990] ss:$24 sps:$4 sm:$0xff]   ;;  %v15072_v37 = vld [vmem:[%s21189_s4 + $0x9c4] ss:$24 sps:$4 sm:$0xff]  }
 0x113   : > { %14648 = vmatmul.mubr.msk.bf16.vlgmr.msra.gmra.mrb[4].mxu1 %vm850_vm10, %v848_v39  ;;  %v15075_v39 = vld [vmem:[%s21189_s4 + $0x27c] ss:$24 sps:$4 sm:$0xff]  }
 0x114   : > { %3399 = vmatpush1.bf16.msra.mxu1 %v14998_v35  ;;  %3430 = vmatprep.mubr.bf16.mxu1 %v16910_v59  ;;  %v15069_v35 = vld [vmem:[%s21189_s4 + $0x24c] ss:$24 sps:$4 sm:$0xff]  }
 0x115   : > { %3400 = vmatprep.subr.bf16.mxu1 %v15006_v38  ;;  %v15070_v38 = vld [vmem:[%s21189_s4 + $0x9c0] ss:$24 sps:$4 sm:$0xff]  }
 0x118   : > { %3401 = vmatpush1.bf16.msra.mxu1 %v15004_v40  ;;  %v15073_v40 = vld [vmem:[%s21189_s4 + $0x278] ss:$24 sps:$4 sm:$0xff]  }
 0x119   : > { %3402 = vmatprep.subr.bf16.mxu1 %v15012_v41  ;;  %v15078_v41 = vld [vmem:[%s21189_s4 + $0x9f4] ss:$24 sps:$4 sm:$0xff]  }
 0x11c   : > { %3403 = vmatpush1.bf16.msra.mxu1 %v15010_v42  ;;  %v15076_v42 = vld [vmem:[%s21189_s4 + $0x9f0] ss:$24 sps:$4 sm:$0xff]  }
 0x11d   : > { %3404 = vmatprep.subr.bf16.mxu1 %v15018_v43  ;;  %v15081_v43 = vld [vmem:[%s21189_s4 + $0x2ac] ss:$24 sps:$4 sm:$0xff]  }
 0x120   : > { %3405 = vmatpush1.bf16.msra.mxu1 %v15016_v44  ;;  %v15079_v44 = vld [vmem:[%s21189_s4 + $0x2a8] ss:$24 sps:$4 sm:$0xff]  }
 0x121   : > { %3406 = vmatprep.subr.bf16.mxu1 %v15024_v45  ;;  %v15084_v45 = vld [vmem:[%s21189_s4 + $0xa24] ss:$24 sps:$4 sm:$0xff]  }
 0x124   : > { %3407 = vmatpush1.bf16.msra.mxu1 %v15022_v46  ;;  %v15082_v46 = vld [vmem:[%s21189_s4 + $0xa20] ss:$24 sps:$4 sm:$0xff]  }
 0x125   : > { %3408 = vmatprep.subr.bf16.mxu1 %v15030_v49  ;;  %v15090_v49 = vld [vmem:[%s21189_s4 + $0xa54] ss:$24 sps:$4 sm:$0xff]  }
 0x128   : > { %3409 = vmatpush1.bf16.msra.mxu1 %v15028_v50  ;;  %v15088_v50 = vld [vmem:[%s21189_s4 + $0xa50] ss:$24 sps:$4 sm:$0xff]  }
 0x129   : > { %3410 = vmatprep.subr.bf16.mxu1 %v15036_v53  ;;  %v15096_v53 = vld [vmem:[%s21189_s4 + $0x914] ss:$24 sps:$4 sm:$0xff]  }
 0x12c   : > { %3411 = vmatpush1.bf16.msra.mxu1 %v15034_v54  ;;  %v15094_v54 = vld [vmem:[%s21189_s4 + $0x910] ss:$24 sps:$4 sm:$0xff]  }
 0x12d   : > { %3412 = vmatprep.subr.bf16.mxu1 %v15042_v58  ;;  %v15102_v58 = vld [vmem:[%s21189_s4 + $0x944] ss:$24 sps:$4 sm:$0xff]  }
 0x130   : > { %3413 = vmatpush1.bf16.msra.mxu1 %v15040_v57 }
 0x131   : > { %3736 = vmatprep.subr.bf16.mxu1 %v15048_v61  ;;  %v15100_v61 = vld [vmem:[%s21189_s4 + $0x940] ss:$24 sps:$4 sm:$0xff]  }
 0x1e6   : > { %v14649_v0 = vpop.f32.mrb[4].mxu1 }
 0x1e7   : > { %v918_v1 = vmul.f32 %v14649_v0, %v12106_v62  ;;  %v894_v2 = vpop.f32.mrb[5].mxu1  ;;  %v15111_v0 = vld [vmem:[%s21189_s4 + $0x224] ss:$24 sps:$4 sm:$0xff]  }
 0x1e8   : > { %v916_v4 = vmul.f32 %v12106_v62, %v894_v2  ;;  %v14650_v5 = vpop.f32.mrb[6].mxu1  ;;  %v15114_v2 = vld [vmem:[%s21189_s4 + $0x9a4] ss:$24 sps:$4 sm:$0xff]  }
 0x1e9   : > { %v929_v6 = vadd.f32 %v12107_v63, %v918_v1  ;;  %v919_v7 = vmul.f32 %v14650_v5, %v12106_v62  ;;  %v897_v8 = vpop.f32.mrb[7].mxu1  ;;  %v15106_v1 = vld [vmem:[%s21189_s4 + $0x970] ss:$24 sps:$4 sm:$0xff]   ;;  %v15117_v5 = vld [vmem:[%s21189_s4 + $0x254] ss:$24 sps:$4 sm:$0xff]  }
 0x1ea   : > { %v927_v9 = vadd.f32 %v12107_v63, %v916_v4  ;;  %v917_v10 = vmul.f32 %v12106_v62, %v897_v8  ;;  %v15108_v62 = vld [vmem:[%s21189_s4 + $0x974] ss:$24 sps:$4 sm:$0xff]   ;;  %v15109_v4 = vld [vmem:[%s21189_s4 + $0x220] ss:$24 sps:$4 sm:$0xff]   ;;  %v15115_v8 = vld [vmem:[%s21189_s4 + $0x250] ss:$24 sps:$4 sm:$0xff]  }
 0x1eb   : > { %v930_v11 = vadd.f32 %v12107_v63, %v919_v7  ;;  %v933_v13 = vmax.f32 %v929_v6, 0.0  ;;  %v15112_v6 = vld [vmem:[%s21189_s4 + $0x9a0] ss:$24 sps:$4 sm:$0xff]   ;;  %v15120_v7 = vld [vmem:[%s21189_s4 + $0x9d4] ss:$24 sps:$4 sm:$0xff]  }
 0x1ec   : > { %v928_v12 = vadd.f32 %v12107_v63, %v917_v10  ;;  %v931_v15 = vmax.f32 %v927_v9, 0.0  ;;  %v15103_v63 = vld [vmem:[%s21189_s4 + $0x1f0] ss:$24 sps:$4 sm:$0xff]   ;;  %v15123_v9 = vld [vmem:[%s21189_s4 + $0x284] ss:$24 sps:$4 sm:$0xff]  }
 0x1ed   : > { %v934_v14 = vmax.f32 %v930_v11, 0.0  ;;  %v15118_v10 = vld [vmem:[%s21189_s4 + $0x9d0] ss:$24 sps:$4 sm:$0xff]   ;;  %v15126_v11 = vld [vmem:[%s21189_s4 + $0xa04] ss:$24 sps:$4 sm:$0xff]  }
 0x1ee   : > { %v932_v16 = vmax.f32 %v928_v12, 0.0  ;;  %v15121_v12 = vld [vmem:[%s21189_s4 + $0x280] ss:$24 sps:$4 sm:$0xff]  }
 0x1ef   : > { %v17232_v17 = vpack.c.bf16 %v934_v14, %v933_v13  ;;  %v15129_v13 = vld [vmem:[%s21189_s4 + $0x2b4] ss:$24 sps:$4 sm:$0xff]   ;;  %v15124_v14 = vld [vmem:[%s21189_s4 + $0xa00] ss:$24 sps:$4 sm:$0xff]  }
 0x1f0   : > { %v17234_v18 = vpack.c.bf16 %v932_v16, %v931_v15  ;;  %v15132_v15 = vld [vmem:[%s21189_s4 + $0xa34] ss:$24 sps:$4 sm:$0xff]   ;;  %v15127_v16 = vld [vmem:[%s21189_s4 + $0x2b0] ss:$24 sps:$4 sm:$0xff]  }
 0x1f2   : > { %v17240_v20 = vshrl.u32 %v17234_v18, 16  ;;  %v17356_v57 = vrot.slane %v17234_v18, 3 }
 0x1f4   : > { %1311 = vmatmul.mubr.bf16.vlgmr.msra.gmra.mrb[8].mxu0 %v17240_v20  ;;  %v17250_v23 = vrot.slane %v17240_v20, 2 }
 0x1f5   : > { %1320 = vmatpush1.bf16.msra.mxu0 %v15043_v19  ;;  %1351 = vmatprep.mubr.bf16.mxu0 %v16910_v59  ;;  %v15135_v19 = vld [vmem:[%s21189_s4 + $0x2e4] ss:$24 sps:$4 sm:$0xff]  }
 0x1f6   : > { %3431 = vmatmul.mubr.bf16.vlgmr.msra.gmra.mrb[8].mxu1 %v17250_v23  ;;  %1321 = vmatprep.subr.bf16.mxu0 %v15051_v21  ;;  %v15130_v21 = vld [vmem:[%s21189_s4 + $0xa30] ss:$24 sps:$4 sm:$0xff]  }
 0x1f7   : > { %3737 = vmatpush1.bf16.msra.mxu1 %v15046_v22  ;;  %3768 = vmatprep.mubr.bf16.mxu1 %v16910_v59  ;;  %v15138_v22 = vld [vmem:[%s21189_s4 + $0xa64] ss:$24 sps:$4 sm:$0xff]  }
 0x1f8   : > { %3738 = vmatprep.subr.bf16.mxu1 %v15054_v24  ;;  %v15133_v24 = vld [vmem:[%s21189_s4 + $0x2e0] ss:$24 sps:$4 sm:$0xff]  }
 0x1f9   : > { %1322 = vmatpush1.bf16.msra.mxu0 %v15049_v25  ;;  %v15141_v25 = vld [vmem:[%s21189_s4 + $0x4] ss:$24 sps:$4 sm:$0xff]  }
 0x1fa   : > { %1323 = vmatprep.subr.bf16.mxu0 %v15057_v26  ;;  %v15136_v26 = vld [vmem:[%s21189_s4 + $0xa60] ss:$24 sps:$4 sm:$0xff]  }
 0x1fb   : > { %3739 = vmatpush1.bf16.msra.mxu1 %v15052_v27  ;;  %v15144_v27 = vld [vmem:[%s21189_s4 + $0xa84] ss:$24 sps:$4 sm:$0xff]  }
 0x1fc   : > { %3740 = vmatprep.subr.bf16.mxu1 %v15060_v29  ;;  %v15147_v29 = vld [vmem:[%s21189_s4 + $0x34] ss:$24 sps:$4 sm:$0xff]  }
 0x1fd   : > { %1324 = vmatpush1.bf16.msra.mxu0 %v15055_v28  ;;  %v15139_v28 = vld [vmem:[%s21189_s4] ss:$24 sps:$4 sm:$0xff]  }
 0x1fe   : > { %1325 = vmatprep.subr.bf16.mxu0 %v15063_v31  ;;  %v15150_v31 = vld [vmem:[%s21189_s4 + $0xab4] ss:$24 sps:$4 sm:$0xff]  }
 0x1ff   : > { %3741 = vmatpush1.bf16.msra.mxu1 %v15058_v30  ;;  %v15142_v30 = vld [vmem:[%s21189_s4 + $0xa80] ss:$24 sps:$4 sm:$0xff]  }
 0x200   : > { %3742 = vmatprep.subr.bf16.mxu1 %v15066_v33  ;;  %v15153_v33 = vld [vmem:[%s21189_s4 + $0x64] ss:$24 sps:$4 sm:$0xff]  }
 0x201   : > { %1326 = vmatpush1.bf16.msra.mxu0 %v15061_v32  ;;  %v15145_v32 = vld [vmem:[%s21189_s4 + $0x30] ss:$24 sps:$4 sm:$0xff]  }
 0x202   : > { %1327 = vmatprep.subr.bf16.mxu0 %v15069_v35  ;;  %v15156_v35 = vld [vmem:[%s21189_s4 + $0xae4] ss:$24 sps:$4 sm:$0xff]  }
 0x203   : > { %3743 = vmatpush1.bf16.msra.mxu1 %v15064_v34  ;;  %v15148_v34 = vld [vmem:[%s21189_s4 + $0xab0] ss:$24 sps:$4 sm:$0xff]  }
 0x204   : > { %3744 = vmatprep.subr.bf16.mxu1 %v15072_v37  ;;  %v15159_v37 = vld [vmem:[%s21189_s4 + $0x94] ss:$24 sps:$4 sm:$0xff]  }
 0x205   : > { %1328 = vmatpush1.bf16.msra.mxu0 %v15067_v36  ;;  %v15151_v36 = vld [vmem:[%s21189_s4 + $0x60] ss:$24 sps:$4 sm:$0xff]  }
 0x206   : > { %1329 = vmatprep.subr.bf16.mxu0 %v15075_v39  ;;  %v15162_v39 = vld [vmem:[%s21189_s4 + $0xb14] ss:$24 sps:$4 sm:$0xff]  }
 0x207   : > { %3745 = vmatpush1.bf16.msra.mxu1 %v15070_v38  ;;  %v15154_v38 = vld [vmem:[%s21189_s4 + $0xae0] ss:$24 sps:$4 sm:$0xff]  }
 0x208   : > { %3746 = vmatprep.subr.bf16.mxu1 %v15078_v41  ;;  %v15165_v41 = vld [vmem:[%s21189_s4 + $0xc4] ss:$24 sps:$4 sm:$0xff]  }
 0x209   : > { %1330 = vmatpush1.bf16.msra.mxu0 %v15073_v40  ;;  %v15157_v40 = vld [vmem:[%s21189_s4 + $0x90] ss:$24 sps:$4 sm:$0xff]  }
 0x20a   : > { %1331 = vmatprep.subr.bf16.mxu0 %v15081_v43  ;;  %v15168_v43 = vld [vmem:[%s21189_s4 + $0xb44] ss:$24 sps:$4 sm:$0xff]  }
 0x20b   : > { %3747 = vmatpush1.bf16.msra.mxu1 %v15076_v42  ;;  %v15160_v42 = vld [vmem:[%s21189_s4 + $0xb10] ss:$24 sps:$4 sm:$0xff]  }
 0x20c   : > { %3748 = vmatprep.subr.bf16.mxu1 %v15084_v45  ;;  %v15171_v45 = vld [vmem:[%s21189_s4 + $0xf4] ss:$24 sps:$4 sm:$0xff]  }
 0x20d   : > { %1332 = vmatpush1.bf16.msra.mxu0 %v15079_v44  ;;  %v15163_v44 = vld [vmem:[%s21189_s4 + $0xc0] ss:$24 sps:$4 sm:$0xff]  }
 0x20e   : > { %1333 = vmatprep.subr.bf16.mxu0 %v15087_v47  ;;  %v15174_v47 = vld [vmem:[%s21189_s4 + $0xb74] ss:$24 sps:$4 sm:$0xff]  }
 0x20f   : > { %3749 = vmatpush1.bf16.msra.mxu1 %v15082_v46  ;;  %v15166_v46 = vld [vmem:[%s21189_s4 + $0xb40] ss:$24 sps:$4 sm:$0xff]  }
 0x210   : > { %3750 = vmatprep.subr.bf16.mxu1 %v15090_v49  ;;  %v15177_v49 = vld [vmem:[%s21189_s4 + $0x124] ss:$24 sps:$4 sm:$0xff]  }
 0x211   : > { %1334 = vmatpush1.bf16.msra.mxu0 %v15085_v48  ;;  %v15169_v48 = vld [vmem:[%s21189_s4 + $0xf0] ss:$24 sps:$4 sm:$0xff]  }
 0x212   : > { %1360 = vmatprep.subr.bf16.mxu0 %v15093_v51  ;;  %v15180_v51 = vld [vmem:[%s21189_s4 + $0xba4] ss:$24 sps:$4 sm:$0xff]  }
 0x213   : > { %3751 = vmatpush1.bf16.msra.mxu1 %v15088_v50  ;;  %v15172_v50 = vld [vmem:[%s21189_s4 + $0xb70] ss:$24 sps:$4 sm:$0xff]  }
 0x214   : > { %1352 = vmatmul.mubr.bf16.vlgmr.msra.gmra.mrb[12].mxu0 %v17240_v20  ;;  %3818 = vmatprep.subr.bf16.mxu1 %v15096_v53  ;;  %v15183_v53 = vld [vmem:[%s21189_s4 + $0x154] ss:$24 sps:$4 sm:$0xff]  }
 0x215   : > { %1361 = vmatpush1.bf16.msra.mxu0 %v15091_v52  ;;  %1392 = vmatprep.mubr.bf16.mxu0 %v16910_v59  ;;  %v15175_v52 = vld [vmem:[%s21189_s4 + $0x120] ss:$24 sps:$4 sm:$0xff]  }
 0x216   : > { %3769 = vmatmul.mubr.bf16.vlgmr.msra.gmra.mrb[12].mxu1 %v17356_v57  ;;  %1362 = vmatprep.subr.bf16.mxu0 %v15099_v55  ;;  %v15186_v55 = vld [vmem:[%s21189_s4 + $0xbd4] ss:$24 sps:$4 sm:$0xff]  }
 0x217   : > { %3819 = vmatpush1.bf16.msra.mxu1 %v15094_v54  ;;  %3850 = vmatprep.mubr.bf16.mxu1 %v16910_v59  ;;  %v15178_v54 = vld [vmem:[%s21189_s4 + $0xba0] ss:$24 sps:$4 sm:$0xff]  }
 0x218   : > { %3820 = vmatprep.subr.bf16.mxu1 %v15102_v58  ;;  %v15189_v58 = vld [vmem:[%s21189_s4 + $0xc] ss:$24 sps:$4 sm:$0xff]  }
 0x219   : > { %1363 = vmatpush1.bf16.msra.mxu0 %v15097_v56  ;;  %v15181_v56 = vld [vmem:[%s21189_s4 + $0x150] ss:$24 sps:$4 sm:$0xff]  }
 0x21a   : > { %1364 = vmatprep.subr.bf16.mxu0 %v15105_v60  ;;  %v15184_v60 = vld [vmem:[%s21189_s4 + $0xbd0] ss:$24 sps:$4 sm:$0xff]  }
 0x21b   : > { %3821 = vmatpush1.bf16.msra.mxu1 %v15100_v61  ;;  %v15192_v61 = vld [vmem:[%s21189_s4 + $0xa94] ss:$24 sps:$4 sm:$0xff]  }
 0x21c   : > { %3822 = vmatprep.subr.bf16.mxu1 %v15108_v62  ;;  %v15187_v62 = vld [vmem:[%s21189_s4 + $0x8] ss:$24 sps:$4 sm:$0xff]  }
 0x21d   : > { %1365 = vmatpush1.bf16.msra.mxu0 %v15103_v63  ;;  %v15195_v63 = vld [vmem:[%s21189_s4 + $0x3c] ss:$24 sps:$4 sm:$0xff]  }
 0x21e   : > { %1366 = vmatprep.subr.bf16.mxu0 %v15111_v0  ;;  %v15190_v0 = vld [vmem:[%s21189_s4 + $0xa90] ss:$24 sps:$4 sm:$0xff]  }
 0x21f   : > { %3823 = vmatpush1.bf16.msra.mxu1 %v15106_v1  ;;  %v17556_v1 = vrot.slane %v17240_v20, 3 }
 0x220   : > { %3824 = vmatprep.subr.bf16.mxu1 %v15114_v2  ;;  %v15198_v2 = vld [vmem:[%s21189_s4 + $0xac4] ss:$24 sps:$4 sm:$0xff]  }
 0x221   : > { %1367 = vmatpush1.bf16.msra.mxu0 %v15109_v4  ;;  %v15193_v4 = vld [vmem:[%s21189_s4 + $0x38] ss:$24 sps:$4 sm:$0xff]  }
 0x222   : > { %1368 = vmatprep.subr.bf16.mxu0 %v15117_v5  ;;  %v15201_v5 = vld [vmem:[%s21189_s4 + $0x6c] ss:$24 sps:$4 sm:$0xff]  }
 0x223   : > { %3825 = vmatpush1.bf16.msra.mxu1 %v15112_v6  ;;  %v15196_v6 = vld [vmem:[%s21189_s4 + $0xac0] ss:$24 sps:$4 sm:$0xff]  }
 0x224   : > { %3826 = vmatprep.subr.bf16.mxu1 %v15120_v7  ;;  %v15204_v7 = vld [vmem:[%s21189_s4 + $0xaf4] ss:$24 sps:$4 sm:$0xff]  }
 0x225   : > { %1369 = vmatpush1.bf16.msra.mxu0 %v15115_v8  ;;  %v15199_v8 = vld [vmem:[%s21189_s4 + $0x68] ss:$24 sps:$4 sm:$0xff]  }
 0x226   : > { %1370 = vmatprep.subr.bf16.mxu0 %v15123_v9  ;;  %v15207_v9 = vld [vmem:[%s21189_s4 + $0x9c] ss:$24 sps:$4 sm:$0xff]  }
 0x227   : > { %3827 = vmatpush1.bf16.msra.mxu1 %v15118_v10  ;;  %v15202_v10 = vld [vmem:[%s21189_s4 + $0xaf0] ss:$24 sps:$4 sm:$0xff]  }
 0x228   : > { %3828 = vmatprep.subr.bf16.mxu1 %v15126_v11  ;;  %v15210_v11 = vld [vmem:[%s21189_s4 + $0xb24] ss:$24 sps:$4 sm:$0xff]  }
 0x229   : > { %1371 = vmatpush1.bf16.msra.mxu0 %v15121_v12  ;;  %v15205_v12 = vld [vmem:[%s21189_s4 + $0x98] ss:$24 sps:$4 sm:$0xff]  }
 0x22a   : > { %1372 = vmatprep.subr.bf16.mxu0 %v15129_v13  ;;  %v15213_v13 = vld [vmem:[%s21189_s4 + $0xcc] ss:$24 sps:$4 sm:$0xff]  }
 0x22b   : > { %3829 = vmatpush1.bf16.msra.mxu1 %v15124_v14  ;;  %v15208_v14 = vld [vmem:[%s21189_s4 + $0xb20] ss:$24 sps:$4 sm:$0xff]  }
 0x22c   : > { %3830 = vmatprep.subr.bf16.mxu1 %v15132_v15  ;;  %v15216_v15 = vld [vmem:[%s21189_s4 + $0xb54] ss:$24 sps:$4 sm:$0xff]  }
 0x22d   : > { %1373 = vmatpush1.bf16.msra.mxu0 %v15127_v16  ;;  %v15211_v16 = vld [vmem:[%s21189_s4 + $0xc8] ss:$24 sps:$4 sm:$0xff]  }
 0x22e   : > { %1374 = vmatprep.subr.bf16.mxu0 %v15135_v19  ;;  %v15219_v19 = vld [vmem:[%s21189_s4 + $0xfc] ss:$24 sps:$4 sm:$0xff]  }
 0x22f   : > { %3831 = vmatpush1.bf16.msra.mxu1 %v15130_v21  ;;  %v15214_v21 = vld [vmem:[%s21189_s4 + $0xb50] ss:$24 sps:$4 sm:$0xff]  }
 0x230   : > { %3832 = vmatprep.subr.bf16.mxu1 %v15138_v22  ;;  %v15222_v22 = vld [vmem:[%s21189_s4 + $0xb84] ss:$24 sps:$4 sm:$0xff]  }
 0x231   : > { %1375 = vmatpush1.bf16.msra.mxu0 %v15133_v24  ;;  %v15217_v24 = vld [vmem:[%s21189_s4 + $0xf8] ss:$24 sps:$4 sm:$0xff]  }
 0x232   : > { %1641 = vmatprep.subr.bf16.mxu0 %v15141_v25  ;;  %v15225_v25 = vld [vmem:[%s21189_s4 + $0x12c] ss:$24 sps:$4 sm:$0xff]  }
 0x233   : > { %3833 = vmatpush1.bf16.msra.mxu1 %v15136_v26  ;;  %v15220_v26 = vld [vmem:[%s21189_s4 + $0xb80] ss:$24 sps:$4 sm:$0xff]  }
 0x234   : > { %1393 = vmatmul.mubr.bf16.vlgmr.msra.gmra.mrb[16].mxu0 %v17240_v20  ;;  %4156 = vmatprep.subr.bf16.mxu1 %v15144_v27  ;;  %v15228_v27 = vld [vmem:[%s21189_s4 + $0xbb4] ss:$24 sps:$4 sm:$0xff]  }
 0x235   : > { %1642 = vmatpush1.bf16.msra.mxu0 %v15139_v28  ;;  %1673 = vmatprep.mubr.bf16.mxu0 %v16910_v59  ;;  %v15223_v28 = vld [vmem:[%s21189_s4 + $0x128] ss:$24 sps:$4 sm:$0xff]  }
 0x236   : > { %3851 = vmatmul.mubr.bf16.vlgmr.msra.gmra.mrb[8].mxu1 %v17356_v57  ;;  %1643 = vmatprep.subr.bf16.mxu0 %v15147_v29  ;;  %v15231_v29 = vld [vmem:[%s21189_s4 + $0x15c] ss:$24 sps:$4 sm:$0xff]  }
 0x237   : > { %4157 = vmatpush1.bf16.msra.mxu1 %v15142_v30  ;;  %4188 = vmatprep.mubr.bf16.mxu1 %v16910_v59  ;;  %v15226_v30 = vld [vmem:[%s21189_s4 + $0xbb0] ss:$24 sps:$4 sm:$0xff]  }
 0x238   : > { %4158 = vmatprep.subr.bf16.mxu1 %v15150_v31  ;;  %v15234_v31 = vld [vmem:[%s21189_s4 + $0xbe4] ss:$24 sps:$4 sm:$0xff]  }
 0x239   : > { %1644 = vmatpush1.bf16.msra.mxu0 %v15145_v32  ;;  %v15229_v32 = vld [vmem:[%s21189_s4 + $0x158] ss:$24 sps:$4 sm:$0xff]  }
 0x23a   : > { %1645 = vmatprep.subr.bf16.mxu0 %v15153_v33  ;;  %v15237_v33 = vld [vmem:[%s21189_s4 + $0x14] ss:$24 sps:$4 sm:$0xff]  }
 0x23b   : > { %4159 = vmatpush1.bf16.msra.mxu1 %v15148_v34  ;;  %v15232_v34 = vld [vmem:[%s21189_s4 + $0xbe0] ss:$24 sps:$4 sm:$0xff]  }
 0x23c   : > { %4160 = vmatprep.subr.bf16.mxu1 %v15156_v35  ;;  %v15240_v35 = vld [vmem:[%s21189_s4 + $0xc04] ss:$24 sps:$4 sm:$0xff]  }
 0x23d   : > { %1646 = vmatpush1.bf16.msra.mxu0 %v15151_v36  ;;  %v15235_v36 = vld [vmem:[%s21189_s4 + $0x10] ss:$24 sps:$4 sm:$0xff]  }
 0x23e   : > { %1647 = vmatprep.subr.bf16.mxu0 %v15159_v37  ;;  %v15243_v37 = vld [vmem:[%s21189_s4 + $0x44] ss:$24 sps:$4 sm:$0xff]  }
 0x23f   : > { %4161 = vmatpush1.bf16.msra.mxu1 %v15154_v38  ;;  %v15238_v38 = vld [vmem:[%s21189_s4 + $0xc00] ss:$24 sps:$4 sm:$0xff]  }
 0x240   : > { %4162 = vmatprep.subr.bf16.mxu1 %v15162_v39  ;;  %v15246_v39 = vld [vmem:[%s21189_s4 + $0xc34] ss:$24 sps:$4 sm:$0xff]  }
 0x241   : > { %1648 = vmatpush1.bf16.msra.mxu0 %v15157_v40  ;;  %v15241_v40 = vld [vmem:[%s21189_s4 + $0x40] ss:$24 sps:$4 sm:$0xff]  }
 0x242   : > { %1649 = vmatprep.subr.bf16.mxu0 %v15165_v41  ;;  %v15249_v41 = vld [vmem:[%s21189_s4 + $0x74] ss:$24 sps:$4 sm:$0xff]  }
 0x243   : > { %4163 = vmatpush1.bf16.msra.mxu1 %v15160_v42  ;;  %v15244_v42 = vld [vmem:[%s21189_s4 + $0xc30] ss:$24 sps:$4 sm:$0xff]  }
 0x244   : > { %4164 = vmatprep.subr.bf16.mxu1 %v15168_v43  ;;  %v15252_v43 = vld [vmem:[%s21189_s4 + $0xc64] ss:$24 sps:$4 sm:$0xff]  }
 0x245   : > { %1650 = vmatpush1.bf16.msra.mxu0 %v15163_v44  ;;  %v15247_v44 = vld [vmem:[%s21189_s4 + $0x70] ss:$24 sps:$4 sm:$0xff]  }
 0x246   : > { %1651 = vmatprep.subr.bf16.mxu0 %v15171_v45  ;;  %v15255_v45 = vld [vmem:[%s21189_s4 + $0xa4] ss:$24 sps:$4 sm:$0xff]  }
 0x247   : > { %4165 = vmatpush1.bf16.msra.mxu1 %v15166_v46  ;;  %v15250_v46 = vld [vmem:[%s21189_s4 + $0xc60] ss:$24 sps:$4 sm:$0xff]  }
 0x248   : > { %4166 = vmatprep.subr.bf16.mxu1 %v15174_v47  ;;  %v15258_v47 = vld [vmem:[%s21189_s4 + $0xc94] ss:$24 sps:$4 sm:$0xff]  }
 0x249   : > { %1652 = vmatpush1.bf16.msra.mxu0 %v15169_v48  ;;  %v15253_v48 = vld [vmem:[%s21189_s4 + $0xa0] ss:$24 sps:$4 sm:$0xff]  }
 0x24a   : > { %1653 = vmatprep.subr.bf16.mxu0 %v15177_v49  ;;  %v15261_v49 = vld [vmem:[%s21189_s4 + $0xd4] ss:$24 sps:$4 sm:$0xff]  }
 0x24b   : > { %4167 = vmatpush1.bf16.msra.mxu1 %v15172_v50  ;;  %v15256_v50 = vld [vmem:[%s21189_s4 + $0xc90] ss:$24 sps:$4 sm:$0xff]  }
 0x24c   : > { %4168 = vmatprep.subr.bf16.mxu1 %v15180_v51  ;;  %v15264_v51 = vld [vmem:[%s21189_s4 + $0xcc4] ss:$24 sps:$4 sm:$0xff]  }
 0x24d   : > { %1654 = vmatpush1.bf16.msra.mxu0 %v15175_v52  ;;  %v15259_v52 = vld [vmem:[%s21189_s4 + $0xd0] ss:$24 sps:$4 sm:$0xff]  }
 0x24e   : > { %1655 = vmatprep.subr.bf16.mxu0 %v15183_v53  ;;  %v15267_v53 = vld [vmem:[%s21189_s4 + $0x104] ss:$24 sps:$4 sm:$0xff]  }
 0x24f   : > { %4169 = vmatpush1.bf16.msra.mxu1 %v15178_v54  ;;  %v15262_v54 = vld [vmem:[%s21189_s4 + $0xcc0] ss:$24 sps:$4 sm:$0xff]  }
 0x250   : > { %4170 = vmatprep.subr.bf16.mxu1 %v15186_v55  ;;  %v15270_v55 = vld [vmem:[%s21189_s4 + $0xcf4] ss:$24 sps:$4 sm:$0xff]  }
 0x251   : > { %1656 = vmatpush1.bf16.msra.mxu0 %v15181_v56  ;;  %v15265_v56 = vld [vmem:[%s21189_s4 + $0x100] ss:$24 sps:$4 sm:$0xff]  }
 0x252   : > { %1682 = vmatprep.subr.bf16.mxu0 %v15189_v58  ;;  %v15273_v58 = vld [vmem:[%s21189_s4 + $0x134] ss:$24 sps:$4 sm:$0xff]  }
 0x253   : > { %4171 = vmatpush1.bf16.msra.mxu1 %v15184_v60  ;;  %v15268_v60 = vld [vmem:[%s21189_s4 + $0xcf0] ss:$24 sps:$4 sm:$0xff]  }
 0x254   : > { %1674 = vmatmul.mubr.bf16.vlgmr.msra.gmra.mrb[8].mxu0 %v17234_v18  ;;  %4238 = vmatprep.subr.bf16.mxu1 %v15192_v61  ;;  %v15276_v61 = vld [vmem:[%s21189_s4 + $0xd24] ss:$24 sps:$4 sm:$0xff]  }
 0x255   : > { %1683 = vmatpush1.bf16.msra.mxu0 %v15187_v62  ;;  %1714 = vmatprep.mubr.bf16.mxu0 %v16910_v59  ;;  %v15271_v62 = vld [vmem:[%s21189_s4 + $0x130] ss:$24 sps:$4 sm:$0xff]  }
 0x256   : > { %4189 = vmatmul.mubr.bf16.vlgmr.msra.gmra.mrb[12].mxu1 %v17556_v1  ;;  %1684 = vmatprep.subr.bf16.mxu0 %v15195_v63  ;;  %v15279_v63 = vld [vmem:[%s21189_s4 + $0x164] ss:$24 sps:$4 sm:$0xff]  }
 0x257   : > { %4239 = vmatpush1.bf16.msra.mxu1 %v15190_v0  ;;  %4270 = vmatprep.mubr.bf16.mxu1 %v16910_v59  ;;  %v15274_v0 = vld [vmem:[%s21189_s4 + $0xd20] ss:$24 sps:$4 sm:$0xff]  }
 0x258   : > { %4240 = vmatprep.subr.bf16.mxu1 %v15198_v2  ;;  %v15282_v2 = vld [vmem:[%s21189_s4 + $0xd54] ss:$24 sps:$4 sm:$0xff]  }
 0x259   : > { %1685 = vmatpush1.bf16.msra.mxu0 %v15193_v4  ;;  %v15277_v4 = vld [vmem:[%s21189_s4 + $0x160] ss:$24 sps:$4 sm:$0xff]  }
 0x25a   : > { %1686 = vmatprep.subr.bf16.mxu0 %v15201_v5  ;;  %v15285_v5 = vld [vmem:[%s21189_s4 + $0x304] ss:$24 sps:$4 sm:$0xff]  }
 0x25b   : > { %4241 = vmatpush1.bf16.msra.mxu1 %v15196_v6  ;;  %v15280_v6 = vld [vmem:[%s21189_s4 + $0xd50] ss:$24 sps:$4 sm:$0xff]  }
 0x25c   : > { %4242 = vmatprep.subr.bf16.mxu1 %v15204_v7  ;;  %v15288_v7 = vld [vmem:[%s21189_s4 + $0xc14] ss:$24 sps:$4 sm:$0xff]  }
 0x25d   : > { %1687 = vmatpush1.bf16.msra.mxu0 %v15199_v8  ;;  %v15283_v8 = vld [vmem:[%s21189_s4 + $0x300] ss:$24 sps:$4 sm:$0xff]  }
 0x25e   : > { %1688 = vmatprep.subr.bf16.mxu0 %v15207_v9  ;;  %v15291_v9 = vld [vmem:[%s21189_s4 + $0x334] ss:$24 sps:$4 sm:$0xff]  }
 0x25f   : > { %4243 = vmatpush1.bf16.msra.mxu1 %v15202_v10  ;;  %v15286_v10 = vld [vmem:[%s21189_s4 + $0xc10] ss:$24 sps:$4 sm:$0xff]  }
 0x260   : > { %4244 = vmatprep.subr.bf16.mxu1 %v15210_v11  ;;  %v17759_v11 = vrot.slane %v17234_v18, 4 }
 0x261   : > { %1689 = vmatpush1.bf16.msra.mxu0 %v15205_v12  ;;  %v15294_v12 = vld [vmem:[%s21189_s4 + $0xc44] ss:$24 sps:$4 sm:$0xff]  }
 0x262   : > { %1690 = vmatprep.subr.bf16.mxu0 %v15213_v13  ;;  %v15289_v13 = vld [vmem:[%s21189_s4 + $0x330] ss:$24 sps:$4 sm:$0xff]  }
 0x263   : > { %4245 = vmatpush1.bf16.msra.mxu1 %v15208_v14  ;;  %v15297_v14 = vld [vmem:[%s21189_s4 + $0x364] ss:$24 sps:$4 sm:$0xff]  }
 0x264   : > { %4246 = vmatprep.subr.bf16.mxu1 %v15216_v15  ;;  %v15292_v15 = vld [vmem:[%s21189_s4 + $0xc40] ss:$24 sps:$4 sm:$0xff]  }
 0x265   : > { %1691 = vmatpush1.bf16.msra.mxu0 %v15211_v16  ;;  %v15300_v16 = vld [vmem:[%s21189_s4 + $0xc74] ss:$24 sps:$4 sm:$0xff]  }
 0x266   : > { %1692 = vmatprep.subr.bf16.mxu0 %v15219_v19  ;;  %v15295_v19 = vld [vmem:[%s21189_s4 + $0x360] ss:$24 sps:$4 sm:$0xff]  }
 0x267   : > { %4247 = vmatpush1.bf16.msra.mxu1 %v15214_v21  ;;  %v15303_v21 = vld [vmem:[%s21189_s4 + $0x394] ss:$24 sps:$4 sm:$0xff]  }
 0x268   : > { %4248 = vmatprep.subr.bf16.mxu1 %v15222_v22  ;;  %v15298_v22 = vld [vmem:[%s21189_s4 + $0xc70] ss:$24 sps:$4 sm:$0xff]  }
 0x269   : > { %1693 = vmatpush1.bf16.msra.mxu0 %v15217_v24  ;;  %v15306_v24 = vld [vmem:[%s21189_s4 + $0xca4] ss:$24 sps:$4 sm:$0xff]  }
 0x26a   : > { %1694 = vmatprep.subr.bf16.mxu0 %v15225_v25  ;;  %v15301_v25 = vld [vmem:[%s21189_s4 + $0x390] ss:$24 sps:$4 sm:$0xff]  }
 0x26b   : > { %4249 = vmatpush1.bf16.msra.mxu1 %v15220_v26  ;;  %v15309_v26 = vld [vmem:[%s21189_s4 + $0x3c4] ss:$24 sps:$4 sm:$0xff]  }
 0x26c   : > { %4250 = vmatprep.subr.bf16.mxu1 %v15228_v27  ;;  %v15304_v27 = vld [vmem:[%s21189_s4 + $0xca0] ss:$24 sps:$4 sm:$0xff]  }
 0x26d   : > { %1695 = vmatpush1.bf16.msra.mxu0 %v15223_v28  ;;  %v15312_v28 = vld [vmem:[%s21189_s4 + $0xcd4] ss:$24 sps:$4 sm:$0xff]  }
 0x26e   : > { %1696 = vmatprep.subr.bf16.mxu0 %v15231_v29  ;;  %v15307_v29 = vld [vmem:[%s21189_s4 + $0x3c0] ss:$24 sps:$4 sm:$0xff]  }
 0x26f   : > { %4251 = vmatpush1.bf16.msra.mxu1 %v15226_v30  ;;  %v15315_v30 = vld [vmem:[%s21189_s4 + $0x3f4] ss:$24 sps:$4 sm:$0xff]  }
 0x270   : > { %4252 = vmatprep.subr.bf16.mxu1 %v15234_v31  ;;  %v15310_v31 = vld [vmem:[%s21189_s4 + $0xcd0] ss:$24 sps:$4 sm:$0xff]  }
 0x271   : > { %1697 = vmatpush1.bf16.msra.mxu0 %v15229_v32  ;;  %v15318_v32 = vld [vmem:[%s21189_s4 + $0xd04] ss:$24 sps:$4 sm:$0xff]  }
 0x272   : > { %1723 = vmatprep.subr.bf16.mxu0 %v15237_v33  ;;  %v15313_v33 = vld [vmem:[%s21189_s4 + $0x3f0] ss:$24 sps:$4 sm:$0xff]  }
 0x273   : > { %4253 = vmatpush1.bf16.msra.mxu1 %v15232_v34  ;;  %v15321_v34 = vld [vmem:[%s21189_s4 + $0x424] ss:$24 sps:$4 sm:$0xff]  }
 0x274   : > { %1715 = vmatmul.mubr.bf16.vlgmr.msra.gmra.mrb[12].mxu0 %v17234_v18  ;;  %4576 = vmatprep.subr.bf16.mxu1 %v15240_v35  ;;  %v15316_v35 = vld [vmem:[%s21189_s4 + $0xd00] ss:$24 sps:$4 sm:$0xff]  }
 0x275   : > { %1724 = vmatpush1.bf16.msra.mxu0 %v15235_v36  ;;  %1755 = vmatprep.mubr.bf16.mxu0 %v16910_v59  ;;  %v15324_v36 = vld [vmem:[%s21189_s4 + $0xd34] ss:$24 sps:$4 sm:$0xff]  }
 0x276   : > { %4271 = vmatmul.mubr.bf16.vlgmr.msra.gmra.mrb[8].mxu1 %v17556_v1  ;;  %1725 = vmatprep.subr.bf16.mxu0 %v15243_v37  ;;  %v15319_v37 = vld [vmem:[%s21189_s4 + $0x420] ss:$24 sps:$4 sm:$0xff]  }
 0x277   : > { %4577 = vmatpush1.bf16.msra.mxu1 %v15238_v38  ;;  %4608 = vmatprep.mubr.bf16.mxu1 %v16910_v59  ;;  %v15327_v38 = vld [vmem:[%s21189_s4 + $0x454] ss:$24 sps:$4 sm:$0xff]  }
 0x278   : > { %4578 = vmatprep.subr.bf16.mxu1 %v15246_v39  ;;  %v15322_v39 = vld [vmem:[%s21189_s4 + $0xd30] ss:$24 sps:$4 sm:$0xff]  }
 0x279   : > { %1726 = vmatpush1.bf16.msra.mxu0 %v15241_v40  ;;  %v15330_v40 = vld [vmem:[%s21189_s4 + $0xd64] ss:$24 sps:$4 sm:$0xff]  }
 0x27a   : > { %1727 = vmatprep.subr.bf16.mxu0 %v15249_v41  ;;  %v15325_v41 = vld [vmem:[%s21189_s4 + $0x450] ss:$24 sps:$4 sm:$0xff]  }
 0x27b   : > { %4579 = vmatpush1.bf16.msra.mxu1 %v15244_v42  ;;  %v15333_v42 = vld [vmem:[%s21189_s4 + $0x30c] ss:$24 sps:$4 sm:$0xff]  }
 0x27c   : > { %4580 = vmatprep.subr.bf16.mxu1 %v15252_v43  ;;  %v15328_v43 = vld [vmem:[%s21189_s4 + $0xd60] ss:$24 sps:$4 sm:$0xff]  }
 0x27d   : > { %1728 = vmatpush1.bf16.msra.mxu0 %v15247_v44  ;;  %v15336_v44 = vld [vmem:[%s21189_s4 + $0xd84] ss:$24 sps:$4 sm:$0xff]  }
 0x27e   : > { %1729 = vmatprep.subr.bf16.mxu0 %v15255_v45  ;;  %v15331_v45 = vld [vmem:[%s21189_s4 + $0x308] ss:$24 sps:$4 sm:$0xff]  }
 0x27f   : > { %4581 = vmatpush1.bf16.msra.mxu1 %v15250_v46  ;;  %v17855_v46 = vrot.slane %v17234_v18, 1 }
 0x280   : > { %4582 = vmatprep.subr.bf16.mxu1 %v15258_v47  ;;  %v15339_v47 = vld [vmem:[%s21189_s4 + $0x33c] ss:$24 sps:$4 sm:$0xff]  }
 0x281   : > { %1730 = vmatpush1.bf16.msra.mxu0 %v15253_v48  ;;  %v15334_v48 = vld [vmem:[%s21189_s4 + $0xd80] ss:$24 sps:$4 sm:$0xff]  }
 0x282   : > { %1731 = vmatprep.subr.bf16.mxu0 %v15261_v49  ;;  %v15342_v49 = vld [vmem:[%s21189_s4 + $0xdb4] ss:$24 sps:$4 sm:$0xff]  }
 0x283   : > { %4583 = vmatpush1.bf16.msra.mxu1 %v15256_v50  ;;  %v15337_v50 = vld [vmem:[%s21189_s4 + $0x338] ss:$24 sps:$4 sm:$0xff]  }
 0x284   : > { %4584 = vmatprep.subr.bf16.mxu1 %v15264_v51  ;;  %v15345_v51 = vld [vmem:[%s21189_s4 + $0x36c] ss:$24 sps:$4 sm:$0xff]  }
 0x285   : > { %1732 = vmatpush1.bf16.msra.mxu0 %v15259_v52  ;;  %v15340_v52 = vld [vmem:[%s21189_s4 + $0xdb0] ss:$24 sps:$4 sm:$0xff]  }
 0x286   : > { %1733 = vmatprep.subr.bf16.mxu0 %v15267_v53  ;;  %v15348_v53 = vld [vmem:[%s21189_s4 + $0xde4] ss:$24 sps:$4 sm:$0xff]  }
 0x287   : > { %4585 = vmatpush1.bf16.msra.mxu1 %v15262_v54  ;;  %v15343_v54 = vld [vmem:[%s21189_s4 + $0x368] ss:$24 sps:$4 sm:$0xff]  }
 0x288   : > { %4586 = vmatprep.subr.bf16.mxu1 %v15270_v55  ;;  %v15351_v55 = vld [vmem:[%s21189_s4 + $0x39c] ss:$24 sps:$4 sm:$0xff]  }
 0x289   : > { %1734 = vmatpush1.bf16.msra.mxu0 %v15265_v56  ;;  %v15346_v56 = vld [vmem:[%s21189_s4 + $0xde0] ss:$24 sps:$4 sm:$0xff]  }
 0x28a   : > { %1735 = vmatprep.subr.bf16.mxu0 %v15273_v58  ;;  %v15354_v58 = vld [vmem:[%s21189_s4 + $0xe14] ss:$24 sps:$4 sm:$0xff]  }
 0x28b   : > { %4587 = vmatpush1.bf16.msra.mxu1 %v15268_v60  ;;  %v15349_v60 = vld [vmem:[%s21189_s4 + $0x398] ss:$24 sps:$4 sm:$0xff]  }
 0x28c   : > { %4588 = vmatprep.subr.bf16.mxu1 %v15276_v61  ;;  %v15357_v61 = vld [vmem:[%s21189_s4 + $0x3cc] ss:$24 sps:$4 sm:$0xff]  }
 0x28d   : > { %1736 = vmatpush1.bf16.msra.mxu0 %v15271_v62  ;;  %v15352_v62 = vld [vmem:[%s21189_s4 + $0xe10] ss:$24 sps:$4 sm:$0xff]  }
 0x28e   : > { %1737 = vmatprep.subr.bf16.mxu0 %v15279_v63  ;;  %v15360_v63 = vld [vmem:[%s21189_s4 + $0xe44] ss:$24 sps:$4 sm:$0xff]  }
 0x28f   : > { %4589 = vmatpush1.bf16.msra.mxu1 %v15274_v0  ;;  %v15355_v0 = vld [vmem:[%s21189_s4 + $0x3c8] ss:$24 sps:$4 sm:$0xff]  }
 0x290   : > { %4590 = vmatprep.subr.bf16.mxu1 %v15282_v2  ;;  %v15363_v2 = vld [vmem:[%s21189_s4 + $0x3fc] ss:$24 sps:$4 sm:$0xff]  }
 0x291   : > { %1738 = vmatpush1.bf16.msra.mxu0 %v15277_v4  ;;  %v15358_v4 = vld [vmem:[%s21189_s4 + $0xe40] ss:$24 sps:$4 sm:$0xff]  }
 0x292   : > { %2056 = vmatprep.subr.bf16.mxu0 %v15285_v5  ;;  %v15366_v5 = vld [vmem:[%s21189_s4 + $0xe74] ss:$24 sps:$4 sm:$0xff]  }
 0x293   : > { %4591 = vmatpush1.bf16.msra.mxu1 %v15280_v6  ;;  %v15361_v6 = vld [vmem:[%s21189_s4 + $0x3f8] ss:$24 sps:$4 sm:$0xff]  }
 0x294   : > { %1756 = vmatmul.mubr.bf16.vlgmr.msra.gmra.mrb[16].mxu0 %v17234_v18  ;;  %4658 = vmatprep.subr.bf16.mxu1 %v15288_v7  ;;  %v15369_v7 = vld [vmem:[%s21189_s4 + $0x42c] ss:$24 sps:$4 sm:$0xff]  }
 0x295   : > { %2057 = vmatpush1.bf16.msra.mxu0 %v15283_v8  ;;  %2088 = vmatprep.mubr.bf16.mxu0 %v16910_v59  ;;  %v15364_v8 = vld [vmem:[%s21189_s4 + $0xe70] ss:$24 sps:$4 sm:$0xff]  }
 0x296   : > { %4609 = vmatmul.mubr.bf16.vlgmr.msra.gmra.mrb[12].mxu1 %v17759_v11  ;;  %2058 = vmatprep.subr.bf16.mxu0 %v15291_v9  ;;  %v15372_v9 = vld [vmem:[%s21189_s4 + $0xea4] ss:$24 sps:$4 sm:$0xff]  }
 0x297   : > { %4659 = vmatpush1.bf16.msra.mxu1 %v15286_v10  ;;  %4690 = vmatprep.mubr.bf16.mxu1 %v16910_v59  ;;  %v15367_v10 = vld [vmem:[%s21189_s4 + $0x428] ss:$24 sps:$4 sm:$0xff]  }
 0x298   : > { %4660 = vmatprep.subr.bf16.mxu1 %v15294_v12  ;;  %v15375_v12 = vld [vmem:[%s21189_s4 + $0x45c] ss:$24 sps:$4 sm:$0xff]  }
 0x299   : > { %2059 = vmatpush1.bf16.msra.mxu0 %v15289_v13  ;;  %v15370_v13 = vld [vmem:[%s21189_s4 + $0xea0] ss:$24 sps:$4 sm:$0xff]  }
 0x29a   : > { %2060 = vmatprep.subr.bf16.mxu0 %v15297_v14  ;;  %v15378_v14 = vld [vmem:[%s21189_s4 + $0xed4] ss:$24 sps:$4 sm:$0xff]  }
 0x29b   : > { %4661 = vmatpush1.bf16.msra.mxu1 %v15292_v15  ;;  %v15373_v15 = vld [vmem:[%s21189_s4 + $0x458] ss:$24 sps:$4 sm:$0xff]  }
 0x29c   : > { %4662 = vmatprep.subr.bf16.mxu1 %v15300_v16  ;;  %v15381_v16 = vld [vmem:[%s21189_s4 + $0x314] ss:$24 sps:$4 sm:$0xff]  }
 0x29d   : > { %2061 = vmatpush1.bf16.msra.mxu0 %v15295_v19  ;;  %v15376_v19 = vld [vmem:[%s21189_s4 + $0xed0] ss:$24 sps:$4 sm:$0xff]  }
 0x29e   : > { %2062 = vmatprep.subr.bf16.mxu0 %v15303_v21  ;;  %v15384_v21 = vld [vmem:[%s21189_s4 + $0xd94] ss:$24 sps:$4 sm:$0xff]  }
 0x29f   : > { %4663 = vmatpush1.bf16.msra.mxu1 %v15298_v22  ;;  %v15379_v22 = vld [vmem:[%s21189_s4 + $0x310] ss:$24 sps:$4 sm:$0xff]  }
 0x2a0   : > { %4664 = vmatprep.subr.bf16.mxu1 %v15306_v24  ;;  %v15387_v24 = vld [vmem:[%s21189_s4 + $0x344] ss:$24 sps:$4 sm:$0xff]  }
 0x2a1   : > { %2063 = vmatpush1.bf16.msra.mxu0 %v15301_v25  ;;  %v15382_v25 = vld [vmem:[%s21189_s4 + $0xd90] ss:$24 sps:$4 sm:$0xff]  }
 0x2a2   : > { %2064 = vmatprep.subr.bf16.mxu0 %v15309_v26  ;;  %v17965_v26 = vrot.slane %v17240_v20, 4 }
 0x2a3   : > { %4665 = vmatpush1.bf16.msra.mxu1 %v15304_v27  ;;  %v15390_v27 = vld [vmem:[%s21189_s4 + $0xdc4] ss:$24 sps:$4 sm:$0xff]  }
 0x2a4   : > { %4666 = vmatprep.subr.bf16.mxu1 %v15312_v28  ;;  %v15385_v28 = vld [vmem:[%s21189_s4 + $0x340] ss:$24 sps:$4 sm:$0xff]  }
 0x2a5   : > { %2065 = vmatpush1.bf16.msra.mxu0 %v15307_v29  ;;  %v15393_v29 = vld [vmem:[%s21189_s4 + $0x374] ss:$24 sps:$4 sm:$0xff]  }
 0x2a6   : > { %2066 = vmatprep.subr.bf16.mxu0 %v15315_v30  ;;  %v15388_v30 = vld [vmem:[%s21189_s4 + $0xdc0] ss:$24 sps:$4 sm:$0xff]  }
 0x2a7   : > { %4667 = vmatpush1.bf16.msra.mxu1 %v15310_v31  ;;  %v15396_v31 = vld [vmem:[%s21189_s4 + $0xdf4] ss:$24 sps:$4 sm:$0xff]  }
 0x2a8   : > { %4668 = vmatprep.subr.bf16.mxu1 %v15318_v32  ;;  %v15391_v32 = vld [vmem:[%s21189_s4 + $0x370] ss:$24 sps:$4 sm:$0xff]  }
 0x2a9   : > { %2067 = vmatpush1.bf16.msra.mxu0 %v15313_v33  ;;  %v15399_v33 = vld [vmem:[%s21189_s4 + $0x3a4] ss:$24 sps:$4 sm:$0xff]  }
 0x2aa   : > { %2068 = vmatprep.subr.bf16.mxu0 %v15321_v34  ;;  %v15394_v34 = vld [vmem:[%s21189_s4 + $0xdf0] ss:$24 sps:$4 sm:$0xff]  }
 0x2ab   : > { %4669 = vmatpush1.bf16.msra.mxu1 %v15316_v35  ;;  %v15402_v35 = vld [vmem:[%s21189_s4 + $0xe24] ss:$24 sps:$4 sm:$0xff]  }
 0x2ac   : > { %4670 = vmatprep.subr.bf16.mxu1 %v15324_v36  ;;  %v15397_v36 = vld [vmem:[%s21189_s4 + $0x3a0] ss:$24 sps:$4 sm:$0xff]  }
 0x2ad   : > { %2069 = vmatpush1.bf16.msra.mxu0 %v15319_v37  ;;  %v15405_v37 = vld [vmem:[%s21189_s4 + $0x3d4] ss:$24 sps:$4 sm:$0xff]  }
 0x2ae   : > { %2070 = vmatprep.subr.bf16.mxu0 %v15327_v38  ;;  %v15400_v38 = vld [vmem:[%s21189_s4 + $0xe20] ss:$24 sps:$4 sm:$0xff]  }
 0x2af   : > { %4671 = vmatpush1.bf16.msra.mxu1 %v15322_v39  ;;  %v15408_v39 = vld [vmem:[%s21189_s4 + $0xe54] ss:$24 sps:$4 sm:$0xff]  }
 0x2b0   : > { %4672 = vmatprep.subr.bf16.mxu1 %v15330_v40  ;;  %v15403_v40 = vld [vmem:[%s21189_s4 + $0x3d0] ss:$24 sps:$4 sm:$0xff]  }
 0x2b1   : > { %2071 = vmatpush1.bf16.msra.mxu0 %v15325_v41  ;;  %v15411_v41 = vld [vmem:[%s21189_s4 + $0x404] ss:$24 sps:$4 sm:$0xff]  }
 0x2b2   : > { %2097 = vmatprep.subr.bf16.mxu0 %v15333_v42  ;;  %v15406_v42 = vld [vmem:[%s21189_s4 + $0xe50] ss:$24 sps:$4 sm:$0xff]  }
 0x2b3   : > { %4673 = vmatpush1.bf16.msra.mxu1 %v15328_v43  ;;  %v15414_v43 = vld [vmem:[%s21189_s4 + $0xe84] ss:$24 sps:$4 sm:$0xff]  }
 0x2b4   : > { %2089 = vmatmul.mubr.bf16.vlgmr.msra.gmra.mrb[8].mxu0 %v17855_v46  ;;  %4996 = vmatprep.subr.bf16.mxu1 %v15336_v44  ;;  %v15409_v44 = vld [vmem:[%s21189_s4 + $0x400] ss:$24 sps:$4 sm:$0xff]  }
 0x2b5   : > { %2098 = vmatpush1.bf16.msra.mxu0 %v15331_v45  ;;  %2129 = vmatprep.mubr.bf16.mxu0 %v16910_v59  ;;  %v15417_v45 = vld [vmem:[%s21189_s4 + $0x434] ss:$24 sps:$4 sm:$0xff]  }
 0x2b6   : > { %4691 = vmatmul.mubr.bf16.vlgmr.msra.gmra.mrb[8].mxu1 %v17759_v11  ;;  %2099 = vmatprep.subr.bf16.mxu0 %v15339_v47  ;;  %v15412_v47 = vld [vmem:[%s21189_s4 + $0xe80] ss:$24 sps:$4 sm:$0xff]  }
 0x2b7   : > { %4997 = vmatpush1.bf16.msra.mxu1 %v15334_v48  ;;  %5028 = vmatprep.mubr.bf16.mxu1 %v16910_v59  ;;  %v15420_v48 = vld [vmem:[%s21189_s4 + $0xeb4] ss:$24 sps:$4 sm:$0xff]  }
 0x2b8   : > { %4998 = vmatprep.subr.bf16.mxu1 %v15342_v49  ;;  %v15415_v49 = vld [vmem:[%s21189_s4 + $0x430] ss:$24 sps:$4 sm:$0xff]  }
 0x2b9   : > { %2100 = vmatpush1.bf16.msra.mxu0 %v15337_v50  ;;  %v15423_v50 = vld [vmem:[%s21189_s4 + $0x464] ss:$24 sps:$4 sm:$0xff]  }
 0x2ba   : > { %2101 = vmatprep.subr.bf16.mxu0 %v15345_v51  ;;  %v15418_v51 = vld [vmem:[%s21189_s4 + $0xeb0] ss:$24 sps:$4 sm:$0xff]  }
 0x2bb   : > { %4999 = vmatpush1.bf16.msra.mxu1 %v15340_v52  ;;  %v15426_v52 = vld [vmem:[%s21189_s4 + $0xee4] ss:$24 sps:$4 sm:$0xff]  }
 0x2bc   : > { %5000 = vmatprep.subr.bf16.mxu1 %v15348_v53  ;;  %v15421_v53 = vld [vmem:[%s21189_s4 + $0x460] ss:$24 sps:$4 sm:$0xff]  }
 0x2bd   : > { %2102 = vmatpush1.bf16.msra.mxu0 %v15343_v54  ;;  %v15429_v54 = vld [vmem:[%s21189_s4 + $0x484] ss:$24 sps:$4 sm:$0xff]  }
 0x2be   : > { %2103 = vmatprep.subr.bf16.mxu0 %v15351_v55  ;;  %v15424_v55 = vld [vmem:[%s21189_s4 + $0xee0] ss:$24 sps:$4 sm:$0xff]  }
 0x2bf   : > { %5001 = vmatpush1.bf16.msra.mxu1 %v15346_v56  ;;  %v15432_v56 = vld [vmem:[%s21189_s4 + $0xf04] ss:$24 sps:$4 sm:$0xff]  }
 0x2c0   : > { %5002 = vmatprep.subr.bf16.mxu1 %v15354_v58  ;;  %v15427_v58 = vld [vmem:[%s21189_s4 + $0x480] ss:$24 sps:$4 sm:$0xff]  }
 0x2c1   : > { %2104 = vmatpush1.bf16.msra.mxu0 %v15349_v60  ;;  %v15435_v60 = vld [vmem:[%s21189_s4 + $0x4b4] ss:$24 sps:$4 sm:$0xff]  }
 0x2c2   : > { %2105 = vmatprep.subr.bf16.mxu0 %v15357_v61  ;;  %v15430_v61 = vld [vmem:[%s21189_s4 + $0xf00] ss:$24 sps:$4 sm:$0xff]  }
 0x2c3   : > { %5003 = vmatpush1.bf16.msra.mxu1 %v15352_v62  ;;  %v15438_v62 = vld [vmem:[%s21189_s4 + $0xf34] ss:$24 sps:$4 sm:$0xff]  }
 0x2c4   : > { %5004 = vmatprep.subr.bf16.mxu1 %v15360_v63  ;;  %v15433_v63 = vld [vmem:[%s21189_s4 + $0x4b0] ss:$24 sps:$4 sm:$0xff]  }
 0x2c5   : > { %2106 = vmatpush1.bf16.msra.mxu0 %v15355_v0  ;;  %v15441_v0 = vld [vmem:[%s21189_s4 + $0x4e4] ss:$24 sps:$4 sm:$0xff]  }
 0x2c6   : > { %2107 = vmatprep.subr.bf16.mxu0 %v15363_v2  ;;  %v15444_v2 = vld [vmem:[%s21189_s4 + $0xf64] ss:$24 sps:$4 sm:$0xff]  }
 0x2c7   : > { %5005 = vmatpush1.bf16.msra.mxu1 %v15358_v4  ;;  %v15439_v4 = vld [vmem:[%s21189_s4 + $0x4e0] ss:$24 sps:$4 sm:$0xff]  }
 0x2c8   : > { %5006 = vmatprep.subr.bf16.mxu1 %v15366_v5  ;;  %v15447_v5 = vld [vmem:[%s21189_s4 + $0x514] ss:$24 sps:$4 sm:$0xff]  }
 0x2c9   : > { %2108 = vmatpush1.bf16.msra.mxu0 %v15361_v6  ;;  %v15442_v6 = vld [vmem:[%s21189_s4 + $0xf60] ss:$24 sps:$4 sm:$0xff]  }
 0x2ca   : > { %2109 = vmatprep.subr.bf16.mxu0 %v15369_v7  ;;  %v15450_v7 = vld [vmem:[%s21189_s4 + $0xf94] ss:$24 sps:$4 sm:$0xff]  }
 0x2cb   : > { %5007 = vmatpush1.bf16.msra.mxu1 %v15364_v8  ;;  %v15445_v8 = vld [vmem:[%s21189_s4 + $0x510] ss:$24 sps:$4 sm:$0xff]  }
 0x2cc   : > { %5008 = vmatprep.subr.bf16.mxu1 %v15372_v9  ;;  %v15453_v9 = vld [vmem:[%s21189_s4 + $0x544] ss:$24 sps:$4 sm:$0xff]  }
 0x2cd   : > { %2110 = vmatpush1.bf16.msra.mxu0 %v15367_v10  ;;  %v15448_v10 = vld [vmem:[%s21189_s4 + $0xf90] ss:$24 sps:$4 sm:$0xff]  }
 0x2ce   : > { %2111 = vmatprep.subr.bf16.mxu0 %v15375_v12  ;;  %v15456_v12 = vld [vmem:[%s21189_s4 + $0xfc4] ss:$24 sps:$4 sm:$0xff]  }
 0x2cf   : > { %5009 = vmatpush1.bf16.msra.mxu1 %v15370_v13  ;;  %v15451_v13 = vld [vmem:[%s21189_s4 + $0x540] ss:$24 sps:$4 sm:$0xff]  }
 0x2d0   : > { %5010 = vmatprep.subr.bf16.mxu1 %v15378_v14  ;;  %v15459_v14 = vld [vmem:[%s21189_s4 + $0x574] ss:$24 sps:$4 sm:$0xff]  }
 0x2d1   : > { %2112 = vmatpush1.bf16.msra.mxu0 %v15373_v15  ;;  %v15454_v15 = vld [vmem:[%s21189_s4 + $0xfc0] ss:$24 sps:$4 sm:$0xff]  }
 0x2d2   : > { %2138 = vmatprep.subr.bf16.mxu0 %v15381_v16  ;;  %v15462_v16 = vld [vmem:[%s21189_s4 + $0xff4] ss:$24 sps:$4 sm:$0xff]  }
 0x2d3   : > { %5011 = vmatpush1.bf16.msra.mxu1 %v15376_v19  ;;  %v15457_v19 = vld [vmem:[%s21189_s4 + $0x570] ss:$24 sps:$4 sm:$0xff]  }
 0x2d4   : > { %2130 = vmatmul.mubr.bf16.vlgmr.msra.gmra.mrb[12].mxu0 %v17855_v46  ;;  %5078 = vmatprep.subr.bf16.mxu1 %v15384_v21  ;;  %v15465_v21 = vld [vmem:[%s21189_s4 + $0x5a4] ss:$24 sps:$4 sm:$0xff]  }
 0x2d5   : > { %2139 = vmatpush1.bf16.msra.mxu0 %v15379_v22  ;;  %2170 = vmatprep.mubr.bf16.mxu0 %v16910_v59  ;;  %v15460_v22 = vld [vmem:[%s21189_s4 + $0xff0] ss:$24 sps:$4 sm:$0xff]  }
 0x2d6   : > { %5029 = vmatmul.mubr.bf16.vlgmr.msra.gmra.mrb[12].mxu1 %v17965_v26  ;;  %2140 = vmatprep.subr.bf16.mxu0 %v15387_v24  ;;  %v15468_v24 = vld [vmem:[%s21189_s4 + $0x1024] ss:$24 sps:$4 sm:$0xff]  }
 0x2d7   : > { %5079 = vmatpush1.bf16.msra.mxu1 %v15382_v25  ;;  %5110 = vmatprep.mubr.bf16.mxu1 %v16910_v59  ;;  %v15463_v25 = vld [vmem:[%s21189_s4 + $0x5a0] ss:$24 sps:$4 sm:$0xff]  }
 0x2d8   : > { %5080 = vmatprep.subr.bf16.mxu1 %v15390_v27  ;;  %v15471_v27 = vld [vmem:[%s21189_s4 + $0x5d4] ss:$24 sps:$4 sm:$0xff]  }
 0x2d9   : > { %2141 = vmatpush1.bf16.msra.mxu0 %v15385_v28  ;;  %v15466_v28 = vld [vmem:[%s21189_s4 + $0x1020] ss:$24 sps:$4 sm:$0xff]  }
 0x2da   : > { %2142 = vmatprep.subr.bf16.mxu0 %v15393_v29  ;;  %v15474_v29 = vld [vmem:[%s21189_s4 + $0x1054] ss:$24 sps:$4 sm:$0xff]  }
 0x2db   : > { %5081 = vmatpush1.bf16.msra.mxu1 %v15388_v30  ;;  %v15469_v30 = vld [vmem:[%s21189_s4 + $0x5d0] ss:$24 sps:$4 sm:$0xff]  }
 0x2dc   : > { %5082 = vmatprep.subr.bf16.mxu1 %v15396_v31  ;;  %v15477_v31 = vld [vmem:[%s21189_s4 + $0x48c] ss:$24 sps:$4 sm:$0xff]  }
 0x2dd   : > { %2143 = vmatpush1.bf16.msra.mxu0 %v15391_v32  ;;  %v15472_v32 = vld [vmem:[%s21189_s4 + $0x1050] ss:$24 sps:$4 sm:$0xff]  }
 0x2de   : > { %2144 = vmatprep.subr.bf16.mxu0 %v15399_v33  ;;  %v15480_v33 = vld [vmem:[%s21189_s4 + $0xf14] ss:$24 sps:$4 sm:$0xff]  }
 0x2df   : > { %5083 = vmatpush1.bf16.msra.mxu1 %v15394_v34  ;;  %v15475_v34 = vld [vmem:[%s21189_s4 + $0x488] ss:$24 sps:$4 sm:$0xff]  }
 0x2e0   : > { %5084 = vmatprep.subr.bf16.mxu1 %v15402_v35  ;;  %v18161_v35 = vrot.slane %v17240_v20, 1 }
 0x2e1   : > { %2145 = vmatpush1.bf16.msra.mxu0 %v15397_v36  ;;  %v15483_v36 = vld [vmem:[%s21189_s4 + $0x4bc] ss:$24 sps:$4 sm:$0xff]  }
 0x2e2   : > { %2146 = vmatprep.subr.bf16.mxu0 %v15405_v37  ;;  %v15478_v37 = vld [vmem:[%s21189_s4 + $0xf10] ss:$24 sps:$4 sm:$0xff]  }
 0x2e3   : > { %5085 = vmatpush1.bf16.msra.mxu1 %v15400_v38  ;;  %v18171_v38 = vrot.slane %v17234_v18, 5 }
 0x2e4   : > { %5086 = vmatprep.subr.bf16.mxu1 %v15408_v39  ;;  %v15486_v39 = vld [vmem:[%s21189_s4 + $0xf44] ss:$24 sps:$4 sm:$0xff]  }
 0x2e5   : > { %2147 = vmatpush1.bf16.msra.mxu0 %v15403_v40  ;;  %v15481_v40 = vld [vmem:[%s21189_s4 + $0x4b8] ss:$24 sps:$4 sm:$0xff]  }
 0x2e6   : > { %2148 = vmatprep.subr.bf16.mxu0 %v15411_v41  ;;  %v15489_v41 = vld [vmem:[%s21189_s4 + $0x4ec] ss:$24 sps:$4 sm:$0xff]  }
 0x2e7   : > { %5087 = vmatpush1.bf16.msra.mxu1 %v15406_v42  ;;  %v15484_v42 = vld [vmem:[%s21189_s4 + $0xf40] ss:$24 sps:$4 sm:$0xff]  }
 0x2e8   : > { %5088 = vmatprep.subr.bf16.mxu1 %v15414_v43  ;;  %v15492_v43 = vld [vmem:[%s21189_s4 + $0xf74] ss:$24 sps:$4 sm:$0xff]  }
 0x2e9   : > { %2149 = vmatpush1.bf16.msra.mxu0 %v15409_v44  ;;  %v15487_v44 = vld [vmem:[%s21189_s4 + $0x4e8] ss:$24 sps:$4 sm:$0xff]  }
 0x2ea   : > { %2150 = vmatprep.subr.bf16.mxu0 %v15417_v45  ;;  %v15495_v45 = vld [vmem:[%s21189_s4 + $0x51c] ss:$24 sps:$4 sm:$0xff]  }
 0x2eb   : > { %5089 = vmatpush1.bf16.msra.mxu1 %v15412_v47  ;;  %v15490_v47 = vld [vmem:[%s21189_s4 + $0xf70] ss:$24 sps:$4 sm:$0xff]  }
 0x2ec   : > { %5090 = vmatprep.subr.bf16.mxu1 %v15420_v48  ;;  %v15498_v48 = vld [vmem:[%s21189_s4 + $0xfa4] ss:$24 sps:$4 sm:$0xff]  }
 0x2ed   : > { %2151 = vmatpush1.bf16.msra.mxu0 %v15415_v49  ;;  %v15493_v49 = vld [vmem:[%s21189_s4 + $0x518] ss:$24 sps:$4 sm:$0xff]  }
 0x2ee   : > { %2152 = vmatprep.subr.bf16.mxu0 %v15423_v50  ;;  %v15501_v50 = vld [vmem:[%s21189_s4 + $0x54c] ss:$24 sps:$4 sm:$0xff]  }
 0x2ef   : > { %5091 = vmatpush1.bf16.msra.mxu1 %v15418_v51  ;;  %v15496_v51 = vld [vmem:[%s21189_s4 + $0xfa0] ss:$24 sps:$4 sm:$0xff]  }
 0x2f0   : > { %5092 = vmatprep.subr.bf16.mxu1 %v15426_v52  ;;  %v15504_v52 = vld [vmem:[%s21189_s4 + $0xfd4] ss:$24 sps:$4 sm:$0xff]  }
 0x2f1   : > { %2153 = vmatpush1.bf16.msra.mxu0 %v15421_v53  ;;  %v15499_v53 = vld [vmem:[%s21189_s4 + $0x548] ss:$24 sps:$4 sm:$0xff]  }
 0x2f2   : > { %2476 = vmatprep.subr.bf16.mxu0 %v15429_v54  ;;  %v15507_v54 = vld [vmem:[%s21189_s4 + $0x57c] ss:$24 sps:$4 sm:$0xff]  }
 0x2f3   : > { %5093 = vmatpush1.bf16.msra.mxu1 %v15424_v55  ;;  %v15502_v55 = vld [vmem:[%s21189_s4 + $0xfd0] ss:$24 sps:$4 sm:$0xff]  }
 0x2f4   : > { %2171 = vmatmul.mubr.bf16.vlgmr.msra.gmra.mrb[16].mxu0 %v17855_v46  ;;  %5416 = vmatprep.subr.bf16.mxu1 %v15432_v56  ;;  %v15436_v46 = vld [vmem:[%s21189_s4 + $0xf30] ss:$24 sps:$4 sm:$0xff]   ;;  %v15510_v56 = vld [vmem:[%s21189_s4 + $0x1004] ss:$24 sps:$4 sm:$0xff]  }
 0x2f5   : > { %2477 = vmatpush1.bf16.msra.mxu0 %v15427_v58  ;;  %2508 = vmatprep.mubr.bf16.mxu0 %v16910_v59  ;;  %v15505_v58 = vld [vmem:[%s21189_s4 + $0x578] ss:$24 sps:$4 sm:$0xff]  }
 0x2f6   : > { %5111 = vmatmul.mubr.bf16.vlgmr.msra.gmra.mrb[8].mxu1 %v17965_v26  ;;  %2478 = vmatprep.subr.bf16.mxu0 %v15435_v60  ;;  %v15513_v60 = vld [vmem:[%s21189_s4 + $0x5ac] ss:$24 sps:$4 sm:$0xff]  }
 0x2f7   : > { %5417 = vmatpush1.bf16.msra.mxu1 %v15430_v61  ;;  %5448 = vmatprep.mubr.bf16.mxu1 %v16910_v59  ;;  %v15508_v61 = vld [vmem:[%s21189_s4 + $0x1000] ss:$24 sps:$4 sm:$0xff]  }
 0x2f8   : > { %5418 = vmatprep.subr.bf16.mxu1 %v15438_v62  ;;  %v15516_v62 = vld [vmem:[%s21189_s4 + $0x1034] ss:$24 sps:$4 sm:$0xff]  }
 0x2f9   : > { %2479 = vmatpush1.bf16.msra.mxu0 %v15433_v63  ;;  %v15511_v63 = vld [vmem:[%s21189_s4 + $0x5a8] ss:$24 sps:$4 sm:$0xff]  }
 0x2fa   : > { %2480 = vmatprep.subr.bf16.mxu0 %v15441_v0  ;;  %v15519_v0 = vld [vmem:[%s21189_s4 + $0x5dc] ss:$24 sps:$4 sm:$0xff]  }
 0x2fb   : > { %5419 = vmatpush1.bf16.msra.mxu1 %v15436_v46  ;;  %v15514_v46 = vld [vmem:[%s21189_s4 + $0x1030] ss:$24 sps:$4 sm:$0xff]  }
 0x2fc   : > { %5420 = vmatprep.subr.bf16.mxu1 %v15444_v2  ;;  %v15522_v2 = vld [vmem:[%s21189_s4 + $0x1064] ss:$24 sps:$4 sm:$0xff]  }
 0x2fd   : > { %2481 = vmatpush1.bf16.msra.mxu0 %v15439_v4  ;;  %v15517_v4 = vld [vmem:[%s21189_s4 + $0x5d8] ss:$24 sps:$4 sm:$0xff]  }
 0x2fe   : > { %2482 = vmatprep.subr.bf16.mxu0 %v15447_v5  ;;  %v15525_v5 = vld [vmem:[%s21189_s4 + $0x494] ss:$24 sps:$4 sm:$0xff]  }
 0x2ff   : > { %5421 = vmatpush1.bf16.msra.mxu1 %v15442_v6  ;;  %v15520_v6 = vld [vmem:[%s21189_s4 + $0x1060] ss:$24 sps:$4 sm:$0xff]  }
 0x300   : > { %5422 = vmatprep.subr.bf16.mxu1 %v15450_v7  ;;  %v15528_v7 = vld [vmem:[%s21189_s4 + $0x1084] ss:$24 sps:$4 sm:$0xff]  }
 0x301   : > { %2483 = vmatpush1.bf16.msra.mxu0 %v15445_v8  ;;  %v15523_v8 = vld [vmem:[%s21189_s4 + $0x490] ss:$24 sps:$4 sm:$0xff]  }
 0x302   : > { %2484 = vmatprep.subr.bf16.mxu0 %v15453_v9  ;;  %v15531_v9 = vld [vmem:[%s21189_s4 + $0x4c4] ss:$24 sps:$4 sm:$0xff]  }
 0x303   : > { %5423 = vmatpush1.bf16.msra.mxu1 %v15448_v10  ;;  %v15526_v10 = vld [vmem:[%s21189_s4 + $0x1080] ss:$24 sps:$4 sm:$0xff]  }
 0x304   : > { %5424 = vmatprep.subr.bf16.mxu1 %v15456_v12  ;;  %v15534_v12 = vld [vmem:[%s21189_s4 + $0x10b4] ss:$24 sps:$4 sm:$0xff]  }
 0x305   : > { %2485 = vmatpush1.bf16.msra.mxu0 %v15451_v13  ;;  %v15529_v13 = vld [vmem:[%s21189_s4 + $0x4c0] ss:$24 sps:$4 sm:$0xff]  }
 0x306   : > { %2486 = vmatprep.subr.bf16.mxu0 %v15459_v14  ;;  %v15537_v14 = vld [vmem:[%s21189_s4 + $0x4f4] ss:$24 sps:$4 sm:$0xff]  }
 0x307   : > { %5425 = vmatpush1.bf16.msra.mxu1 %v15454_v15  ;;  %v15532_v15 = vld [vmem:[%s21189_s4 + $0x10b0] ss:$24 sps:$4 sm:$0xff]  }
 0x308   : > { %5426 = vmatprep.subr.bf16.mxu1 %v15462_v16  ;;  %v15540_v16 = vld [vmem:[%s21189_s4 + $0x10e4] ss:$24 sps:$4 sm:$0xff]  }
 0x309   : > { %2487 = vmatpush1.bf16.msra.mxu0 %v15457_v19  ;;  %v15535_v19 = vld [vmem:[%s21189_s4 + $0x4f0] ss:$24 sps:$4 sm:$0xff]  }
 0x30a   : > { %2488 = vmatprep.subr.bf16.mxu0 %v15465_v21  ;;  %v15543_v21 = vld [vmem:[%s21189_s4 + $0x524] ss:$24 sps:$4 sm:$0xff]  }
 0x30b   : > { %5427 = vmatpush1.bf16.msra.mxu1 %v15460_v22  ;;  %v15538_v22 = vld [vmem:[%s21189_s4 + $0x10e0] ss:$24 sps:$4 sm:$0xff]  }
 0x30c   : > { %5428 = vmatprep.subr.bf16.mxu1 %v15468_v24  ;;  %v15546_v24 = vld [vmem:[%s21189_s4 + $0x1114] ss:$24 sps:$4 sm:$0xff]  }
 0x30d   : > { %2489 = vmatpush1.bf16.msra.mxu0 %v15463_v25  ;;  %v15541_v25 = vld [vmem:[%s21189_s4 + $0x520] ss:$24 sps:$4 sm:$0xff]  }
 0x30e   : > { %2490 = vmatprep.subr.bf16.mxu0 %v15471_v27  ;;  %v15549_v27 = vld [vmem:[%s21189_s4 + $0x554] ss:$24 sps:$4 sm:$0xff]  }
 0x30f   : > { %5429 = vmatpush1.bf16.msra.mxu1 %v15466_v28  ;;  %v15544_v28 = vld [vmem:[%s21189_s4 + $0x1110] ss:$24 sps:$4 sm:$0xff]  }
 0x310   : > { %5430 = vmatprep.subr.bf16.mxu1 %v15474_v29  ;;  %v15552_v29 = vld [vmem:[%s21189_s4 + $0x1144] ss:$24 sps:$4 sm:$0xff]  }
 0x311   : > { %2491 = vmatpush1.bf16.msra.mxu0 %v15469_v30  ;;  %v15547_v30 = vld [vmem:[%s21189_s4 + $0x550] ss:$24 sps:$4 sm:$0xff]  }
 0x312   : > { %2517 = vmatprep.subr.bf16.mxu0 %v15477_v31  ;;  %v15555_v31 = vld [vmem:[%s21189_s4 + $0x584] ss:$24 sps:$4 sm:$0xff]  }
 0x313   : > { %5431 = vmatpush1.bf16.msra.mxu1 %v15472_v32  ;;  %v15550_v32 = vld [vmem:[%s21189_s4 + $0x1140] ss:$24 sps:$4 sm:$0xff]  }
 0x314   : > { %2509 = vmatmul.mubr.bf16.vlgmr.msra.gmra.mrb[8].mxu0 %v18161_v35  ;;  %5498 = vmatprep.subr.bf16.mxu1 %v15480_v33  ;;  %v15558_v33 = vld [vmem:[%s21189_s4 + $0x1174] ss:$24 sps:$4 sm:$0xff]  }
 0x315   : > { %2518 = vmatpush1.bf16.msra.mxu0 %v15475_v34  ;;  %2549 = vmatprep.mubr.bf16.mxu0 %v16910_v59  ;;  %v15553_v34 = vld [vmem:[%s21189_s4 + $0x580] ss:$24 sps:$4 sm:$0xff]  }
 0x316   : > { %5449 = vmatmul.mubr.bf16.vlgmr.msra.gmra.mrb[12].mxu1 %v18171_v38  ;;  %2519 = vmatprep.subr.bf16.mxu0 %v15483_v36  ;;  %v15561_v36 = vld [vmem:[%s21189_s4 + $0x5b4] ss:$24 sps:$4 sm:$0xff]  }
 0x317   : > { %5499 = vmatpush1.bf16.msra.mxu1 %v15478_v37  ;;  %5530 = vmatprep.mubr.bf16.mxu1 %v16910_v59  ;;  %v15556_v37 = vld [vmem:[%s21189_s4 + $0x1170] ss:$24 sps:$4 sm:$0xff]  }
 0x318   : > { %5500 = vmatprep.subr.bf16.mxu1 %v15486_v39  ;;  %v15564_v39 = vld [vmem:[%s21189_s4 + $0x11a4] ss:$24 sps:$4 sm:$0xff]  }
 0x319   : > { %2520 = vmatpush1.bf16.msra.mxu0 %v15481_v40  ;;  %v15559_v40 = vld [vmem:[%s21189_s4 + $0x5b0] ss:$24 sps:$4 sm:$0xff]  }
 0x31a   : > { %2521 = vmatprep.subr.bf16.mxu0 %v15489_v41  ;;  %v15567_v41 = vld [vmem:[%s21189_s4 + $0x5e4] ss:$24 sps:$4 sm:$0xff]  }
 0x31b   : > { %5501 = vmatpush1.bf16.msra.mxu1 %v15484_v42  ;;  %v15562_v42 = vld [vmem:[%s21189_s4 + $0x11a0] ss:$24 sps:$4 sm:$0xff]  }
 0x31c   : > { %5502 = vmatprep.subr.bf16.mxu1 %v15492_v43  ;;  %v15570_v43 = vld [vmem:[%s21189_s4 + $0x11d4] ss:$24 sps:$4 sm:$0xff]  }
 0x31d   : > { %2522 = vmatpush1.bf16.msra.mxu0 %v15487_v44  ;;  %v15565_v44 = vld [vmem:[%s21189_s4 + $0x5e0] ss:$24 sps:$4 sm:$0xff]  }
 0x31e   : > { %2523 = vmatprep.subr.bf16.mxu0 %v15495_v45  ;;  %v15573_v45 = vld [vmem:[%s21189_s4 + $0x604] ss:$24 sps:$4 sm:$0xff]  }
 0x31f   : > { %5503 = vmatpush1.bf16.msra.mxu1 %v15490_v47  ;;  %v15568_v47 = vld [vmem:[%s21189_s4 + $0x11d0] ss:$24 sps:$4 sm:$0xff]  }
 0x320   : > { %5504 = vmatprep.subr.bf16.mxu1 %v15498_v48  ;;  %v15576_v48 = vld [vmem:[%s21189_s4 + $0x1094] ss:$24 sps:$4 sm:$0xff]  }
 0x321   : > { %2524 = vmatpush1.bf16.msra.mxu0 %v15493_v49  ;;  %v15571_v49 = vld [vmem:[%s21189_s4 + $0x600] ss:$24 sps:$4 sm:$0xff]  }
 0x322   : > { %2525 = vmatprep.subr.bf16.mxu0 %v15501_v50  ;;  %v15579_v50 = vld [vmem:[%s21189_s4 + $0x634] ss:$24 sps:$4 sm:$0xff]  }
 0x323   : > { %5505 = vmatpush1.bf16.msra.mxu1 %v15496_v51  ;;  %v15574_v51 = vld [vmem:[%s21189_s4 + $0x1090] ss:$24 sps:$4 sm:$0xff]  }
 0x324   : > { %5506 = vmatprep.subr.bf16.mxu1 %v15504_v52  ;;  %v18374_v52 = vrot.slane %v17240_v20, 5 }
 0x325   : > { %2526 = vmatpush1.bf16.msra.mxu0 %v15499_v53  ;;  %v15582_v53 = vld [vmem:[%s21189_s4 + $0x10c4] ss:$24 sps:$4 sm:$0xff]  }
 0x326   : > { %2527 = vmatprep.subr.bf16.mxu0 %v15507_v54  ;;  %v15577_v54 = vld [vmem:[%s21189_s4 + $0x630] ss:$24 sps:$4 sm:$0xff]  }
 0x327   : > { %5507 = vmatpush1.bf16.msra.mxu1 %v15502_v55  ;;  %v15580_v55 = vld [vmem:[%s21189_s4 + $0x10c0] ss:$24 sps:$4 sm:$0xff]  }
 0x328   : > { %5508 = vmatprep.subr.bf16.mxu1 %v15510_v56  ;;  %v15588_v56 = vld [vmem:[%s21189_s4 + $0x10f4] ss:$24 sps:$4 sm:$0xff]  }
 0x329   : > { %2528 = vmatpush1.bf16.msra.mxu0 %v15505_v58  ;;  %v15583_v58 = vld [vmem:[%s21189_s4 + $0x660] ss:$24 sps:$4 sm:$0xff]  }
 0x32a   : > { %2529 = vmatprep.subr.bf16.mxu0 %v15513_v60  ;;  %v15591_v60 = vld [vmem:[%s21189_s4 + $0x694] ss:$24 sps:$4 sm:$0xff]  }
 0x32b   : > { %5509 = vmatpush1.bf16.msra.mxu1 %v15508_v61  ;;  %v15586_v61 = vld [vmem:[%s21189_s4 + $0x10f0] ss:$24 sps:$4 sm:$0xff]  }
 0x32c   : > { %5510 = vmatprep.subr.bf16.mxu1 %v15516_v62  ;;  %v15594_v62 = vld [vmem:[%s21189_s4 + $0x1124] ss:$24 sps:$4 sm:$0xff]  }
 0x32d   : > { %2530 = vmatpush1.bf16.msra.mxu0 %v15511_v63  ;;  %v15589_v63 = vld [vmem:[%s21189_s4 + $0x690] ss:$24 sps:$4 sm:$0xff]  }
 0x32e   : > { %2531 = vmatprep.subr.bf16.mxu0 %v15519_v0  ;;  %v15597_v0 = vld [vmem:[%s21189_s4 + $0x6c4] ss:$24 sps:$4 sm:$0xff]  }
 0x32f   : > { %5511 = vmatpush1.bf16.msra.mxu1 %v15514_v46  ;;  %v15592_v46 = vld [vmem:[%s21189_s4 + $0x1120] ss:$24 sps:$4 sm:$0xff]  }
 0x330   : > { %5512 = vmatprep.subr.bf16.mxu1 %v15522_v2  ;;  %v15600_v2 = vld [vmem:[%s21189_s4 + $0x1154] ss:$24 sps:$4 sm:$0xff]  }
 0x331   : > { %2532 = vmatpush1.bf16.msra.mxu0 %v15517_v4  ;;  %v15595_v4 = vld [vmem:[%s21189_s4 + $0x6c0] ss:$24 sps:$4 sm:$0xff]  }
 0x332   : > { %2558 = vmatprep.subr.bf16.mxu0 %v15525_v5  ;;  %v15603_v5 = vld [vmem:[%s21189_s4 + $0x6f4] ss:$24 sps:$4 sm:$0xff]  }
 0x333   : > { %5513 = vmatpush1.bf16.msra.mxu1 %v15520_v6  ;;  %v15598_v6 = vld [vmem:[%s21189_s4 + $0x1150] ss:$24 sps:$4 sm:$0xff]  }
 0x334   : > { %2550 = vmatmul.mubr.bf16.vlgmr.msra.gmra.mrb[12].mxu0 %v18161_v35  ;;  %5836 = vmatprep.subr.bf16.mxu1 %v15528_v7  ;;  %v15606_v7 = vld [vmem:[%s21189_s4 + $0x1184] ss:$24 sps:$4 sm:$0xff]  }
 0x335   : > { %2559 = vmatpush1.bf16.msra.mxu0 %v15523_v8  ;;  %2590 = vmatprep.mubr.bf16.mxu0 %v16910_v59  ;;  %v15601_v8 = vld [vmem:[%s21189_s4 + $0x6f0] ss:$24 sps:$4 sm:$0xff]  }
 0x336   : > { %5531 = vmatmul.mubr.bf16.vlgmr.msra.gmra.mrb[8].mxu1 %v18171_v38  ;;  %2560 = vmatprep.subr.bf16.mxu0 %v15531_v9  ;;  %v15609_v9 = vld [vmem:[%s21189_s4 + $0x724] ss:$24 sps:$4 sm:$0xff]  }
 0x337   : > { %5837 = vmatpush1.bf16.msra.mxu1 %v15526_v10  ;;  %5868 = vmatprep.mubr.bf16.mxu1 %v16910_v59  ;;  %v15604_v10 = vld [vmem:[%s21189_s4 + $0x1180] ss:$24 sps:$4 sm:$0xff]  }
 0x338   : > { %5838 = vmatprep.subr.bf16.mxu1 %v15534_v12  ;;  %v15612_v12 = vld [vmem:[%s21189_s4 + $0x11b4] ss:$24 sps:$4 sm:$0xff]  }
 0x339   : > { %2561 = vmatpush1.bf16.msra.mxu0 %v15529_v13  ;;  %v15607_v13 = vld [vmem:[%s21189_s4 + $0x720] ss:$24 sps:$4 sm:$0xff]  }
 0x33a   : > { %2562 = vmatprep.subr.bf16.mxu0 %v15537_v14  ;;  %v15615_v14 = vld [vmem:[%s21189_s4 + $0x754] ss:$24 sps:$4 sm:$0xff]  }
 0x33b   : > { %5839 = vmatpush1.bf16.msra.mxu1 %v15532_v15  ;;  %v15610_v15 = vld [vmem:[%s21189_s4 + $0x11b0] ss:$24 sps:$4 sm:$0xff]  }
 0x33c   : > { %5840 = vmatprep.subr.bf16.mxu1 %v15540_v16  ;;  %v15618_v16 = vld [vmem:[%s21189_s4 + $0x11e4] ss:$24 sps:$4 sm:$0xff]  }
 0x33d   : > { %2563 = vmatpush1.bf16.msra.mxu0 %v15535_v19  ;;  %v15613_v19 = vld [vmem:[%s21189_s4 + $0x750] ss:$24 sps:$4 sm:$0xff]  }
 0x33e   : > { %2564 = vmatprep.subr.bf16.mxu0 %v15543_v21  ;;  %v15621_v21 = vld [vmem:[%s21189_s4 + $0x60c] ss:$24 sps:$4 sm:$0xff]  }
 0x33f   : > { %5841 = vmatpush1.bf16.msra.mxu1 %v15538_v22  ;;  %v15616_v22 = vld [vmem:[%s21189_s4 + $0x11e0] ss:$24 sps:$4 sm:$0xff]  }
 0x340   : > { %5842 = vmatprep.subr.bf16.mxu1 %v15546_v24  ;;  %v15624_v24 = vld [vmem:[%s21189_s4 + $0x1204] ss:$24 sps:$4 sm:$0xff]  }
 0x341   : > { %2565 = vmatpush1.bf16.msra.mxu0 %v15541_v25  ;;  %v15619_v25 = vld [vmem:[%s21189_s4 + $0x608] ss:$24 sps:$4 sm:$0xff]  }
 0x342   : > { %2566 = vmatprep.subr.bf16.mxu0 %v15549_v27  ;;  %v18470_v27 = vrot.slane %v17234_v18, 2 }
 0x343   : > { %5843 = vmatpush1.bf16.msra.mxu1 %v15544_v28  ;;  %v15627_v28 = vld [vmem:[%s21189_s4 + $0x63c] ss:$24 sps:$4 sm:$0xff]  }
 0x344   : > { %5844 = vmatprep.subr.bf16.mxu1 %v15552_v29  ;;  %v15622_v29 = vld [vmem:[%s21189_s4 + $0x1200] ss:$24 sps:$4 sm:$0xff]  }
 0x345   : > { %2567 = vmatpush1.bf16.msra.mxu0 %v15547_v30  ;;  %v15630_v30 = vld [vmem:[%s21189_s4 + $0x1234] ss:$24 sps:$4 sm:$0xff]  }
 0x346   : > { %2568 = vmatprep.subr.bf16.mxu0 %v15555_v31  ;;  %v15625_v31 = vld [vmem:[%s21189_s4 + $0x638] ss:$24 sps:$4 sm:$0xff]  }
 0x347   : > { %5845 = vmatpush1.bf16.msra.mxu1 %v15550_v32  ;;  %v15633_v32 = vld [vmem:[%s21189_s4 + $0x66c] ss:$24 sps:$4 sm:$0xff]  }
 0x348   : > { %5846 = vmatprep.subr.bf16.mxu1 %v15558_v33  ;;  %v15628_v33 = vld [vmem:[%s21189_s4 + $0x1230] ss:$24 sps:$4 sm:$0xff]  }
 0x349   : > { %2569 = vmatpush1.bf16.msra.mxu0 %v15553_v34  ;;  %v15636_v34 = vld [vmem:[%s21189_s4 + $0x1264] ss:$24 sps:$4 sm:$0xff]  }
 0x34a   : > { %2570 = vmatprep.subr.bf16.mxu0 %v15561_v36  ;;  %v15631_v36 = vld [vmem:[%s21189_s4 + $0x668] ss:$24 sps:$4 sm:$0xff]  }
 0x34b   : > { %5847 = vmatpush1.bf16.msra.mxu1 %v15556_v37  ;;  %v15639_v37 = vld [vmem:[%s21189_s4 + $0x69c] ss:$24 sps:$4 sm:$0xff]  }
 0x34c   : > { %5848 = vmatprep.subr.bf16.mxu1 %v15564_v39  ;;  %v15634_v39 = vld [vmem:[%s21189_s4 + $0x1260] ss:$24 sps:$4 sm:$0xff]  }
 0x34d   : > { %2571 = vmatpush1.bf16.msra.mxu0 %v15559_v40  ;;  %v15642_v40 = vld [vmem:[%s21189_s4 + $0x1294] ss:$24 sps:$4 sm:$0xff]  }
 0x34e   : > { %2572 = vmatprep.subr.bf16.mxu0 %v15567_v41  ;;  %v15637_v41 = vld [vmem:[%s21189_s4 + $0x698] ss:$24 sps:$4 sm:$0xff]  }
 0x34f   : > { %5849 = vmatpush1.bf16.msra.mxu1 %v15562_v42  ;;  %v15645_v42 = vld [vmem:[%s21189_s4 + $0x6cc] ss:$24 sps:$4 sm:$0xff]  }
 0x350   : > { %5850 = vmatprep.subr.bf16.mxu1 %v15570_v43  ;;  %v15640_v43 = vld [vmem:[%s21189_s4 + $0x1290] ss:$24 sps:$4 sm:$0xff]  }
 0x351   : > { %2573 = vmatpush1.bf16.msra.mxu0 %v15565_v44  ;;  %v15648_v44 = vld [vmem:[%s21189_s4 + $0x12c4] ss:$24 sps:$4 sm:$0xff]  }
 0x352   : > { %2896 = vmatprep.subr.bf16.mxu0 %v15573_v45  ;;  %v15643_v45 = vld [vmem:[%s21189_s4 + $0x6c8] ss:$24 sps:$4 sm:$0xff]  }
 0x353   : > { %5851 = vmatpush1.bf16.msra.mxu1 %v15568_v47  ;;  %v15651_v47 = vld [vmem:[%s21189_s4 + $0x6fc] ss:$24 sps:$4 sm:$0xff]  }
 0x354   : > { %2591 = vmatmul.mubr.bf16.vlgmr.msra.gmra.mrb[16].mxu0 %v18161_v35  ;;  %5918 = vmatprep.subr.bf16.mxu1 %v15576_v48  ;;  %v15585_v35 = vld [vmem:[%s21189_s4 + $0x664] ss:$24 sps:$4 sm:$0xff]   ;;  %v15646_v48 = vld [vmem:[%s21189_s4 + $0x12c0] ss:$24 sps:$4 sm:$0xff]  }
 0x355   : > { %2897 = vmatpush1.bf16.msra.mxu0 %v15571_v49  ;;  %2928 = vmatprep.mubr.bf16.mxu0 %v16910_v59  ;;  %v15654_v49 = vld [vmem:[%s21189_s4 + $0x12f4] ss:$24 sps:$4 sm:$0xff]  }
 0x356   : > { %5869 = vmatmul.mubr.bf16.vlgmr.msra.gmra.mrb[12].mxu1 %v18374_v52  ;;  %2898 = vmatprep.subr.bf16.mxu0 %v15579_v50  ;;  %v15649_v50 = vld [vmem:[%s21189_s4 + $0x6f8] ss:$24 sps:$4 sm:$0xff]  }
 0x357   : > { %5919 = vmatpush1.bf16.msra.mxu1 %v15574_v51  ;;  %5950 = vmatprep.mubr.bf16.mxu1 %v16910_v59  ;;  %v15657_v51 = vld [vmem:[%s21189_s4 + $0x72c] ss:$24 sps:$4 sm:$0xff]  }
 0x358   : > { %5920 = vmatprep.subr.bf16.mxu1 %v15582_v53  ;;  %v15652_v53 = vld [vmem:[%s21189_s4 + $0x12f0] ss:$24 sps:$4 sm:$0xff]  }
 0x359   : > { %2899 = vmatpush1.bf16.msra.mxu0 %v15577_v54  ;;  %v15660_v54 = vld [vmem:[%s21189_s4 + $0x1324] ss:$24 sps:$4 sm:$0xff]  }
 0x35a   : > { %2900 = vmatprep.subr.bf16.mxu0 %v15585_v35  ;;  %v15655_v35 = vld [vmem:[%s21189_s4 + $0x728] ss:$24 sps:$4 sm:$0xff]  }
 0x35b   : > { %5921 = vmatpush1.bf16.msra.mxu1 %v15580_v55  ;;  %v15663_v55 = vld [vmem:[%s21189_s4 + $0x75c] ss:$24 sps:$4 sm:$0xff]  }
 0x35c   : > { %5922 = vmatprep.subr.bf16.mxu1 %v15588_v56  ;;  %v15658_v56 = vld [vmem:[%s21189_s4 + $0x1320] ss:$24 sps:$4 sm:$0xff]  }
 0x35d   : > { %2901 = vmatpush1.bf16.msra.mxu0 %v15583_v58  ;;  %v15666_v58 = vld [vmem:[%s21189_s4 + $0x1354] ss:$24 sps:$4 sm:$0xff]  }
 0x35e   : > { %2902 = vmatprep.subr.bf16.mxu0 %v15591_v60  ;;  %v15661_v60 = vld [vmem:[%s21189_s4 + $0x758] ss:$24 sps:$4 sm:$0xff]  }
 0x35f   : > { %5923 = vmatpush1.bf16.msra.mxu1 %v15586_v61  ;;  %v15669_v61 = vld [vmem:[%s21189_s4 + $0x614] ss:$24 sps:$4 sm:$0xff]  }
 0x360   : > { %5924 = vmatprep.subr.bf16.mxu1 %v15594_v62  ;;  %v15664_v62 = vld [vmem:[%s21189_s4 + $0x1350] ss:$24 sps:$4 sm:$0xff]  }
 0x361   : > { %2903 = vmatpush1.bf16.msra.mxu0 %v15589_v63  ;;  %v15672_v63 = vld [vmem:[%s21189_s4 + $0x1214] ss:$24 sps:$4 sm:$0xff]  }
 0x362   : > { %2904 = vmatprep.subr.bf16.mxu0 %v15597_v0  ;;  %v15667_v0 = vld [vmem:[%s21189_s4 + $0x610] ss:$24 sps:$4 sm:$0xff]  }
 0x363   : > { %5925 = vmatpush1.bf16.msra.mxu1 %v15592_v46  ;;  %v15675_v46 = vld [vmem:[%s21189_s4 + $0x644] ss:$24 sps:$4 sm:$0xff]  }
 0x364   : > { %5926 = vmatprep.subr.bf16.mxu1 %v15600_v2  ;;  %v15670_v2 = vld [vmem:[%s21189_s4 + $0x1210] ss:$24 sps:$4 sm:$0xff]  }
 0x365   : > { %2905 = vmatpush1.bf16.msra.mxu0 %v15595_v4  ;;  %v18580_v4 = vrot.slane %v17234_v18, 6 }
 0x366   : > { %2906 = vmatprep.subr.bf16.mxu0 %v15603_v5  ;;  %v15678_v5 = vld [vmem:[%s21189_s4 + $0x1244] ss:$24 sps:$4 sm:$0xff]  }
 0x367   : > { %5927 = vmatpush1.bf16.msra.mxu1 %v15598_v6  ;;  %v15673_v6 = vld [vmem:[%s21189_s4 + $0x640] ss:$24 sps:$4 sm:$0xff]  }
 0x368   : > { %5928 = vmatprep.subr.bf16.mxu1 %v15606_v7  ;;  %v15681_v7 = vld [vmem:[%s21189_s4 + $0x674] ss:$24 sps:$4 sm:$0xff]  }
 0x369   : > { %2907 = vmatpush1.bf16.msra.mxu0 %v15601_v8  ;;  %v15676_v8 = vld [vmem:[%s21189_s4 + $0x1240] ss:$24 sps:$4 sm:$0xff]  }
 0x36a   : > { %2908 = vmatprep.subr.bf16.mxu0 %v15609_v9  ;;  %v15684_v9 = vld [vmem:[%s21189_s4 + $0x1274] ss:$24 sps:$4 sm:$0xff]  }
 0x36b   : > { %5929 = vmatpush1.bf16.msra.mxu1 %v15604_v10  ;;  %v15679_v10 = vld [vmem:[%s21189_s4 + $0x670] ss:$24 sps:$4 sm:$0xff]  }
 0x36c   : > { %5930 = vmatprep.subr.bf16.mxu1 %v15612_v12  ;;  %v15687_v12 = vld [vmem:[%s21189_s4 + $0x6a4] ss:$24 sps:$4 sm:$0xff]  }
 0x36d   : > { %2909 = vmatpush1.bf16.msra.mxu0 %v15607_v13  ;;  %v15682_v13 = vld [vmem:[%s21189_s4 + $0x1270] ss:$24 sps:$4 sm:$0xff]  }
 0x36e   : > { %2910 = vmatprep.subr.bf16.mxu0 %v15615_v14  ;;  %v15690_v14 = vld [vmem:[%s21189_s4 + $0x12a4] ss:$24 sps:$4 sm:$0xff]  }
 0x36f   : > { %5931 = vmatpush1.bf16.msra.mxu1 %v15610_v15  ;;  %v15685_v15 = vld [vmem:[%s21189_s4 + $0x6a0] ss:$24 sps:$4 sm:$0xff]  }
 0x370   : > { %5932 = vmatprep.subr.bf16.mxu1 %v15618_v16  ;;  %v15693_v16 = vld [vmem:[%s21189_s4 + $0x6d4] ss:$24 sps:$4 sm:$0xff]  }
 0x371   : > { %2911 = vmatpush1.bf16.msra.mxu0 %v15613_v19  ;;  %v15688_v19 = vld [vmem:[%s21189_s4 + $0x12a0] ss:$24 sps:$4 sm:$0xff]  }
 0x372   : > { %2937 = vmatprep.subr.bf16.mxu0 %v15621_v21  ;;  %v15696_v21 = vld [vmem:[%s21189_s4 + $0x12d4] ss:$24 sps:$4 sm:$0xff]  }
 0x373   : > { %5933 = vmatpush1.bf16.msra.mxu1 %v15616_v22  ;;  %v15691_v22 = vld [vmem:[%s21189_s4 + $0x6d0] ss:$24 sps:$4 sm:$0xff]  }
 0x374   : > { %2929 = vmatmul.mubr.bf16.vlgmr.msra.gmra.mrb[8].mxu0 %v18470_v27  ;;  %6256 = vmatprep.subr.bf16.mxu1 %v15624_v24  ;;  %v15699_v24 = vld [vmem:[%s21189_s4 + $0x704] ss:$24 sps:$4 sm:$0xff]  }
 0x375   : > { %2938 = vmatpush1.bf16.msra.mxu0 %v15619_v25  ;;  %2969 = vmatprep.mubr.bf16.mxu0 %v16910_v59  ;;  %v15694_v25 = vld [vmem:[%s21189_s4 + $0x12d0] ss:$24 sps:$4 sm:$0xff]  }
 0x376   : > { %5951 = vmatmul.mubr.bf16.vlgmr.msra.gmra.mrb[8].mxu1 %v18374_v52  ;;  %2939 = vmatprep.subr.bf16.mxu0 %v15627_v28  ;;  %v15702_v28 = vld [vmem:[%s21189_s4 + $0x1304] ss:$24 sps:$4 sm:$0xff]  }
 0x377   : > { %6257 = vmatpush1.bf16.msra.mxu1 %v15622_v29  ;;  %6288 = vmatprep.mubr.bf16.mxu1 %v16910_v59  ;;  %v15697_v29 = vld [vmem:[%s21189_s4 + $0x700] ss:$24 sps:$4 sm:$0xff]  }
 0x378   : > { %6258 = vmatprep.subr.bf16.mxu1 %v15630_v30  ;;  %v15705_v30 = vld [vmem:[%s21189_s4 + $0x734] ss:$24 sps:$4 sm:$0xff]  }
 0x379   : > { %2940 = vmatpush1.bf16.msra.mxu0 %v15625_v31  ;;  %v15700_v31 = vld [vmem:[%s21189_s4 + $0x1300] ss:$24 sps:$4 sm:$0xff]  }
 0x37a   : > { %2941 = vmatprep.subr.bf16.mxu0 %v15633_v32  ;;  %v15708_v32 = vld [vmem:[%s21189_s4 + $0x1334] ss:$24 sps:$4 sm:$0xff]  }
 0x37b   : > { %6259 = vmatpush1.bf16.msra.mxu1 %v15628_v33  ;;  %v15703_v33 = vld [vmem:[%s21189_s4 + $0x730] ss:$24 sps:$4 sm:$0xff]  }
 0x37c   : > { %6260 = vmatprep.subr.bf16.mxu1 %v15636_v34  ;;  %v15711_v34 = vld [vmem:[%s21189_s4 + $0x764] ss:$24 sps:$4 sm:$0xff]  }
 0x37d   : > { %2942 = vmatpush1.bf16.msra.mxu0 %v15631_v36  ;;  %v15706_v36 = vld [vmem:[%s21189_s4 + $0x1330] ss:$24 sps:$4 sm:$0xff]  }
 0x37e   : > { %2943 = vmatprep.subr.bf16.mxu0 %v15639_v37  ;;  %v15714_v37 = vld [vmem:[%s21189_s4 + $0x1364] ss:$24 sps:$4 sm:$0xff]  }
 0x37f   : > { %6261 = vmatpush1.bf16.msra.mxu1 %v15634_v39  ;;  %v15709_v39 = vld [vmem:[%s21189_s4 + $0x760] ss:$24 sps:$4 sm:$0xff]  }
 0x380   : > { %6262 = vmatprep.subr.bf16.mxu1 %v15642_v40  ;;  %v15717_v40 = vld [vmem:[%s21189_s4 + $0x784] ss:$24 sps:$4 sm:$0xff]  }
 0x381   : > { %2944 = vmatpush1.bf16.msra.mxu0 %v15637_v41  ;;  %v15712_v41 = vld [vmem:[%s21189_s4 + $0x1360] ss:$24 sps:$4 sm:$0xff]  }
 0x382   : > { %2945 = vmatprep.subr.bf16.mxu0 %v15645_v42  ;;  %v15720_v42 = vld [vmem:[%s21189_s4 + $0x1384] ss:$24 sps:$4 sm:$0xff]  }
 0x383   : > { %6263 = vmatpush1.bf16.msra.mxu1 %v15640_v43  ;;  %v15715_v43 = vld [vmem:[%s21189_s4 + $0x780] ss:$24 sps:$4 sm:$0xff]  }
 0x384   : > { %6264 = vmatprep.subr.bf16.mxu1 %v15648_v44  ;;  %v15723_v44 = vld [vmem:[%s21189_s4 + $0x7b4] ss:$24 sps:$4 sm:$0xff]  }
 0x385   : > { %2946 = vmatpush1.bf16.msra.mxu0 %v15643_v45  ;;  %v15718_v45 = vld [vmem:[%s21189_s4 + $0x1380] ss:$24 sps:$4 sm:$0xff]  }
 0x386   : > { %2947 = vmatprep.subr.bf16.mxu0 %v15651_v47  ;;  %v15726_v47 = vld [vmem:[%s21189_s4 + $0x13b4] ss:$24 sps:$4 sm:$0xff]  }
 0x387   : > { %6265 = vmatpush1.bf16.msra.mxu1 %v15646_v48  ;;  %v15721_v48 = vld [vmem:[%s21189_s4 + $0x7b0] ss:$24 sps:$4 sm:$0xff]  }
 0x388   : > { %6266 = vmatprep.subr.bf16.mxu1 %v15654_v49  ;;  %v15729_v49 = vld [vmem:[%s21189_s4 + $0x7e4] ss:$24 sps:$4 sm:$0xff]  }
 0x389   : > { %2948 = vmatpush1.bf16.msra.mxu0 %v15649_v50  ;;  %v15732_v50 = vld [vmem:[%s21189_s4 + $0x13e4] ss:$24 sps:$4 sm:$0xff]  }
 0x38a   : > { %2949 = vmatprep.subr.bf16.mxu0 %v15657_v51  ;;  %v15727_v51 = vld [vmem:[%s21189_s4 + $0x7e0] ss:$24 sps:$4 sm:$0xff]  }
 0x38b   : > { %6267 = vmatpush1.bf16.msra.mxu1 %v15652_v53  ;;  %v15735_v53 = vld [vmem:[%s21189_s4 + $0x814] ss:$24 sps:$4 sm:$0xff]  }
 0x38c   : > { %6268 = vmatprep.subr.bf16.mxu1 %v15660_v54  ;;  %v15730_v54 = vld [vmem:[%s21189_s4 + $0x13e0] ss:$24 sps:$4 sm:$0xff]  }
 0x38d   : > { %2950 = vmatpush1.bf16.msra.mxu0 %v15655_v35  ;;  %v15738_v35 = vld [vmem:[%s21189_s4 + $0x1414] ss:$24 sps:$4 sm:$0xff]  }
 0x38e   : > { %2951 = vmatprep.subr.bf16.mxu0 %v15663_v55  ;;  %v15733_v55 = vld [vmem:[%s21189_s4 + $0x810] ss:$24 sps:$4 sm:$0xff]  }
 0x38f   : > { %6269 = vmatpush1.bf16.msra.mxu1 %v15658_v56  ;;  %v15741_v56 = vld [vmem:[%s21189_s4 + $0x844] ss:$24 sps:$4 sm:$0xff]  }
 0x390   : > { %6270 = vmatprep.subr.bf16.mxu1 %v15666_v58  ;;  %v15736_v58 = vld [vmem:[%s21189_s4 + $0x1410] ss:$24 sps:$4 sm:$0xff]  }
 0x391   : > { %2952 = vmatpush1.bf16.msra.mxu0 %v15661_v60  ;;  %v15744_v60 = vld [vmem:[%s21189_s4 + $0x1444] ss:$24 sps:$4 sm:$0xff]  }
 0x392   : > { %2978 = vmatprep.subr.bf16.mxu0 %v15669_v61  ;;  %v15739_v61 = vld [vmem:[%s21189_s4 + $0x840] ss:$24 sps:$4 sm:$0xff]  }
 0x393   : > { %6271 = vmatpush1.bf16.msra.mxu1 %v15664_v62  ;;  %v15747_v62 = vld [vmem:[%s21189_s4 + $0x874] ss:$24 sps:$4 sm:$0xff]  }
 0x394   : > { %2970 = vmatmul.mubr.bf16.vlgmr.msra.gmra.mrb[12].mxu0 %v18470_v27  ;;  %6338 = vmatprep.subr.bf16.mxu1 %v15672_v63  ;;  %v15742_v63 = vld [vmem:[%s21189_s4 + $0x1440] ss:$24 sps:$4 sm:$0xff]  }
 0x395   : > { %2979 = vmatpush1.bf16.msra.mxu0 %v15667_v0  ;;  %3010 = vmatprep.mubr.bf16.mxu0 %v16910_v59  ;;  %v15750_v0 = vld [vmem:[%s21189_s4 + $0x1474] ss:$24 sps:$4 sm:$0xff]  }
 0x396   : > { %6289 = vmatmul.mubr.bf16.vlgmr.msra.gmra.mrb[12].mxu1 %v18580_v4  ;;  %2980 = vmatprep.subr.bf16.mxu0 %v15675_v46  ;;  %v15745_v46 = vld [vmem:[%s21189_s4 + $0x870] ss:$24 sps:$4 sm:$0xff]  }
 0x397   : > { %6339 = vmatpush1.bf16.msra.mxu1 %v15670_v2  ;;  %6370 = vmatprep.mubr.bf16.mxu1 %v16910_v59  ;;  %v15753_v2 = vld [vmem:[%s21189_s4 + $0x8a4] ss:$24 sps:$4 sm:$0xff]  }
 0x398   : > { %6340 = vmatprep.subr.bf16.mxu1 %v15678_v5  ;;  %v15748_v5 = vld [vmem:[%s21189_s4 + $0x1470] ss:$24 sps:$4 sm:$0xff]  }
 0x399   : > { %2981 = vmatpush1.bf16.msra.mxu0 %v15673_v6  ;;  %v15756_v6 = vld [vmem:[%s21189_s4 + $0x14a4] ss:$24 sps:$4 sm:$0xff]  }
 0x39a   : > { %2982 = vmatprep.subr.bf16.mxu0 %v15681_v7  ;;  %v15751_v7 = vld [vmem:[%s21189_s4 + $0x8a0] ss:$24 sps:$4 sm:$0xff]  }
 0x39b   : > { %6341 = vmatpush1.bf16.msra.mxu1 %v15676_v8  ;;  %v15759_v8 = vld [vmem:[%s21189_s4 + $0x8d4] ss:$24 sps:$4 sm:$0xff]  }
 0x39c   : > { %6342 = vmatprep.subr.bf16.mxu1 %v15684_v9  ;;  %v15754_v9 = vld [vmem:[%s21189_s4 + $0x14a0] ss:$24 sps:$4 sm:$0xff]  }
 0x39d   : > { %2983 = vmatpush1.bf16.msra.mxu0 %v15679_v10  ;;  %v15762_v10 = vld [vmem:[%s21189_s4 + $0x14d4] ss:$24 sps:$4 sm:$0xff]  }
 0x39e   : > { %2984 = vmatprep.subr.bf16.mxu0 %v15687_v12  ;;  %v15757_v12 = vld [vmem:[%s21189_s4 + $0x8d0] ss:$24 sps:$4 sm:$0xff]  }
 0x39f   : > { %6343 = vmatpush1.bf16.msra.mxu1 %v15682_v13  ;;  %v15765_v13 = vld [vmem:[%s21189_s4 + $0x78c] ss:$24 sps:$4 sm:$0xff]  }
 0x3a0   : > { %6344 = vmatprep.subr.bf16.mxu1 %v15690_v14  ;;  %v15760_v14 = vld [vmem:[%s21189_s4 + $0x14d0] ss:$24 sps:$4 sm:$0xff]  }
 0x3a1   : > { %2985 = vmatpush1.bf16.msra.mxu0 %v15685_v15  ;;  %v15768_v15 = vld [vmem:[%s21189_s4 + $0x1394] ss:$24 sps:$4 sm:$0xff]  }
 0x3a2   : > { %2986 = vmatprep.subr.bf16.mxu0 %v15693_v16  ;;  %v15763_v16 = vld [vmem:[%s21189_s4 + $0x788] ss:$24 sps:$4 sm:$0xff]  }
 0x3a3   : > { %6345 = vmatpush1.bf16.msra.mxu1 %v15688_v19  ;;  %v15771_v19 = vld [vmem:[%s21189_s4 + $0x7bc] ss:$24 sps:$4 sm:$0xff]  }
 0x3a4   : > { %6346 = vmatprep.subr.bf16.mxu1 %v15696_v21  ;;  %v15766_v21 = vld [vmem:[%s21189_s4 + $0x1390] ss:$24 sps:$4 sm:$0xff]  }
 0x3a5   : > { %2987 = vmatpush1.bf16.msra.mxu0 %v15691_v22  ;;  %v18783_v22 = vrot.slane %v17240_v20, 6 }
 0x3a6   : > { %2988 = vmatprep.subr.bf16.mxu0 %v15699_v24  ;;  %v15774_v24 = vld [vmem:[%s21189_s4 + $0x13c4] ss:$24 sps:$4 sm:$0xff]  }
 0x3a7   : > { %6347 = vmatpush1.bf16.msra.mxu1 %v15694_v25  ;;  %v15769_v25 = vld [vmem:[%s21189_s4 + $0x7b8] ss:$24 sps:$4 sm:$0xff]  }
 0x3a8   : > { %6348 = vmatprep.subr.bf16.mxu1 %v15702_v28  ;;  %v15777_v28 = vld [vmem:[%s21189_s4 + $0x7ec] ss:$24 sps:$4 sm:$0xff]  }
 0x3a9   : > { %2989 = vmatpush1.bf16.msra.mxu0 %v15697_v29  ;;  %v15772_v29 = vld [vmem:[%s21189_s4 + $0x13c0] ss:$24 sps:$4 sm:$0xff]  }
 0x3aa   : > { %2990 = vmatprep.subr.bf16.mxu0 %v15705_v30  ;;  %v15780_v30 = vld [vmem:[%s21189_s4 + $0x13f4] ss:$24 sps:$4 sm:$0xff]  }
 0x3ab   : > { %6349 = vmatpush1.bf16.msra.mxu1 %v15700_v31  ;;  %v15775_v31 = vld [vmem:[%s21189_s4 + $0x7e8] ss:$24 sps:$4 sm:$0xff]  }
 0x3ac   : > { %6350 = vmatprep.subr.bf16.mxu1 %v15708_v32  ;;  %v15783_v32 = vld [vmem:[%s21189_s4 + $0x81c] ss:$24 sps:$4 sm:$0xff]  }
 0x3ad   : > { %2991 = vmatpush1.bf16.msra.mxu0 %v15703_v33  ;;  %v15778_v33 = vld [vmem:[%s21189_s4 + $0x13f0] ss:$24 sps:$4 sm:$0xff]  }
 0x3ae   : > { %2992 = vmatprep.subr.bf16.mxu0 %v15711_v34  ;;  %v15786_v34 = vld [vmem:[%s21189_s4 + $0x1424] ss:$24 sps:$4 sm:$0xff]  }
 0x3af   : > { %6351 = vmatpush1.bf16.msra.mxu1 %v15706_v36  ;;  %v15781_v36 = vld [vmem:[%s21189_s4 + $0x818] ss:$24 sps:$4 sm:$0xff]  }
 0x3b0   : > { %6352 = vmatprep.subr.bf16.mxu1 %v15714_v37  ;;  %v15789_v37 = vld [vmem:[%s21189_s4 + $0x84c] ss:$24 sps:$4 sm:$0xff]  }
 0x3b1   : > { %2993 = vmatpush1.bf16.msra.mxu0 %v15709_v39  ;;  %v15784_v39 = vld [vmem:[%s21189_s4 + $0x1420] ss:$24 sps:$4 sm:$0xff]  }
 0x3b2   : > { %3316 = vmatprep.subr.bf16.mxu0 %v15717_v40  ;;  %v15792_v40 = vld [vmem:[%s21189_s4 + $0x1454] ss:$24 sps:$4 sm:$0xff]  }
 0x3b3   : > { %6353 = vmatpush1.bf16.msra.mxu1 %v15712_v41  ;;  %v15787_v41 = vld [vmem:[%s21189_s4 + $0x848] ss:$24 sps:$4 sm:$0xff]  }
 0x3b4   : > { %3011 = vmatmul.mubr.bf16.vlgmr.msra.gmra.mrb[16].mxu0 %v18470_v27  ;;  %6676 = vmatprep.subr.bf16.mxu1 %v15720_v42  ;;  %v15724_v27 = vld [vmem:[%s21189_s4 + $0x13b0] ss:$24 sps:$4 sm:$0xff]   ;;  %v15795_v42 = vld [vmem:[%s21189_s4 + $0x87c] ss:$24 sps:$4 sm:$0xff]  }
 0x3b5   : > { %3317 = vmatpush1.bf16.msra.mxu0 %v15715_v43  ;;  %3348 = vmatprep.mubr.bf16.mxu0 %v16910_v59  ;;  %v15790_v43 = vld [vmem:[%s21189_s4 + $0x1450] ss:$24 sps:$4 sm:$0xff]  }
 0x3b6   : > { %6371 = vmatmul.mubr.bf16.vlgmr.msra.gmra.mrb[8].mxu1 %v18580_v4  ;;  %3318 = vmatprep.subr.bf16.mxu0 %v15723_v44  ;;  %v15798_v44 = vld [vmem:[%s21189_s4 + $0x1484] ss:$24 sps:$4 sm:$0xff]  }
 0x3b7   : > { %6677 = vmatpush1.bf16.msra.mxu1 %v15718_v45  ;;  %6708 = vmatprep.mubr.bf16.mxu1 %v16910_v59  ;;  %v15793_v45 = vld [vmem:[%s21189_s4 + $0x878] ss:$24 sps:$4 sm:$0xff]  }
 0x3b8   : > { %6678 = vmatprep.subr.bf16.mxu1 %v15726_v47  ;;  %v15801_v47 = vld [vmem:[%s21189_s4 + $0x8ac] ss:$24 sps:$4 sm:$0xff]  }
 0x3b9   : > { %3319 = vmatpush1.bf16.msra.mxu0 %v15721_v48  ;;  %v15796_v48 = vld [vmem:[%s21189_s4 + $0x1480] ss:$24 sps:$4 sm:$0xff]  }
 0x3ba   : > { %3320 = vmatprep.subr.bf16.mxu0 %v15729_v49  ;;  %v15804_v49 = vld [vmem:[%s21189_s4 + $0x14b4] ss:$24 sps:$4 sm:$0xff]  }
 0x3bb   : > { %6679 = vmatpush1.bf16.msra.mxu1 %v15724_v27  ;;  %v15799_v27 = vld [vmem:[%s21189_s4 + $0x8a8] ss:$24 sps:$4 sm:$0xff]  }
 0x3bc   : > { %6680 = vmatprep.subr.bf16.mxu1 %v15732_v50  ;;  %v15807_v50 = vld [vmem:[%s21189_s4 + $0x8dc] ss:$24 sps:$4 sm:$0xff]  }
 0x3bd   : > { %3321 = vmatpush1.bf16.msra.mxu0 %v15727_v51  ;;  %v15802_v51 = vld [vmem:[%s21189_s4 + $0x14b0] ss:$24 sps:$4 sm:$0xff]  }
 0x3be   : > { %3322 = vmatprep.subr.bf16.mxu0 %v15735_v53  ;;  %v15810_v53 = vld [vmem:[%s21189_s4 + $0x14e4] ss:$24 sps:$4 sm:$0xff]  }
 0x3bf   : > { %6681 = vmatpush1.bf16.msra.mxu1 %v15730_v54  ;;  %v15805_v54 = vld [vmem:[%s21189_s4 + $0x8d8] ss:$24 sps:$4 sm:$0xff]  }
 0x3c0   : > { %6682 = vmatprep.subr.bf16.mxu1 %v15738_v35  ;;  %v15813_v35 = vld [vmem:[%s21189_s4 + $0x90c] ss:$24 sps:$4 sm:$0xff]  }
 0x3c1   : > { %3323 = vmatpush1.bf16.msra.mxu0 %v15733_v55  ;;  %v15808_v55 = vld [vmem:[%s21189_s4 + $0x14e0] ss:$24 sps:$4 sm:$0xff]  }
 0x3c2   : > { %3324 = vmatprep.subr.bf16.mxu0 %v15741_v56  ;;  %v15816_v56 = vld [vmem:[%s21189_s4 + $0x1504] ss:$24 sps:$4 sm:$0xff]  }
 0x3c3   : > { %6683 = vmatpush1.bf16.msra.mxu1 %v15736_v58  ;;  %v15811_v58 = vld [vmem:[%s21189_s4 + $0x908] ss:$24 sps:$4 sm:$0xff]  }
 0x3c4   : > { %6684 = vmatprep.subr.bf16.mxu1 %v15744_v60  ;;  %v15819_v60 = vld [vmem:[%s21189_s4 + $0x93c] ss:$24 sps:$4 sm:$0xff]  }
 0x3c5   : > { %3325 = vmatpush1.bf16.msra.mxu0 %v15739_v61  ;;  %v15814_v61 = vld [vmem:[%s21189_s4 + $0x1500] ss:$24 sps:$4 sm:$0xff]  }
 0x3c6   : > { %3326 = vmatprep.subr.bf16.mxu0 %v15747_v62  ;;  %v15822_v62 = vld [vmem:[%s21189_s4 + $0x1534] ss:$24 sps:$4 sm:$0xff]  }
 0x3c7   : > { %6685 = vmatpush1.bf16.msra.mxu1 %v15742_v63  ;;  %v15817_v63 = vld [vmem:[%s21189_s4 + $0x938] ss:$24 sps:$4 sm:$0xff]  }
 0x3c8   : > { %6686 = vmatprep.subr.bf16.mxu1 %v15750_v0  ;;  %v15825_v0 = vld [vmem:[%s21189_s4 + $0x96c] ss:$24 sps:$4 sm:$0xff]  }
 0x3c9   : > { %3327 = vmatpush1.bf16.msra.mxu0 %v15745_v46  ;;  %v15828_v46 = vld [vmem:[%s21189_s4 + $0x1564] ss:$24 sps:$4 sm:$0xff]  }
 0x3ca   : > { %3328 = vmatprep.subr.bf16.mxu0 %v15753_v2  ;;  %v15823_v2 = vld [vmem:[%s21189_s4 + $0x968] ss:$24 sps:$4 sm:$0xff]  }
 0x3cb   : > { %6687 = vmatpush1.bf16.msra.mxu1 %v15748_v5  ;;  %v15831_v5 = vld [vmem:[%s21189_s4 + $0x99c] ss:$24 sps:$4 sm:$0xff]  }
 0x3cc   : > { %6688 = vmatprep.subr.bf16.mxu1 %v15756_v6  ;;  %v15826_v6 = vld [vmem:[%s21189_s4 + $0x1560] ss:$24 sps:$4 sm:$0xff]  }
 0x3cd   : > { %3329 = vmatpush1.bf16.msra.mxu0 %v15751_v7  ;;  %v15834_v7 = vld [vmem:[%s21189_s4 + $0x1594] ss:$24 sps:$4 sm:$0xff]  }
 0x3ce   : > { %3330 = vmatprep.subr.bf16.mxu0 %v15759_v8  ;;  %v15829_v8 = vld [vmem:[%s21189_s4 + $0x998] ss:$24 sps:$4 sm:$0xff]  }
 0x3cf   : > { %6689 = vmatpush1.bf16.msra.mxu1 %v15754_v9  ;;  %v15837_v9 = vld [vmem:[%s21189_s4 + $0x9cc] ss:$24 sps:$4 sm:$0xff]  }
 0x3d0   : > { %6690 = vmatprep.subr.bf16.mxu1 %v15762_v10  ;;  %v15832_v10 = vld [vmem:[%s21189_s4 + $0x1590] ss:$24 sps:$4 sm:$0xff]  }
 0x3d1   : > { %3331 = vmatpush1.bf16.msra.mxu0 %v15757_v12  ;;  %v15840_v12 = vld [vmem:[%s21189_s4 + $0x15c4] ss:$24 sps:$4 sm:$0xff]  }
 0x3d2   : > { %3357 = vmatprep.subr.bf16.mxu0 %v15765_v13  ;;  %v15835_v13 = vld [vmem:[%s21189_s4 + $0x9c8] ss:$24 sps:$4 sm:$0xff]  }
 0x3d3   : > { %6691 = vmatpush1.bf16.msra.mxu1 %v15760_v14  ;;  %v15843_v14 = vld [vmem:[%s21189_s4 + $0x9fc] ss:$24 sps:$4 sm:$0xff]  }
 0x3d4   : > { %3349 = vmatmul.mubr.bf16.vlgmr.msra.gmra.mrb[8].mxu0 %v17250_v23  ;;  %6758 = vmatprep.subr.bf16.mxu1 %v15768_v15  ;;  %v15838_v15 = vld [vmem:[%s21189_s4 + $0x15c0] ss:$24 sps:$4 sm:$0xff]  }
 0x3d5   : > { %3358 = vmatpush1.bf16.msra.mxu0 %v15763_v16  ;;  %3389 = vmatprep.mubr.bf16.mxu0 %v16910_v59  ;;  %v15846_v16 = vld [vmem:[%s21189_s4 + $0x15f4] ss:$24 sps:$4 sm:$0xff]  }
 0x3d6   : > { %6709 = vmatmul.mubr.bf16.vlgmr.msra.gmra.mrb[12].mxu1 %v18783_v22  ;;  %3359 = vmatprep.subr.bf16.mxu0 %v15771_v19  ;;  %v15841_v19 = vld [vmem:[%s21189_s4 + $0x9f8] ss:$24 sps:$4 sm:$0xff]  }
 0x3d7   : > { %6759 = vmatpush1.bf16.msra.mxu1 %v15766_v21  ;;  %6790 = vmatprep.mubr.bf16.mxu1 %v16910_v59  ;;  %v15849_v21 = vld [vmem:[%s21189_s4 + $0xa2c] ss:$24 sps:$4 sm:$0xff]  }
 0x3d8   : > { %6760 = vmatprep.subr.bf16.mxu1 %v15774_v24  ;;  %v15844_v24 = vld [vmem:[%s21189_s4 + $0x15f0] ss:$24 sps:$4 sm:$0xff]  }
 0x3d9   : > { %3360 = vmatpush1.bf16.msra.mxu0 %v15769_v25  ;;  %v15852_v25 = vld [vmem:[%s21189_s4 + $0x1624] ss:$24 sps:$4 sm:$0xff]  }
 0x3da   : > { %3361 = vmatprep.subr.bf16.mxu0 %v15777_v28  ;;  %v15847_v28 = vld [vmem:[%s21189_s4 + $0xa28] ss:$24 sps:$4 sm:$0xff]  }
 0x3db   : > { %6761 = vmatpush1.bf16.msra.mxu1 %v15772_v29  ;;  %v15855_v29 = vld [vmem:[%s21189_s4 + $0xa5c] ss:$24 sps:$4 sm:$0xff]  }
 0x3dc   : > { %6762 = vmatprep.subr.bf16.mxu1 %v15780_v30  ;;  %v15850_v30 = vld [vmem:[%s21189_s4 + $0x1620] ss:$24 sps:$4 sm:$0xff]  }
 0x3dd   : > { %3362 = vmatpush1.bf16.msra.mxu0 %v15775_v31  ;;  %v15858_v31 = vld [vmem:[%s21189_s4 + $0x1654] ss:$24 sps:$4 sm:$0xff]  }
 0x3de   : > { %3363 = vmatprep.subr.bf16.mxu0 %v15783_v32  ;;  %v15853_v32 = vld [vmem:[%s21189_s4 + $0xa58] ss:$24 sps:$4 sm:$0xff]  }
 0x3df   : > { %6763 = vmatpush1.bf16.msra.mxu1 %v15778_v33  ;;  %v15861_v33 = vld [vmem:[%s21189_s4 + $0xa8c] ss:$24 sps:$4 sm:$0xff]  }
 0x3e0   : > { %6764 = vmatprep.subr.bf16.mxu1 %v15786_v34  ;;  %v15856_v34 = vld [vmem:[%s21189_s4 + $0x1650] ss:$24 sps:$4 sm:$0xff]  }
 0x3e1   : > { %3364 = vmatpush1.bf16.msra.mxu0 %v15781_v36  ;;  %v15864_v36 = vld [vmem:[%s21189_s4 + $0x1514] ss:$24 sps:$4 sm:$0xff]  }
 0x3e2   : > { %3365 = vmatprep.subr.bf16.mxu0 %v15789_v37  ;;  %v15859_v37 = vld [vmem:[%s21189_s4 + $0xa88] ss:$24 sps:$4 sm:$0xff]  }
 0x3e3   : > { %6765 = vmatpush1.bf16.msra.mxu1 %v15784_v39  ;;  %v15867_v39 = vld [vmem:[%s21189_s4 + $0xabc] ss:$24 sps:$4 sm:$0xff]  }
 0x3e4   : > { %6766 = vmatprep.subr.bf16.mxu1 %v15792_v40  ;;  %v15862_v40 = vld [vmem:[%s21189_s4 + $0x1510] ss:$24 sps:$4 sm:$0xff]  }
 0x3e5   : > { %3366 = vmatpush1.bf16.msra.mxu0 %v15787_v41  ;;  %v18986_v41 = vrot.slane %v17234_v18, 7  ;;  %v15873_v18 = vld [vmem:[%s21189_s4 + $0xaec] ss:$24 sps:$4 sm:$0xff]  }
 0x3e6   : > { %3367 = vmatprep.subr.bf16.mxu0 %v15795_v42  ;;  %v15870_v42 = vld [vmem:[%s21189_s4 + $0x1544] ss:$24 sps:$4 sm:$0xff]  }
 0x3e7   : > { %6767 = vmatpush1.bf16.msra.mxu1 %v15790_v43  ;;  %v15865_v43 = vld [vmem:[%s21189_s4 + $0xab8] ss:$24 sps:$4 sm:$0xff]  }
 0x3e8   : > { %6768 = vmatprep.subr.bf16.mxu1 %v15798_v44  ;;  %v15876_v44 = vld [vmem:[%s21189_s4 + $0x1574] ss:$24 sps:$4 sm:$0xff]  }
 0x3e9   : > { %3368 = vmatpush1.bf16.msra.mxu0 %v15793_v45  ;;  %v15871_v45 = vld [vmem:[%s21189_s4 + $0xae8] ss:$24 sps:$4 sm:$0xff]  }
 0x3ea   : > { %3369 = vmatprep.subr.bf16.mxu0 %v15801_v47  ;;  %v15879_v47 = vld [vmem:[%s21189_s4 + $0xb1c] ss:$24 sps:$4 sm:$0xff]  }
 0x3eb   : > { %6769 = vmatpush1.bf16.msra.mxu1 %v15796_v48  ;;  %v15874_v48 = vld [vmem:[%s21189_s4 + $0x1570] ss:$24 sps:$4 sm:$0xff]  }
 0x3ec   : > { %6770 = vmatprep.subr.bf16.mxu1 %v15804_v49  ;;  %v15882_v49 = vld [vmem:[%s21189_s4 + $0x15a4] ss:$24 sps:$4 sm:$0xff]  }
 0x3ed   : > { %3370 = vmatpush1.bf16.msra.mxu0 %v15799_v27  ;;  %v15877_v27 = vld [vmem:[%s21189_s4 + $0xb18] ss:$24 sps:$4 sm:$0xff]  }
 0x3ee   : > { %3371 = vmatprep.subr.bf16.mxu0 %v15807_v50  ;;  %v15885_v50 = vld [vmem:[%s21189_s4 + $0xb4c] ss:$24 sps:$4 sm:$0xff]  }
 0x3ef   : > { %6771 = vmatpush1.bf16.msra.mxu1 %v15802_v51  ;;  %v15880_v51 = vld [vmem:[%s21189_s4 + $0x15a0] ss:$24 sps:$4 sm:$0xff]  }
 0x3f0   : > { %6772 = vmatprep.subr.bf16.mxu1 %v15810_v53  ;;  %v15888_v53 = vld [vmem:[%s21189_s4 + $0x15d4] ss:$24 sps:$4 sm:$0xff]  }
 0x3f1   : > { %3372 = vmatpush1.bf16.msra.mxu0 %v15805_v54  ;;  %v15883_v54 = vld [vmem:[%s21189_s4 + $0xb48] ss:$24 sps:$4 sm:$0xff]  }
 0x3f2   : > { %3777 = vmatprep.subr.bf16.mxu0 %v15813_v35  ;;  %v15891_v35 = vld [vmem:[%s21189_s4 + $0xb7c] ss:$24 sps:$4 sm:$0xff]  }
 0x3f3   : > { %6773 = vmatpush1.bf16.msra.mxu1 %v15808_v55  ;;  %v15886_v55 = vld [vmem:[%s21189_s4 + $0x15d0] ss:$24 sps:$4 sm:$0xff]  }
 0x3f4   : > { %3390 = vmatmul.mubr.bf16.vlgmr.msra.gmra.mrb[12].mxu0 %v17250_v23  ;;  %7096 = vmatprep.subr.bf16.mxu1 %v15816_v56  ;;  %v15820_v23 = vld [vmem:[%s21189_s4 + $0x1530] ss:$24 sps:$4 sm:$0xff]   ;;  %v15894_v56 = vld [vmem:[%s21189_s4 + $0x1604] ss:$24 sps:$4 sm:$0xff]  }
 0x3f5   : > { %3778 = vmatpush1.bf16.msra.mxu0 %v15811_v58  ;;  %3809 = vmatprep.mubr.bf16.mxu0 %v16910_v59  ;;  %v15889_v58 = vld [vmem:[%s21189_s4 + $0xb78] ss:$24 sps:$4 sm:$0xff]  }
 0x3f6   : > { %6791 = vmatmul.mubr.bf16.vlgmr.msra.gmra.mrb[8].mxu1 %v18783_v22  ;;  %3779 = vmatprep.subr.bf16.mxu0 %v15819_v60  ;;  %v15897_v60 = vld [vmem:[%s21189_s4 + $0xbac] ss:$24 sps:$4 sm:$0xff]  }
 0x3f7   : > { %7097 = vmatpush1.bf16.msra.mxu1 %v15814_v61  ;;  %7128 = vmatprep.mubr.bf16.mxu1 %v16910_v59  ;;  %v15892_v61 = vld [vmem:[%s21189_s4 + $0x1600] ss:$24 sps:$4 sm:$0xff]  }
 0x3f8   : > { %7098 = vmatprep.subr.bf16.mxu1 %v15822_v62  ;;  %v15900_v62 = vld [vmem:[%s21189_s4 + $0x1634] ss:$24 sps:$4 sm:$0xff]  }
 0x3f9   : > { %3780 = vmatpush1.bf16.msra.mxu0 %v15817_v63  ;;  %v15895_v63 = vld [vmem:[%s21189_s4 + $0xba8] ss:$24 sps:$4 sm:$0xff]  }
 0x3fa   : > { %3781 = vmatprep.subr.bf16.mxu0 %v15825_v0  ;;  %v15903_v0 = vld [vmem:[%s21189_s4 + $0xbdc] ss:$24 sps:$4 sm:$0xff]  }
 0x3fb   : > { %7099 = vmatpush1.bf16.msra.mxu1 %v15820_v23  ;;  %v15898_v23 = vld [vmem:[%s21189_s4 + $0x1630] ss:$24 sps:$4 sm:$0xff]  }
 0x3fc   : > { %7100 = vmatprep.subr.bf16.mxu1 %v15828_v46  ;;  %v15906_v46 = vld [vmem:[%s21189_s4 + $0x1664] ss:$24 sps:$4 sm:$0xff]  }
 0x3fd   : > { %3782 = vmatpush1.bf16.msra.mxu0 %v15823_v2  ;;  %v15901_v2 = vld [vmem:[%s21189_s4 + $0xbd8] ss:$24 sps:$4 sm:$0xff]  }
 0x3fe   : > { %3783 = vmatprep.subr.bf16.mxu0 %v15831_v5  ;;  %v15909_v5 = vld [vmem:[%s21189_s4 + $0xc0c] ss:$24 sps:$4 sm:$0xff]  }
 0x3ff   : > { %7101 = vmatpush1.bf16.msra.mxu1 %v15826_v6  ;;  %v15904_v6 = vld [vmem:[%s21189_s4 + $0x1660] ss:$24 sps:$4 sm:$0xff]  }
 0x400   : > { %7102 = vmatprep.subr.bf16.mxu1 %v15834_v7  ;;  %v15912_v7 = vld [vmem:[%s21189_s4 + $0x1684] ss:$24 sps:$4 sm:$0xff]  }
 0x401   : > { %3784 = vmatpush1.bf16.msra.mxu0 %v15829_v8  ;;  %v15907_v8 = vld [vmem:[%s21189_s4 + $0xc08] ss:$24 sps:$4 sm:$0xff]  }
 0x402   : > { %3785 = vmatprep.subr.bf16.mxu0 %v15837_v9  ;;  %v15915_v9 = vld [vmem:[%s21189_s4 + $0xc3c] ss:$24 sps:$4 sm:$0xff]  }
 0x403   : > { %7103 = vmatpush1.bf16.msra.mxu1 %v15832_v10  ;;  %v15910_v10 = vld [vmem:[%s21189_s4 + $0x1680] ss:$24 sps:$4 sm:$0xff]  }
 0x404   : > { %7104 = vmatprep.subr.bf16.mxu1 %v15840_v12  ;;  %v15918_v12 = vld [vmem:[%s21189_s4 + $0x16b4] ss:$24 sps:$4 sm:$0xff]  }
 0x405   : > { %3786 = vmatpush1.bf16.msra.mxu0 %v15835_v13  ;;  %v15913_v13 = vld [vmem:[%s21189_s4 + $0xc38] ss:$24 sps:$4 sm:$0xff]  }
 0x406   : > { %3787 = vmatprep.subr.bf16.mxu0 %v15843_v14  ;;  %v15921_v14 = vld [vmem:[%s21189_s4 + $0xc6c] ss:$24 sps:$4 sm:$0xff]  }
 0x407   : > { %7105 = vmatpush1.bf16.msra.mxu1 %v15838_v15  ;;  %v15924_v15 = vld [vmem:[%s21189_s4 + $0x16e4] ss:$24 sps:$4 sm:$0xff]  }
 0x408   : > { %7106 = vmatprep.subr.bf16.mxu1 %v15846_v16  ;;  %v15919_v16 = vld [vmem:[%s21189_s4 + $0xc68] ss:$24 sps:$4 sm:$0xff]  }
 0x409   : > { %3788 = vmatpush1.bf16.msra.mxu0 %v15841_v19  ;;  %v15927_v19 = vld [vmem:[%s21189_s4 + $0xc9c] ss:$24 sps:$4 sm:$0xff]  }
 0x40a   : > { %3789 = vmatprep.subr.bf16.mxu0 %v15849_v21  ;;  %v15922_v21 = vld [vmem:[%s21189_s4 + $0x16e0] ss:$24 sps:$4 sm:$0xff]  }
 0x40b   : > { %7107 = vmatpush1.bf16.msra.mxu1 %v15844_v24  ;;  %v15930_v24 = vld [vmem:[%s21189_s4 + $0x1714] ss:$24 sps:$4 sm:$0xff]  }
 0x40c   : > { %7108 = vmatprep.subr.bf16.mxu1 %v15852_v25  ;;  %v15925_v25 = vld [vmem:[%s21189_s4 + $0xc98] ss:$24 sps:$4 sm:$0xff]  }
 0x40d   : > { %3790 = vmatpush1.bf16.msra.mxu0 %v15847_v28  ;;  %v15933_v28 = vld [vmem:[%s21189_s4 + $0xccc] ss:$24 sps:$4 sm:$0xff]  }
 0x40e   : > { %3791 = vmatprep.subr.bf16.mxu0 %v15855_v29  ;;  %v15928_v29 = vld [vmem:[%s21189_s4 + $0x1710] ss:$24 sps:$4 sm:$0xff]  }
 0x40f   : > { %7109 = vmatpush1.bf16.msra.mxu1 %v15850_v30  ;;  %v15936_v30 = vld [vmem:[%s21189_s4 + $0x1744] ss:$24 sps:$4 sm:$0xff]  }
 0x410   : > { %7110 = vmatprep.subr.bf16.mxu1 %v15858_v31  ;;  %v15931_v31 = vld [vmem:[%s21189_s4 + $0xcc8] ss:$24 sps:$4 sm:$0xff]  }
 0x411   : > { %3792 = vmatpush1.bf16.msra.mxu0 %v15853_v32  ;;  %v15939_v32 = vld [vmem:[%s21189_s4 + $0xcfc] ss:$24 sps:$4 sm:$0xff]  }
 0x412   : > { %4197 = vmatprep.subr.bf16.mxu0 %v15861_v33  ;;  %v15934_v33 = vld [vmem:[%s21189_s4 + $0x1740] ss:$24 sps:$4 sm:$0xff]  }
 0x413   : > { %7111 = vmatpush1.bf16.msra.mxu1 %v15856_v34  ;;  %v15942_v34 = vld [vmem:[%s21189_s4 + $0x1774] ss:$24 sps:$4 sm:$0xff]  }
 0x414   : > { %3810 = vmatmul.mubr.bf16.vlgmr.msra.gmra.mrb[12].mxu0 %v17356_v57  ;;  %7178 = vmatprep.subr.bf16.mxu1 %v15864_v36  ;;  %v15868_v57 = vld [vmem:[%s21189_s4 + $0x1540] ss:$24 sps:$4 sm:$0xff]  }
 0x415   : > { %4198 = vmatpush1.bf16.msra.mxu0 %v15859_v37  ;;  %4229 = vmatprep.mubr.bf16.mxu0 %v16910_v59  ;;  %v15937_v36 = vld [vmem:[%s21189_s4 + $0xcf8] ss:$24 sps:$4 sm:$0xff]   ;;  %v15945_v37 = vld [vmem:[%s21189_s4 + $0xd2c] ss:$24 sps:$4 sm:$0xff]  }
 0x416   : > { %7129 = vmatmul.mubr.bf16.vlgmr.msra.gmra.mrb[12].mxu1 %v18986_v41  ;;  %4199 = vmatprep.subr.bf16.mxu0 %v15867_v39  ;;  %v15940_v39 = vld [vmem:[%s21189_s4 + $0x1770] ss:$24 sps:$4 sm:$0xff]  }
 0x417   : > { %7179 = vmatpush1.bf16.msra.mxu1 %v15862_v40  ;;  %7210 = vmatprep.mubr.bf16.mxu1 %v16910_v59  ;;  %v15948_v40 = vld [vmem:[%s21189_s4 + $0x17a4] ss:$24 sps:$4 sm:$0xff]  }
 0x418   : > { %7180 = vmatprep.subr.bf16.mxu1 %v15870_v42  ;;  %v15943_v42 = vld [vmem:[%s21189_s4 + $0xd28] ss:$24 sps:$4 sm:$0xff]  }
 0x419   : > { %4200 = vmatpush1.bf16.msra.mxu0 %v15865_v43  ;;  %v15951_v43 = vld [vmem:[%s21189_s4 + $0xd5c] ss:$24 sps:$4 sm:$0xff]  }
 0x41a   : > { %4201 = vmatprep.subr.bf16.mxu0 %v15873_v18  ;;  %v15946_v18 = vld [vmem:[%s21189_s4 + $0x17a0] ss:$24 sps:$4 sm:$0xff]  }
 0x41b   : > { %7181 = vmatpush1.bf16.msra.mxu1 %v15868_v57  ;;  %v15954_v57 = vld [vmem:[%s21189_s4 + $0x17d4] ss:$24 sps:$4 sm:$0xff]  }
 0x41c   : > { %7182 = vmatprep.subr.bf16.mxu1 %v15876_v44  ;;  %v15949_v44 = vld [vmem:[%s21189_s4 + $0xd58] ss:$24 sps:$4 sm:$0xff]  }
 0x41d   : > { %4202 = vmatpush1.bf16.msra.mxu0 %v15871_v45  ;;  %v15957_v45 = vld [vmem:[%s21189_s4 + $0xd8c] ss:$24 sps:$4 sm:$0xff]  }
 0x41e   : > { %4203 = vmatprep.subr.bf16.mxu0 %v15879_v47  ;;  %v15952_v47 = vld [vmem:[%s21189_s4 + $0x17d0] ss:$24 sps:$4 sm:$0xff]  }
 0x41f   : > { %7183 = vmatpush1.bf16.msra.mxu1 %v15874_v48  ;;  %v15960_v48 = vld [vmem:[%s21189_s4 + $0x1694] ss:$24 sps:$4 sm:$0xff]  }
 0x420   : > { %7184 = vmatprep.subr.bf16.mxu1 %v15882_v49  ;;  %v15955_v49 = vld [vmem:[%s21189_s4 + $0xd88] ss:$24 sps:$4 sm:$0xff]  }
 0x421   : > { %4204 = vmatpush1.bf16.msra.mxu0 %v15877_v27  ;;  %v15963_v27 = vld [vmem:[%s21189_s4 + $0xdbc] ss:$24 sps:$4 sm:$0xff]  }
 0x422   : > { %4205 = vmatprep.subr.bf16.mxu0 %v15885_v50  ;;  %v15958_v50 = vld [vmem:[%s21189_s4 + $0x1690] ss:$24 sps:$4 sm:$0xff]  }
 0x423   : > { %7185 = vmatpush1.bf16.msra.mxu1 %v15880_v51  ;;  %v19189_v51 = vrot.slane %v17240_v20, 7  ;;  %v15969_v20 = vld [vmem:[%s21189_s4 + $0xdec] ss:$24 sps:$4 sm:$0xff]  }
 0x424   : > { %7186 = vmatprep.subr.bf16.mxu1 %v15888_v53  ;;  %v15966_v53 = vld [vmem:[%s21189_s4 + $0x16c4] ss:$24 sps:$4 sm:$0xff]  }
 0x425   : > { %4206 = vmatpush1.bf16.msra.mxu0 %v15883_v54  ;;  %v15961_v54 = vld [vmem:[%s21189_s4 + $0xdb8] ss:$24 sps:$4 sm:$0xff]  }
 0x426   : > { %4207 = vmatprep.subr.bf16.mxu0 %v15891_v35  ;;  %v15972_v35 = vld [vmem:[%s21189_s4 + $0x16f4] ss:$24 sps:$4 sm:$0xff]  }
 0x427   : > { %7187 = vmatpush1.bf16.msra.mxu1 %v15886_v55  ;;  %v15967_v55 = vld [vmem:[%s21189_s4 + $0xde8] ss:$24 sps:$4 sm:$0xff]  }
 0x428   : > { %7188 = vmatprep.subr.bf16.mxu1 %v15894_v56  ;;  %v15975_v56 = vld [vmem:[%s21189_s4 + $0xe1c] ss:$24 sps:$4 sm:$0xff]  }
 0x429   : > { %4208 = vmatpush1.bf16.msra.mxu0 %v15889_v58  ;;  %v15970_v58 = vld [vmem:[%s21189_s4 + $0x16f0] ss:$24 sps:$4 sm:$0xff]  }
 0x42a   : > { %4209 = vmatprep.subr.bf16.mxu0 %v15897_v60  ;;  %v15978_v60 = vld [vmem:[%s21189_s4 + $0x1724] ss:$24 sps:$4 sm:$0xff]  }
 0x42b   : > { %7189 = vmatpush1.bf16.msra.mxu1 %v15892_v61  ;;  %v15973_v61 = vld [vmem:[%s21189_s4 + $0xe18] ss:$24 sps:$4 sm:$0xff]  }
 0x42c   : > { %7190 = vmatprep.subr.bf16.mxu1 %v15900_v62  ;;  %v15981_v62 = vld [vmem:[%s21189_s4 + $0xe4c] ss:$24 sps:$4 sm:$0xff]  }
 0x42d   : > { %4210 = vmatpush1.bf16.msra.mxu0 %v15895_v63  ;;  %v15976_v63 = vld [vmem:[%s21189_s4 + $0x1720] ss:$24 sps:$4 sm:$0xff]  }
 0x42e   : > { %4211 = vmatprep.subr.bf16.mxu0 %v15903_v0  ;;  %v15984_v0 = vld [vmem:[%s21189_s4 + $0x1754] ss:$24 sps:$4 sm:$0xff]  }
 0x42f   : > { %7191 = vmatpush1.bf16.msra.mxu1 %v15898_v23  ;;  %v15979_v23 = vld [vmem:[%s21189_s4 + $0xe48] ss:$24 sps:$4 sm:$0xff]  }
 0x430   : > { %7192 = vmatprep.subr.bf16.mxu1 %v15906_v46  ;;  %v15987_v46 = vld [vmem:[%s21189_s4 + $0xe7c] ss:$24 sps:$4 sm:$0xff]  }
 0x431   : > { %4212 = vmatpush1.bf16.msra.mxu0 %v15901_v2  ;;  %v15982_v2 = vld [vmem:[%s21189_s4 + $0x1750] ss:$24 sps:$4 sm:$0xff]  }
 0x432   : > { %4617 = vmatprep.subr.bf16.mxu0 %v15909_v5  ;;  %v15990_v5 = vld [vmem:[%s21189_s4 + $0x1784] ss:$24 sps:$4 sm:$0xff]  }
 0x433   : > { %7193 = vmatpush1.bf16.msra.mxu1 %v15904_v6  ;;  %v15985_v6 = vld [vmem:[%s21189_s4 + $0xe78] ss:$24 sps:$4 sm:$0xff]  }
 0x434   : > { %4230 = vmatmul.mubr.bf16.vlgmr.msra.gmra.mrb[12].mxu0 %v17556_v1  ;;  %7516 = vmatprep.subr.bf16.mxu1 %v15912_v7  ;;  %v15916_v1 = vld [vmem:[%s21189_s4 + $0x16b0] ss:$24 sps:$4 sm:$0xff]   ;;  %v15993_v7 = vld [vmem:[%s21189_s4 + $0xeac] ss:$24 sps:$4 sm:$0xff]  }
 0x435   : > { %4618 = vmatpush1.bf16.msra.mxu0 %v15907_v8  ;;  %4649 = vmatprep.mubr.bf16.mxu0 %v16910_v59  ;;  %v15988_v8 = vld [vmem:[%s21189_s4 + $0x1780] ss:$24 sps:$4 sm:$0xff]  }
 0x436   : > { %7211 = vmatmul.mubr.bf16.vlgmr.msra.gmra.mrb[8].mxu1 %v18986_v41  ;;  %4619 = vmatprep.subr.bf16.mxu0 %v15915_v9  ;;  %v15996_v9 = vld [vmem:[%s21189_s4 + $0x17b4] ss:$24 sps:$4 sm:$0xff]  }
 0x437   : > { %7517 = vmatpush1.bf16.msra.mxu1 %v15910_v10  ;;  %7548 = vmatprep.mubr.bf16.mxu1 %v16910_v59  ;;  %v15991_v10 = vld [vmem:[%s21189_s4 + $0xea8] ss:$24 sps:$4 sm:$0xff]  }
 0x438   : > { %7518 = vmatprep.subr.bf16.mxu1 %v15918_v12  ;;  %v15999_v12 = vld [vmem:[%s21189_s4 + $0xedc] ss:$24 sps:$4 sm:$0xff]  }
 0x439   : > { %4620 = vmatpush1.bf16.msra.mxu0 %v15913_v13  ;;  %v15994_v13 = vld [vmem:[%s21189_s4 + $0x17b0] ss:$24 sps:$4 sm:$0xff]  }
 0x43a   : > { %4621 = vmatprep.subr.bf16.mxu0 %v15921_v14  ;;  %v16002_v14 = vld [vmem:[%s21189_s4 + $0x17e4] ss:$24 sps:$4 sm:$0xff]  }
 0x43b   : > { %7519 = vmatpush1.bf16.msra.mxu1 %v15916_v1  ;;  %v15997_v1 = vld [vmem:[%s21189_s4 + $0xed8] ss:$24 sps:$4 sm:$0xff]  }
 0x43c   : > { %7520 = vmatprep.subr.bf16.mxu1 %v15924_v15  ;;  %v16005_v15 = vld [vmem:[%s21189_s4 + $0xf0c] ss:$24 sps:$4 sm:$0xff]  }
 0x43d   : > { %4622 = vmatpush1.bf16.msra.mxu0 %v15919_v16  ;;  %v16000_v16 = vld [vmem:[%s21189_s4 + $0x17e0] ss:$24 sps:$4 sm:$0xff]  }
 0x43e   : > { %4623 = vmatprep.subr.bf16.mxu0 %v15927_v19  ;;  %v16008_v19 = vld [vmem:[%s21189_s4 + $0x1804] ss:$24 sps:$4 sm:$0xff]  }
 0x43f   : > { %7521 = vmatpush1.bf16.msra.mxu1 %v15922_v21  ;;  %v16003_v21 = vld [vmem:[%s21189_s4 + $0xf08] ss:$24 sps:$4 sm:$0xff]  }
 0x440   : > { %7522 = vmatprep.subr.bf16.mxu1 %v15930_v24  ;;  %v16011_v24 = vld [vmem:[%s21189_s4 + $0xf3c] ss:$24 sps:$4 sm:$0xff]  }
 0x441   : > { %4624 = vmatpush1.bf16.msra.mxu0 %v15925_v25  ;;  %v16006_v25 = vld [vmem:[%s21189_s4 + $0x1800] ss:$24 sps:$4 sm:$0xff]  }
 0x442   : > { %4625 = vmatprep.subr.bf16.mxu0 %v15933_v28  ;;  %v16014_v28 = vld [vmem:[%s21189_s4 + $0x1834] ss:$24 sps:$4 sm:$0xff]  }
 0x443   : > { %7523 = vmatpush1.bf16.msra.mxu1 %v15928_v29  ;;  %v16009_v29 = vld [vmem:[%s21189_s4 + $0xf38] ss:$24 sps:$4 sm:$0xff]  }
 0x444   : > { %7524 = vmatprep.subr.bf16.mxu1 %v15936_v30  ;;  %v16017_v30 = vld [vmem:[%s21189_s4 + $0xf6c] ss:$24 sps:$4 sm:$0xff]  }
 0x445   : > { %4626 = vmatpush1.bf16.msra.mxu0 %v15931_v31  ;;  %v16020_v31 = vld [vmem:[%s21189_s4 + $0x1864] ss:$24 sps:$4 sm:$0xff]  }
 0x446   : > { %4627 = vmatprep.subr.bf16.mxu0 %v15939_v32  ;;  %v16015_v32 = vld [vmem:[%s21189_s4 + $0xf68] ss:$24 sps:$4 sm:$0xff]  }
 0x447   : > { %7525 = vmatpush1.bf16.msra.mxu1 %v15934_v33  ;;  %v16023_v33 = vld [vmem:[%s21189_s4 + $0xf9c] ss:$24 sps:$4 sm:$0xff]  }
 0x448   : > { %7526 = vmatprep.subr.bf16.mxu1 %v15942_v34  ;;  %v16018_v34 = vld [vmem:[%s21189_s4 + $0x1860] ss:$24 sps:$4 sm:$0xff]  }
 0x449   : > { %4628 = vmatpush1.bf16.msra.mxu0 %v15937_v36  ;;  %v16026_v36 = vld [vmem:[%s21189_s4 + $0x1894] ss:$24 sps:$4 sm:$0xff]  }
 0x44a   : > { %4629 = vmatprep.subr.bf16.mxu0 %v15945_v37  ;;  %v16021_v37 = vld [vmem:[%s21189_s4 + $0xf98] ss:$24 sps:$4 sm:$0xff]  }
 0x44b   : > { %7527 = vmatpush1.bf16.msra.mxu1 %v15940_v39  ;;  %v16029_v39 = vld [vmem:[%s21189_s4 + $0xfcc] ss:$24 sps:$4 sm:$0xff]  }
 0x44c   : > { %7528 = vmatprep.subr.bf16.mxu1 %v15948_v40  ;;  %v16024_v40 = vld [vmem:[%s21189_s4 + $0x1890] ss:$24 sps:$4 sm:$0xff]  }
 0x44d   : > { %4630 = vmatpush1.bf16.msra.mxu0 %v15943_v42  ;;  %v16032_v42 = vld [vmem:[%s21189_s4 + $0x18c4] ss:$24 sps:$4 sm:$0xff]  }
 0x44e   : > { %4631 = vmatprep.subr.bf16.mxu0 %v15951_v43  ;;  %v16027_v43 = vld [vmem:[%s21189_s4 + $0xfc8] ss:$24 sps:$4 sm:$0xff]  }
 0x44f   : > { %7529 = vmatpush1.bf16.msra.mxu1 %v15946_v18  ;;  %v16035_v18 = vld [vmem:[%s21189_s4 + $0xffc] ss:$24 sps:$4 sm:$0xff]  }
 0x450   : > { %7530 = vmatprep.subr.bf16.mxu1 %v15954_v57  ;;  %v16030_v57 = vld [vmem:[%s21189_s4 + $0x18c0] ss:$24 sps:$4 sm:$0xff]  }
 0x451   : > { %4632 = vmatpush1.bf16.msra.mxu0 %v15949_v44  ;;  %v16038_v44 = vld [vmem:[%s21189_s4 + $0x18f4] ss:$24 sps:$4 sm:$0xff]  }
 0x452   : > { %5037 = vmatprep.subr.bf16.mxu0 %v15957_v45  ;;  %v16033_v45 = vld [vmem:[%s21189_s4 + $0xff8] ss:$24 sps:$4 sm:$0xff]  }
 0x453   : > { %7531 = vmatpush1.bf16.msra.mxu1 %v15952_v47  ;;  %v16041_v47 = vld [vmem:[%s21189_s4 + $0x102c] ss:$24 sps:$4 sm:$0xff]  }
 0x454   : > { %4650 = vmatmul.mubr.bf16.vlgmr.msra.gmra.mrb[12].mxu0 %v17759_v11  ;;  %7598 = vmatprep.subr.bf16.mxu1 %v15960_v48  ;;  %v15964_v11 = vld [vmem:[%s21189_s4 + $0x16c0] ss:$24 sps:$4 sm:$0xff]  }
 0x455   : > { %5038 = vmatpush1.bf16.msra.mxu0 %v15955_v49  ;;  %5069 = vmatprep.mubr.bf16.mxu0 %v16910_v59  ;;  %v16036_v49 = vld [vmem:[%s21189_s4 + $0x18f0] ss:$24 sps:$4 sm:$0xff]  }
 0x456   : > { %7549 = vmatmul.mubr.bf16.vlgmr.msra.gmra.mrb[12].mxu1 %v19189_v51  ;;  %5039 = vmatprep.subr.bf16.mxu0 %v15963_v27 }
 0x457   : > { %7599 = vmatpush1.bf16.msra.mxu1 %v15958_v50  ;;  %7630 = vmatprep.mubr.bf16.mxu1 %v16910_v59  ;;  %v16044_v50 = vld [vmem:[%s21189_s4 + $0x1924] ss:$24 sps:$4 sm:$0xff]  }
 0x458   : > { %7600 = vmatprep.subr.bf16.mxu1 %v15966_v53 }
 0x459   : > { %5040 = vmatpush1.bf16.msra.mxu0 %v15961_v54  ;;  %v16039_v54 = vld [vmem:[%s21189_s4 + $0x1028] ss:$24 sps:$4 sm:$0xff]  }
 0x45a   : > { %5041 = vmatprep.subr.bf16.mxu0 %v15969_v20 }
 0x45b   : > { %7601 = vmatpush1.bf16.msra.mxu1 %v15964_v11  ;;  %v16047_v11 = vld [vmem:[%s21189_s4 + $0x105c] ss:$24 sps:$4 sm:$0xff]  }
 0x45c   : > { %7602 = vmatprep.subr.bf16.mxu1 %v15972_v35  ;;  %v16042_v35 = vld [vmem:[%s21189_s4 + $0x1920] ss:$24 sps:$4 sm:$0xff]  }
 0x45d   : > { %5042 = vmatpush1.bf16.msra.mxu0 %v15967_v55  ;;  %v16050_v55 = vld [vmem:[%s21189_s4 + $0x1954] ss:$24 sps:$4 sm:$0xff]  }
 0x45e   : > { %5043 = vmatprep.subr.bf16.mxu0 %v15975_v56  ;;  %v16045_v56 = vld [vmem:[%s21189_s4 + $0x1058] ss:$24 sps:$4 sm:$0xff]  }
 0x45f   : > { %7603 = vmatpush1.bf16.msra.mxu1 %v15970_v58  ;;  %v16053_v58 = vld [vmem:[%s21189_s4 + $0x108c] ss:$24 sps:$4 sm:$0xff]  }
 0x460   : > { %7604 = vmatprep.subr.bf16.mxu1 %v15978_v60  ;;  %v16048_v60 = vld [vmem:[%s21189_s4 + $0x1950] ss:$24 sps:$4 sm:$0xff]  }
 0x461   : > { %5044 = vmatpush1.bf16.msra.mxu0 %v15973_v61  ;;  %v16056_v61 = vld [vmem:[%s21189_s4 + $0x1814] ss:$24 sps:$4 sm:$0xff]  }
 0x462   : > { %5045 = vmatprep.subr.bf16.mxu0 %v15981_v62  ;;  %v16051_v62 = vld [vmem:[%s21189_s4 + $0x1088] ss:$24 sps:$4 sm:$0xff]  }
 0x463   : > { %7605 = vmatpush1.bf16.msra.mxu1 %v15976_v63  ;;  %v16059_v63 = vld [vmem:[%s21189_s4 + $0x10bc] ss:$24 sps:$4 sm:$0xff]  }
 0x464   : > { %7606 = vmatprep.subr.bf16.mxu1 %v15984_v0  ;;  %v16054_v0 = vld [vmem:[%s21189_s4 + $0x1810] ss:$24 sps:$4 sm:$0xff]  }
 0x465   : > { %5046 = vmatpush1.bf16.msra.mxu0 %v15979_v23  ;;  %v16062_v23 = vld [vmem:[%s21189_s4 + $0x1844] ss:$24 sps:$4 sm:$0xff]  }
 0x466   : > { %5047 = vmatprep.subr.bf16.mxu0 %v15987_v46  ;;  %v16057_v46 = vld [vmem:[%s21189_s4 + $0x10b8] ss:$24 sps:$4 sm:$0xff]  }
 0x467   : > { %7607 = vmatpush1.bf16.msra.mxu1 %v15982_v2  ;;  %v16065_v2 = vld [vmem:[%s21189_s4 + $0x10ec] ss:$24 sps:$4 sm:$0xff]  }
 0x468   : > { %7608 = vmatprep.subr.bf16.mxu1 %v15990_v5  ;;  %v16068_v5 = vld [vmem:[%s21189_s4 + $0x1874] ss:$24 sps:$4 sm:$0xff]  }
 0x469   : > { %5048 = vmatpush1.bf16.msra.mxu0 %v15985_v6  ;;  %v16063_v6 = vld [vmem:[%s21189_s4 + $0x10e8] ss:$24 sps:$4 sm:$0xff]  }
 0x46a   : > { %5049 = vmatprep.subr.bf16.mxu0 %v15993_v7  ;;  %v16071_v7 = vld [vmem:[%s21189_s4 + $0x111c] ss:$24 sps:$4 sm:$0xff]  }
 0x46b   : > { %7609 = vmatpush1.bf16.msra.mxu1 %v15988_v8  ;;  %v16066_v8 = vld [vmem:[%s21189_s4 + $0x1870] ss:$24 sps:$4 sm:$0xff]  }
 0x46c   : > { %7610 = vmatprep.subr.bf16.mxu1 %v15996_v9  ;;  %v16074_v9 = vld [vmem:[%s21189_s4 + $0x18a4] ss:$24 sps:$4 sm:$0xff]  }
 0x46d   : > { %5050 = vmatpush1.bf16.msra.mxu0 %v15991_v10  ;;  %v16069_v10 = vld [vmem:[%s21189_s4 + $0x1118] ss:$24 sps:$4 sm:$0xff]  }
 0x46e   : > { %5051 = vmatprep.subr.bf16.mxu0 %v15999_v12  ;;  %v16077_v12 = vld [vmem:[%s21189_s4 + $0x114c] ss:$24 sps:$4 sm:$0xff]  }
 0x46f   : > { %7611 = vmatpush1.bf16.msra.mxu1 %v15994_v13  ;;  %v16072_v13 = vld [vmem:[%s21189_s4 + $0x18a0] ss:$24 sps:$4 sm:$0xff]  }
 0x470   : > { %7612 = vmatprep.subr.bf16.mxu1 %v16002_v14  ;;  %v16080_v14 = vld [vmem:[%s21189_s4 + $0x18d4] ss:$24 sps:$4 sm:$0xff]  }
 0x471   : > { %5052 = vmatpush1.bf16.msra.mxu0 %v15997_v1  ;;  %v16075_v1 = vld [vmem:[%s21189_s4 + $0x1148] ss:$24 sps:$4 sm:$0xff]  }
 0x472   : > { %5457 = vmatprep.subr.bf16.mxu0 %v16005_v15  ;;  %v16083_v15 = vld [vmem:[%s21189_s4 + $0x117c] ss:$24 sps:$4 sm:$0xff]  }
 0x473   : > { %7613 = vmatpush1.bf16.msra.mxu1 %v16000_v16  ;;  %v16078_v16 = vld [vmem:[%s21189_s4 + $0x18d0] ss:$24 sps:$4 sm:$0xff]  }
 0x474   : > { %5070 = vmatmul.mubr.bf16.vlgmr.msra.gmra.mrb[12].mxu0 %v17965_v26  ;;  %7934 = vmatprep.subr.bf16.mxu1 %v16008_v19  ;;  %v16012_v26 = vld [vmem:[%s21189_s4 + $0x1830] ss:$24 sps:$4 sm:$0xff]   ;;  %v16086_v19 = vld [vmem:[%s21189_s4 + $0x1904] ss:$24 sps:$4 sm:$0xff]  }
 0x475   : > { %5458 = vmatpush1.bf16.msra.mxu0 %v16003_v21  ;;  %5489 = vmatprep.mubr.bf16.mxu0 %v16910_v59  ;;  %v16081_v21 = vld [vmem:[%s21189_s4 + $0x1178] ss:$24 sps:$4 sm:$0xff]  }
 0x476   : > { %7631 = vmatmul.mubr.bf16.vlgmr.msra.gmra.mrb[8].mxu1 %v19189_v51  ;;  %5459 = vmatprep.subr.bf16.mxu0 %v16011_v24  ;;  %v16089_v24 = vld [vmem:[%s21189_s4 + $0x11ac] ss:$24 sps:$4 sm:$0xff]  }
 0x477   : > { %7935 = vmatpush1.bf16.msra.mxu1 %v16006_v25  ;;  %7966 = vmatprep.mubr.bf16.mxu1 %v16910_v59 }
 0x478   : > { %7936 = vmatprep.subr.bf16.mxu1 %v16014_v28  ;;  %v16084_v28 = vld [vmem:[%s21189_s4 + $0x1900] ss:$24 sps:$4 sm:$0xff]  }
 0x479   : > { %5460 = vmatpush1.bf16.msra.mxu0 %v16009_v29 }
 0x47a   : > { %5461 = vmatprep.subr.bf16.mxu0 %v16017_v30  ;;  %v16092_v30 = vld [vmem:[%s21189_s4 + $0x1934] ss:$24 sps:$4 sm:$0xff]  }
 0x47b   : > { %7937 = vmatpush1.bf16.msra.mxu1 %v16012_v26 }
 0x47c   : > { %7938 = vmatprep.subr.bf16.mxu1 %v16020_v31  ;;  %v16087_v31 = vld [vmem:[%s21189_s4 + $0x11a8] ss:$24 sps:$4 sm:$0xff]  }
 0x47d   : > { %5462 = vmatpush1.bf16.msra.mxu0 %v16015_v32 }
 0x47e   : > { %5463 = vmatprep.subr.bf16.mxu0 %v16023_v33  ;;  %v16095_v33 = vld [vmem:[%s21189_s4 + $0x11dc] ss:$24 sps:$4 sm:$0xff]  }
 0x47f   : > { %7939 = vmatpush1.bf16.msra.mxu1 %v16018_v34  ;;  %v16090_v34 = vld [vmem:[%s21189_s4 + $0x1930] ss:$24 sps:$4 sm:$0xff]  }
 0x480   : > { %7940 = vmatprep.subr.bf16.mxu1 %v16026_v36  ;;  %v16098_v36 = vld [vmem:[%s21189_s4 + $0x1964] ss:$24 sps:$4 sm:$0xff]  }
 0x481   : > { %5464 = vmatpush1.bf16.msra.mxu0 %v16021_v37  ;;  %v16093_v37 = vld [vmem:[%s21189_s4 + $0x11d8] ss:$24 sps:$4 sm:$0xff]  }
 0x482   : > { %5465 = vmatprep.subr.bf16.mxu0 %v16029_v39  ;;  %v16101_v39 = vld [vmem:[%s21189_s4 + $0x120c] ss:$24 sps:$4 sm:$0xff]  }
 0x483   : > { %7941 = vmatpush1.bf16.msra.mxu1 %v16024_v40  ;;  %v16096_v40 = vld [vmem:[%s21189_s4 + $0x1960] ss:$24 sps:$4 sm:$0xff]  }
 0x484   : > { %7942 = vmatprep.subr.bf16.mxu1 %v16032_v42  ;;  %v16104_v42 = vld [vmem:[%s21189_s4 + $0x1984] ss:$24 sps:$4 sm:$0xff]  }
 0x485   : > { %5466 = vmatpush1.bf16.msra.mxu0 %v16027_v43  ;;  %v16099_v43 = vld [vmem:[%s21189_s4 + $0x1208] ss:$24 sps:$4 sm:$0xff]  }
 0x486   : > { %5467 = vmatprep.subr.bf16.mxu0 %v16035_v18  ;;  %v16107_v18 = vld [vmem:[%s21189_s4 + $0x123c] ss:$24 sps:$4 sm:$0xff]  }
 0x487   : > { %v19351_v48 = vpop.f32.mrb[16].mxu0  ;;  %7943 = vmatpush1.bf16.msra.mxu1 %v16030_v57  ;;  %v16102_v57 = vld [vmem:[%s21189_s4 + $0x1980] ss:$24 sps:$4 sm:$0xff]  }
 0x488   : > { %v19356_v27 = vpop.f32.mrb[17].mxu0  ;;  %7944 = vmatprep.subr.bf16.mxu1 %v16038_v44  ;;  %v16110_v44 = vld [vmem:[%s21189_s4 + $0x19b4] ss:$24 sps:$4 sm:$0xff]  }
 0x489   : > { %v3016_v53 = vpop.f32.mrb[18].mxu0  ;;  %5468 = vmatpush1.bf16.msra.mxu0 %v16033_v45  ;;  %v16105_v45 = vld [vmem:[%s21189_s4 + $0x1238] ss:$24 sps:$4 sm:$0xff]  }
 0x48a   : > { %v3017_v20 = vpop.f32.mrb[19].mxu0  ;;  %5469 = vmatprep.subr.bf16.mxu0 %v16041_v47  ;;  %v16113_v47 = vld [vmem:[%s21189_s4 + $0x126c] ss:$24 sps:$4 sm:$0xff]   ;;  %v16119_v53 = vld [vmem:[%s21189_s4 + $0x129c] ss:$24 sps:$4 sm:$0xff]  }
 0x48b   : > { %7945 = vmatpush1.bf16.msra.mxu1 %v16036_v49  ;;  %v16116_v49 = vld [vmem:[%s21189_s4 + $0x19e4] ss:$24 sps:$4 sm:$0xff]   ;;  %v16122_v20 = vld [vmem:[%s21189_s4 + $0x1a14] ss:$24 sps:$4 sm:$0xff]  }
 0x48c   : > { %7946 = vmatprep.subr.bf16.mxu1 %v16044_v50  ;;  %v16111_v50 = vld [vmem:[%s21189_s4 + $0x1268] ss:$24 sps:$4 sm:$0xff]  }
 0x48d   : > { %5470 = vmatpush1.bf16.msra.mxu0 %v16039_v54  ;;  %v16114_v54 = vld [vmem:[%s21189_s4 + $0x19e0] ss:$24 sps:$4 sm:$0xff]  }
 0x48e   : > { %5471 = vmatprep.subr.bf16.mxu0 %v16047_v11  ;;  %v16117_v11 = vld [vmem:[%s21189_s4 + $0x1298] ss:$24 sps:$4 sm:$0xff]  }
 0x48f   : > { %7947 = vmatpush1.bf16.msra.mxu1 %v16042_v35  ;;  %v16125_v35 = vld [vmem:[%s21189_s4 + $0x12cc] ss:$24 sps:$4 sm:$0xff]  }
 0x490   : > { %7948 = vmatprep.subr.bf16.mxu1 %v16050_v55  ;;  %v16120_v55 = vld [vmem:[%s21189_s4 + $0x1a10] ss:$24 sps:$4 sm:$0xff]  }
 0x491   : > { %5472 = vmatpush1.bf16.msra.mxu0 %v16045_v56  ;;  %v16128_v56 = vld [vmem:[%s21189_s4 + $0x1a44] ss:$24 sps:$4 sm:$0xff]  }
 0x492   : > { %5877 = vmatprep.subr.bf16.mxu0 %v16053_v58  ;;  %v16123_v58 = vld [vmem:[%s21189_s4 + $0x12c8] ss:$24 sps:$4 sm:$0xff]  }
 0x493   : > { %7949 = vmatpush1.bf16.msra.mxu1 %v16048_v60  ;;  %v16131_v60 = vld [vmem:[%s21189_s4 + $0x12fc] ss:$24 sps:$4 sm:$0xff]  }
 0x494   : > { %5490 = vmatmul.mubr.bf16.vlgmr.msra.gmra.mrb[12].mxu0 %v18171_v38  ;;  %8016 = vmatprep.subr.bf16.mxu1 %v16056_v61  ;;  %v16060_v38 = vld [vmem:[%s21189_s4 + $0x1840] ss:$24 sps:$4 sm:$0xff]  }
 0x495   : > { %5878 = vmatpush1.bf16.msra.mxu0 %v16051_v62  ;;  %5909 = vmatprep.mubr.bf16.mxu0 %v16910_v59  ;;  %v16126_v61 = vld [vmem:[%s21189_s4 + $0x1a40] ss:$24 sps:$4 sm:$0xff]   ;;  %v16134_v62 = vld [vmem:[%s21189_s4 + $0x1a74] ss:$24 sps:$4 sm:$0xff]  }
 0x496   : > { %7967 = vmatmul.mubr.bf16.vlgmr.msra.gmra.mrb[12].mxu1 %v17232_v17  ;;  %5879 = vmatprep.subr.bf16.mxu0 %v16059_v63  ;;  %v16129_v63 = vld [vmem:[%s21189_s4 + $0x12f8] ss:$24 sps:$4 sm:$0xff]  }
 0x497   : > { %8017 = vmatpush1.bf16.msra.mxu1 %v16054_v0  ;;  %8048 = vmatprep.mubr.bf16.mxu1 %v16910_v59  ;;  %v16137_v0 = vld [vmem:[%s21189_s4 + $0x132c] ss:$24 sps:$4 sm:$0xff]  }
 0x498   : > { %8018 = vmatprep.subr.bf16.mxu1 %v16062_v23  ;;  %v16132_v23 = vld [vmem:[%s21189_s4 + $0x1a70] ss:$24 sps:$4 sm:$0xff]  }
 0x499   : > { %5880 = vmatpush1.bf16.msra.mxu0 %v16057_v46  ;;  %v16140_v46 = vld [vmem:[%s21189_s4 + $0x1aa4] ss:$24 sps:$4 sm:$0xff]  }
 0x49a   : > { %5881 = vmatprep.subr.bf16.mxu0 %v16065_v2  ;;  %v16135_v2 = vld [vmem:[%s21189_s4 + $0x1328] ss:$24 sps:$4 sm:$0xff]  }
 0x49b   : > { %8019 = vmatpush1.bf16.msra.mxu1 %v16060_v38  ;;  %v16143_v38 = vld [vmem:[%s21189_s4 + $0x135c] ss:$24 sps:$4 sm:$0xff]  }
 0x49c   : > { %8020 = vmatprep.subr.bf16.mxu1 %v16068_v5  ;;  %v16138_v5 = vld [vmem:[%s21189_s4 + $0x1aa0] ss:$24 sps:$4 sm:$0xff]  }
 0x49d   : > { %5882 = vmatpush1.bf16.msra.mxu0 %v16063_v6  ;;  %v16146_v6 = vld [vmem:[%s21189_s4 + $0x1ad4] ss:$24 sps:$4 sm:$0xff]  }
 0x49e   : > { %5883 = vmatprep.subr.bf16.mxu0 %v16071_v7  ;;  %v16141_v7 = vld [vmem:[%s21189_s4 + $0x1358] ss:$24 sps:$4 sm:$0xff]  }
 0x49f   : > { %8021 = vmatpush1.bf16.msra.mxu1 %v16066_v8  ;;  %v16149_v8 = vld [vmem:[%s21189_s4 + $0x138c] ss:$24 sps:$4 sm:$0xff]  }
 0x4a0   : > { %8022 = vmatprep.subr.bf16.mxu1 %v16074_v9  ;;  %v16144_v9 = vld [vmem:[%s21189_s4 + $0x1ad0] ss:$24 sps:$4 sm:$0xff]  }
 0x4a1   : > { %5884 = vmatpush1.bf16.msra.mxu0 %v16069_v10  ;;  %v16152_v10 = vld [vmem:[%s21189_s4 + $0x1994] ss:$24 sps:$4 sm:$0xff]  }
 0x4a2   : > { %5885 = vmatprep.subr.bf16.mxu0 %v16077_v12  ;;  %v16147_v12 = vld [vmem:[%s21189_s4 + $0x1388] ss:$24 sps:$4 sm:$0xff]  }
 0x4a3   : > { %8023 = vmatpush1.bf16.msra.mxu1 %v16072_v13  ;;  %v16155_v13 = vld [vmem:[%s21189_s4 + $0x13bc] ss:$24 sps:$4 sm:$0xff]  }
 0x4a4   : > { %8024 = vmatprep.subr.bf16.mxu1 %v16080_v14  ;;  %v16150_v14 = vld [vmem:[%s21189_s4 + $0x1990] ss:$24 sps:$4 sm:$0xff]  }
 0x4a5   : > { %5886 = vmatpush1.bf16.msra.mxu0 %v16075_v1  ;;  %v19600_v1 = vshrl.u32 %v17232_v17, 16 }
 0x4a6   : > { %5887 = vmatprep.subr.bf16.mxu0 %v16083_v15  ;;  %v16158_v15 = vld [vmem:[%s21189_s4 + $0x19c4] ss:$24 sps:$4 sm:$0xff]  }
 0x4a7   : > { %v19455_v25 = vpop.f32.mrb[8].mxu0  ;;  %8025 = vmatpush1.bf16.msra.mxu1 %v16078_v16  ;;  %v16153_v16 = vld [vmem:[%s21189_s4 + $0x13b8] ss:$24 sps:$4 sm:$0xff]  }
 0x4a8   : > { %v19460_v29 = vpop.f32.mrb[9].mxu0  ;;  %8026 = vmatprep.subr.bf16.mxu1 %v16086_v19  ;;  %v16156_v19 = vld [vmem:[%s21189_s4 + $0x19c0] ss:$24 sps:$4 sm:$0xff]  }
 0x4a9   : > { %v3354_v26 = vpop.f32.mrb[10].mxu0  ;;  %5888 = vmatpush1.bf16.msra.mxu0 %v16081_v21  ;;  %v16164_v21 = vld [vmem:[%s21189_s4 + $0x19f4] ss:$24 sps:$4 sm:$0xff]  }
 0x4aa   : > { %v3355_v32 = vpop.f32.mrb[11].mxu0  ;;  %5889 = vmatprep.subr.bf16.mxu0 %v16089_v24  ;;  %v16159_v24 = vld [vmem:[%s21189_s4 + $0x13e8] ss:$24 sps:$4 sm:$0xff]   ;;  %v16170_v26 = vld [vmem:[%s21189_s4 + $0x1a24] ss:$24 sps:$4 sm:$0xff]  }
 0x4ab   : > { %8027 = vmatpush1.bf16.msra.mxu1 %v16084_v28  ;;  %v16167_v28 = vld [vmem:[%s21189_s4 + $0x141c] ss:$24 sps:$4 sm:$0xff]   ;;  %v16173_v32 = vld [vmem:[%s21189_s4 + $0x144c] ss:$24 sps:$4 sm:$0xff]  }
 0x4ac   : > { %8028 = vmatprep.subr.bf16.mxu1 %v16092_v30  ;;  %v16162_v30 = vld [vmem:[%s21189_s4 + $0x19f0] ss:$24 sps:$4 sm:$0xff]  }
 0x4ad   : > { %5890 = vmatpush1.bf16.msra.mxu0 %v16087_v31  ;;  %v16165_v31 = vld [vmem:[%s21189_s4 + $0x1418] ss:$24 sps:$4 sm:$0xff]  }
 0x4ae   : > { %5891 = vmatprep.subr.bf16.mxu0 %v16095_v33  ;;  %v16168_v33 = vld [vmem:[%s21189_s4 + $0x1a20] ss:$24 sps:$4 sm:$0xff]  }
 0x4af   : > { %8029 = vmatpush1.bf16.msra.mxu1 %v16090_v34  ;;  %v16176_v34 = vld [vmem:[%s21189_s4 + $0x1a54] ss:$24 sps:$4 sm:$0xff]  }
 0x4b0   : > { %8030 = vmatprep.subr.bf16.mxu1 %v16098_v36  ;;  %v16171_v36 = vld [vmem:[%s21189_s4 + $0x1448] ss:$24 sps:$4 sm:$0xff]  }
 0x4b1   : > { %5892 = vmatpush1.bf16.msra.mxu0 %v16093_v37  ;;  %v16179_v37 = vld [vmem:[%s21189_s4 + $0x147c] ss:$24 sps:$4 sm:$0xff]  }
 0x4b2   : > { %6297 = vmatprep.subr.bf16.mxu0 %v16101_v39  ;;  %v16174_v39 = vld [vmem:[%s21189_s4 + $0x1a50] ss:$24 sps:$4 sm:$0xff]  }
 0x4b3   : > { %8031 = vmatpush1.bf16.msra.mxu1 %v16096_v40  ;;  %v16182_v40 = vld [vmem:[%s21189_s4 + $0x1a84] ss:$24 sps:$4 sm:$0xff]  }
 0x4b4   : > { %5910 = vmatmul.mubr.bf16.vlgmr.msra.gmra.mrb[12].mxu0 %v18374_v52  ;;  %8356 = vmatprep.subr.bf16.mxu1 %v16104_v42  ;;  %v16108_v52 = vld [vmem:[%s21189_s4 + $0x19b0] ss:$24 sps:$4 sm:$0xff]  }
 0x4b5   : > { %6298 = vmatpush1.bf16.msra.mxu0 %v16099_v43  ;;  %6329 = vmatprep.mubr.bf16.mxu0 %v16910_v59  ;;  %v16177_v42 = vld [vmem:[%s21189_s4 + $0x1478] ss:$24 sps:$4 sm:$0xff]   ;;  %v16185_v43 = vld [vmem:[%s21189_s4 + $0x14ac] ss:$24 sps:$4 sm:$0xff]  }
 0x4b6   : > { %8049 = vmatmul.mubr.bf16.vlgmr.msra.gmra.mrb[8].mxu1 %v17232_v17  ;;  %6299 = vmatprep.subr.bf16.mxu0 %v16107_v18  ;;  %v16180_v18 = vld [vmem:[%s21189_s4 + $0x1a80] ss:$24 sps:$4 sm:$0xff]  }
 0x4b7   : > { %8357 = vmatpush1.bf16.msra.mxu1 %v16102_v57  ;;  %8388 = vmatprep.mubr.bf16.mxu1 %v16910_v59  ;;  %v16188_v57 = vld [vmem:[%s21189_s4 + $0x1ab4] ss:$24 sps:$4 sm:$0xff]  }
 0x4b8   : > { %8358 = vmatprep.subr.bf16.mxu1 %v16110_v44  ;;  %v16183_v44 = vld [vmem:[%s21189_s4 + $0x14a8] ss:$24 sps:$4 sm:$0xff]  }
 0x4b9   : > { %6300 = vmatpush1.bf16.msra.mxu0 %v16105_v45  ;;  %v16191_v45 = vld [vmem:[%s21189_s4 + $0x14dc] ss:$24 sps:$4 sm:$0xff]  }
 0x4ba   : > { %6301 = vmatprep.subr.bf16.mxu0 %v16113_v47  ;;  %v16186_v47 = vld [vmem:[%s21189_s4 + $0x1ab0] ss:$24 sps:$4 sm:$0xff]  }
 0x4bb   : > { %8359 = vmatpush1.bf16.msra.mxu1 %v16108_v52  ;;  %v16194_v52 = vld [vmem:[%s21189_s4 + $0x1ae4] ss:$24 sps:$4 sm:$0xff]  }
 0x4bc   : > { %8360 = vmatprep.subr.bf16.mxu1 %v16116_v49  ;;  %v16189_v49 = vld [vmem:[%s21189_s4 + $0x14d8] ss:$24 sps:$4 sm:$0xff]  }
 0x4bd   : > { %6302 = vmatpush1.bf16.msra.mxu0 %v16111_v50  ;;  %v16197_v50 = vld [vmem:[%s21189_s4 + $0x150c] ss:$24 sps:$4 sm:$0xff]  }
 0x4be   : > { %6303 = vmatprep.subr.bf16.mxu0 %v16119_v53  ;;  %v16192_v53 = vld [vmem:[%s21189_s4 + $0x1ae0] ss:$24 sps:$4 sm:$0xff]  }
 0x4bf   : > { %8361 = vmatpush1.bf16.msra.mxu1 %v16114_v54  ;;  %v16200_v54 = vld [vmem:[%s21189_s4 + $0x1b04] ss:$24 sps:$4 sm:$0xff]  }
 0x4c0   : > { %8362 = vmatprep.subr.bf16.mxu1 %v16122_v20  ;;  %v16195_v20 = vld [vmem:[%s21189_s4 + $0x1508] ss:$24 sps:$4 sm:$0xff]  }
 0x4c1   : > { %6304 = vmatpush1.bf16.msra.mxu0 %v16117_v11  ;;  %v16203_v11 = vld [vmem:[%s21189_s4 + $0x153c] ss:$24 sps:$4 sm:$0xff]  }
 0x4c2   : > { %6305 = vmatprep.subr.bf16.mxu0 %v16125_v35  ;;  %v16198_v35 = vld [vmem:[%s21189_s4 + $0x1b00] ss:$24 sps:$4 sm:$0xff]  }
 0x4c3   : > { %8363 = vmatpush1.bf16.msra.mxu1 %v16120_v55  ;;  %v16206_v55 = vld [vmem:[%s21189_s4 + $0x1b34] ss:$24 sps:$4 sm:$0xff]  }
 0x4c4   : > { %8364 = vmatprep.subr.bf16.mxu1 %v16128_v56  ;;  %v16201_v56 = vld [vmem:[%s21189_s4 + $0x1538] ss:$24 sps:$4 sm:$0xff]  }
 0x4c5   : > { %6306 = vmatpush1.bf16.msra.mxu0 %v16123_v58  ;;  %v16209_v58 = vld [vmem:[%s21189_s4 + $0x156c] ss:$24 sps:$4 sm:$0xff]  }
 0x4c6   : > { %6307 = vmatprep.subr.bf16.mxu0 %v16131_v60  ;;  %v16212_v60 = vld [vmem:[%s21189_s4 + $0x1b64] ss:$24 sps:$4 sm:$0xff]  }
 0x4c7   : > { %8365 = vmatpush1.bf16.msra.mxu1 %v16126_v61  ;;  %v16207_v61 = vld [vmem:[%s21189_s4 + $0x1568] ss:$24 sps:$4 sm:$0xff]  }
 0x4c8   : > { %8366 = vmatprep.subr.bf16.mxu1 %v16134_v62  ;;  %v16215_v62 = vld [vmem:[%s21189_s4 + $0x159c] ss:$24 sps:$4 sm:$0xff]  }
 0x4c9   : > { %6308 = vmatpush1.bf16.msra.mxu0 %v16129_v63  ;;  %v16210_v63 = vld [vmem:[%s21189_s4 + $0x1b60] ss:$24 sps:$4 sm:$0xff]  }
 0x4ca   : > { %6309 = vmatprep.subr.bf16.mxu0 %v16137_v0  ;;  %v16218_v0 = vld [vmem:[%s21189_s4 + $0x1b94] ss:$24 sps:$4 sm:$0xff]  }
 0x4cb   : > { %8367 = vmatpush1.bf16.msra.mxu1 %v16132_v23  ;;  %v16213_v23 = vld [vmem:[%s21189_s4 + $0x1598] ss:$24 sps:$4 sm:$0xff]  }
 0x4cc   : > { %8368 = vmatprep.subr.bf16.mxu1 %v16140_v46  ;;  %v16221_v46 = vld [vmem:[%s21189_s4 + $0x15cc] ss:$24 sps:$4 sm:$0xff]  }
 0x4cd   : > { %6310 = vmatpush1.bf16.msra.mxu0 %v16135_v2  ;;  %v16216_v2 = vld [vmem:[%s21189_s4 + $0x1b90] ss:$24 sps:$4 sm:$0xff]  }
 0x4ce   : > { %6311 = vmatprep.subr.bf16.mxu0 %v16143_v38  ;;  %v16224_v38 = vld [vmem:[%s21189_s4 + $0x1bc4] ss:$24 sps:$4 sm:$0xff]  }
 0x4cf   : > { %8369 = vmatpush1.bf16.msra.mxu1 %v16138_v5  ;;  %v16219_v5 = vld [vmem:[%s21189_s4 + $0x15c8] ss:$24 sps:$4 sm:$0xff]  }
 0x4d0   : > { %8370 = vmatprep.subr.bf16.mxu1 %v16146_v6  ;;  %v16227_v6 = vld [vmem:[%s21189_s4 + $0x15fc] ss:$24 sps:$4 sm:$0xff]  }
 0x4d1   : > { %6312 = vmatpush1.bf16.msra.mxu0 %v16141_v7  ;;  %v16222_v7 = vld [vmem:[%s21189_s4 + $0x1bc0] ss:$24 sps:$4 sm:$0xff]  }
 0x4d2   : > { %6717 = vmatprep.subr.bf16.mxu0 %v16149_v8  ;;  %v16230_v8 = vld [vmem:[%s21189_s4 + $0x1bf4] ss:$24 sps:$4 sm:$0xff]  }
 0x4d3   : > { %8371 = vmatpush1.bf16.msra.mxu1 %v16144_v9  ;;  %v16225_v9 = vld [vmem:[%s21189_s4 + $0x15f8] ss:$24 sps:$4 sm:$0xff]  }
 0x4d4   : > { %6330 = vmatmul.mubr.bf16.vlgmr.msra.gmra.mrb[12].mxu0 %v18580_v4  ;;  %8438 = vmatprep.subr.bf16.mxu1 %v16152_v10  ;;  %v16161_v4 = vld [vmem:[%s21189_s4 + $0x13ec] ss:$24 sps:$4 sm:$0xff]  }
 0x4d5   : > { %6718 = vmatpush1.bf16.msra.mxu0 %v16147_v12  ;;  %6749 = vmatprep.mubr.bf16.mxu0 %v16910_v59  ;;  %v16233_v10 = vld [vmem:[%s21189_s4 + $0x162c] ss:$24 sps:$4 sm:$0xff]   ;;  %v16228_v12 = vld [vmem:[%s21189_s4 + $0x1bf0] ss:$24 sps:$4 sm:$0xff]  }
 0x4d6   : > { %8389 = vmatmul.mubr.bf16.vlgmr.msra.gmra.mrb[12].mxu1 %v19600_v1  ;;  %6719 = vmatprep.subr.bf16.mxu0 %v16155_v13  ;;  %v16236_v13 = vld [vmem:[%s21189_s4 + $0x1c24] ss:$24 sps:$4 sm:$0xff]  }
 0x4d7   : > { %8439 = vmatpush1.bf16.msra.mxu1 %v16150_v14  ;;  %8470 = vmatprep.mubr.bf16.mxu1 %v16910_v59  ;;  %v16231_v14 = vld [vmem:[%s21189_s4 + $0x1628] ss:$24 sps:$4 sm:$0xff]  }
 0x4d8   : > { %8440 = vmatprep.subr.bf16.mxu1 %v16158_v15  ;;  %v16239_v15 = vld [vmem:[%s21189_s4 + $0x165c] ss:$24 sps:$4 sm:$0xff]  }
 0x4d9   : > { %6720 = vmatpush1.bf16.msra.mxu0 %v16153_v16  ;;  %v16234_v16 = vld [vmem:[%s21189_s4 + $0x1c20] ss:$24 sps:$4 sm:$0xff]  }
 0x4da   : > { %6721 = vmatprep.subr.bf16.mxu0 %v16161_v4  ;;  %v16242_v4 = vld [vmem:[%s21189_s4 + $0x1c54] ss:$24 sps:$4 sm:$0xff]  }
 0x4db   : > { %8441 = vmatpush1.bf16.msra.mxu1 %v16156_v19  ;;  %v16237_v19 = vld [vmem:[%s21189_s4 + $0x1658] ss:$24 sps:$4 sm:$0xff]  }
 0x4dc   : > { %8442 = vmatprep.subr.bf16.mxu1 %v16164_v21  ;;  %v16245_v21 = vld [vmem:[%s21189_s4 + $0x168c] ss:$24 sps:$4 sm:$0xff]  }
 0x4dd   : > { %6722 = vmatpush1.bf16.msra.mxu0 %v16159_v24  ;;  %v16240_v24 = vld [vmem:[%s21189_s4 + $0x1c50] ss:$24 sps:$4 sm:$0xff]  }
 0x4de   : > { %6723 = vmatprep.subr.bf16.mxu0 %v16167_v28  ;;  %v16248_v28 = vld [vmem:[%s21189_s4 + $0x1b14] ss:$24 sps:$4 sm:$0xff]  }
 0x4df   : > { %8443 = vmatpush1.bf16.msra.mxu1 %v16162_v30  ;;  %v16243_v30 = vld [vmem:[%s21189_s4 + $0x1688] ss:$24 sps:$4 sm:$0xff]  }
 0x4e0   : > { %8444 = vmatprep.subr.bf16.mxu1 %v16170_v26  ;;  %v16251_v26 = vld [vmem:[%s21189_s4 + $0x16bc] ss:$24 sps:$4 sm:$0xff]  }
 0x4e1   : > { %6724 = vmatpush1.bf16.msra.mxu0 %v16165_v31  ;;  %v16246_v31 = vld [vmem:[%s21189_s4 + $0x1b10] ss:$24 sps:$4 sm:$0xff]  }
 0x4e2   : > { %6725 = vmatprep.subr.bf16.mxu0 %v16173_v32  ;;  %v19803_v32 = vrot.slane %v17232_v17, 1 }
 0x4e3   : > { %8445 = vmatpush1.bf16.msra.mxu1 %v16168_v33  ;;  %v16254_v33 = vld [vmem:[%s21189_s4 + $0x1b44] ss:$24 sps:$4 sm:$0xff]  }
 0x4e4   : > { %8446 = vmatprep.subr.bf16.mxu1 %v16176_v34  ;;  %v16249_v34 = vld [vmem:[%s21189_s4 + $0x16b8] ss:$24 sps:$4 sm:$0xff]  }
 0x4e5   : > { %6726 = vmatpush1.bf16.msra.mxu0 %v16171_v36  ;;  %v16252_v36 = vld [vmem:[%s21189_s4 + $0x1b40] ss:$24 sps:$4 sm:$0xff]  }
 0x4e6   : > { %6727 = vmatprep.subr.bf16.mxu0 %v16179_v37  ;;  %v16260_v37 = vld [vmem:[%s21189_s4 + $0x1b74] ss:$24 sps:$4 sm:$0xff]  }
 0x4e7   : > { %8447 = vmatpush1.bf16.msra.mxu1 %v16174_v39  ;;  %v16255_v39 = vld [vmem:[%s21189_s4 + $0x16e8] ss:$24 sps:$4 sm:$0xff]  }
 0x4e8   : > { %8448 = vmatprep.subr.bf16.mxu1 %v16182_v40  ;;  %v16263_v40 = vld [vmem:[%s21189_s4 + $0x171c] ss:$24 sps:$4 sm:$0xff]  }
 0x4e9   : > { %6728 = vmatpush1.bf16.msra.mxu0 %v16177_v42  ;;  %v16258_v42 = vld [vmem:[%s21189_s4 + $0x1b70] ss:$24 sps:$4 sm:$0xff]  }
 0x4ea   : > { %6729 = vmatprep.subr.bf16.mxu0 %v16185_v43  ;;  %v16266_v43 = vld [vmem:[%s21189_s4 + $0x1ba4] ss:$24 sps:$4 sm:$0xff]  }
 0x4eb   : > { %8449 = vmatpush1.bf16.msra.mxu1 %v16180_v18  ;;  %v16261_v18 = vld [vmem:[%s21189_s4 + $0x1718] ss:$24 sps:$4 sm:$0xff]  }
 0x4ec   : > { %8450 = vmatprep.subr.bf16.mxu1 %v16188_v57  ;;  %v16269_v57 = vld [vmem:[%s21189_s4 + $0x174c] ss:$24 sps:$4 sm:$0xff]  }
 0x4ed   : > { %6730 = vmatpush1.bf16.msra.mxu0 %v16183_v44  ;;  %v16264_v44 = vld [vmem:[%s21189_s4 + $0x1ba0] ss:$24 sps:$4 sm:$0xff]  }
 0x4ee   : > { %6731 = vmatprep.subr.bf16.mxu0 %v16191_v45  ;;  %v16272_v45 = vld [vmem:[%s21189_s4 + $0x1bd4] ss:$24 sps:$4 sm:$0xff]  }
 0x4ef   : > { %8451 = vmatpush1.bf16.msra.mxu1 %v16186_v47  ;;  %v16267_v47 = vld [vmem:[%s21189_s4 + $0x1748] ss:$24 sps:$4 sm:$0xff]  }
 0x4f0   : > { %8452 = vmatprep.subr.bf16.mxu1 %v16194_v52  ;;  %v16275_v52 = vld [vmem:[%s21189_s4 + $0x177c] ss:$24 sps:$4 sm:$0xff]  }
 0x4f1   : > { %6732 = vmatpush1.bf16.msra.mxu0 %v16189_v49  ;;  %v16270_v49 = vld [vmem:[%s21189_s4 + $0x1bd0] ss:$24 sps:$4 sm:$0xff]  }
 0x4f2   : > { %7137 = vmatprep.subr.bf16.mxu0 %v16197_v50  ;;  %v16278_v50 = vld [vmem:[%s21189_s4 + $0x1c04] ss:$24 sps:$4 sm:$0xff]  }
 0x4f3   : > { %8453 = vmatpush1.bf16.msra.mxu1 %v16192_v53  ;;  %v16273_v53 = vld [vmem:[%s21189_s4 + $0x1778] ss:$24 sps:$4 sm:$0xff]  }
 0x4f4   : > { %6750 = vmatmul.mubr.bf16.vlgmr.msra.gmra.mrb[12].mxu0 %v18783_v22  ;;  %8777 = vmatprep.subr.bf16.mxu1 %v16200_v54  ;;  %v16204_v22 = vld [vmem:[%s21189_s4 + $0x1b30] ss:$24 sps:$4 sm:$0xff]   ;;  %v16281_v54 = vld [vmem:[%s21189_s4 + $0x17ac] ss:$24 sps:$4 sm:$0xff]  }
 0x4f5   : > { %7138 = vmatpush1.bf16.msra.mxu0 %v16195_v20  ;;  %7169 = vmatprep.mubr.bf16.mxu0 %v16910_v59  ;;  %v16276_v20 = vld [vmem:[%s21189_s4 + $0x1c00] ss:$24 sps:$4 sm:$0xff]  }
 0x4f6   : > { %8471 = vmatmul.mubr.bf16.vlgmr.msra.gmra.mrb[8].mxu1 %v19600_v1  ;;  %7139 = vmatprep.subr.bf16.mxu0 %v16203_v11  ;;  %v16284_v11 = vld [vmem:[%s21189_s4 + $0x1c34] ss:$24 sps:$4 sm:$0xff]  }
 0x4f7   : > { %8778 = vmatpush1.bf16.msra.mxu1 %v16198_v35  ;;  %8809 = vmatprep.mubr.bf16.mxu1 %v16910_v59  ;;  %v16279_v35 = vld [vmem:[%s21189_s4 + $0x17a8] ss:$24 sps:$4 sm:$0xff]  }
 0x4f8   : > { %8779 = vmatprep.subr.bf16.mxu1 %v16206_v55  ;;  %v16287_v55 = vld [vmem:[%s21189_s4 + $0x17dc] ss:$24 sps:$4 sm:$0xff]  }
 0x4f9   : > { %7140 = vmatpush1.bf16.msra.mxu0 %v16201_v56  ;;  %v16282_v56 = vld [vmem:[%s21189_s4 + $0x1c30] ss:$24 sps:$4 sm:$0xff]  }
 0x4fa   : > { %7141 = vmatprep.subr.bf16.mxu0 %v16209_v58  ;;  %v16290_v58 = vld [vmem:[%s21189_s4 + $0x1c64] ss:$24 sps:$4 sm:$0xff]  }
 0x4fb   : > { %8780 = vmatpush1.bf16.msra.mxu1 %v16204_v22  ;;  %v16285_v22 = vld [vmem:[%s21189_s4 + $0x17d8] ss:$24 sps:$4 sm:$0xff]  }
 0x4fc   : > { %8781 = vmatprep.subr.bf16.mxu1 %v16212_v60  ;;  %v16293_v60 = vld [vmem:[%s21189_s4 + $0x180c] ss:$24 sps:$4 sm:$0xff]  }
 0x4fd   : > { %7142 = vmatpush1.bf16.msra.mxu0 %v16207_v61  ;;  %v16288_v61 = vld [vmem:[%s21189_s4 + $0x1c60] ss:$24 sps:$4 sm:$0xff]  }
 0x4fe   : > { %7143 = vmatprep.subr.bf16.mxu0 %v16215_v62  ;;  %v16296_v62 = vld [vmem:[%s21189_s4 + $0x1c84] ss:$24 sps:$4 sm:$0xff]  }
 0x4ff   : > { %8782 = vmatpush1.bf16.msra.mxu1 %v16210_v63  ;;  %v16291_v63 = vld [vmem:[%s21189_s4 + $0x1808] ss:$24 sps:$4 sm:$0xff]  }
 0x500   : > { %8783 = vmatprep.subr.bf16.mxu1 %v16218_v0  ;;  %v16299_v0 = vld [vmem:[%s21189_s4 + $0x183c] ss:$24 sps:$4 sm:$0xff]  }
 0x501   : > { %7144 = vmatpush1.bf16.msra.mxu0 %v16213_v23  ;;  %v16294_v23 = vld [vmem:[%s21189_s4 + $0x1c80] ss:$24 sps:$4 sm:$0xff]  }
 0x502   : > { %7145 = vmatprep.subr.bf16.mxu0 %v16221_v46  ;;  %v16302_v46 = vld [vmem:[%s21189_s4 + $0x1cb4] ss:$24 sps:$4 sm:$0xff]  }
 0x503   : > { %8784 = vmatpush1.bf16.msra.mxu1 %v16216_v2  ;;  %v16297_v2 = vld [vmem:[%s21189_s4 + $0x1838] ss:$24 sps:$4 sm:$0xff]  }
 0x504   : > { %8785 = vmatprep.subr.bf16.mxu1 %v16224_v38  ;;  %v16305_v38 = vld [vmem:[%s21189_s4 + $0x186c] ss:$24 sps:$4 sm:$0xff]  }
 0x505   : > { %7146 = vmatpush1.bf16.msra.mxu0 %v16219_v5  ;;  %v16308_v5 = vld [vmem:[%s21189_s4 + $0x1ce4] ss:$24 sps:$4 sm:$0xff]  }
 0x506   : > { %7147 = vmatprep.subr.bf16.mxu0 %v16227_v6  ;;  %v16303_v6 = vld [vmem:[%s21189_s4 + $0x1868] ss:$24 sps:$4 sm:$0xff]  }
 0x507   : > { %8786 = vmatpush1.bf16.msra.mxu1 %v16222_v7  ;;  %v16311_v7 = vld [vmem:[%s21189_s4 + $0x189c] ss:$24 sps:$4 sm:$0xff]  }
 0x508   : > { %8787 = vmatprep.subr.bf16.mxu1 %v16230_v8  ;;  %v16306_v8 = vld [vmem:[%s21189_s4 + $0x1ce0] ss:$24 sps:$4 sm:$0xff]  }
 0x509   : > { %7148 = vmatpush1.bf16.msra.mxu0 %v16225_v9  ;;  %v16314_v9 = vld [vmem:[%s21189_s4 + $0x1d14] ss:$24 sps:$4 sm:$0xff]  }
 0x50a   : > { %7149 = vmatprep.subr.bf16.mxu0 %v16233_v10  ;;  %v16309_v10 = vld [vmem:[%s21189_s4 + $0x1898] ss:$24 sps:$4 sm:$0xff]  }
 0x50b   : > { %8788 = vmatpush1.bf16.msra.mxu1 %v16228_v12  ;;  %v16317_v12 = vld [vmem:[%s21189_s4 + $0x18cc] ss:$24 sps:$4 sm:$0xff]  }
 0x50c   : > { %8789 = vmatprep.subr.bf16.mxu1 %v16236_v13  ;;  %v16312_v13 = vld [vmem:[%s21189_s4 + $0x1d10] ss:$24 sps:$4 sm:$0xff]  }
 0x50d   : > { %7150 = vmatpush1.bf16.msra.mxu0 %v16231_v14  ;;  %v16320_v14 = vld [vmem:[%s21189_s4 + $0x1d44] ss:$24 sps:$4 sm:$0xff]  }
 0x50e   : > { %7151 = vmatprep.subr.bf16.mxu0 %v16239_v15  ;;  %v16315_v15 = vld [vmem:[%s21189_s4 + $0x18c8] ss:$24 sps:$4 sm:$0xff]  }
 0x50f   : > { %8790 = vmatpush1.bf16.msra.mxu1 %v16234_v16  ;;  %v16323_v16 = vld [vmem:[%s21189_s4 + $0x18fc] ss:$24 sps:$4 sm:$0xff]  }
 0x510   : > { %8791 = vmatprep.subr.bf16.mxu1 %v16242_v4  ;;  %v16318_v4 = vld [vmem:[%s21189_s4 + $0x1d40] ss:$24 sps:$4 sm:$0xff]  }
 0x511   : > { %7152 = vmatpush1.bf16.msra.mxu0 %v16237_v19  ;;  %v16326_v19 = vld [vmem:[%s21189_s4 + $0x1d74] ss:$24 sps:$4 sm:$0xff]  }
 0x512   : > { %7557 = vmatprep.subr.bf16.mxu0 %v16245_v21  ;;  %v16321_v21 = vld [vmem:[%s21189_s4 + $0x18f8] ss:$24 sps:$4 sm:$0xff]  }
 0x513   : > { %8792 = vmatpush1.bf16.msra.mxu1 %v16240_v24  ;;  %v16329_v24 = vld [vmem:[%s21189_s4 + $0x192c] ss:$24 sps:$4 sm:$0xff]  }
 0x514   : > { %7170 = vmatmul.mubr.bf16.vlgmr.msra.gmra.mrb[12].mxu0 %v18986_v41  ;;  %8859 = vmatprep.subr.bf16.mxu1 %v16248_v28  ;;  %v16257_v41 = vld [vmem:[%s21189_s4 + $0x16ec] ss:$24 sps:$4 sm:$0xff]   ;;  %v16324_v28 = vld [vmem:[%s21189_s4 + $0x1d70] ss:$24 sps:$4 sm:$0xff]  }
 0x515   : > { %7558 = vmatpush1.bf16.msra.mxu0 %v16243_v30  ;;  %7589 = vmatprep.mubr.bf16.mxu0 %v16910_v59  ;;  %v16332_v30 = vld [vmem:[%s21189_s4 + $0x1da4] ss:$24 sps:$4 sm:$0xff]  }
 0x516   : > { %8810 = vmatmul.mubr.bf16.vlgmr.msra.gmra.mrb[12].mxu1 %v19803_v32  ;;  %7559 = vmatprep.subr.bf16.mxu0 %v16251_v26  ;;  %v16327_v26 = vld [vmem:[%s21189_s4 + $0x1928] ss:$24 sps:$4 sm:$0xff]  }
 0x517   : > { %8860 = vmatpush1.bf16.msra.mxu1 %v16246_v31  ;;  %8891 = vmatprep.mubr.bf16.mxu1 %v16910_v59  ;;  %v16335_v31 = vld [vmem:[%s21189_s4 + $0x195c] ss:$24 sps:$4 sm:$0xff]  }
 0x518   : > { %8861 = vmatprep.subr.bf16.mxu1 %v16254_v33  ;;  %v16330_v33 = vld [vmem:[%s21189_s4 + $0x1da0] ss:$24 sps:$4 sm:$0xff]  }
 0x519   : > { %7560 = vmatpush1.bf16.msra.mxu0 %v16249_v34  ;;  %v16338_v34 = vld [vmem:[%s21189_s4 + $0x1dd4] ss:$24 sps:$4 sm:$0xff]  }
 0x51a   : > { %7561 = vmatprep.subr.bf16.mxu0 %v16257_v41  ;;  %v16333_v41 = vld [vmem:[%s21189_s4 + $0x1958] ss:$24 sps:$4 sm:$0xff]  }
 0x51b   : > { %8862 = vmatpush1.bf16.msra.mxu1 %v16252_v36  ;;  %v16341_v36 = vld [vmem:[%s21189_s4 + $0x198c] ss:$24 sps:$4 sm:$0xff]  }
 0x51c   : > { %8863 = vmatprep.subr.bf16.mxu1 %v16260_v37  ;;  %v16336_v37 = vld [vmem:[%s21189_s4 + $0x1dd0] ss:$24 sps:$4 sm:$0xff]  }
 0x51d   : > { %7562 = vmatpush1.bf16.msra.mxu0 %v16255_v39  ;;  %v16344_v39 = vld [vmem:[%s21189_s4 + $0x1c94] ss:$24 sps:$4 sm:$0xff]  }
 0x51e   : > { %7563 = vmatprep.subr.bf16.mxu0 %v16263_v40  ;;  %v16339_v40 = vld [vmem:[%s21189_s4 + $0x1988] ss:$24 sps:$4 sm:$0xff]  }
 0x51f   : > { %8864 = vmatpush1.bf16.msra.mxu1 %v16258_v42  ;;  %v16347_v42 = vld [vmem:[%s21189_s4 + $0x19bc] ss:$24 sps:$4 sm:$0xff]  }
 0x520   : > { %8865 = vmatprep.subr.bf16.mxu1 %v16266_v43  ;;  %v16342_v43 = vld [vmem:[%s21189_s4 + $0x1c90] ss:$24 sps:$4 sm:$0xff]  }
 0x521   : > { %7564 = vmatpush1.bf16.msra.mxu0 %v16261_v18  ;;  %v20006_v18 = vrot.slane %v19600_v1, 1 }
 0x522   : > { %7565 = vmatprep.subr.bf16.mxu0 %v16269_v57  ;;  %v16350_v57 = vld [vmem:[%s21189_s4 + $0x1cc4] ss:$24 sps:$4 sm:$0xff]  }
 0x523   : > { %8866 = vmatpush1.bf16.msra.mxu1 %v16264_v44  ;;  %v16345_v44 = vld [vmem:[%s21189_s4 + $0x19b8] ss:$24 sps:$4 sm:$0xff]  }
 0x524   : > { %8867 = vmatprep.subr.bf16.mxu1 %v16272_v45  ;;  %v16353_v45 = vld [vmem:[%s21189_s4 + $0x19ec] ss:$24 sps:$4 sm:$0xff]  }
 0x525   : > { %7566 = vmatpush1.bf16.msra.mxu0 %v16267_v47  ;;  %v16348_v47 = vld [vmem:[%s21189_s4 + $0x1cc0] ss:$24 sps:$4 sm:$0xff]  }
 0x526   : > { %7567 = vmatprep.subr.bf16.mxu0 %v16275_v52  ;;  %v16356_v52 = vld [vmem:[%s21189_s4 + $0x1cf4] ss:$24 sps:$4 sm:$0xff]  }
 0x527   : > { %8868 = vmatpush1.bf16.msra.mxu1 %v16270_v49  ;;  %v16351_v49 = vld [vmem:[%s21189_s4 + $0x19e8] ss:$24 sps:$4 sm:$0xff]  }
 0x528   : > { %8869 = vmatprep.subr.bf16.mxu1 %v16278_v50  ;;  %v16359_v50 = vld [vmem:[%s21189_s4 + $0x1a1c] ss:$24 sps:$4 sm:$0xff]  }
 0x529   : > { %7568 = vmatpush1.bf16.msra.mxu0 %v16273_v53  ;;  %v16354_v53 = vld [vmem:[%s21189_s4 + $0x1cf0] ss:$24 sps:$4 sm:$0xff]  }
 0x52a   : > { %7569 = vmatprep.subr.bf16.mxu0 %v16281_v54  ;;  %v16362_v54 = vld [vmem:[%s21189_s4 + $0x1d24] ss:$24 sps:$4 sm:$0xff]  }
 0x52b   : > { %8870 = vmatpush1.bf16.msra.mxu1 %v16276_v20  ;;  %v16357_v20 = vld [vmem:[%s21189_s4 + $0x1a18] ss:$24 sps:$4 sm:$0xff]  }
 0x52c   : > { %8871 = vmatprep.subr.bf16.mxu1 %v16284_v11  ;;  %v16365_v11 = vld [vmem:[%s21189_s4 + $0x1a4c] ss:$24 sps:$4 sm:$0xff]  }
 0x52d   : > { %7570 = vmatpush1.bf16.msra.mxu0 %v16279_v35  ;;  %v16360_v35 = vld [vmem:[%s21189_s4 + $0x1d20] ss:$24 sps:$4 sm:$0xff]  }
 0x52e   : > { %7571 = vmatprep.subr.bf16.mxu0 %v16287_v55  ;;  %v16368_v55 = vld [vmem:[%s21189_s4 + $0x1d54] ss:$24 sps:$4 sm:$0xff]  }
 0x52f   : > { %8872 = vmatpush1.bf16.msra.mxu1 %v16282_v56  ;;  %v16363_v56 = vld [vmem:[%s21189_s4 + $0x1a48] ss:$24 sps:$4 sm:$0xff]  }
 0x530   : > { %8873 = vmatprep.subr.bf16.mxu1 %v16290_v58  ;;  %v16371_v58 = vld [vmem:[%s21189_s4 + $0x1a7c] ss:$24 sps:$4 sm:$0xff]  }
 0x531   : > { %7572 = vmatpush1.bf16.msra.mxu0 %v16285_v22  ;;  %v16366_v22 = vld [vmem:[%s21189_s4 + $0x1d50] ss:$24 sps:$4 sm:$0xff]  }
 0x532   : > { %7975 = vmatprep.subr.bf16.mxu0 %v16293_v60  ;;  %v16374_v60 = vld [vmem:[%s21189_s4 + $0x1d84] ss:$24 sps:$4 sm:$0xff]  }
 0x533   : > { %8874 = vmatpush1.bf16.msra.mxu1 %v16288_v61  ;;  %v16369_v61 = vld [vmem:[%s21189_s4 + $0x1a78] ss:$24 sps:$4 sm:$0xff]  }
 0x534   : > { %7590 = vmatmul.mubr.bf16.vlgmr.msra.gmra.mrb[12].mxu0 %v19189_v51  ;;  %9197 = vmatprep.subr.bf16.mxu1 %v16296_v62  ;;  %v16300_v51 = vld [vmem:[%s21189_s4 + $0x1cb0] ss:$24 sps:$4 sm:$0xff]   ;;  %v16377_v62 = vld [vmem:[%s21189_s4 + $0x1aac] ss:$24 sps:$4 sm:$0xff]  }
 0x535   : > { %7976 = vmatpush1.bf16.msra.mxu0 %v16291_v63  ;;  %8007 = vmatprep.mubr.bf16.mxu0 %v16910_v59  ;;  %v16372_v63 = vld [vmem:[%s21189_s4 + $0x1d80] ss:$24 sps:$4 sm:$0xff]  }
 0x536   : > { %8892 = vmatmul.mubr.bf16.vlgmr.msra.gmra.mrb[8].mxu1 %v19803_v32  ;;  %7977 = vmatprep.subr.bf16.mxu0 %v16299_v0  ;;  %v16380_v0 = vld [vmem:[%s21189_s4 + $0x1db4] ss:$24 sps:$4 sm:$0xff]  }
 0x537   : > { %9198 = vmatpush1.bf16.msra.mxu1 %v16294_v23  ;;  %9229 = vmatprep.mubr.bf16.mxu1 %v16910_v59  ;;  %v16375_v23 = vld [vmem:[%s21189_s4 + $0x1aa8] ss:$24 sps:$4 sm:$0xff]  }
 0x538   : > { %9199 = vmatprep.subr.bf16.mxu1 %v16302_v46  ;;  %v16383_v46 = vld [vmem:[%s21189_s4 + $0x1adc] ss:$24 sps:$4 sm:$0xff]  }
 0x539   : > { %7978 = vmatpush1.bf16.msra.mxu0 %v16297_v2  ;;  %v16378_v2 = vld [vmem:[%s21189_s4 + $0x1db0] ss:$24 sps:$4 sm:$0xff]  }
 0x53a   : > { %7979 = vmatprep.subr.bf16.mxu0 %v16305_v38  ;;  %v16386_v38 = vld [vmem:[%s21189_s4 + $0x1de4] ss:$24 sps:$4 sm:$0xff]  }
 0x53b   : > { %9200 = vmatpush1.bf16.msra.mxu1 %v16300_v51  ;;  %v16381_v51 = vld [vmem:[%s21189_s4 + $0x1ad8] ss:$24 sps:$4 sm:$0xff]  }
 0x53c   : > { %9201 = vmatprep.subr.bf16.mxu1 %v16308_v5  ;;  %v16389_v5 = vld [vmem:[%s21189_s4 + $0x1b0c] ss:$24 sps:$4 sm:$0xff]  }
 0x53d   : > { %7980 = vmatpush1.bf16.msra.mxu0 %v16303_v6  ;;  %v16384_v6 = vld [vmem:[%s21189_s4 + $0x1de0] ss:$24 sps:$4 sm:$0xff]  }
 0x53e   : > { %7981 = vmatprep.subr.bf16.mxu0 %v16311_v7  ;;  %v16392_v7 = vld [vmem:[%s21189_s4 + $0x1e04] ss:$24 sps:$4 sm:$0xff]  }
 0x53f   : > { %9202 = vmatpush1.bf16.msra.mxu1 %v16306_v8  ;;  %v16387_v8 = vld [vmem:[%s21189_s4 + $0x1b08] ss:$24 sps:$4 sm:$0xff]  }
 0x540   : > { %9203 = vmatprep.subr.bf16.mxu1 %v16314_v9  ;;  %v16395_v9 = vld [vmem:[%s21189_s4 + $0x1b3c] ss:$24 sps:$4 sm:$0xff]  }
 0x541   : > { %7982 = vmatpush1.bf16.msra.mxu0 %v16309_v10  ;;  %v16390_v10 = vld [vmem:[%s21189_s4 + $0x1e00] ss:$24 sps:$4 sm:$0xff]  }
 0x542   : > { %7983 = vmatprep.subr.bf16.mxu0 %v16317_v12  ;;  %v16398_v12 = vld [vmem:[%s21189_s4 + $0x1e34] ss:$24 sps:$4 sm:$0xff]  }
 0x543   : > { %9204 = vmatpush1.bf16.msra.mxu1 %v16312_v13  ;;  %v16393_v13 = vld [vmem:[%s21189_s4 + $0x1b38] ss:$24 sps:$4 sm:$0xff]  }
 0x544   : > { %9205 = vmatprep.subr.bf16.mxu1 %v16320_v14  ;;  %v16401_v14 = vld [vmem:[%s21189_s4 + $0x1b6c] ss:$24 sps:$4 sm:$0xff]  }
 0x545   : > { %7984 = vmatpush1.bf16.msra.mxu0 %v16315_v15  ;;  %v16396_v15 = vld [vmem:[%s21189_s4 + $0x1e30] ss:$24 sps:$4 sm:$0xff]  }
 0x546   : > { %7985 = vmatprep.subr.bf16.mxu0 %v16323_v16  ;;  %v16404_v16 = vld [vmem:[%s21189_s4 + $0x1e64] ss:$24 sps:$4 sm:$0xff]  }
 0x547   : > { %9206 = vmatpush1.bf16.msra.mxu1 %v16318_v4  ;;  %v16399_v4 = vld [vmem:[%s21189_s4 + $0x1b68] ss:$24 sps:$4 sm:$0xff]  }
 0x548   : > { %9207 = vmatprep.subr.bf16.mxu1 %v16326_v19  ;;  %v16407_v19 = vld [vmem:[%s21189_s4 + $0x1b9c] ss:$24 sps:$4 sm:$0xff]  }
 0x549   : > { %7986 = vmatpush1.bf16.msra.mxu0 %v16321_v21  ;;  %v16402_v21 = vld [vmem:[%s21189_s4 + $0x1e60] ss:$24 sps:$4 sm:$0xff]  }
 0x54a   : > { %7987 = vmatprep.subr.bf16.mxu0 %v16329_v24  ;;  %v16410_v24 = vld [vmem:[%s21189_s4 + $0x1e94] ss:$24 sps:$4 sm:$0xff]  }
 0x54b   : > { %9208 = vmatpush1.bf16.msra.mxu1 %v16324_v28  ;;  %v16405_v28 = vld [vmem:[%s21189_s4 + $0x1b98] ss:$24 sps:$4 sm:$0xff]  }
 0x54c   : > { %9209 = vmatprep.subr.bf16.mxu1 %v16332_v30  ;;  %v16413_v30 = vld [vmem:[%s21189_s4 + $0x1bcc] ss:$24 sps:$4 sm:$0xff]  }
 0x54d   : > { %7988 = vmatpush1.bf16.msra.mxu0 %v16327_v26  ;;  %v16408_v26 = vld [vmem:[%s21189_s4 + $0x1e90] ss:$24 sps:$4 sm:$0xff]  }
 0x54e   : > { %7989 = vmatprep.subr.bf16.mxu0 %v16335_v31  ;;  %v16416_v31 = vld [vmem:[%s21189_s4 + $0x1ec4] ss:$24 sps:$4 sm:$0xff]  }
 0x54f   : > { %9210 = vmatpush1.bf16.msra.mxu1 %v16330_v33  ;;  %v16411_v33 = vld [vmem:[%s21189_s4 + $0x1bc8] ss:$24 sps:$4 sm:$0xff]  }
 0x550   : > { %9211 = vmatprep.subr.bf16.mxu1 %v16338_v34  ;;  %v16419_v34 = vld [vmem:[%s21189_s4 + $0x1bfc] ss:$24 sps:$4 sm:$0xff]  }
 0x551   : > { %7990 = vmatpush1.bf16.msra.mxu0 %v16333_v41  ;;  %v16414_v41 = vld [vmem:[%s21189_s4 + $0x1ec0] ss:$24 sps:$4 sm:$0xff]  }
 0x552   : > { %8397 = vmatprep.subr.bf16.mxu0 %v16341_v36  ;;  %v16422_v36 = vld [vmem:[%s21189_s4 + $0x1ef4] ss:$24 sps:$4 sm:$0xff]  }
 0x553   : > { %9212 = vmatpush1.bf16.msra.mxu1 %v16336_v37  ;;  %v16417_v37 = vld [vmem:[%s21189_s4 + $0x1bf8] ss:$24 sps:$4 sm:$0xff]  }
 0x554   : > { %8008 = vmatmul.mubr.bf16.vlgmr.msra.gmra.mrb[12].mxu0 %v17232_v17  ;;  %9279 = vmatprep.subr.bf16.mxu1 %v16344_v39  ;;  %v16425_v39 = vld [vmem:[%s21189_s4 + $0x1c2c] ss:$24 sps:$4 sm:$0xff]  }
 0x555   : > { %8398 = vmatpush1.bf16.msra.mxu0 %v16339_v40  ;;  %8429 = vmatprep.mubr.bf16.mxu0 %v16910_v59  ;;  %v16420_v40 = vld [vmem:[%s21189_s4 + $0x1ef0] ss:$24 sps:$4 sm:$0xff]  }
 0x556   : > { %9230 = vmatmul.mubr.bf16.vlgmr.msra.gmra.mrb[12].mxu1 %v20006_v18  ;;  %8399 = vmatprep.subr.bf16.mxu0 %v16347_v42  ;;  %v16428_v42 = vld [vmem:[%s21189_s4 + $0x1f24] ss:$24 sps:$4 sm:$0xff]  }
 0x557   : > { %9280 = vmatpush1.bf16.msra.mxu1 %v16342_v43  ;;  %9311 = vmatprep.mubr.bf16.mxu1 %v16910_v59  ;;  %v16423_v43 = vld [vmem:[%s21189_s4 + $0x1c28] ss:$24 sps:$4 sm:$0xff]  }
 0x558   : > { %9281 = vmatprep.subr.bf16.mxu1 %v16350_v57  ;;  %v16431_v57 = vld [vmem:[%s21189_s4 + $0x1c5c] ss:$24 sps:$4 sm:$0xff]  }
 0x559   : > { %8400 = vmatpush1.bf16.msra.mxu0 %v16345_v44  ;;  %v16426_v44 = vld [vmem:[%s21189_s4 + $0x1f20] ss:$24 sps:$4 sm:$0xff]  }
 0x55a   : > { %8401 = vmatprep.subr.bf16.mxu0 %v16353_v45  ;;  %v16434_v45 = vld [vmem:[%s21189_s4 + $0x1f54] ss:$24 sps:$4 sm:$0xff]  }
 0x55b   : > { %9282 = vmatpush1.bf16.msra.mxu1 %v16348_v47  ;;  %v16429_v47 = vld [vmem:[%s21189_s4 + $0x1c58] ss:$24 sps:$4 sm:$0xff]  }
 0x55c   : > { %9283 = vmatprep.subr.bf16.mxu1 %v16356_v52  ;;  %v16437_v52 = vld [vmem:[%s21189_s4 + $0x1c8c] ss:$24 sps:$4 sm:$0xff]  }
 0x55d   : > { %8402 = vmatpush1.bf16.msra.mxu0 %v16351_v49  ;;  %v16432_v49 = vld [vmem:[%s21189_s4 + $0x1f50] ss:$24 sps:$4 sm:$0xff]  }
 0x55e   : > { %8403 = vmatprep.subr.bf16.mxu0 %v16359_v50  ;;  %v16440_v50 = vld [vmem:[%s21189_s4 + $0x1e14] ss:$24 sps:$4 sm:$0xff]  }
 0x55f   : > { %9284 = vmatpush1.bf16.msra.mxu1 %v16354_v53  ;;  %v16435_v53 = vld [vmem:[%s21189_s4 + $0x1c88] ss:$24 sps:$4 sm:$0xff]  }
 0x560   : > { %9285 = vmatprep.subr.bf16.mxu1 %v16362_v54  ;;  %v16443_v54 = vld [vmem:[%s21189_s4 + $0x1cbc] ss:$24 sps:$4 sm:$0xff]  }
 0x561   : > { %8404 = vmatpush1.bf16.msra.mxu0 %v16357_v20  ;;  %v16438_v20 = vld [vmem:[%s21189_s4 + $0x1e10] ss:$24 sps:$4 sm:$0xff]  }
 0x562   : > { %8405 = vmatprep.subr.bf16.mxu0 %v16365_v11  ;;  %v20209_v11 = vrot.slane %v17232_v17, 2 }
 0x563   : > { %9286 = vmatpush1.bf16.msra.mxu1 %v16360_v35  ;;  %v16446_v35 = vld [vmem:[%s21189_s4 + $0x1e44] ss:$24 sps:$4 sm:$0xff]  }
 0x564   : > { %9287 = vmatprep.subr.bf16.mxu1 %v16368_v55  ;;  %v16441_v55 = vld [vmem:[%s21189_s4 + $0x1cb8] ss:$24 sps:$4 sm:$0xff]  }
 0x565   : > { %8406 = vmatpush1.bf16.msra.mxu0 %v16363_v56  ;;  %v16444_v56 = vld [vmem:[%s21189_s4 + $0x1e40] ss:$24 sps:$4 sm:$0xff]  }
 0x566   : > { %8407 = vmatprep.subr.bf16.mxu0 %v16371_v58  ;;  %v16452_v58 = vld [vmem:[%s21189_s4 + $0x1e74] ss:$24 sps:$4 sm:$0xff]  }
 0x567   : > { %9288 = vmatpush1.bf16.msra.mxu1 %v16366_v22  ;;  %v16447_v22 = vld [vmem:[%s21189_s4 + $0x1ce8] ss:$24 sps:$4 sm:$0xff]  }
 0x568   : > { %9289 = vmatprep.subr.bf16.mxu1 %v16374_v60  ;;  %v16455_v60 = vld [vmem:[%s21189_s4 + $0x1d1c] ss:$24 sps:$4 sm:$0xff]  }
 0x569   : > { %8408 = vmatpush1.bf16.msra.mxu0 %v16369_v61  ;;  %v16450_v61 = vld [vmem:[%s21189_s4 + $0x1e70] ss:$24 sps:$4 sm:$0xff]  }
 0x56a   : > { %8409 = vmatprep.subr.bf16.mxu0 %v16377_v62  ;;  %v16458_v62 = vld [vmem:[%s21189_s4 + $0x1ea4] ss:$24 sps:$4 sm:$0xff]  }
 0x56b   : > { %9290 = vmatpush1.bf16.msra.mxu1 %v16372_v63  ;;  %v16453_v63 = vld [vmem:[%s21189_s4 + $0x1d18] ss:$24 sps:$4 sm:$0xff]  }
 0x56c   : > { %9291 = vmatprep.subr.bf16.mxu1 %v16380_v0  ;;  %v16461_v0 = vld [vmem:[%s21189_s4 + $0x1d4c] ss:$24 sps:$4 sm:$0xff]  }
 0x56d   : > { %8410 = vmatpush1.bf16.msra.mxu0 %v16375_v23  ;;  %v16456_v23 = vld [vmem:[%s21189_s4 + $0x1ea0] ss:$24 sps:$4 sm:$0xff]  }
 0x56e   : > { %8411 = vmatprep.subr.bf16.mxu0 %v16383_v46  ;;  %v16464_v46 = vld [vmem:[%s21189_s4 + $0x1ed4] ss:$24 sps:$4 sm:$0xff]  }
 0x56f   : > { %9292 = vmatpush1.bf16.msra.mxu1 %v16378_v2  ;;  %v16459_v2 = vld [vmem:[%s21189_s4 + $0x1d48] ss:$24 sps:$4 sm:$0xff]  }
 0x570   : > { %9293 = vmatprep.subr.bf16.mxu1 %v16386_v38  ;;  %v16467_v38 = vld [vmem:[%s21189_s4 + $0x1d7c] ss:$24 sps:$4 sm:$0xff]  }
 0x571   : > { %8412 = vmatpush1.bf16.msra.mxu0 %v16381_v51  ;;  %v16462_v51 = vld [vmem:[%s21189_s4 + $0x1ed0] ss:$24 sps:$4 sm:$0xff]  }
 0x572   : > { %8818 = vmatprep.subr.bf16.mxu0 %v16389_v5  ;;  %v16470_v5 = vld [vmem:[%s21189_s4 + $0x1f04] ss:$24 sps:$4 sm:$0xff]  }
 0x573   : > { %9294 = vmatpush1.bf16.msra.mxu1 %v16384_v6  ;;  %v16465_v6 = vld [vmem:[%s21189_s4 + $0x1d78] ss:$24 sps:$4 sm:$0xff]  }
 0x574   : > { %8430 = vmatmul.mubr.bf16.vlgmr.msra.gmra.mrb[12].mxu0 %v19600_v1  ;;  %9617 = vmatprep.subr.bf16.mxu1 %v16392_v7  ;;  %v16473_v7 = vld [vmem:[%s21189_s4 + $0x1dac] ss:$24 sps:$4 sm:$0xff]  }
 0x575   : > { %8819 = vmatpush1.bf16.msra.mxu0 %v16387_v8  ;;  %8850 = vmatprep.mubr.bf16.mxu0 %v16910_v59  ;;  %v16468_v8 = vld [vmem:[%s21189_s4 + $0x1f00] ss:$24 sps:$4 sm:$0xff]  }
 0x576   : > { %9312 = vmatmul.mubr.bf16.vlgmr.msra.gmra.mrb[8].mxu1 %v20006_v18  ;;  %8820 = vmatprep.subr.bf16.mxu0 %v16395_v9  ;;  %v16476_v9 = vld [vmem:[%s21189_s4 + $0x1f34] ss:$24 sps:$4 sm:$0xff]  }
 0x577   : > { %9618 = vmatpush1.bf16.msra.mxu1 %v16390_v10  ;;  %9649 = vmatprep.mubr.bf16.mxu1 %v16910_v59  ;;  %v16471_v10 = vld [vmem:[%s21189_s4 + $0x1da8] ss:$24 sps:$4 sm:$0xff]  }
 0x578   : > { %9619 = vmatprep.subr.bf16.mxu1 %v16398_v12  ;;  %v16479_v12 = vld [vmem:[%s21189_s4 + $0x1ddc] ss:$24 sps:$4 sm:$0xff]  }
 0x579   : > { %8821 = vmatpush1.bf16.msra.mxu0 %v16393_v13  ;;  %v16474_v13 = vld [vmem:[%s21189_s4 + $0x1f30] ss:$24 sps:$4 sm:$0xff]  }
 0x57a   : > { %8822 = vmatprep.subr.bf16.mxu0 %v16401_v14  ;;  %v16482_v14 = vld [vmem:[%s21189_s4 + $0x1f64] ss:$24 sps:$4 sm:$0xff]  }
 0x57b   : > { %9620 = vmatpush1.bf16.msra.mxu1 %v16396_v15  ;;  %v16477_v15 = vld [vmem:[%s21189_s4 + $0x1dd8] ss:$24 sps:$4 sm:$0xff]  }
 0x57c   : > { %9621 = vmatprep.subr.bf16.mxu1 %v16404_v16  ;;  %v16485_v16 = vld [vmem:[%s21189_s4 + $0x1e0c] ss:$24 sps:$4 sm:$0xff]  }
 0x57d   : > { %8823 = vmatpush1.bf16.msra.mxu0 %v16399_v4  ;;  %v16480_v4 = vld [vmem:[%s21189_s4 + $0x1f60] ss:$24 sps:$4 sm:$0xff]  }
 0x57e   : > { %8824 = vmatprep.subr.bf16.mxu0 %v16407_v19  ;;  %v16488_v19 = vld [vmem:[%s21189_s4 + $0x1f84] ss:$24 sps:$4 sm:$0xff]  }
 0x57f   : > { %9622 = vmatpush1.bf16.msra.mxu1 %v16402_v21  ;;  %v16483_v21 = vld [vmem:[%s21189_s4 + $0x1e08] ss:$24 sps:$4 sm:$0xff]  }
 0x580   : > { %9623 = vmatprep.subr.bf16.mxu1 %v16410_v24  ;;  %v16491_v24 = vld [vmem:[%s21189_s4 + $0x1e3c] ss:$24 sps:$4 sm:$0xff]  }
 0x581   : > { %8825 = vmatpush1.bf16.msra.mxu0 %v16405_v28  ;;  %v16486_v28 = vld [vmem:[%s21189_s4 + $0x1f80] ss:$24 sps:$4 sm:$0xff]  }
 0x582   : > { %8826 = vmatprep.subr.bf16.mxu0 %v16413_v30  ;;  %v16494_v30 = vld [vmem:[%s21189_s4 + $0x1fb4] ss:$24 sps:$4 sm:$0xff]  }
 0x583   : > { %9624 = vmatpush1.bf16.msra.mxu1 %v16408_v26  ;;  %v16489_v26 = vld [vmem:[%s21189_s4 + $0x1e38] ss:$24 sps:$4 sm:$0xff]  }
 0x584   : > { %9625 = vmatprep.subr.bf16.mxu1 %v16416_v31  ;;  %v16497_v31 = vld [vmem:[%s21189_s4 + $0x1e6c] ss:$24 sps:$4 sm:$0xff]  }
 0x585   : > { %8827 = vmatpush1.bf16.msra.mxu0 %v16411_v33  ;;  %v16500_v33 = vld [vmem:[%s21189_s4 + $0x1fe4] ss:$24 sps:$4 sm:$0xff]  }
 0x586   : > { %8828 = vmatprep.subr.bf16.mxu0 %v16419_v34  ;;  %v16495_v34 = vld [vmem:[%s21189_s4 + $0x1e68] ss:$24 sps:$4 sm:$0xff]  }
 0x587   : > { %9626 = vmatpush1.bf16.msra.mxu1 %v16414_v41  ;;  %v16503_v41 = vld [vmem:[%s21189_s4 + $0x1e9c] ss:$24 sps:$4 sm:$0xff]  }
 0x588   : > { %9627 = vmatprep.subr.bf16.mxu1 %v16422_v36  ;;  %v16498_v36 = vld [vmem:[%s21189_s4 + $0x1fe0] ss:$24 sps:$4 sm:$0xff]  }
 0x589   : > { %8829 = vmatpush1.bf16.msra.mxu0 %v16417_v37  ;;  %v16506_v37 = vld [vmem:[%s21189_s4 + $0x2014] ss:$24 sps:$4 sm:$0xff]  }
 0x58a   : > { %8830 = vmatprep.subr.bf16.mxu0 %v16425_v39  ;;  %v16501_v39 = vld [vmem:[%s21189_s4 + $0x1e98] ss:$24 sps:$4 sm:$0xff]  }
 0x58b   : > { %9628 = vmatpush1.bf16.msra.mxu1 %v16420_v40  ;;  %v16509_v40 = vld [vmem:[%s21189_s4 + $0x1ecc] ss:$24 sps:$4 sm:$0xff]  }
 0x58c   : > { %9629 = vmatprep.subr.bf16.mxu1 %v16428_v42  ;;  %v16504_v42 = vld [vmem:[%s21189_s4 + $0x2010] ss:$24 sps:$4 sm:$0xff]  }
 0x58d   : > { %8831 = vmatpush1.bf16.msra.mxu0 %v16423_v43  ;;  %v16512_v43 = vld [vmem:[%s21189_s4 + $0x2044] ss:$24 sps:$4 sm:$0xff]  }
 0x58e   : > { %8832 = vmatprep.subr.bf16.mxu0 %v16431_v57  ;;  %v16507_v57 = vld [vmem:[%s21189_s4 + $0x1ec8] ss:$24 sps:$4 sm:$0xff]  }
 0x58f   : > { %9630 = vmatpush1.bf16.msra.mxu1 %v16426_v44  ;;  %v16515_v44 = vld [vmem:[%s21189_s4 + $0x1efc] ss:$24 sps:$4 sm:$0xff]  }
 0x590   : > { %9631 = vmatprep.subr.bf16.mxu1 %v16434_v45  ;;  %v16510_v45 = vld [vmem:[%s21189_s4 + $0x2040] ss:$24 sps:$4 sm:$0xff]  }
 0x591   : > { %8833 = vmatpush1.bf16.msra.mxu0 %v16429_v47  ;;  %v16518_v47 = vld [vmem:[%s21189_s4 + $0x2074] ss:$24 sps:$4 sm:$0xff]  }
 0x592   : > { %9238 = vmatprep.subr.bf16.mxu0 %v16437_v52  ;;  %v16513_v52 = vld [vmem:[%s21189_s4 + $0x1ef8] ss:$24 sps:$4 sm:$0xff]  }
 0x593   : > { %9632 = vmatpush1.bf16.msra.mxu1 %v16432_v49  ;;  %v16521_v49 = vld [vmem:[%s21189_s4 + $0x1f2c] ss:$24 sps:$4 sm:$0xff]  }
 0x594   : > { %8851 = vmatmul.mubr.bf16.vlgmr.msra.gmra.mrb[12].mxu0 %v19803_v32  ;;  %9699 = vmatprep.subr.bf16.mxu1 %v16440_v50  ;;  %v16449_v32 = vld [vmem:[%s21189_s4 + $0x1cec] ss:$24 sps:$4 sm:$0xff]   ;;  %v16516_v50 = vld [vmem:[%s21189_s4 + $0x2070] ss:$24 sps:$4 sm:$0xff]  }
 0x595   : > { %9239 = vmatpush1.bf16.msra.mxu0 %v16435_v53  ;;  %9270 = vmatprep.mubr.bf16.mxu0 %v16910_v59  ;;  %v16524_v53 = vld [vmem:[%s21189_s4 + $0x20a4] ss:$24 sps:$4 sm:$0xff]  }
 0x596   : > { %9650 = vmatmul.mubr.bf16.vlgmr.msra.gmra.mrb[12].mxu1 %v20209_v11  ;;  %9240 = vmatprep.subr.bf16.mxu0 %v16443_v54  ;;  %v16519_v54 = vld [vmem:[%s21189_s4 + $0x1f28] ss:$24 sps:$4 sm:$0xff]  }
 0x597   : > { %9700 = vmatpush1.bf16.msra.mxu1 %v16438_v20  ;;  %9731 = vmatprep.mubr.bf16.mxu1 %v16910_v59  ;;  %v16527_v20 = vld [vmem:[%s21189_s4 + $0x1f5c] ss:$24 sps:$4 sm:$0xff]  }
 0x598   : > { %9701 = vmatprep.subr.bf16.mxu1 %v16446_v35  ;;  %v16522_v35 = vld [vmem:[%s21189_s4 + $0x20a0] ss:$24 sps:$4 sm:$0xff]  }
 0x599   : > { %9241 = vmatpush1.bf16.msra.mxu0 %v16441_v55  ;;  %v16530_v55 = vld [vmem:[%s21189_s4 + $0x20d4] ss:$24 sps:$4 sm:$0xff]  }
 0x59a   : > { %9242 = vmatprep.subr.bf16.mxu0 %v16449_v32  ;;  %v16525_v32 = vld [vmem:[%s21189_s4 + $0x1f58] ss:$24 sps:$4 sm:$0xff]  }
 0x59b   : > { %9702 = vmatpush1.bf16.msra.mxu1 %v16444_v56  ;;  %v16533_v56 = vld [vmem:[%s21189_s4 + $0x1f8c] ss:$24 sps:$4 sm:$0xff]  }
 0x59c   : > { %9703 = vmatprep.subr.bf16.mxu1 %v16452_v58  ;;  %v16528_v58 = vld [vmem:[%s21189_s4 + $0x20d0] ss:$24 sps:$4 sm:$0xff]  }
 0x59d   : > { %9243 = vmatpush1.bf16.msra.mxu0 %v16447_v22  ;;  %v16536_v22 = vld [vmem:[%s21189_s4 + $0x1f94] ss:$24 sps:$4 sm:$0xff]  }
 0x59e   : > { %9244 = vmatprep.subr.bf16.mxu0 %v16455_v60  ;;  %v16531_v60 = vld [vmem:[%s21189_s4 + $0x1f88] ss:$24 sps:$4 sm:$0xff]  }
 0x59f   : > { %9704 = vmatpush1.bf16.msra.mxu1 %v16450_v61  ;;  %v16539_v61 = vld [vmem:[%s21189_s4 + $0x1fbc] ss:$24 sps:$4 sm:$0xff]  }
 0x5a0   : > { %9705 = vmatprep.subr.bf16.mxu1 %v16458_v62  ;;  %v16534_v62 = vld [vmem:[%s21189_s4 + $0x1f90] ss:$24 sps:$4 sm:$0xff]  }
 0x5a1   : > { %9245 = vmatpush1.bf16.msra.mxu0 %v16453_v63  ;;  %v20412_v63 = vrot.slane %v19600_v1, 2 }
 0x5a2   : > { %9246 = vmatprep.subr.bf16.mxu0 %v16461_v0  ;;  %v16542_v0 = vld [vmem:[%s21189_s4 + $0x1fc4] ss:$24 sps:$4 sm:$0xff]  }
 0x5a3   : > { %9706 = vmatpush1.bf16.msra.mxu1 %v16456_v23  ;;  %v16537_v23 = vld [vmem:[%s21189_s4 + $0x1fb8] ss:$24 sps:$4 sm:$0xff]  }
 0x5a4   : > { %9707 = vmatprep.subr.bf16.mxu1 %v16464_v46  ;;  %v16540_v46 = vld [vmem:[%s21189_s4 + $0x1fc0] ss:$24 sps:$4 sm:$0xff]  }
 0x5a5   : > { %9247 = vmatpush1.bf16.msra.mxu0 %v16459_v2  ;;  %v16548_v2 = vld [vmem:[%s21189_s4 + $0x1ff4] ss:$24 sps:$4 sm:$0xff]  }
 0x5a6   : > { %9248 = vmatprep.subr.bf16.mxu0 %v16467_v38  ;;  %v16543_v38 = vld [vmem:[%s21189_s4 + $0x1fe8] ss:$24 sps:$4 sm:$0xff]  }
 0x5a7   : > { %9708 = vmatpush1.bf16.msra.mxu1 %v16462_v51  ;;  %v16551_v51 = vld [vmem:[%s21189_s4 + $0x201c] ss:$24 sps:$4 sm:$0xff]  }
 0x5a8   : > { %9709 = vmatprep.subr.bf16.mxu1 %v16470_v5  ;;  %v16546_v5 = vld [vmem:[%s21189_s4 + $0x1ff0] ss:$24 sps:$4 sm:$0xff]  }
 0x5a9   : > { %9249 = vmatpush1.bf16.msra.mxu0 %v16465_v6  ;;  %v16554_v6 = vld [vmem:[%s21189_s4 + $0x2024] ss:$24 sps:$4 sm:$0xff]  }
 0x5aa   : > { %9250 = vmatprep.subr.bf16.mxu0 %v16473_v7  ;;  %v16549_v7 = vld [vmem:[%s21189_s4 + $0x2018] ss:$24 sps:$4 sm:$0xff]  }
 0x5ab   : > { %9710 = vmatpush1.bf16.msra.mxu1 %v16468_v8  ;;  %v16557_v8 = vld [vmem:[%s21189_s4 + $0x204c] ss:$24 sps:$4 sm:$0xff]  }
 0x5ac   : > { %9711 = vmatprep.subr.bf16.mxu1 %v16476_v9  ;;  %v16552_v9 = vld [vmem:[%s21189_s4 + $0x2020] ss:$24 sps:$4 sm:$0xff]  }
 0x5ad   : > { %9251 = vmatpush1.bf16.msra.mxu0 %v16471_v10  ;;  %v16560_v10 = vld [vmem:[%s21189_s4 + $0x2054] ss:$24 sps:$4 sm:$0xff]  }
 0x5ae   : > { %9252 = vmatprep.subr.bf16.mxu0 %v16479_v12  ;;  %v16555_v12 = vld [vmem:[%s21189_s4 + $0x2048] ss:$24 sps:$4 sm:$0xff]  }
 0x5af   : > { %9712 = vmatpush1.bf16.msra.mxu1 %v16474_v13  ;;  %v16563_v13 = vld [vmem:[%s21189_s4 + $0x207c] ss:$24 sps:$4 sm:$0xff]  }
 0x5b0   : > { %9713 = vmatprep.subr.bf16.mxu1 %v16482_v14  ;;  %v16558_v14 = vld [vmem:[%s21189_s4 + $0x2050] ss:$24 sps:$4 sm:$0xff]  }
 0x5b1   : > { %9253 = vmatpush1.bf16.msra.mxu0 %v16477_v15  ;;  %v16566_v15 = vld [vmem:[%s21189_s4 + $0x2084] ss:$24 sps:$4 sm:$0xff]  }
 0x5b2   : > { %9658 = vmatprep.subr.bf16.mxu0 %v16485_v16  ;;  %v16561_v16 = vld [vmem:[%s21189_s4 + $0x2078] ss:$24 sps:$4 sm:$0xff]  }
 0x5b3   : > { %9714 = vmatpush1.bf16.msra.mxu1 %v16480_v4  ;;  %v16569_v4 = vld [vmem:[%s21189_s4 + $0x20ac] ss:$24 sps:$4 sm:$0xff]  }
 0x5b4   : > { %9271 = vmatmul.mubr.bf16.vlgmr.msra.gmra.mrb[12].mxu0 %v20006_v18  ;;  %10037 = vmatprep.subr.bf16.mxu1 %v16488_v19  ;;  %v16492_v18 = vld [vmem:[%s21189_s4 + $0x1fb0] ss:$24 sps:$4 sm:$0xff]   ;;  %v16564_v19 = vld [vmem:[%s21189_s4 + $0x2080] ss:$24 sps:$4 sm:$0xff]  }
 0x5b5   : > { %9659 = vmatpush1.bf16.msra.mxu0 %v16483_v21  ;;  %9690 = vmatprep.mubr.bf16.mxu0 %v16910_v59  ;;  %v16572_v21 = vld [vmem:[%s21189_s4 + $0x20b4] ss:$24 sps:$4 sm:$0xff]  }
 0x5b6   : > { %9732 = vmatmul.mubr.bf16.vlgmr.msra.gmra.mrb[8].mxu1 %v20209_v11  ;;  %9660 = vmatprep.subr.bf16.mxu0 %v16491_v24  ;;  %v16567_v24 = vld [vmem:[%s21189_s4 + $0x20a8] ss:$24 sps:$4 sm:$0xff]  }
 0x5b7   : > { %10038 = vmatpush1.bf16.msra.mxu1 %v16486_v28  ;;  %10069 = vmatprep.mubr.bf16.mxu1 %v16910_v59  ;;  %v16575_v28 = vld [vmem:[%s21189_s4 + $0x20dc] ss:$24 sps:$4 sm:$0xff]  }
 0x5b8   : > { %10039 = vmatprep.subr.bf16.mxu1 %v16494_v30  ;;  %v16570_v30 = vld [vmem:[%s21189_s4 + $0x20b0] ss:$24 sps:$4 sm:$0xff]  }
 0x5b9   : > { %9661 = vmatpush1.bf16.msra.mxu0 %v16489_v26  ;;  %v16578_v26 = vld [vmem:[%s21189_s4 + $0x20e4] ss:$24 sps:$4 sm:$0xff]  }
 0x5ba   : > { %9662 = vmatprep.subr.bf16.mxu0 %v16497_v31  ;;  %v16573_v31 = vld [vmem:[%s21189_s4 + $0x20d8] ss:$24 sps:$4 sm:$0xff]  }
 0x5bb   : > { %10040 = vmatpush1.bf16.msra.mxu1 %v16492_v18  ;;  %v16581_v18 = vld [vmem:[%s21189_s4 + $0x210c] ss:$24 sps:$4 sm:$0xff]  }
 0x5bc   : > { %10041 = vmatprep.subr.bf16.mxu1 %v16500_v33  ;;  %v16576_v33 = vld [vmem:[%s21189_s4 + $0x20e0] ss:$24 sps:$4 sm:$0xff]  }
 0x5bd   : > { %9663 = vmatpush1.bf16.msra.mxu0 %v16495_v34  ;;  %v16584_v34 = vld [vmem:[%s21189_s4 + $0x2104] ss:$24 sps:$4 sm:$0xff]  }
 0x5be   : > { %9664 = vmatprep.subr.bf16.mxu0 %v16503_v41  ;;  %v16579_v41 = vld [vmem:[%s21189_s4 + $0x2108] ss:$24 sps:$4 sm:$0xff]  }
 0x5bf   : > { %10042 = vmatpush1.bf16.msra.mxu1 %v16498_v36  ;;  %v16587_v36 = vld [vmem:[%s21189_s4 + $0x213c] ss:$24 sps:$4 sm:$0xff]  }
 0x5c0   : > { %10043 = vmatprep.subr.bf16.mxu1 %v16506_v37  ;;  %v16582_v37 = vld [vmem:[%s21189_s4 + $0x2100] ss:$24 sps:$4 sm:$0xff]  }
 0x5c1   : > { %9665 = vmatpush1.bf16.msra.mxu0 %v16501_v39  ;;  %v16590_v39 = vld [vmem:[%s21189_s4 + $0x2134] ss:$24 sps:$4 sm:$0xff]  }
 0x5c2   : > { %9666 = vmatprep.subr.bf16.mxu0 %v16509_v40  ;;  %v16585_v40 = vld [vmem:[%s21189_s4 + $0x2138] ss:$24 sps:$4 sm:$0xff]  }
 0x5c3   : > { %10044 = vmatpush1.bf16.msra.mxu1 %v16504_v42  ;;  %v16593_v42 = vld [vmem:[%s21189_s4 + $0x216c] ss:$24 sps:$4 sm:$0xff]  }
 0x5c4   : > { %10045 = vmatprep.subr.bf16.mxu1 %v16512_v43  ;;  %v16588_v43 = vld [vmem:[%s21189_s4 + $0x2130] ss:$24 sps:$4 sm:$0xff]  }
 0x5c5   : > { %9667 = vmatpush1.bf16.msra.mxu0 %v16507_v57  ;;  %v16596_v57 = vld [vmem:[%s21189_s4 + $0x2164] ss:$24 sps:$4 sm:$0xff]  }
 0x5c6   : > { %9668 = vmatprep.subr.bf16.mxu0 %v16515_v44  ;;  %v16591_v44 = vld [vmem:[%s21189_s4 + $0x2168] ss:$24 sps:$4 sm:$0xff]  }
 0x5c7   : > { %10046 = vmatpush1.bf16.msra.mxu1 %v16510_v45  ;;  %v16599_v45 = vld [vmem:[%s21189_s4 + $0x219c] ss:$24 sps:$4 sm:$0xff]  }
 0x5c8   : > { %10047 = vmatprep.subr.bf16.mxu1 %v16518_v47  ;;  %v16594_v47 = vld [vmem:[%s21189_s4 + $0x2160] ss:$24 sps:$4 sm:$0xff]  }
 0x5c9   : > { %9669 = vmatpush1.bf16.msra.mxu0 %v16513_v52  ;;  %v16602_v52 = vld [vmem:[%s21189_s4 + $0x2194] ss:$24 sps:$4 sm:$0xff]  }
 0x5ca   : > { %9670 = vmatprep.subr.bf16.mxu0 %v16521_v49  ;;  %v16597_v49 = vld [vmem:[%s21189_s4 + $0x2198] ss:$24 sps:$4 sm:$0xff]  }
 0x5cb   : > { %10048 = vmatpush1.bf16.msra.mxu1 %v16516_v50  ;;  %v16605_v50 = vld [vmem:[%s21189_s4 + $0x21cc] ss:$24 sps:$4 sm:$0xff]  }
 0x5cc   : > { %10049 = vmatprep.subr.bf16.mxu1 %v16524_v53  ;;  %v16600_v53 = vld [vmem:[%s21189_s4 + $0x2190] ss:$24 sps:$4 sm:$0xff]  }
 0x5cd   : > { %9671 = vmatpush1.bf16.msra.mxu0 %v16519_v54  ;;  %v16608_v54 = vld [vmem:[%s21189_s4 + $0x21c4] ss:$24 sps:$4 sm:$0xff]  }
 0x5ce   : > { %9672 = vmatprep.subr.bf16.mxu0 %v16527_v20  ;;  %v16603_v20 = vld [vmem:[%s21189_s4 + $0x21c8] ss:$24 sps:$4 sm:$0xff]  }
 0x5cf   : > { %10050 = vmatpush1.bf16.msra.mxu1 %v16522_v35  ;;  %v16611_v35 = vld [vmem:[%s21189_s4 + $0x21fc] ss:$24 sps:$4 sm:$0xff]  }
 0x5d0   : > { %10051 = vmatprep.subr.bf16.mxu1 %v16530_v55  ;;  %v16606_v55 = vld [vmem:[%s21189_s4 + $0x21c0] ss:$24 sps:$4 sm:$0xff]  }
 0x5d1   : > { %9673 = vmatpush1.bf16.msra.mxu0 %v16525_v32  ;;  %v16614_v32 = vld [vmem:[%s21189_s4 + $0x21f4] ss:$24 sps:$4 sm:$0xff]  }
 0x5d2   : > { %10078 = vmatprep.subr.bf16.mxu0 %v16533_v56  ;;  %v16609_v56 = vld [vmem:[%s21189_s4 + $0x21f8] ss:$24 sps:$4 sm:$0xff]  }
 0x5d3   : > { %10052 = vmatpush1.bf16.msra.mxu1 %v16528_v58  ;;  %v16617_v58 = vld [vmem:[%s21189_s4 + $0x222c] ss:$24 sps:$4 sm:$0xff]  }
 0x5d4   : > { %9691 = vmatmul.mubr.bf16.vlgmr.msra.gmra.mrb[12].mxu0 %v20209_v11  ;;  %10119 = vmatprep.subr.bf16.mxu1 %v16536_v22  ;;  %v16545_v11 = vld [vmem:[%s21189_s4 + $0x1fec] ss:$24 sps:$4 sm:$0xff]   ;;  %v16612_v22 = vld [vmem:[%s21189_s4 + $0x21f0] ss:$24 sps:$4 sm:$0xff]  }
 0x5d5   : > { %10079 = vmatpush1.bf16.msra.mxu0 %v16531_v60  ;;  %10110 = vmatprep.mubr.bf16.mxu0 %v16910_v59  ;;  %v16620_v60 = vld [vmem:[%s21189_s4 + $0x2224] ss:$24 sps:$4 sm:$0xff]  }
 0x5d6   : > { %10070 = vmatmul.mubr.bf16.vlgmr.msra.gmra.mrb[12].mxu1 %v20412_v63  ;;  %10080 = vmatprep.subr.bf16.mxu0 %v16539_v61  ;;  %v16615_v61 = vld [vmem:[%s21189_s4 + $0x2228] ss:$24 sps:$4 sm:$0xff]  }
 0x5d7   : > { %10120 = vmatpush1.bf16.msra.mxu1 %v16534_v62  ;;  %10151 = vmatprep.mubr.bf16.mxu1 %v16910_v59  ;;  %v16623_v62 = vld [vmem:[%s21189_s4 + $0x225c] ss:$24 sps:$4 sm:$0xff]  }
 0x5d8   : > { %10121 = vmatprep.subr.bf16.mxu1 %v16542_v0  ;;  %v16626_v0 = vld [vmem:[%s21189_s4 + $0x2254] ss:$24 sps:$4 sm:$0xff]  }
 0x5d9   : > { %10081 = vmatpush1.bf16.msra.mxu0 %v16537_v23  ;;  %v16621_v23 = vld [vmem:[%s21189_s4 + $0x2258] ss:$24 sps:$4 sm:$0xff]  }
 0x5da   : > { %10082 = vmatprep.subr.bf16.mxu0 %v16545_v11  ;;  %v16629_v11 = vld [vmem:[%s21189_s4 + $0x228c] ss:$24 sps:$4 sm:$0xff]  }
 0x5db   : > { %10122 = vmatpush1.bf16.msra.mxu1 %v16540_v46  ;;  %v16624_v46 = vld [vmem:[%s21189_s4 + $0x2250] ss:$24 sps:$4 sm:$0xff]  }
 0x5dc   : > { %10123 = vmatprep.subr.bf16.mxu1 %v16548_v2  ;;  %v16632_v2 = vld [vmem:[%s21189_s4 + $0x2114] ss:$24 sps:$4 sm:$0xff]  }
 0x5dd   : > { %10083 = vmatpush1.bf16.msra.mxu0 %v16543_v38  ;;  %v16627_v38 = vld [vmem:[%s21189_s4 + $0x2288] ss:$24 sps:$4 sm:$0xff]  }
 0x5de   : > { %10084 = vmatprep.subr.bf16.mxu0 %v16551_v51  ;;  %v20608_v51 = vrot.slane %v17232_v17, 3 }
 0x5df   : > { %10124 = vmatpush1.bf16.msra.mxu1 %v16546_v5  ;;  %v16635_v5 = vld [vmem:[%s21189_s4 + $0x22bc] ss:$24 sps:$4 sm:$0xff]  }
 0x5e0   : > { %10125 = vmatprep.subr.bf16.mxu1 %v16554_v6  ;;  %v16630_v6 = vld [vmem:[%s21189_s4 + $0x2110] ss:$24 sps:$4 sm:$0xff]  }
 0x5e1   : > { %10085 = vmatpush1.bf16.msra.mxu0 %v16549_v7  ;;  %v16638_v7 = vld [vmem:[%s21189_s4 + $0x2144] ss:$24 sps:$4 sm:$0xff]  }
 0x5e2   : > { %10086 = vmatprep.subr.bf16.mxu0 %v16557_v8  ;;  %v16633_v8 = vld [vmem:[%s21189_s4 + $0x22b8] ss:$24 sps:$4 sm:$0xff]  }
 0x5e3   : > { %10126 = vmatpush1.bf16.msra.mxu1 %v16552_v9  ;;  %v16641_v9 = vld [vmem:[%s21189_s4 + $0x22ec] ss:$24 sps:$4 sm:$0xff]  }
 0x5e4   : > { %10127 = vmatprep.subr.bf16.mxu1 %v16560_v10  ;;  %v16636_v10 = vld [vmem:[%s21189_s4 + $0x2140] ss:$24 sps:$4 sm:$0xff]  }
 0x5e5   : > { %10087 = vmatpush1.bf16.msra.mxu0 %v16555_v12  ;;  %v16644_v12 = vld [vmem:[%s21189_s4 + $0x2174] ss:$24 sps:$4 sm:$0xff]  }
 0x5e6   : > { %10088 = vmatprep.subr.bf16.mxu0 %v16563_v13  ;;  %v16639_v13 = vld [vmem:[%s21189_s4 + $0x22e8] ss:$24 sps:$4 sm:$0xff]  }
 0x5e7   : > { %10128 = vmatpush1.bf16.msra.mxu1 %v16558_v14  ;;  %v16647_v14 = vld [vmem:[%s21189_s4 + $0x231c] ss:$24 sps:$4 sm:$0xff]  }
 0x5e8   : > { %10129 = vmatprep.subr.bf16.mxu1 %v16566_v15  ;;  %v16642_v15 = vld [vmem:[%s21189_s4 + $0x2170] ss:$24 sps:$4 sm:$0xff]  }
 0x5e9   : > { %10089 = vmatpush1.bf16.msra.mxu0 %v16561_v16  ;;  %v16650_v16 = vld [vmem:[%s21189_s4 + $0x21a4] ss:$24 sps:$4 sm:$0xff]  }
 0x5ea   : > { %10090 = vmatprep.subr.bf16.mxu0 %v16569_v4  ;;  %v16645_v4 = vld [vmem:[%s21189_s4 + $0x2318] ss:$24 sps:$4 sm:$0xff]  }
 0x5eb   : > { %10130 = vmatpush1.bf16.msra.mxu1 %v16564_v19  ;;  %v16653_v19 = vld [vmem:[%s21189_s4 + $0x234c] ss:$24 sps:$4 sm:$0xff]  }
 0x5ec   : > { %10131 = vmatprep.subr.bf16.mxu1 %v16572_v21  ;;  %v16648_v21 = vld [vmem:[%s21189_s4 + $0x21a0] ss:$24 sps:$4 sm:$0xff]  }
 0x5ed   : > { %10091 = vmatpush1.bf16.msra.mxu0 %v16567_v24  ;;  %v16656_v24 = vld [vmem:[%s21189_s4 + $0x21d4] ss:$24 sps:$4 sm:$0xff]  }
 0x5ee   : > { %10092 = vmatprep.subr.bf16.mxu0 %v16575_v28  ;;  %v16651_v28 = vld [vmem:[%s21189_s4 + $0x2348] ss:$24 sps:$4 sm:$0xff]  }
 0x5ef   : > { %10132 = vmatpush1.bf16.msra.mxu1 %v16570_v30  ;;  %v16659_v30 = vld [vmem:[%s21189_s4 + $0x237c] ss:$24 sps:$4 sm:$0xff]  }
 0x5f0   : > { %10133 = vmatprep.subr.bf16.mxu1 %v16578_v26  ;;  %v16654_v26 = vld [vmem:[%s21189_s4 + $0x21d0] ss:$24 sps:$4 sm:$0xff]  }
 0x5f1   : > { %10093 = vmatpush1.bf16.msra.mxu0 %v16573_v31  ;;  %v16662_v31 = vld [vmem:[%s21189_s4 + $0x2204] ss:$24 sps:$4 sm:$0xff]  }
 0x5f2   : > { %10498 = vmatprep.subr.bf16.mxu0 %v16581_v18  ;;  %v16657_v18 = vld [vmem:[%s21189_s4 + $0x2378] ss:$24 sps:$4 sm:$0xff]  }
 0x5f3   : > { %10134 = vmatpush1.bf16.msra.mxu1 %v16576_v33  ;;  %v16665_v33 = vld [vmem:[%s21189_s4 + $0x23ac] ss:$24 sps:$4 sm:$0xff]  }
 0x5f4   : > { %10111 = vmatmul.mubr.bf16.vlgmr.msra.gmra.mrb[12].mxu0 %v20412_v63  ;;  %10457 = vmatprep.subr.bf16.mxu1 %v16584_v34  ;;  %v16660_v34 = vld [vmem:[%s21189_s4 + $0x2200] ss:$24 sps:$4 sm:$0xff]  }
 0x5f5   : > { %10499 = vmatpush1.bf16.msra.mxu0 %v16579_v41  ;;  %10530 = vmatprep.mubr.bf16.mxu0 %v16910_v59  ;;  %v16668_v41 = vld [vmem:[%s21189_s4 + $0x2234] ss:$24 sps:$4 sm:$0xff]  }
 0x5f6   : > { %10152 = vmatmul.mubr.bf16.vlgmr.msra.gmra.mrb[8].mxu1 %v20412_v63  ;;  %10500 = vmatprep.subr.bf16.mxu0 %v16587_v36  ;;  %v16618_v63 = vld [vmem:[%s21189_s4 + $0x2220] ss:$24 sps:$4 sm:$0xff]  }
 0x5f7   : > { %10458 = vmatpush1.bf16.msra.mxu1 %v16582_v37  ;;  %10489 = vmatprep.mubr.bf16.mxu1 %v16910_v59  ;;  %v16663_v36 = vld [vmem:[%s21189_s4 + $0x23a8] ss:$24 sps:$4 sm:$0xff]   ;;  %v16671_v37 = vld [vmem:[%s21189_s4 + $0x23dc] ss:$24 sps:$4 sm:$0xff]  }
 0x5f8   : > { %10459 = vmatprep.subr.bf16.mxu1 %v16590_v39  ;;  %v16666_v39 = vld [vmem:[%s21189_s4 + $0x2230] ss:$24 sps:$4 sm:$0xff]  }
 0x5f9   : > { %10501 = vmatpush1.bf16.msra.mxu0 %v16585_v40  ;;  %v16674_v40 = vld [vmem:[%s21189_s4 + $0x2264] ss:$24 sps:$4 sm:$0xff]  }
 0x5fa   : > { %10502 = vmatprep.subr.bf16.mxu0 %v16593_v42  ;;  %v16669_v42 = vld [vmem:[%s21189_s4 + $0x23d8] ss:$24 sps:$4 sm:$0xff]  }
 0x5fb   : > { %10460 = vmatpush1.bf16.msra.mxu1 %v16588_v43  ;;  %v16677_v43 = vld [vmem:[%s21189_s4 + $0x240c] ss:$24 sps:$4 sm:$0xff]  }
 0x5fc   : > { %10461 = vmatprep.subr.bf16.mxu1 %v16596_v57  ;;  %v16672_v57 = vld [vmem:[%s21189_s4 + $0x2260] ss:$24 sps:$4 sm:$0xff]  }
 0x5fd   : > { %10503 = vmatpush1.bf16.msra.mxu0 %v16591_v44  ;;  %v16680_v44 = vld [vmem:[%s21189_s4 + $0x2284] ss:$24 sps:$4 sm:$0xff]  }
 0x5fe   : > { %10504 = vmatprep.subr.bf16.mxu0 %v16599_v45  ;;  %v16675_v45 = vld [vmem:[%s21189_s4 + $0x2408] ss:$24 sps:$4 sm:$0xff]  }
 0x5ff   : > { %10462 = vmatpush1.bf16.msra.mxu1 %v16594_v47  ;;  %v20711_v47 = vrot.slane %v19600_v1, 3  ;;  %v16681_v1 = vld [vmem:[%s21189_s4 + $0x2438] ss:$24 sps:$4 sm:$0xff]  }
 0x600   : > { %10463 = vmatprep.subr.bf16.mxu1 %v16602_v52  ;;  %v16683_v52 = vld [vmem:[%s21189_s4 + $0x243c] ss:$24 sps:$4 sm:$0xff]  }
 0x601   : > { %10505 = vmatpush1.bf16.msra.mxu0 %v16597_v49  ;;  %v16678_v49 = vld [vmem:[%s21189_s4 + $0x2280] ss:$24 sps:$4 sm:$0xff]  }
 0x602   : > { %10506 = vmatprep.subr.bf16.mxu0 %v16605_v50  ;;  %v16686_v50 = vld [vmem:[%s21189_s4 + $0x22b4] ss:$24 sps:$4 sm:$0xff]  }
 0x603   : > { %10464 = vmatpush1.bf16.msra.mxu1 %v16600_v53  ;;  %v16689_v53 = vld [vmem:[%s21189_s4 + $0x246c] ss:$24 sps:$4 sm:$0xff]  }
 0x604   : > { %10465 = vmatprep.subr.bf16.mxu1 %v16608_v54  ;;  %v16684_v54 = vld [vmem:[%s21189_s4 + $0x22b0] ss:$24 sps:$4 sm:$0xff]  }
 0x605   : > { %10507 = vmatpush1.bf16.msra.mxu0 %v16603_v20  ;;  %v16692_v20 = vld [vmem:[%s21189_s4 + $0x22e4] ss:$24 sps:$4 sm:$0xff]  }
 0x606   : > { %10508 = vmatprep.subr.bf16.mxu0 %v16611_v35  ;;  %v16687_v35 = vld [vmem:[%s21189_s4 + $0x2468] ss:$24 sps:$4 sm:$0xff]  }
 0x607   : > { %10466 = vmatpush1.bf16.msra.mxu1 %v16606_v55  ;;  %v16695_v55 = vld [vmem:[%s21189_s4 + $0x249c] ss:$24 sps:$4 sm:$0xff]  }
 0x608   : > { %10467 = vmatprep.subr.bf16.mxu1 %v16614_v32  ;;  %v16690_v32 = vld [vmem:[%s21189_s4 + $0x22e0] ss:$24 sps:$4 sm:$0xff]  }
 0x609   : > { %10509 = vmatpush1.bf16.msra.mxu0 %v16609_v56  ;;  %v16698_v56 = vld [vmem:[%s21189_s4 + $0x2314] ss:$24 sps:$4 sm:$0xff]  }
 0x60a   : > { %10510 = vmatprep.subr.bf16.mxu0 %v16617_v58  ;;  %v16693_v58 = vld [vmem:[%s21189_s4 + $0x2498] ss:$24 sps:$4 sm:$0xff]  }
 0x60b   : > { %10468 = vmatpush1.bf16.msra.mxu1 %v16612_v22  ;;  %v16701_v22 = vld [vmem:[%s21189_s4 + $0x24cc] ss:$24 sps:$4 sm:$0xff]  }
 0x60c   : > { %10469 = vmatprep.subr.bf16.mxu1 %v16620_v60  ;;  %v16696_v60 = vld [vmem:[%s21189_s4 + $0x2310] ss:$24 sps:$4 sm:$0xff]  }
 0x60d   : > { %10511 = vmatpush1.bf16.msra.mxu0 %v16615_v61  ;;  %v16704_v61 = vld [vmem:[%s21189_s4 + $0x2344] ss:$24 sps:$4 sm:$0xff]  }
 0x60e   : > { %10512 = vmatprep.subr.bf16.mxu0 %v16623_v62  ;;  %v16699_v62 = vld [vmem:[%s21189_s4 + $0x24c8] ss:$24 sps:$4 sm:$0xff]  }
 0x60f   : > { %10470 = vmatpush1.bf16.msra.mxu1 %v16618_v63  ;;  %v16707_v63 = vld [vmem:[%s21189_s4 + $0x24fc] ss:$24 sps:$4 sm:$0xff]  }
 0x610   : > { %10471 = vmatprep.subr.bf16.mxu1 %v16626_v0  ;;  %v16702_v0 = vld [vmem:[%s21189_s4 + $0x2340] ss:$24 sps:$4 sm:$0xff]  }
 0x611   : > { %10513 = vmatpush1.bf16.msra.mxu0 %v16621_v23  ;;  %v16710_v23 = vld [vmem:[%s21189_s4 + $0x2374] ss:$24 sps:$4 sm:$0xff]  }
 0x612   : > { %10918 = vmatprep.subr.bf16.mxu0 %v16629_v11  ;;  %v16705_v11 = vld [vmem:[%s21189_s4 + $0x24f8] ss:$24 sps:$4 sm:$0xff]  }
 0x613   : > { %10472 = vmatpush1.bf16.msra.mxu1 %v16624_v46  ;;  %v16713_v46 = vld [vmem:[%s21189_s4 + $0x252c] ss:$24 sps:$4 sm:$0xff]  }
 0x614   : > { %10531 = vmatmul.mubr.bf16.vlgmr.msra.gmra.mrb[12].mxu0 %v20608_v51  ;;  %10539 = vmatprep.subr.bf16.mxu1 %v16632_v2  ;;  %v16708_v2 = vld [vmem:[%s21189_s4 + $0x2370] ss:$24 sps:$4 sm:$0xff]  }
 0x615   : > { %10919 = vmatpush1.bf16.msra.mxu0 %v16627_v38  ;;  %10950 = vmatprep.mubr.bf16.mxu0 %v16910_v59  ;;  %v16716_v38 = vld [vmem:[%s21189_s4 + $0x23a4] ss:$24 sps:$4 sm:$0xff]  }
 0x616   : > { %10490 = vmatmul.mubr.bf16.vlgmr.msra.gmra.mrb[12].mxu1 %v20608_v51  ;;  %10920 = vmatprep.subr.bf16.mxu0 %v16635_v5  ;;  %v16719_v5 = vld [vmem:[%s21189_s4 + $0x255c] ss:$24 sps:$4 sm:$0xff]  }
 0x617   : > { %10540 = vmatpush1.bf16.msra.mxu1 %v16630_v6  ;;  %10571 = vmatprep.mubr.bf16.mxu1 %v16910_v59  ;;  %v16714_v6 = vld [vmem:[%s21189_s4 + $0x23a0] ss:$24 sps:$4 sm:$0xff]  }
 0x618   : > { %10541 = vmatprep.subr.bf16.mxu1 %v16638_v7  ;;  %v16722_v7 = vld [vmem:[%s21189_s4 + $0x23d4] ss:$24 sps:$4 sm:$0xff]  }
 0x619   : > { %10921 = vmatpush1.bf16.msra.mxu0 %v16633_v8  ;;  %v16717_v8 = vld [vmem:[%s21189_s4 + $0x2558] ss:$24 sps:$4 sm:$0xff]  }
 0x61a   : > { %10922 = vmatprep.subr.bf16.mxu0 %v16641_v9  ;;  %v16720_v9 = vld [vmem:[%s21189_s4 + $0x23d0] ss:$24 sps:$4 sm:$0xff]  }
 0x61b   : > { %10542 = vmatpush1.bf16.msra.mxu1 %v16636_v10  ;;  %v16725_v10 = vld [vmem:[%s21189_s4 + $0x2294] ss:$24 sps:$4 sm:$0xff]  }
 0x61c   : > { %10543 = vmatprep.subr.bf16.mxu1 %v16644_v12  ;;  %v20808_v12 = vrot.slane %v17232_v17, 4  ;;  %v16726_v17 = vld [vmem:[%s21189_s4 + $0x22c0] ss:$24 sps:$4 sm:$0xff]  }
 0x61d   : > { %10923 = vmatpush1.bf16.msra.mxu0 %v16639_v13  ;;  %v16723_v13 = vld [vmem:[%s21189_s4 + $0x2290] ss:$24 sps:$4 sm:$0xff]  }
 0x61e   : > { %10924 = vmatprep.subr.bf16.mxu0 %v16647_v14  ;;  %v16728_v14 = vld [vmem:[%s21189_s4 + $0x22c4] ss:$24 sps:$4 sm:$0xff]  }
 0x61f   : > { %10544 = vmatpush1.bf16.msra.mxu1 %v16642_v15  ;;  %v16731_v15 = vld [vmem:[%s21189_s4 + $0x22f4] ss:$24 sps:$4 sm:$0xff]  }
 0x620   : > { %10545 = vmatprep.subr.bf16.mxu1 %v16650_v16  ;;  %v16729_v16 = vld [vmem:[%s21189_s4 + $0x22f0] ss:$24 sps:$4 sm:$0xff]  }
 0x621   : > { %10925 = vmatpush1.bf16.msra.mxu0 %v16645_v4  ;;  %v16734_v4 = vld [vmem:[%s21189_s4 + $0x2324] ss:$24 sps:$4 sm:$0xff]  }
 0x622   : > { %10926 = vmatprep.subr.bf16.mxu0 %v16653_v19  ;;  %v16732_v19 = vld [vmem:[%s21189_s4 + $0x2320] ss:$24 sps:$4 sm:$0xff]  }
 0x623   : > { %10546 = vmatpush1.bf16.msra.mxu1 %v16648_v21  ;;  %v16737_v21 = vld [vmem:[%s21189_s4 + $0x2354] ss:$24 sps:$4 sm:$0xff]  }
 0x624   : > { %10547 = vmatprep.subr.bf16.mxu1 %v16656_v24  ;;  %v16735_v24 = vld [vmem:[%s21189_s4 + $0x2350] ss:$24 sps:$4 sm:$0xff]  }
 0x625   : > { %10927 = vmatpush1.bf16.msra.mxu0 %v16651_v28  ;;  %v16740_v28 = vld [vmem:[%s21189_s4 + $0x2384] ss:$24 sps:$4 sm:$0xff]  }
 0x626   : > { %10928 = vmatprep.subr.bf16.mxu0 %v16659_v30  ;;  %v16738_v30 = vld [vmem:[%s21189_s4 + $0x2380] ss:$24 sps:$4 sm:$0xff]  }
 0x627   : > { %10548 = vmatpush1.bf16.msra.mxu1 %v16654_v26  ;;  %v16743_v26 = vld [vmem:[%s21189_s4 + $0x23b4] ss:$24 sps:$4 sm:$0xff]  }
 0x628   : > { %10549 = vmatprep.subr.bf16.mxu1 %v16662_v31  ;;  %v16741_v31 = vld [vmem:[%s21189_s4 + $0x23b0] ss:$24 sps:$4 sm:$0xff]  }
 0x629   : > { %10929 = vmatpush1.bf16.msra.mxu0 %v16657_v18  ;;  %v16746_v18 = vld [vmem:[%s21189_s4 + $0x23e4] ss:$24 sps:$4 sm:$0xff]  }
 0x62a   : > { %10930 = vmatprep.subr.bf16.mxu0 %v16665_v33  ;;  %v16744_v33 = vld [vmem:[%s21189_s4 + $0x23e0] ss:$24 sps:$4 sm:$0xff]  }
 0x62b   : > { %10550 = vmatpush1.bf16.msra.mxu1 %v16660_v34  ;;  %v16749_v34 = vld [vmem:[%s21189_s4 + $0x2404] ss:$24 sps:$4 sm:$0xff]  }
 0x62c   : > { %10551 = vmatprep.subr.bf16.mxu1 %v16668_v41  ;;  %v16747_v41 = vld [vmem:[%s21189_s4 + $0x2400] ss:$24 sps:$4 sm:$0xff]  }
 0x62d   : > { %10931 = vmatpush1.bf16.msra.mxu0 %v16663_v36  ;;  %v16752_v36 = vld [vmem:[%s21189_s4 + $0x2434] ss:$24 sps:$4 sm:$0xff]  }
 0x62e   : > { %10932 = vmatprep.subr.bf16.mxu0 %v16671_v37  ;;  %v16750_v37 = vld [vmem:[%s21189_s4 + $0x2430] ss:$24 sps:$4 sm:$0xff]  }
 0x62f   : > { %10552 = vmatpush1.bf16.msra.mxu1 %v16666_v39  ;;  %v16755_v39 = vld [vmem:[%s21189_s4 + $0x2464] ss:$24 sps:$4 sm:$0xff]  }
 0x630   : > { %10553 = vmatprep.subr.bf16.mxu1 %v16674_v40  ;;  %v16753_v40 = vld [vmem:[%s21189_s4 + $0x2460] ss:$24 sps:$4 sm:$0xff]  }
 0x631   : > { %10933 = vmatpush1.bf16.msra.mxu0 %v16669_v42  ;;  %v16758_v42 = vld [vmem:[%s21189_s4 + $0x2494] ss:$24 sps:$4 sm:$0xff]  }
 0x632   : > { %11338 = vmatprep.subr.bf16.mxu0 %v16677_v43  ;;  %v16756_v43 = vld [vmem:[%s21189_s4 + $0x2490] ss:$24 sps:$4 sm:$0xff]  }
 0x633   : > { %10554 = vmatpush1.bf16.msra.mxu1 %v16672_v57  ;;  %v16761_v57 = vld [vmem:[%s21189_s4 + $0x24c4] ss:$24 sps:$4 sm:$0xff]  }
 0x634   : > { %10951 = vmatmul.mubr.bf16.vlgmr.msra.gmra.mrb[12].mxu0 %v20711_v47  ;;  %10877 = vmatprep.subr.bf16.mxu1 %v16680_v44  ;;  %v16759_v44 = vld [vmem:[%s21189_s4 + $0x24c0] ss:$24 sps:$4 sm:$0xff]  }
 0x635   : > { %11339 = vmatpush1.bf16.msra.mxu0 %v16675_v45  ;;  %11370 = vmatprep.mubr.bf16.mxu0 %v16910_v59  ;;  %v16764_v45 = vld [vmem:[%s21189_s4 + $0x24f4] ss:$24 sps:$4 sm:$0xff]  }
 0x636   : > { %10572 = vmatmul.mubr.bf16.vlgmr.msra.gmra.mrb[8].mxu1 %v20608_v51  ;;  %11340 = vmatprep.subr.bf16.mxu0 %v16683_v52  ;;  %v16711_v51 = vld [vmem:[%s21189_s4 + $0x2528] ss:$24 sps:$4 sm:$0xff]   ;;  %v16767_v52 = vld [vmem:[%s21189_s4 + $0x2524] ss:$24 sps:$4 sm:$0xff]  }
 0x637   : > { %10878 = vmatpush1.bf16.msra.mxu1 %v16678_v49  ;;  %10909 = vmatprep.mubr.bf16.mxu1 %v16910_v59  ;;  %v16765_v49 = vld [vmem:[%s21189_s4 + $0x2520] ss:$24 sps:$4 sm:$0xff]  }
 0x638   : > { %10879 = vmatprep.subr.bf16.mxu1 %v16686_v50  ;;  %v16770_v50 = vld [vmem:[%s21189_s4 + $0x2554] ss:$24 sps:$4 sm:$0xff]  }
 0x639   : > { %11341 = vmatpush1.bf16.msra.mxu0 %v16681_v1  ;;  %v16768_v1 = vld [vmem:[%s21189_s4 + $0x2550] ss:$24 sps:$4 sm:$0xff]  }
 0x63a   : > { %11342 = vmatprep.subr.bf16.mxu0 %v16689_v53  ;;  %v16773_v53 = vld [vmem:[%s21189_s4 + $0x2414] ss:$24 sps:$4 sm:$0xff]  }
 0x63b   : > { %10880 = vmatpush1.bf16.msra.mxu1 %v16684_v54  ;;  %v16771_v54 = vld [vmem:[%s21189_s4 + $0x2410] ss:$24 sps:$4 sm:$0xff]  }
 0x63c   : > { %10881 = vmatprep.subr.bf16.mxu1 %v16692_v20  ;;  %v16776_v20 = vld [vmem:[%s21189_s4 + $0x2444] ss:$24 sps:$4 sm:$0xff]  }
 0x63d   : > { %11343 = vmatpush1.bf16.msra.mxu0 %v16687_v35  ;;  %v16774_v35 = vld [vmem:[%s21189_s4 + $0x2440] ss:$24 sps:$4 sm:$0xff]  }
 0x63e   : > { %11344 = vmatprep.subr.bf16.mxu0 %v16695_v55  ;;  %v16779_v55 = vld [vmem:[%s21189_s4 + $0x2474] ss:$24 sps:$4 sm:$0xff]  }
 0x63f   : > { %10882 = vmatpush1.bf16.msra.mxu1 %v16690_v32  ;;  %v16777_v32 = vld [vmem:[%s21189_s4 + $0x2470] ss:$24 sps:$4 sm:$0xff]  }
 0x640   : > { %10883 = vmatprep.subr.bf16.mxu1 %v16698_v56  ;;  %v16782_v56 = vld [vmem:[%s21189_s4 + $0x24a4] ss:$24 sps:$4 sm:$0xff]  }
 0x641   : > { %11345 = vmatpush1.bf16.msra.mxu0 %v16693_v58  ;;  %v16785_v58 = vld [vmem:[%s21189_s4 + $0x24d4] ss:$24 sps:$4 sm:$0xff]  }
 0x642   : > { %11346 = vmatprep.subr.bf16.mxu0 %v16701_v22  ;;  %v16783_v22 = vld [vmem:[%s21189_s4 + $0x24d0] ss:$24 sps:$4 sm:$0xff]  }
 0x643   : > { %10884 = vmatpush1.bf16.msra.mxu1 %v16696_v60  ;;  %v16788_v60 = vld [vmem:[%s21189_s4 + $0x2504] ss:$24 sps:$4 sm:$0xff]  }
 0x644   : > { %10885 = vmatprep.subr.bf16.mxu1 %v16704_v61  ;;  %v16786_v61 = vld [vmem:[%s21189_s4 + $0x2500] ss:$24 sps:$4 sm:$0xff]  }
 0x645   : > { %11347 = vmatpush1.bf16.msra.mxu0 %v16699_v62  ;;  %v16791_v62 = vld [vmem:[%s21189_s4 + $0x2534] ss:$24 sps:$4 sm:$0xff]  }
 0x646   : > { %11348 = vmatprep.subr.bf16.mxu0 %v16707_v63  ;;  %v16789_v63 = vld [vmem:[%s21189_s4 + $0x2530] ss:$24 sps:$4 sm:$0xff]  }
 0x647   : > { %10886 = vmatpush1.bf16.msra.mxu1 %v16702_v0  ;;  %v16794_v0 = vld [vmem:[%s21189_s4 + $0x2564] ss:$24 sps:$4 sm:$0xff]  }
 0x648   : > { %10887 = vmatprep.subr.bf16.mxu1 %v16710_v23  ;;  %v16792_v23 = vld [vmem:[%s21189_s4 + $0x2560] ss:$24 sps:$4 sm:$0xff]  }
 0x649   : > { %11349 = vmatpush1.bf16.msra.mxu0 %v16705_v11  ;;  %v16795_v11 = vld [vmem:[%s21192_s7 + $0x40] sm:$0xff]  }
 0x64a   : > { %11350 = vmatprep.subr.bf16.mxu0 %v16713_v46  ;;  %v16796_v46 = vld [vmem:[%s21192_s7] sm:$0xff]  }
 0x64b   : > { %10888 = vmatpush1.bf16.msra.mxu1 %v16708_v2  ;;  %v16797_v2 = vld [vmem:[%s21192_s7 + $0x48] sm:$0xff]  }
 0x64c   : > { %10889 = vmatprep.subr.bf16.mxu1 %v16716_v38  ;;  %v16798_v38 = vld [vmem:[%s21192_s7 + $0x8] sm:$0xff]  }
 0x64d   : > { %11351 = vmatpush1.bf16.msra.mxu0 %v16711_v51  ;;  %v16799_v51 = vld [vmem:[%s21192_s7 + $0x50] sm:$0xff]  }
 0x64e   : > { %11352 = vmatprep.subr.bf16.mxu0 %v16719_v5  ;;  %v16800_v5 = vld [vmem:[%s21192_s7 + $0x10] sm:$0xff]  }
 0x64f   : > { %10890 = vmatpush1.bf16.msra.mxu1 %v16714_v6  ;;  %v16801_v6 = vld [vmem:[%s21192_s7 + $0x58] sm:$0xff]  }
 0x650   : > { %10891 = vmatprep.subr.bf16.mxu1 %v16722_v7  ;;  %v16802_v7 = vld [vmem:[%s21192_s7 + $0x18] sm:$0xff]  }
 0x651   : > { %11353 = vmatpush1.bf16.msra.mxu0 %v16717_v8  ;;  %v16803_v8 = vld [vmem:[%s21192_s7 + $0x60] sm:$0xff]  }
 0x652   : > { %14534 = vmatprep.subr.bf16.mxu0 %v16795_v11  ;;  %v16821_v11 = vld [vmem:[%s21192_s7 + $0xe8] sm:$0xff]  }
 0x653   : > { %10892 = vmatpush1.bf16.msra.mxu1 %v16720_v9  ;;  %v16804_v9 = vld [vmem:[%s21192_s7 + $0x20] sm:$0xff]  }
 0x654   : > { %11371 = vmatmul.mubr.bf16.vlgmr.msra.gmra.mrb[12].mxu0 %v20808_v12  ;;  %10959 = vmatprep.subr.bf16.mxu1 %v16725_v10  ;;  %v16805_v10 = vld [vmem:[%s21192_s7 + $0x68] sm:$0xff]  }
 0x655   : > { %14535 = vmatpush3.bf16.msra.mxu0 %v16796_v46  ;;  %v11450_v46 = vsub.s32 5, %v17018_v3 }
 0x656   : > { %10910 = vmatmul.mubr.bf16.vlgmr.msra.gmra.mrb[12].mxu1 %v20711_v47  ;;  %14536 = vmatprep.subr.bf16.mxu0 %v16797_v2  ;;  %v16822_v2 = vld [vmem:[%s21192_s7 + $0xa8] sm:$0xff]  }
 0x657   : > { %10960 = vmatpush1.bf16.msra.mxu1 %v16723_v13  ;;  %10991 = vmatprep.mubr.bf16.mxu1 %v16910_v59  ;;  %v16807_v13 = vld [vmem:[%s21192_s7 + $0x70] sm:$0xff]  }
 0x658   : > { %10961 = vmatprep.subr.bf16.mxu1 %v16728_v14  ;;  %v16808_v14 = vld [vmem:[%s21192_s7 + $0x30] sm:$0xff]  }
 0x659   : > { %14537 = vmatpush3.bf16.msra.mxu0 %v16798_v38 }
 0x65a   : > { %14538 = vmatprep.subr.bf16.mxu0 %v16799_v51 }
 0x65b   : > { %10962 = vmatpush1.bf16.msra.mxu1 %v16726_v17  ;;  %v16809_v17 = vld [vmem:[%s21192_s7 + $0x78] sm:$0xff]  }
 0x65c   : > { %10963 = vmatprep.subr.bf16.mxu1 %v16731_v15  ;;  %v16810_v15 = vld [vmem:[%s21192_s7 + $0x38] sm:$0xff]  }
 0x65d   : > { %14539 = vmatpush3.bf16.msra.mxu0 %v16800_v5  ;;  %v16823_v5 = vld [vmem:[%s21192_s7 + $0xf0] sm:$0xff]  }
 0x65e   : > { %14540 = vmatprep.subr.bf16.mxu0 %v16801_v6 }
 0x65f   : > { %10964 = vmatpush1.bf16.msra.mxu1 %v16729_v16  ;;  %v16811_v16 = vld [vmem:[%s21192_s7 + $0xc0] sm:$0xff]  }
 0x660   : > { %10965 = vmatprep.subr.bf16.mxu1 %v16734_v4 }
 0x661   : > { %14541 = vmatpush3.bf16.msra.mxu0 %v16802_v7 }
 0x662   : > { %14542 = vmatprep.subr.bf16.mxu0 %v16803_v8 }
 0x663   : > { %10966 = vmatpush1.bf16.msra.mxu1 %v16732_v19 }
 0x664   : > { %10967 = vmatprep.subr.bf16.mxu1 %v16737_v21 }
 0x665   : > { %14543 = vmatpush3.bf16.msra.mxu0 %v16804_v9 }
 0x666   : > { %14544 = vmatprep.subr.bf16.mxu0 %v16805_v10 }
 0x667   : > { %10968 = vmatpush1.bf16.msra.mxu1 %v16735_v24 }
 0x668   : > { %10969 = vmatprep.subr.bf16.mxu1 %v16740_v28  ;;  %v11442_v28 = vsub.s32 3, %v17018_v3 }
 0x66b   : > { %10970 = vmatpush1.bf16.msra.mxu1 %v16738_v30  ;;  %v21014_v30 = vld [vmem:[%s21190_s5] sm:$0x3f] }
 0x66c   : > { %10971 = vmatprep.subr.bf16.mxu1 %v16743_v26  ;;  %v11430_v26 = vsub.s32 0, %v17018_v3  ;;  %v11451_v7 = vrot.slane %v21014_v30, %v11450_v46 }
 0x66f   : > { %10972 = vmatpush1.bf16.msra.mxu1 %v16741_v31  ;;  %v11443_v31 = vrot.slane %v21014_v30, %v11442_v28 }
 0x670   : > { %10973 = vmatprep.subr.bf16.mxu1 %v16746_v18  ;;  %v11434_v18 = vsub.s32 1, %v17018_v3 }
 0x673   : > { %10974 = vmatpush1.bf16.msra.mxu1 %v16744_v33  ;;  %v21022_v33 = vld [vmem:[%s21191_s6] sm:$0x3f] }
 0x674   : > { %11297 = vmatprep.subr.bf16.mxu1 %v16749_v34  ;;  %v11431_v34 = vrot.slane %v21014_v30, %v11430_v26 }
 0x676   : > { %10992 = vmatmul.mubr.bf16.vlgmr.msra.gmra.mrb[8].mxu1 %v20711_v47  ;;  %v16762_v47 = vld [vmem:[%s21189_s4 + $0x24f0] ss:$24 sps:$4 sm:$0xff]  }
 0x677   : > { %11298 = vmatpush1.bf16.msra.mxu1 %v16747_v41  ;;  %11329 = vmatprep.mubr.bf16.mxu1 %v16910_v59 }
 0x678   : > { %11299 = vmatprep.subr.bf16.mxu1 %v16752_v36  ;;  %v11481_v36 = vrot.slane %v21022_v33, %v11442_v28  ;;  %v16828_v28 = vld [vmem:[%s21192_s7 + $0x100] sm:$0xff]  }
 0x67b   : > { %11300 = vmatpush1.bf16.msra.mxu1 %v16750_v37 }
 0x67c   : > { %11301 = vmatprep.subr.bf16.mxu1 %v16755_v39  ;;  %v11435_v39 = vrot.slane %v21014_v30, %v11434_v18 }
 0x67f   : > { %11302 = vmatpush1.bf16.msra.mxu1 %v16753_v40 }
 0x680   : > { %11303 = vmatprep.subr.bf16.mxu1 %v16758_v42  ;;  %v11469_v42 = vrot.slane %v21022_v33, %v11430_v26 }
 0x683   : > { %11304 = vmatpush1.bf16.msra.mxu1 %v16756_v43 }
 0x684   : > { %11305 = vmatprep.subr.bf16.mxu1 %v16761_v57 }
 0x687   : > { %11306 = vmatpush1.bf16.msra.mxu1 %v16759_v44  ;;  %v11473_v44 = vrot.slane %v21022_v33, %v11434_v18  ;;  %v16829_v18 = vld [vmem:[%s21192_s7 + $0x148] sm:$0xff]  }
 0x688   : > { %11307 = vmatprep.subr.bf16.mxu1 %v16764_v45 }
 0x68b   : > { %11308 = vmatpush1.bf16.msra.mxu1 %v16762_v47 }
 0x68c   : > { %11309 = vmatprep.subr.bf16.mxu1 %v16767_v52 }
 0x68f   : > { %11310 = vmatpush1.bf16.msra.mxu1 %v16765_v49 }
 0x690   : > { %11311 = vmatprep.subr.bf16.mxu1 %v16770_v50 }
 0x693   : > { %11312 = vmatpush1.bf16.msra.mxu1 %v16768_v1 }
 0x694   : > { %11379 = vmatprep.subr.bf16.mxu1 %v16773_v53 }
 0x696   : > { %11330 = vmatmul.mubr.bf16.vlgmr.msra.gmra.mrb[12].mxu1 %v20808_v12 }
 0x697   : > { %11380 = vmatpush1.bf16.msra.mxu1 %v16771_v54  ;;  %11411 = vmatprep.mubr.bf16.mxu1 %v16910_v59  ;;  %v16780_v59 = vld [vmem:[%s21189_s4 + $0x24a0] ss:$24 sps:$4 sm:$0xff]  }
 0x698   : > { %11381 = vmatprep.subr.bf16.mxu1 %v16776_v20 }
 0x69b   : > { %11382 = vmatpush1.bf16.msra.mxu1 %v16774_v35 }
 0x69c   : > { %11383 = vmatprep.subr.bf16.mxu1 %v16779_v55 }
 0x69f   : > { %11384 = vmatpush1.bf16.msra.mxu1 %v16777_v32 }
 0x6a0   : > { %11385 = vmatprep.subr.bf16.mxu1 %v16782_v56 }
 0x6a3   : > { %11386 = vmatpush1.bf16.msra.mxu1 %v16780_v59  ;;  %v16814_v59 = vld [vmem:[%s21192_s7 + $0x88] sm:$0xff]  }
 0x6a4   : > { %11387 = vmatprep.subr.bf16.mxu1 %v16785_v58  ;;  %v16815_v58 = vld [vmem:[%s21192_s7 + $0xd0] sm:$0xff]  }
 0x6a7   : > { %11388 = vmatpush1.bf16.msra.mxu1 %v16783_v22  ;;  %v16816_v22 = vld [vmem:[%s21192_s7 + $0x90] sm:$0xff]  }
 0x6a8   : > { %11389 = vmatprep.subr.bf16.mxu1 %v16788_v60  ;;  %v16817_v60 = vld [vmem:[%s21192_s7 + $0xd8] sm:$0xff]  }
 0x6ab   : > { %11390 = vmatpush1.bf16.msra.mxu1 %v16786_v61  ;;  %v16818_v61 = vld [vmem:[%s21192_s7 + $0x98] sm:$0xff]  }
 0x6ac   : > { %11391 = vmatprep.subr.bf16.mxu1 %v16791_v62  ;;  %v11438_v62 = vsub.s32 2, %v17018_v3 }
 0x6ae   : > { %v11477_v51 = vrot.slane %v21022_v33, %v11438_v62 }
 0x6af   : > { %11392 = vmatpush1.bf16.msra.mxu1 %v16789_v63  ;;  %v16819_v63 = vld [vmem:[%s21192_s7 + $0xe0] sm:$0xff]  }
 0x6b0   : > { %11393 = vmatprep.subr.bf16.mxu1 %v16794_v0  ;;  %v16820_v0 = vld [vmem:[%s21192_s7 + $0xa0] sm:$0xff]  }
 0x6b3   : > { %11394 = vmatpush1.bf16.msra.mxu1 %v16792_v23  ;;  %v11439_v23 = vrot.slane %v21014_v30, %v11438_v62 }
 0x6b6   : > { %11412 = vmatmul.mubr.bf16.vlgmr.msra.gmra.mrb[8].mxu1 %v20808_v12  ;;  %v16806_v12 = vld [vmem:[%s21192_s7 + $0x28] sm:$0xff]  }
 0x6b7   : > { %14545 = vmatpush3.bf16.msra.mxu0 %v16806_v12  ;;  %v11489_v12 = vrot.slane %v21022_v33, %v11450_v46 }
 0x6b8   : > { %14546 = vmatprep.subr.bf16.mxu0 %v16807_v13 }
 0x6bb   : > { %14547 = vmatpush3.bf16.msra.mxu0 %v16808_v14  ;;  %v16824_v14 = vld [vmem:[%s21192_s7 + $0xb0] sm:$0xff]  }
 0x6bc   : > { %14548 = vmatprep.subr.bf16.mxu0 %v16809_v17 }
 0x6bf   : > { %14549 = vmatpush3.bf16.msra.mxu0 %v16810_v15 }
 0x6c0   : > { %14556 = vmatprep.subr.bf16.mxu0 %v16811_v16  ;;  %v16825_v16 = vld [vmem:[%s21192_s7 + $0xf8] sm:$0xff]  }
 0x727   : > { %v11372_v4 = vpop.f32.mrb[12].mxu0 }
 0x728   : > { %v11374_v19 = vpop.f32.mrb[13].mxu0  ;;  %v11460_v38 = vmul.f32 %v11439_v23, %v11372_v4 }
 0x729   : > { %v11376_v21 = vpop.f32.mrb[14].mxu0  ;;  %v11461_v41 = vmul.f32 %v11443_v31, %v11374_v19 }
 0x72a   : > { %v11377_v24 = vpop.f32.mrb[15].mxu0  ;;  %v11498_v17 = vadd.f32 %v11477_v51, %v11460_v38  ;;  %v16827_v21 = vld [vmem:[%s21192_s7 + $0x140] sm:$0xff]  }
 0x72b   : > { %v11499_v49 = vadd.f32 %v11481_v36, %v11461_v41  ;;  %v16831_v41 = vld [vmem:[%s21192_s7 + $0x150] sm:$0xff]  }
 0x72c   : > { %v11504_v19 = vmax.f32 %v11498_v17, 0.0  ;;  %v16832_v36 = vld [vmem:[%s21192_s7 + $0x110] sm:$0xff]  }
 0x72d   : > { %v11505_v20 = vmax.f32 %v11499_v49, 0.0 }
 0x72e   : > { %v11510_v31 = vpack.c.bf16 %v11504_v19, %v11504_v19 }
 0x72f   : > { %v11511_v56 = vpack.c.bf16 %v11505_v20, %v11505_v20 }
 0x769   : > { %v11331_v37 = vpop.f32.mrb[12].mxu1 }
 0x76a   : > { %v14666_v40 = vadd.f32 %v11331_v37, %v19455_v25  ;;  %v11333_v43 = vpop.f32.mrb[13].mxu1  ;;  %v16812_v25 = vld [vmem:[%s21192_s7 + $0x80] sm:$0xff]   ;;  %v16833_v37 = vld [vmem:[%s21192_s7 + $0x158] sm:$0xff]  }
 0x76b   : > { %v14667_v57 = vadd.f32 %v11333_v43, %v19460_v29  ;;  %v11335_v45 = vpop.f32.mrb[14].mxu1  ;;  %v16813_v29 = vld [vmem:[%s21192_s7 + $0xc8] sm:$0xff]   ;;  %v16836_v43 = vld [vmem:[%s21192_s7 + $0x120] sm:$0xff]  }
 0x76c   : > { %v11458_v47 = vmul.f32 %v14666_v40, %v11431_v34  ;;  %v11336_v52 = vpop.f32.mrb[15].mxu1  ;;  %v16830_v34 = vld [vmem:[%s21192_s7 + $0x108] sm:$0xff]   ;;  %v11446_v40 = vsub.s32 4, %v17018_v3 }
 0x76d   : > { %v11459_v50 = vmul.f32 %v14667_v57, %v11435_v39  ;;  %v16834_v39 = vld [vmem:[%s21192_s7 + $0x118] sm:$0xff]   ;;  %v16838_v3 = vld [vmem:[%s21192_s7 + $0x128] sm:$0xff]   ;;  %v16839_v52 = vld [vmem:[%s21192_s7 + $0x170] sm:$0xff]  }
 0x76e   : > { %v11496_v1 = vadd.f32 %v11469_v42, %v11458_v47  ;;  %v16835_v42 = vld [vmem:[%s21192_s7 + $0x160] sm:$0xff]   ;;  %v11447_v57 = vrot.slane %v21014_v30, %v11446_v40  ;;  %v11485_v47 = vrot.slane %v21022_v33, %v11446_v40  ;;  %v16840_v30 = vld [vmem:[%s21192_s7 + $0x130] sm:$0xff]   ;;  %v16842_v33 = vld [vmem:[%s21192_s7 + $0x138] sm:$0xff]  }
 0x76f   : > { %v11497_v53 = vadd.f32 %v11473_v44, %v11459_v50  ;;  %v16837_v44 = vld [vmem:[%s21192_s7 + $0x168] sm:$0xff]   ;;  %v16841_v50 = vld [vmem:[%s21192_s7 + $0x178] sm:$0xff]  }
 0x770   : > { %v11502_v54 = vmax.f32 %v11496_v1, 0.0 }
 0x771   : > { %v11503_v35 = vmax.f32 %v11497_v53, 0.0 }
 0x772   : > { %v11508_v32 = vpack.c.bf16 %v11502_v54, %v11502_v54 }
 0x773   : > { %v11509_v55 = vpack.c.bf16 %v11503_v35, %v11503_v35 }
 0x775   : > { %11931 = vmatprep.mubr.bf16.mxu0 %v11509_v55 }
 0x776   : > { %11932 = vmatmul.mubr.bf16.vlgmr.msra.gmra.mrb[20].mxu0 %v11508_v32  ;;  %v11610_v32 = vld [vmem:[%s21193_s8] sm:$0x1] }
 0x777   : > { %14557 = vmatpush3.bf16.msra.mxu0 %v16812_v25  ;;  %11971 = vmatprep.mubr.bf16.mxu0 %v11511_v56 }
 0x778   : > { %14558 = vmatprep.subr.bf16.mxu0 %v16813_v29 }
 0x77b   : > { %14559 = vmatpush3.bf16.msra.mxu0 %v16814_v59 }
 0x77c   : > { %14560 = vmatprep.subr.bf16.mxu0 %v16815_v58 }
 0x77f   : > { %14561 = vmatpush3.bf16.msra.mxu0 %v16816_v22 }
 0x780   : > { %14562 = vmatprep.subr.bf16.mxu0 %v16817_v60 }
 0x783   : > { %14563 = vmatpush3.bf16.msra.mxu0 %v16818_v61 }
 0x784   : > { %14564 = vmatprep.subr.bf16.mxu0 %v16819_v63 }
 0x787   : > { %14565 = vmatpush3.bf16.msra.mxu0 %v16820_v0 }
 0x788   : > { %14566 = vmatprep.subr.bf16.mxu0 %v16821_v11 }
 0x789   : > { %v11413_v6 = vpop.f32.mrb[8].mxu1 }
 0x78a   : > { %v14668_v8 = vadd.f32 %v11413_v6, %v19351_v48  ;;  %v11415_v9 = vpop.f32.mrb[9].mxu1 }
 0x78b   : > { %v14669_v10 = vadd.f32 %v11415_v9, %v19356_v27  ;;  %14567 = vmatpush3.bf16.msra.mxu0 %v16822_v2  ;;  %v11417_v13 = vpop.f32.mrb[10].mxu1  ;;  %v16826_v27 = vld [vmem:[%s21192_s7 + $0xb8] sm:$0xff]  }
 0x78c   : > { %v11418_v15 = vpop.f32.mrb[11].mxu1  ;;  %14568 = vmatprep.subr.bf16.mxu0 %v16823_v5  ;;  %v11462_v45 = vmul.f32 %v14668_v8, %v11447_v57 }
 0x78d   : > { %v11463_v4 = vmul.f32 %v14669_v10, %v11451_v7 }
 0x78e   : > { %v11500_v49 = vadd.f32 %v11485_v47, %v11462_v45 }
 0x78f   : > { %v11501_v48 = vadd.f32 %v11489_v12, %v11463_v4  ;;  %14569 = vmatpush3.bf16.msra.mxu0 %v16824_v14 }
 0x790   : > { %14570 = vmatprep.subr.bf16.mxu0 %v16825_v16  ;;  %v11506_v1 = vmax.f32 %v11500_v49, 0.0 }
 0x791   : > { %v11507_v24 = vmax.f32 %v11501_v48, 0.0 }
 0x792   : > { %v11512_v53 = vpack.c.bf16 %v11506_v1, %v11506_v1 }
 0x793   : > { %14571 = vmatpush3.bf16.msra.mxu0 %v16826_v27  ;;  %v11513_v26 = vpack.c.bf16 %v11507_v24, %v11507_v24 }
 0x794   : > { %14578 = vmatprep.subr.bf16.mxu0 %v16827_v21 }
 0x796   : > { %11972 = vmatmul.mubr.bf16.vlgmr.msra.gmra.mrb[24].mxu0 %v11510_v31 }
 0x797   : > { %14579 = vmatpush3.bf16.msra.mxu0 %v16828_v28  ;;  %12011 = vmatprep.mubr.bf16.mxu0 %v11513_v26 }
 0x798   : > { %14580 = vmatprep.subr.bf16.mxu0 %v16829_v18 }
 0x79b   : > { %14581 = vmatpush3.bf16.msra.mxu0 %v16830_v34 }
 0x79c   : > { %14582 = vmatprep.subr.bf16.mxu0 %v16831_v41 }
 0x79f   : > { %14583 = vmatpush3.bf16.msra.mxu0 %v16832_v36 }
 0x7a0   : > { %14584 = vmatprep.subr.bf16.mxu0 %v16833_v37 }
 0x7a3   : > { %14585 = vmatpush3.bf16.msra.mxu0 %v16834_v39 }
 0x7a4   : > { %14586 = vmatprep.subr.bf16.mxu0 %v16835_v42 }
 0x7a7   : > { %14587 = vmatpush3.bf16.msra.mxu0 %v16836_v43 }
 0x7a8   : > { %14588 = vmatprep.subr.bf16.mxu0 %v16837_v44 }
 0x7ab   : > { %14589 = vmatpush3.bf16.msra.mxu0 %v16838_v3 }
 0x7ac   : > { %14590 = vmatprep.subr.bf16.mxu0 %v16839_v52 }
 0x7af   : > { %14591 = vmatpush3.bf16.msra.mxu0 %v16840_v30 }
 0x7b0   : > { %14592 = vmatprep.subr.bf16.mxu0 %v16841_v50 }
 0x7b3   : > { %14593 = vmatpush3.bf16.msra.mxu0 %v16842_v33 }
 0x7b6   : > { %12012 = vmatmul.mubr.bf16.vlgmr.msra.gmra.mrb[28].mxu0 %v11512_v53 }
 0x849   : > { %v14550_v54 = vpop.f32.mrb[20].mxu0 }
 0x84a   : > { %v14551_v20 = vpop.f32.mrb[21].mxu0 }
 0x84b   : > { %v14552_v35 = vadd.f32 %v14551_v20, %v14550_v54  ;;  %v14553_v55 = vpop.f32.mrb[22].mxu0 }
 0x84c   : > { %v14554_v25 = vpop.f32.mrb[23].mxu0 }
 0x84d   : > { %v11934_v59 = vadd.f32 %v14552_v35, %v11610_v32 }
 0x869   : > { %v14572_v29 = vpop.f32.mrb[24].mxu0 }
 0x86a   : > { %v14573_v56 = vpop.f32.mrb[25].mxu0 }
 0x86b   : > { %v14574_v58 = vadd.f32 %v14573_v56, %v14572_v29  ;;  %v14575_v22 = vpop.f32.mrb[26].mxu0 }
 0x86c   : > { %v14576_v60 = vpop.f32.mrb[27].mxu0 }
 0x86d   : > { %v11974_v61 = vadd.f32 %v14574_v58, %v11934_v59 }
 0x889   : > { %v14594_v62 = vpop.f32.mrb[28].mxu0 }
 0x88a   : > { %v14595_v63 = vpop.f32.mrb[29].mxu0 }
 0x88b   : > { %v14596_v0 = vadd.f32 %v14595_v63, %v14594_v62  ;;  %v14597_v23 = vpop.f32.mrb[30].mxu0 }
 0x88c   : > { %v14598_v11 = vpop.f32.mrb[31].mxu0 }
 0x88d   : > { %v12014_v46 = vadd.f32 %v14596_v0, %v11974_v61 }
 0x88f   : > { %12019 = vst [vmem:[%s324_s28] sm:$0x1] %v12014_v46 }
 0x890   : > { %16856 = shalt.err (!%p16853_p3)
}
 0x891   : > { %s16857_s25 = scalar_lea.hbm %s21143_s17, 16  ;;  %s16861_s28 = scalar_lea.hbm %s21194_s9, 32 }
 0x892   : > { %p16858_p4 = scmp.ne.s32.totalorder %s21143_s17, %s16857_s25  ;;  %p16862_p9 = scmp.lt.u32.totalorder %s21143_s17, %s21194_s9 }
 0x893   : > { %p16863_p10 = scmp.lt.u32.totalorder %s16861_s28, %s16857_s25  ;;  %p16865_p12 = scmp.lt.u32.totalorder %s16857_s25, %s21143_s17 }
 0x894   : > { %p16859_p7 = pnand %p16858_p4, %p17000_p5 }
 0x895   : > { %p16864_p11 = por %p16863_p10, %p16862_p9 }
 0x896   : > { %p16860_p8 = pneg %p16859_p7 }
 0x897   : > { %p16866_p13 = por %p16865_p12, %p16864_p11 }
 0x899   : > { %p16867_p0 = pnand %p16866_p13, %p16860_p8 }
 0x89b   : > { %16870 = shalt.err (!%p16867_p0)
}
 0x89c   : > { %14952 = dma.vmem_to_hbm [thread:$0]  (%p17000_p5), %s21145_s29, 16, %s21143_s17, %s12021_s21  }
 0x89d PF: > { %p14958_p1 = scmp.ge.s32.totalorder %s16905_s12, 2  ;;  %s12045_s22 = sand.u32 1, %s16893_s30  }
 0x89e   : > { %s12046_s13 = scalar_lea.sflag [#allocation3], %s12045_s22 }
 0x89f   : > { %p14955_p2 = pnand %p14958_p1, %p17004_p6 }
 0x8a1   : > { %16888 = dma.done.wait (!%p14955_p2), %s12046_s13, 16  }
 0x8a2   : > { %16890 = vsyncadd (!%p14955_p2), %s12046_s13, 4294967280  ;;  %p19_p3 = scmp.ge.s32.totalorder %s16987_s15, 4   ;;  %s21199_s30 = smov %s16897_s10 }
 0x8a3   : > { %s21200_s10 = smov %s16901_s11  ;;  %s21201_s11 = smov %s16998_s18 }
 0x8a4   : > { %s21202_s12 = smov %s16987_s15  ;;  %21 = sbr.rel (!%p19_p3) target bundleno = 3 (0x3), region = 115 }
 0x8ab   :  { %12050 = vsyncpa [#allocation3], 1 }
 0x8ac   :  { %12052 = vsyncpa [#allocation3 + $0x1], 1 }

</bundles_post_ra>
